<compile_context>
chip_gen: v7x
topology: tpu7x:2x2x1
jax: 0.10.0
libtpu: 0.0.40
codegen_flags: <defaults>
</compile_context>

<pallas_src>
import math

import jax
import jax.numpy as jnp
from jax import lax
from jax.experimental import pallas as pl
from jax.experimental.pallas import tpu as pltpu


C1_OUT, C2_OUT = 6, 16          # true (unpadded) conv output channels


# ---------------------------------------------------------------------------
# Pallas kernels
# ---------------------------------------------------------------------------
def _conv_pool_kernel(w_ref, b_ref, cols_ref, o_ref):
    """Fused conv-as-matmul + bias + ReLU + MaxPool3d(2,2) for one lane block.

    w_ref:    (Cout_pad, K_pad)        bf16  (resident)
    b_ref:    (Cout_pad, 1)            f32   (resident)
    cols_ref: (8, K_pad, BMQ)          bf16  (8 = pool-parity slots, leading axis)
    o_ref:    (Cout_pad, BMQ)          bf16  (pooled output, lane-dense spatial)
    """
    w = w_ref[...]
    acc = jnp.dot(w, cols_ref[0], preferred_element_type=jnp.float32)
    for p in range(1, 8):                      # static 8-way unroll: max over pool window
        acc = jnp.maximum(
            acc, jnp.dot(w, cols_ref[p], preferred_element_type=jnp.float32))
    acc = acc + b_ref[...]                     # bias (per-row), broadcast over lanes
    o_ref[...] = jnp.maximum(acc, 0.0).astype(o_ref.dtype)


def _fc_stack_kernel(x_ref, w1, b1, w2, b2, w3, b3, w4, b4, w5, b5, o_ref):
    """Fused fc1..fc5 (+bias, ReLU on fc1..fc4).  All weights resident in VMEM."""
    def layer(h, w_ref, b_ref, relu):
        y = jnp.dot(h, w_ref[...], preferred_element_type=jnp.float32)
        y = y + b_ref[...]
        if relu:
            y = jnp.maximum(y, 0.0)
        return y

    h = x_ref[...]                                            # (8, 1600) bf16
    h = layer(h, w1, b1, True).astype(jnp.bfloat16)
    h = layer(h, w2, b2, True).astype(jnp.bfloat16)
    h = layer(h, w3, b3, True).astype(jnp.bfloat16)
    h = layer(h, w4, b4, True).astype(jnp.bfloat16)
    o_ref[...] = layer(h, w5, b5, False)                      # f32 logits


# ---------------------------------------------------------------------------
# Pallas-backed building blocks
# ---------------------------------------------------------------------------
def _pick_pool_grid(mq, target=6):
    """Grid steps over the pooled-M axis: a divisor of mq/128 closest to `target`,
    preferring even step counts (v7x megacore).  Falls back to a single full block."""
    if mq % 128 != 0:
        return 1
    n128 = mq // 128
    cands = [g for g in range(1, n128 + 1) if n128 % g == 0]
    return min(cands, key=lambda g: (abs(g - target), g % 2))


def im2col_pool_parity(x, k):
    """x: (N, C, D, H, W) -> cols: (8, C*Tpad, Mq) with
         parity axis p = (dp, hp, wp)              (leading, size 8)
         K order      = (c, z, y, x) padded 125 -> 128 per c (zero taps, free)
         Mq order     = (n, d/2, h/2, w/2)
    so conv + ReLU + MaxPool3d(2,2) is `max_p relu(W @ cols[p] + b)` inside one kernel.
    """
    n, c, d, h, w = x.shape
    od, oh, ow = d - k + 1, h - k + 1, w - k + 1
    assert od % 2 == 0 and oh % 2 == 0 and ow % 2 == 0
    d2, h2, w2 = od // 2, oh // 2, ow // 2

    taps = []
    for z in range(k):
        for y in range(k):
            for xx in range(k):
                taps.append(x[:, :, z:z + od, y:y + oh, xx:xx + ow])
    t = k ** 3
    t_pad = ((t + 127) // 128) * 128
    zero = jnp.zeros_like(taps[0])
    taps.extend([zero] * (t_pad - t))                     # pad K to 128 multiple (free)
    tarr = jnp.stack(taps, axis=0)                        # (Tpad, N, C, OD, OH, OW)
    tarr = tarr.reshape(t_pad, n, c, d2, 2, h2, 2, w2, 2)
    # axes: 0=T 1=N 2=C 3=d2 4=dp 5=h2 6=hp 7=w2 8=wp -> (dp,hp,wp, C, T, N, d2, h2, w2)
    tarr = tarr.transpose(4, 6, 8, 2, 0, 1, 3, 5, 7)
    cols = tarr.reshape(8, c * t_pad, n * d2 * h2 * w2)
    return cols, (d2, h2, w2)


def conv_relu_pool_pallas(w_flat, b_col, cols, *, block_mq=None):
    """pooled(Cout_pad, Mq) = MaxPool3d(2,2)(relu(W @ im2col + b)), one fused kernel."""
    cout_pad, k_pad = w_flat.shape
    par, k_pad2, mq = cols.shape
    assert par == 8 and k_pad == k_pad2
    if block_mq is None:
        block_mq = mq // _pick_pool_grid(mq)
    grid = (mq // block_mq,)
    return pl.pallas_call(
        _conv_pool_kernel,
        out_shape=jax.ShapeDtypeStruct((cout_pad, mq), jnp.bfloat16),
        grid=grid,
        in_specs=[
            pl.BlockSpec((cout_pad, k_pad), lambda i: (0, 0)),      # weight, resident
            pl.BlockSpec((cout_pad, 1), lambda i: (0, 0)),          # bias col, resident
            pl.BlockSpec((8, k_pad, block_mq), lambda i: (0, 0, i)),  # im2col lane block
        ],
        out_specs=pl.BlockSpec((cout_pad, block_mq), lambda i: (0, i)),
        compiler_params=pltpu.CompilerParams(dimension_semantics=("parallel",)),
    )(w_flat, b_col, cols)


def fc_stack_pallas(feat, pk):
    """feat: (N, 1600) bf16/f32 -> logits (N, 4) f32, whole fc stack fused in one kernel."""
    n = feat.shape[0]
    n_pad = ((n + 7) // 8) * 8
    x = jnp.pad(feat, ((0, n_pad - n), (0, 0))).astype(jnp.bfloat16)
    out_f = pk["fc5_w"].shape[1]
    out = pl.pallas_call(
        _fc_stack_kernel,
        out_shape=jax.ShapeDtypeStruct((n_pad, out_f), jnp.float32),
    )(x,
      pk["fc1_w"], pk["fc1_b"], pk["fc2_w"], pk["fc2_b"],
      pk["fc3_w"], pk["fc3_b"], pk["fc4_w"], pk["fc4_b"],
      pk["fc5_w"], pk["fc5_b"])
    return out[:n]


# ---------------------------------------------------------------------------
# Parameters
# ---------------------------------------------------------------------------
def init_params(key):
    ks = jax.random.split(key, 14)

    def u(k_, shape, bound):
        return jax.random.uniform(k_, shape, jnp.float32, -bound, bound)

    def conv_init(kw_, kb_, cout, cin, k):
        bound = 1.0 / math.sqrt(cin * k ** 3)
        return u(kw_, (cout, cin, k, k, k), bound), u(kb_, (cout,), bound)

    def fc_init(kw_, kb_, in_f, out_f):
        bound = 1.0 / math.sqrt(in_f)
        # stored pre-transposed as (in, out)
        return u(kw_, (in_f, out_f), bound), u(kb_, (out_f,), bound)

    p = {}
    p["conv1_w"], p["conv1_b"] = conv_init(ks[0], ks[1], C1_OUT, 1, 5)
    p["conv2_w"], p["conv2_b"] = conv_init(ks[2], ks[3], C2_OUT, C1_OUT, 5)
    p["fc1_w"], p["fc1_b"] = fc_init(ks[4], ks[5], 16 * 5 * 5 * 4, 200)
    p["fc2_w"], p["fc2_b"] = fc_init(ks[6], ks[7], 200, 120)
    p["fc3_w"], p["fc3_b"] = fc_init(ks[8], ks[9], 120, 120)
    p["fc4_w"], p["fc4_b"] = fc_init(ks[10], ks[11], 120, 84)
    p["fc5_w"], p["fc5_b"] = fc_init(ks[12], ks[13], 84, 4)
    return p


def prepare_params(p):
    """One-time packing: pad/flatten conv weights, cast matmul operands to bf16."""
    def pack_conv(w, b, cout_pad):
        cout, cin, kd, kh, kw = w.shape
        t = kd * kh * kw
        t_pad = ((t + 127) // 128) * 128
        wf = w.reshape(cout, cin, t)
        wf = jnp.pad(wf, ((0, cout_pad - cout), (0, 0), (0, t_pad - t)))
        wf = wf.reshape(cout_pad, cin * t_pad).astype(jnp.bfloat16)
        bb = jnp.pad(b, (0, cout_pad - cout)).reshape(cout_pad, 1).astype(jnp.float32)
        return wf, bb

    q = {}
    q["conv1_w"], q["conv1_b"] = pack_conv(p["conv1_w"], p["conv1_b"], 8)
    q["conv2_w"], q["conv2_b"] = pack_conv(p["conv2_w"], p["conv2_b"], 16)
    for i in range(1, 6):
        q[f"fc{i}_w"] = p[f"fc{i}_w"].astype(jnp.bfloat16)       # (in, out)
        q[f"fc{i}_b"] = p[f"fc{i}_b"].reshape(1, -1).astype(jnp.float32)
    return q


# ---------------------------------------------------------------------------
# Forward pass
# ---------------------------------------------------------------------------
def lenet_forward(img, pk):
    n, _, d, h, w = img.shape
    x = img.astype(jnp.bfloat16)

    # conv1 output / pooled spatial dims
    od, oh, ow = d - 4, h - 4, w - 4
    d2, h2, w2 = od // 2, oh // 2, ow // 2

    # Pad input D (zeros, ~0.1 MiB) so the pooled-M axis Mq1 = n*d2p*h2*w2 is a multiple
    # of 128 -> conv1 runs an even multi-step "parallel" grid (DMA/compute overlap, both
    # v7x TensorCores).  Padded rows produce garbage pooled slots that are sliced off.
    d2p = d2
    for cand in range(d2, d2 + 9):
        if (n * cand * h2 * w2) % 128 == 0:
            d2p = cand
            break
    if d2p > d2:
        x = jnp.pad(x, ((0, 0), (0, 0), (0, 2 * (d2p - d2)), (0, 0), (0, 0)))

    # conv1 + ReLU + MaxPool3d(2,2): one fused Pallas kernel
    cols1, _ = im2col_pool_parity(x, 5)                       # (8, 128, n*d2p*h2*w2)
    p1 = conv_relu_pool_pallas(pk["conv1_w"], pk["conv1_b"], cols1)   # (8, Mq1) bf16
    x2 = (p1[:C1_OUT].reshape(C1_OUT, n, d2p, h2, w2)[:, :, :d2]
          .transpose(1, 0, 2, 3, 4))                          # (n, 6, 14, 14, 12) bf16

    # conv2 + ReLU + MaxPool3d(2,2): one fused Pallas kernel (single full block)
    cols2, (e2, f2, g2) = im2col_pool_parity(x2, 5)           # (8, 768, n*5*5*4)
    p2 = conv_relu_pool_pallas(pk["conv2_w"], pk["conv2_b"], cols2)   # (16, Mq2) bf16
    feat = (p2[:C2_OUT].reshape(C2_OUT, n, e2 * f2 * g2)
            .transpose(1, 0, 2).reshape(n, -1))               # (n, 1600), NCDHW order

    # fused fc stack
    return fc_stack_pallas(feat, pk)


# ---------------------------------------------------------------------------
# Pure-JAX reference (f32) for a correctness sanity check
# ---------------------------------------------------------------------------
def _ref_forward(img, params):
    def conv3d_ref(x, w, b):
        dn = lax.conv_dimension_numbers(x.shape, w.shape, ("NCDHW", "OIDHW", "NCDHW"))
        y = lax.conv_general_dilated(x, w, (1, 1, 1), "VALID", dimension_numbers=dn)
        return jax.nn.relu(y + b[None, :, None, None, None])

    def pool_ref(x):
        n, c, d, h, w = x.shape
        return x.reshape(n, c, d // 2, 2, h // 2, 2, w // 2, 2).max(axis=(3, 5, 7))

    x = pool_ref(conv3d_ref(img, params["conv1_w"], params["conv1_b"]))
    x = pool_ref(conv3d_ref(x, params["conv2_w"], params["conv2_b"]))
    h = x.reshape(img.shape[0], -1)
    for i in (1, 2, 3, 4):
        h = jax.nn.relu(h @ params[f"fc{i}_w"] + params[f"fc{i}_b"])
    return h @ params["fc5_w"] + params["fc5_b"]


if __name__ == "__main__":
    key = jax.random.PRNGKey(0)
    k_in, k_par = jax.random.split(key)

    # Input spatial size (32, 32, 28) makes the conv feature flatten to 16*5*5*4 = 1600,
    # matching the fc stack of the original module.
    img = jax.random.normal(k_in, (2, 1, 32, 32, 28), dtype=jnp.float32)
    params = init_params(k_par)
    packed = prepare_params(params)

    fwd = jax.jit(lenet_forward)
    out = fwd(img, packed)
    jax.block_until_ready(out)
    assert out.shape == (2, 4) and out.dtype == jnp.float32

    ref = jax.jit(_ref_forward)(img, params)
    err = float(jnp.max(jnp.abs(out - ref)))
    assert err < 0.15, f"max abs err vs f32 reference: {err}"

    print("KERNEL_OK")
</pallas_src>

<mosaic_0001>
module attributes {stable_mosaic.version = 11 : i64} {
  func.func @_conv_pool_kernel(%arg0: i32, %arg1: memref<8x128xbf16, #tpu.memory_space<vmem>>, %arg2: memref<8x1xf32, #tpu.memory_space<vmem>>, %arg3: memref<8x128x896xbf16, #tpu.memory_space<vmem>>, %arg4: memref<8x896xbf16, #tpu.memory_space<vmem>>) attributes {dimension_semantics = [#tpu.dimension_semantics<parallel>], iteration_bounds = array<i64: 6>, scalar_prefetch = 0 : i64, scratch_operands = 0 : i64, tpu.core_type = #tpu.core_type<tc>, window_params = [{pipeline_mode = #tpu.pipeline_mode<synchronous>, transform_indices = @transform_0, window_bounds = array<i64: 8, 128>}, {pipeline_mode = #tpu.pipeline_mode<synchronous>, transform_indices = @transform_1, window_bounds = array<i64: 8, 1>}, {transform_indices = @transform_2, window_bounds = array<i64: 8, 128, 896>}, {transform_indices = @transform_3, window_bounds = array<i64: 8, 896>}]} {
    %c0 = arith.constant 0 : index
    %c0_0 = arith.constant 0 : index
    %0 = vector.load %arg1[%c0, %c0_0] : memref<8x128xbf16, #tpu.memory_space<vmem>>, vector<8x128xbf16>
    %c0_1 = arith.constant 0 : index
    %c0_2 = arith.constant 0 : index
    %c0_3 = arith.constant 0 : index
    %1 = vector.load %arg3[%c0_1, %c0_2, %c0_3] : memref<8x128x896xbf16, #tpu.memory_space<vmem>>, vector<1x128x896xbf16>
    %2 = vector.shape_cast %1 : vector<1x128x896xbf16> to vector<128x896xbf16>
    %cst = arith.constant dense<0.000000e+00> : vector<8x896xf32>
    %3 = tpu.matmul %0, %2, %cst {dimension_numbers = #tpu.dot_dimension_numbers<[1], [0], [0], [1], [0, 0, 1, 1], [], []>} : vector<8x128xbf16>, vector<128x896xbf16>, vector<8x896xf32> -> vector<8x896xf32>
    %c1 = arith.constant 1 : index
    %c0_4 = arith.constant 0 : index
    %c0_5 = arith.constant 0 : index
    %4 = vector.load %arg3[%c1, %c0_4, %c0_5] : memref<8x128x896xbf16, #tpu.memory_space<vmem>>, vector<1x128x896xbf16>
    %5 = vector.shape_cast %4 : vector<1x128x896xbf16> to vector<128x896xbf16>
    %cst_6 = arith.constant dense<0.000000e+00> : vector<8x896xf32>
    %6 = tpu.matmul %0, %5, %cst_6 {dimension_numbers = #tpu.dot_dimension_numbers<[1], [0], [0], [1], [0, 0, 1, 1], [], []>} : vector<8x128xbf16>, vector<128x896xbf16>, vector<8x896xf32> -> vector<8x896xf32>
    %7 = arith.maximumf %3, %6 : vector<8x896xf32>
    %c2 = arith.constant 2 : index
    %c0_7 = arith.constant 0 : index
    %c0_8 = arith.constant 0 : index
    %8 = vector.load %arg3[%c2, %c0_7, %c0_8] : memref<8x128x896xbf16, #tpu.memory_space<vmem>>, vector<1x128x896xbf16>
    %9 = vector.shape_cast %8 : vector<1x128x896xbf16> to vector<128x896xbf16>
    %cst_9 = arith.constant dense<0.000000e+00> : vector<8x896xf32>
    %10 = tpu.matmul %0, %9, %cst_9 {dimension_numbers = #tpu.dot_dimension_numbers<[1], [0], [0], [1], [0, 0, 1, 1], [], []>} : vector<8x128xbf16>, vector<128x896xbf16>, vector<8x896xf32> -> vector<8x896xf32>
    %11 = arith.maximumf %7, %10 : vector<8x896xf32>
    %c3 = arith.constant 3 : index
    %c0_10 = arith.constant 0 : index
    %c0_11 = arith.constant 0 : index
    %12 = vector.load %arg3[%c3, %c0_10, %c0_11] : memref<8x128x896xbf16, #tpu.memory_space<vmem>>, vector<1x128x896xbf16>
    %13 = vector.shape_cast %12 : vector<1x128x896xbf16> to vector<128x896xbf16>
    %cst_12 = arith.constant dense<0.000000e+00> : vector<8x896xf32>
    %14 = tpu.matmul %0, %13, %cst_12 {dimension_numbers = #tpu.dot_dimension_numbers<[1], [0], [0], [1], [0, 0, 1, 1], [], []>} : vector<8x128xbf16>, vector<128x896xbf16>, vector<8x896xf32> -> vector<8x896xf32>
    %15 = arith.maximumf %11, %14 : vector<8x896xf32>
    %c4 = arith.constant 4 : index
    %c0_13 = arith.constant 0 : index
    %c0_14 = arith.constant 0 : index
    %16 = vector.load %arg3[%c4, %c0_13, %c0_14] : memref<8x128x896xbf16, #tpu.memory_space<vmem>>, vector<1x128x896xbf16>
    %17 = vector.shape_cast %16 : vector<1x128x896xbf16> to vector<128x896xbf16>
    %cst_15 = arith.constant dense<0.000000e+00> : vector<8x896xf32>
    %18 = tpu.matmul %0, %17, %cst_15 {dimension_numbers = #tpu.dot_dimension_numbers<[1], [0], [0], [1], [0, 0, 1, 1], [], []>} : vector<8x128xbf16>, vector<128x896xbf16>, vector<8x896xf32> -> vector<8x896xf32>
    %19 = arith.maximumf %15, %18 : vector<8x896xf32>
    %c5 = arith.constant 5 : index
    %c0_16 = arith.constant 0 : index
    %c0_17 = arith.constant 0 : index
    %20 = vector.load %arg3[%c5, %c0_16, %c0_17] : memref<8x128x896xbf16, #tpu.memory_space<vmem>>, vector<1x128x896xbf16>
    %21 = vector.shape_cast %20 : vector<1x128x896xbf16> to vector<128x896xbf16>
    %cst_18 = arith.constant dense<0.000000e+00> : vector<8x896xf32>
    %22 = tpu.matmul %0, %21, %cst_18 {dimension_numbers = #tpu.dot_dimension_numbers<[1], [0], [0], [1], [0, 0, 1, 1], [], []>} : vector<8x128xbf16>, vector<128x896xbf16>, vector<8x896xf32> -> vector<8x896xf32>
    %23 = arith.maximumf %19, %22 : vector<8x896xf32>
    %c6 = arith.constant 6 : index
    %c0_19 = arith.constant 0 : index
    %c0_20 = arith.constant 0 : index
    %24 = vector.load %arg3[%c6, %c0_19, %c0_20] : memref<8x128x896xbf16, #tpu.memory_space<vmem>>, vector<1x128x896xbf16>
    %25 = vector.shape_cast %24 : vector<1x128x896xbf16> to vector<128x896xbf16>
    %cst_21 = arith.constant dense<0.000000e+00> : vector<8x896xf32>
    %26 = tpu.matmul %0, %25, %cst_21 {dimension_numbers = #tpu.dot_dimension_numbers<[1], [0], [0], [1], [0, 0, 1, 1], [], []>} : vector<8x128xbf16>, vector<128x896xbf16>, vector<8x896xf32> -> vector<8x896xf32>
    %27 = arith.maximumf %23, %26 : vector<8x896xf32>
    %c7 = arith.constant 7 : index
    %c0_22 = arith.constant 0 : index
    %c0_23 = arith.constant 0 : index
    %28 = vector.load %arg3[%c7, %c0_22, %c0_23] : memref<8x128x896xbf16, #tpu.memory_space<vmem>>, vector<1x128x896xbf16>
    %29 = vector.shape_cast %28 : vector<1x128x896xbf16> to vector<128x896xbf16>
    %cst_24 = arith.constant dense<0.000000e+00> : vector<8x896xf32>
    %30 = tpu.matmul %0, %29, %cst_24 {dimension_numbers = #tpu.dot_dimension_numbers<[1], [0], [0], [1], [0, 0, 1, 1], [], []>} : vector<8x128xbf16>, vector<128x896xbf16>, vector<8x896xf32> -> vector<8x896xf32>
    %31 = arith.maximumf %27, %30 : vector<8x896xf32>
    %c0_25 = arith.constant 0 : index
    %c0_26 = arith.constant 0 : index
    %32 = vector.load %arg2[%c0_25, %c0_26] : memref<8x1xf32, #tpu.memory_space<vmem>>, vector<8x1xf32>
    %33 = vector.broadcast %32 : vector<8x1xf32> to vector<8x896xf32>
    %34 = arith.addf %31, %33 : vector<8x896xf32>
    %cst_27 = arith.constant 0.000000e+00 : f32
    %35 = vector.broadcast %cst_27 : f32 to vector<8x896xf32>
    %36 = arith.maximumf %34, %35 : vector<8x896xf32>
    %37 = arith.truncf %36 : vector<8x896xf32> to vector<8x896xbf16>
    %c0_28 = arith.constant 0 : index
    %c0_29 = arith.constant 0 : index
    %38 = vector.load %arg4[%c0_28, %c0_29] : memref<8x896xbf16, #tpu.memory_space<vmem>>, vector<8x896xbf16>
    tpu.vector_store %arg4[%c0_28, %c0_29], %37 {strides = array<i32>} : memref<8x896xbf16, #tpu.memory_space<vmem>>, vector<8x896xbf16>,
    return
  }
  func.func @transform_0(%arg0: i32) -> (i32, i32) {
    %c0_i32 = arith.constant 0 : i32
    %c0_i32_0 = arith.constant 0 : i32
    %c0_i32_1 = arith.constant 0 : i32
    return %c0_i32, %c0_i32_0 : i32, i32
  }
  func.func @transform_1(%arg0: i32) -> (i32, i32) {
    %c0_i32 = arith.constant 0 : i32
    %c0_i32_0 = arith.constant 0 : i32
    %c0_i32_1 = arith.constant 0 : i32
    return %c0_i32, %c0_i32_0 : i32, i32
  }
  func.func @transform_2(%arg0: i32) -> (i32, i32, i32) {
    %c0_i32 = arith.constant 0 : i32
    %c0_i32_0 = arith.constant 0 : i32
    %c0_i32_1 = arith.constant 0 : i32
    return %c0_i32, %c0_i32_0, %arg0 : i32, i32, i32
  }
  func.func @transform_3(%arg0: i32) -> (i32, i32) {
    %c0_i32 = arith.constant 0 : i32
    %c0_i32_0 = arith.constant 0 : i32
    return %c0_i32, %arg0 : i32, i32
  }
}

module attributes {stable_mosaic.version = 11 : i64} {
  func.func @_conv_pool_kernel(%arg0: i32, %arg1: memref<16x768xbf16, #tpu.memory_space<vmem>>, %arg2: memref<16x1xf32, #tpu.memory_space<vmem>>, %arg3: memref<8x768x200xbf16, #tpu.memory_space<vmem>>, %arg4: memref<16x200xbf16, #tpu.memory_space<vmem>>) attributes {dimension_semantics = [#tpu.dimension_semantics<parallel>], iteration_bounds = array<i64: 1>, scalar_prefetch = 0 : i64, scratch_operands = 0 : i64, tpu.core_type = #tpu.core_type<tc>, window_params = [{pipeline_mode = #tpu.pipeline_mode<synchronous>, transform_indices = @transform_0, window_bounds = array<i64: 16, 768>}, {pipeline_mode = #tpu.pipeline_mode<synchronous>, transform_indices = @transform_1, window_bounds = array<i64: 16, 1>}, {transform_indices = @transform_2, window_bounds = array<i64: 8, 768, 200>}, {transform_indices = @transform_3, window_bounds = array<i64: 16, 200>}]} {
    %c0 = arith.constant 0 : index
    %c0_0 = arith.constant 0 : index
    %0 = vector.load %arg1[%c0, %c0_0] : memref<16x768xbf16, #tpu.memory_space<vmem>>, vector<16x768xbf16>
    %c0_1 = arith.constant 0 : index
    %c0_2 = arith.constant 0 : index
    %c0_3 = arith.constant 0 : index
    %1 = vector.load %arg3[%c0_1, %c0_2, %c0_3] : memref<8x768x200xbf16, #tpu.memory_space<vmem>>, vector<1x768x200xbf16>
    %2 = vector.shape_cast %1 : vector<1x768x200xbf16> to vector<768x200xbf16>
    %cst = arith.constant dense<0.000000e+00> : vector<16x200xf32>
    %3 = tpu.matmul %0, %2, %cst {dimension_numbers = #tpu.dot_dimension_numbers<[1], [0], [0], [1], [0, 0, 1, 1], [], []>} : vector<16x768xbf16>, vector<768x200xbf16>, vector<16x200xf32> -> vector<16x200xf32>
    %c1 = arith.constant 1 : index
    %c0_4 = arith.constant 0 : index
    %c0_5 = arith.constant 0 : index
    %4 = vector.load %arg3[%c1, %c0_4, %c0_5] : memref<8x768x200xbf16, #tpu.memory_space<vmem>>, vector<1x768x200xbf16>
    %5 = vector.shape_cast %4 : vector<1x768x200xbf16> to vector<768x200xbf16>
    %cst_6 = arith.constant dense<0.000000e+00> : vector<16x200xf32>
    %6 = tpu.matmul %0, %5, %cst_6 {dimension_numbers = #tpu.dot_dimension_numbers<[1], [0], [0], [1], [0, 0, 1, 1], [], []>} : vector<16x768xbf16>, vector<768x200xbf16>, vector<16x200xf32> -> vector<16x200xf32>
    %7 = arith.maximumf %3, %6 : vector<16x200xf32>
    %c2 = arith.constant 2 : index
    %c0_7 = arith.constant 0 : index
    %c0_8 = arith.constant 0 : index
    %8 = vector.load %arg3[%c2, %c0_7, %c0_8] : memref<8x768x200xbf16, #tpu.memory_space<vmem>>, vector<1x768x200xbf16>
    %9 = vector.shape_cast %8 : vector<1x768x200xbf16> to vector<768x200xbf16>
    %cst_9 = arith.constant dense<0.000000e+00> : vector<16x200xf32>
    %10 = tpu.matmul %0, %9, %cst_9 {dimension_numbers = #tpu.dot_dimension_numbers<[1], [0], [0], [1], [0, 0, 1, 1], [], []>} : vector<16x768xbf16>, vector<768x200xbf16>, vector<16x200xf32> -> vector<16x200xf32>
    %11 = arith.maximumf %7, %10 : vector<16x200xf32>
    %c3 = arith.constant 3 : index
    %c0_10 = arith.constant 0 : index
    %c0_11 = arith.constant 0 : index
    %12 = vector.load %arg3[%c3, %c0_10, %c0_11] : memref<8x768x200xbf16, #tpu.memory_space<vmem>>, vector<1x768x200xbf16>
    %13 = vector.shape_cast %12 : vector<1x768x200xbf16> to vector<768x200xbf16>
    %cst_12 = arith.constant dense<0.000000e+00> : vector<16x200xf32>
    %14 = tpu.matmul %0, %13, %cst_12 {dimension_numbers = #tpu.dot_dimension_numbers<[1], [0], [0], [1], [0, 0, 1, 1], [], []>} : vector<16x768xbf16>, vector<768x200xbf16>, vector<16x200xf32> -> vector<16x200xf32>
    %15 = arith.maximumf %11, %14 : vector<16x200xf32>
    %c4 = arith.constant 4 : index
    %c0_13 = arith.constant 0 : index
    %c0_14 = arith.constant 0 : index
    %16 = vector.load %arg3[%c4, %c0_13, %c0_14] : memref<8x768x200xbf16, #tpu.memory_space<vmem>>, vector<1x768x200xbf16>
    %17 = vector.shape_cast %16 : vector<1x768x200xbf16> to vector<768x200xbf16>
    %cst_15 = arith.constant dense<0.000000e+00> : vector<16x200xf32>
    %18 = tpu.matmul %0, %17, %cst_15 {dimension_numbers = #tpu.dot_dimension_numbers<[1], [0], [0], [1], [0, 0, 1, 1], [], []>} : vector<16x768xbf16>, vector<768x200xbf16>, vector<16x200xf32> -> vector<16x200xf32>
    %19 = arith.maximumf %15, %18 : vector<16x200xf32>
    %c5 = arith.constant 5 : index
    %c0_16 = arith.constant 0 : index
    %c0_17 = arith.constant 0 : index
    %20 = vector.load %arg3[%c5, %c0_16, %c0_17] : memref<8x768x200xbf16, #tpu.memory_space<vmem>>, vector<1x768x200xbf16>
    %21 = vector.shape_cast %20 : vector<1x768x200xbf16> to vector<768x200xbf16>
    %cst_18 = arith.constant dense<0.000000e+00> : vector<16x200xf32>
    %22 = tpu.matmul %0, %21, %cst_18 {dimension_numbers = #tpu.dot_dimension_numbers<[1], [0], [0], [1], [0, 0, 1, 1], [], []>} : vector<16x768xbf16>, vector<768x200xbf16>, vector<16x200xf32> -> vector<16x200xf32>
    %23 = arith.maximumf %19, %22 : vector<16x200xf32>
    %c6 = arith.constant 6 : index
    %c0_19 = arith.constant 0 : index
    %c0_20 = arith.constant 0 : index
    %24 = vector.load %arg3[%c6, %c0_19, %c0_20] : memref<8x768x200xbf16, #tpu.memory_space<vmem>>, vector<1x768x200xbf16>
    %25 = vector.shape_cast %24 : vector<1x768x200xbf16> to vector<768x200xbf16>
    %cst_21 = arith.constant dense<0.000000e+00> : vector<16x200xf32>
    %26 = tpu.matmul %0, %25, %cst_21 {dimension_numbers = #tpu.dot_dimension_numbers<[1], [0], [0], [1], [0, 0, 1, 1], [], []>} : vector<16x768xbf16>, vector<768x200xbf16>, vector<16x200xf32> -> vector<16x200xf32>
    %27 = arith.maximumf %23, %26 : vector<16x200xf32>
    %c7 = arith.constant 7 : index
    %c0_22 = arith.constant 0 : index
    %c0_23 = arith.constant 0 : index
    %28 = vector.load %arg3[%c7, %c0_22, %c0_23] : memref<8x768x200xbf16, #tpu.memory_space<vmem>>, vector<1x768x200xbf16>
    %29 = vector.shape_cast %28 : vector<1x768x200xbf16> to vector<768x200xbf16>
    %cst_24 = arith.constant dense<0.000000e+00> : vector<16x200xf32>
    %30 = tpu.matmul %0, %29, %cst_24 {dimension_numbers = #tpu.dot_dimension_numbers<[1], [0], [0], [1], [0, 0, 1, 1], [], []>} : vector<16x768xbf16>, vector<768x200xbf16>, vector<16x200xf32> -> vector<16x200xf32>
    %31 = arith.maximumf %27, %30 : vector<16x200xf32>
    %c0_25 = arith.constant 0 : index
    %c0_26 = arith.constant 0 : index
    %32 = vector.load %arg2[%c0_25, %c0_26] : memref<16x1xf32, #tpu.memory_space<vmem>>, vector<16x1xf32>
    %33 = vector.broadcast %32 : vector<16x1xf32> to vector<16x200xf32>
    %34 = arith.addf %31, %33 : vector<16x200xf32>
    %cst_27 = arith.constant 0.000000e+00 : f32
    %35 = vector.broadcast %cst_27 : f32 to vector<16x200xf32>
    %36 = arith.maximumf %34, %35 : vector<16x200xf32>
    %37 = arith.truncf %36 : vector<16x200xf32> to vector<16x200xbf16>
    %c0_28 = arith.constant 0 : index
    %c0_29 = arith.constant 0 : index
    %38 = vector.load %arg4[%c0_28, %c0_29] : memref<16x200xbf16, #tpu.memory_space<vmem>>, vector<16x200xbf16>
    tpu.vector_store %arg4[%c0_28, %c0_29], %37 {strides = array<i32>} : memref<16x200xbf16, #tpu.memory_space<vmem>>, vector<16x200xbf16>,
    return
  }
  func.func @transform_0(%arg0: i32) -> (i32, i32) {
    %c0_i32 = arith.constant 0 : i32
    %c0_i32_0 = arith.constant 0 : i32
    %c0_i32_1 = arith.constant 0 : i32
    return %c0_i32, %c0_i32_0 : i32, i32
  }
  func.func @transform_1(%arg0: i32) -> (i32, i32) {
    %c0_i32 = arith.constant 0 : i32
    %c0_i32_0 = arith.constant 0 : i32
    %c0_i32_1 = arith.constant 0 : i32
    return %c0_i32, %c0_i32_0 : i32, i32
  }
  func.func @transform_2(%arg0: i32) -> (i32, i32, i32) {
    %c0_i32 = arith.constant 0 : i32
    %c0_i32_0 = arith.constant 0 : i32
    %c0_i32_1 = arith.constant 0 : i32
    return %c0_i32, %c0_i32_0, %arg0 : i32, i32, i32
  }
  func.func @transform_3(%arg0: i32) -> (i32, i32) {
    %c0_i32 = arith.constant 0 : i32
    %c0_i32_0 = arith.constant 0 : i32
    return %c0_i32, %arg0 : i32, i32
  }
}

module attributes {stable_mosaic.version = 11 : i64} {
  func.func @_fc_stack_kernel(%arg0: memref<8x1600xbf16, #tpu.memory_space<vmem>>, %arg1: memref<1600x200xbf16, #tpu.memory_space<vmem>>, %arg2: memref<1x200xf32, #tpu.memory_space<vmem>>, %arg3: memref<200x120xbf16, #tpu.memory_space<vmem>>, %arg4: memref<1x120xf32, #tpu.memory_space<vmem>>, %arg5: memref<120x120xbf16, #tpu.memory_space<vmem>>, %arg6: memref<1x120xf32, #tpu.memory_space<vmem>>, %arg7: memref<120x84xbf16, #tpu.memory_space<vmem>>, %arg8: memref<1x84xf32, #tpu.memory_space<vmem>>, %arg9: memref<84x4xbf16, #tpu.memory_space<vmem>>, %arg10: memref<1x4xf32, #tpu.memory_space<vmem>>, %arg11: memref<8x4xf32, #tpu.memory_space<vmem>>) attributes {dimension_semantics = [], scalar_prefetch = 0 : i64, scratch_operands = 0 : i64, tpu.core_type = #tpu.core_type<tc>} {
    %c0 = arith.constant 0 : index
    %c0_0 = arith.constant 0 : index
    %0 = vector.load %arg0[%c0, %c0_0] : memref<8x1600xbf16, #tpu.memory_space<vmem>>, vector<8x1600xbf16>
    %c0_1 = arith.constant 0 : index
    %c0_2 = arith.constant 0 : index
    %1 = vector.load %arg1[%c0_1, %c0_2] : memref<1600x200xbf16, #tpu.memory_space<vmem>>, vector<1600x200xbf16>
    %cst = arith.constant dense<0.000000e+00> : vector<8x200xf32>
    %2 = tpu.matmul %0, %1, %cst {dimension_numbers = #tpu.dot_dimension_numbers<[1], [0], [0], [1], [0, 0, 1, 1], [], []>} : vector<8x1600xbf16>, vector<1600x200xbf16>, vector<8x200xf32> -> vector<8x200xf32>
    %c0_3 = arith.constant 0 : index
    %c0_4 = arith.constant 0 : index
    %3 = vector.load %arg2[%c0_3, %c0_4] : memref<1x200xf32, #tpu.memory_space<vmem>>, vector<1x200xf32>
    %4 = vector.broadcast %3 : vector<1x200xf32> to vector<8x200xf32>
    %5 = arith.addf %2, %4 : vector<8x200xf32>
    %cst_5 = arith.constant 0.000000e+00 : f32
    %6 = vector.broadcast %cst_5 : f32 to vector<8x200xf32>
    %7 = arith.maximumf %5, %6 : vector<8x200xf32>
    %8 = arith.truncf %7 : vector<8x200xf32> to vector<8x200xbf16>
    %c0_6 = arith.constant 0 : index
    %c0_7 = arith.constant 0 : index
    %9 = vector.load %arg3[%c0_6, %c0_7] : memref<200x120xbf16, #tpu.memory_space<vmem>>, vector<200x120xbf16>
    %cst_8 = arith.constant dense<0.000000e+00> : vector<8x120xf32>
    %10 = tpu.matmul %8, %9, %cst_8 {dimension_numbers = #tpu.dot_dimension_numbers<[1], [0], [0], [1], [0, 0, 1, 1], [], []>} : vector<8x200xbf16>, vector<200x120xbf16>, vector<8x120xf32> -> vector<8x120xf32>
    %c0_9 = arith.constant 0 : index
    %c0_10 = arith.constant 0 : index
    %11 = vector.load %arg4[%c0_9, %c0_10] : memref<1x120xf32, #tpu.memory_space<vmem>>, vector<1x120xf32>
    %12 = vector.broadcast %11 : vector<1x120xf32> to vector<8x120xf32>
    %13 = arith.addf %10, %12 : vector<8x120xf32>
    %cst_11 = arith.constant 0.000000e+00 : f32
    %14 = vector.broadcast %cst_11 : f32 to vector<8x120xf32>
    %15 = arith.maximumf %13, %14 : vector<8x120xf32>
    %16 = arith.truncf %15 : vector<8x120xf32> to vector<8x120xbf16>
    %c0_12 = arith.constant 0 : index
    %c0_13 = arith.constant 0 : index
    %17 = vector.load %arg5[%c0_12, %c0_13] : memref<120x120xbf16, #tpu.memory_space<vmem>>, vector<120x120xbf16>
    %cst_14 = arith.constant dense<0.000000e+00> : vector<8x120xf32>
    %18 = tpu.matmul %16, %17, %cst_14 {dimension_numbers = #tpu.dot_dimension_numbers<[1], [0], [0], [1], [0, 0, 1, 1], [], []>} : vector<8x120xbf16>, vector<120x120xbf16>, vector<8x120xf32> -> vector<8x120xf32>
    %c0_15 = arith.constant 0 : index
    %c0_16 = arith.constant 0 : index
    %19 = vector.load %arg6[%c0_15, %c0_16] : memref<1x120xf32, #tpu.memory_space<vmem>>, vector<1x120xf32>
    %20 = vector.broadcast %19 : vector<1x120xf32> to vector<8x120xf32>
    %21 = arith.addf %18, %20 : vector<8x120xf32>
    %cst_17 = arith.constant 0.000000e+00 : f32
    %22 = vector.broadcast %cst_17 : f32 to vector<8x120xf32>
    %23 = arith.maximumf %21, %22 : vector<8x120xf32>
    %24 = arith.truncf %23 : vector<8x120xf32> to vector<8x120xbf16>
    %c0_18 = arith.constant 0 : index
    %c0_19 = arith.constant 0 : index
    %25 = vector.load %arg7[%c0_18, %c0_19] : memref<120x84xbf16, #tpu.memory_space<vmem>>, vector<120x84xbf16>
    %cst_20 = arith.constant dense<0.000000e+00> : vector<8x84xf32>
    %26 = tpu.matmul %24, %25, %cst_20 {dimension_numbers = #tpu.dot_dimension_numbers<[1], [0], [0], [1], [0, 0, 1, 1], [], []>} : vector<8x120xbf16>, vector<120x84xbf16>, vector<8x84xf32> -> vector<8x84xf32>
    %c0_21 = arith.constant 0 : index
    %c0_22 = arith.constant 0 : index
    %27 = vector.load %arg8[%c0_21, %c0_22] : memref<1x84xf32, #tpu.memory_space<vmem>>, vector<1x84xf32>
    %28 = vector.broadcast %27 : vector<1x84xf32> to vector<8x84xf32>
    %29 = arith.addf %26, %28 : vector<8x84xf32>
    %cst_23 = arith.constant 0.000000e+00 : f32
    %30 = vector.broadcast %cst_23 : f32 to vector<8x84xf32>
    %31 = arith.maximumf %29, %30 : vector<8x84xf32>
    %32 = arith.truncf %31 : vector<8x84xf32> to vector<8x84xbf16>
    %c0_24 = arith.constant 0 : index
    %c0_25 = arith.constant 0 : index
    %33 = vector.load %arg9[%c0_24, %c0_25] : memref<84x4xbf16, #tpu.memory_space<vmem>>, vector<84x4xbf16>
    %cst_26 = arith.constant dense<0.000000e+00> : vector<8x4xf32>
    %34 = tpu.matmul %32, %33, %cst_26 {dimension_numbers = #tpu.dot_dimension_numbers<[1], [0], [0], [1], [0, 0, 1, 1], [], []>} : vector<8x84xbf16>, vector<84x4xbf16>, vector<8x4xf32> -> vector<8x4xf32>
    %c0_27 = arith.constant 0 : index
    %c0_28 = arith.constant 0 : index
    %35 = vector.load %arg10[%c0_27, %c0_28] : memref<1x4xf32, #tpu.memory_space<vmem>>, vector<1x4xf32>
    %36 = vector.broadcast %35 : vector<1x4xf32> to vector<8x4xf32>
    %37 = arith.addf %34, %36 : vector<8x4xf32>
    %c0_29 = arith.constant 0 : index
    %c0_30 = arith.constant 0 : index
    %38 = vector.load %arg11[%c0_29, %c0_30] : memref<8x4xf32, #tpu.memory_space<vmem>>, vector<8x4xf32>
    tpu.vector_store %arg11[%c0_29, %c0_30], %37 {strides = array<i32>} : memref<8x4xf32, #tpu.memory_space<vmem>>, vector<8x4xf32>,
    return
  }
}

</mosaic_0001>

<bundles_post_ra>
// kernel: lenet_forward.3
= control target key start
LH: loop header
LB: loop body
LE: loop exit
PB: predicated region body
PF: predicated region fallthrough
CT: control target
= control target key end

     0   :  { %s7642_s12 = smov 0   ;;  %s7644_s13 = smov 0   ;;  %s9465_s0 = inlined_call_operand.vmem [shape: bf16[8,128], index: 0, kind: input, shape index: {}]   ;;  %s9466_s1 = inlined_call_operand.vmem [shape: f32[8,1], index: 1, kind: input, shape index: {}]   ;;  %s9467_s2 = inlined_call_operand.vmem [shape: bf16[8,128,5376], index: 2, kind: input, shape index: {}]   ;;  %s9468_s3 = inlined_call_operand.vmem [shape: bf16[8,5376], index: 3, kind: output, shape index: {}]  }
   0x1   :  { %s7646_s14 = smov 0  }
   0x2 LB: > { %s5521_s15 = sadd.s32 4294967295, %s7617_s14   ;;  %s7659_s16 = sadd.s32 1, %s7617_s14   ;;  %s7617_s14 = sphi %s7646_s14, %s9471_s14   ;;  %s7613_s13 = sphi %s7644_s13, %s9470_s13   ;;  %s7609_s12 = sphi %s7642_s12, %s9469_s12  }
   0x3   : > { %s59_s17 = ssub.s32 %s7617_s14, %s7659_s16  ;;  %s62_s18 = sadd.s32 1, %s7613_s13 }
   0x4   : > { %p60_p0 = scmp.eq.s32.totalorder %s59_s17, 0  ;;  %p69_p1 = scmp.ne.s32.totalorder %s7613_s13, %s7609_s12 }
   0x5   : > { %p70_p2 = scmp.eq.s32.totalorder %s7617_s14, 0  ;;  %p5524_p4 = scmp.ge.s32.totalorder %s7617_s14, 6 }
   0x6   : > { %s7668_s19 = scalar_select %p60_p0, %s7613_s13, %s62_s18  }
   0x7   : > { %p71_p3 = por %p70_p2, %p69_p1  ;;  %127 = sbr.rel (%p5524_p4) target bundleno = 296 (0x128), region = 24 }
   0xe   : > { %130 = sbr.rel (!%p71_p3) target bundleno = 296 (0x128), region = 28  ;;  %s132_s20 = sand.u32 (%p71_p3), 1, %s7613_s13  }
   0xf   : > { %s6686_s21 = smul.u32 (%p71_p3), 28, %s7617_s14 }
  0x10   : > { %s6923_s22 = smul.u32 (%p71_p3), 3584, %s132_s20 }
  0x11   : > { %s7676_s25 = scalar_lea.vmem (%p71_p3), %s9467_s2, %s6686_s21 }
  0x12   : > { %v152_v0 = vld [vmem:[%s7676_s25] sm:$0xff] (%p71_p3)  ;;  %v154_v1 = vld [vmem:[%s7676_s25 + $0x8] sm:$0xff] (%p71_p3)  ;;  %v156_v2 = vld [vmem:[%s7676_s25 + $0x10] sm:$0xff] (%p71_p3)  ;;  %s7681_s26 = scalar_lea.vmem (%p71_p3), [#allocation2], %s6923_s22 }
  0x13   : > { %153 = vst [vmem:[%s7681_s26] sm:$0xff] (%p71_p3), %v152_v0  ;;  %155 = vst [vmem:[%s7681_s26 + $0x8] sm:$0xff] (%p71_p3), %v154_v1  ;;  %v158_v3 = vld [vmem:[%s7676_s25 + $0xa8] sm:$0xff] (%p71_p3)  ;;  %v160_v4 = vld [vmem:[%s7676_s25 + $0xb0] sm:$0xff] (%p71_p3) }
  0x14   : > { %157 = vst [vmem:[%s7681_s26 + $0x10] sm:$0xff] (%p71_p3), %v156_v2  ;;  %v162_v5 = vld [vmem:[%s7676_s25 + $0xb8] sm:$0xff] (%p71_p3)  ;;  %159 = vst [vmem:[%s7681_s26 + $0x1c] sm:$0xff] (%p71_p3), %v158_v3  ;;  %v164_v6 = vld [vmem:[%s7676_s25 + $0x150] sm:$0xff] (%p71_p3) }
  0x15   : > { %161 = vst [vmem:[%s7681_s26 + $0x24] sm:$0xff] %v160_v4  ;;  %163 = vst [vmem:[%s7681_s26 + $0x2c] sm:$0xff] %v162_v5  ;;  %v166_v7 = vld [vmem:[%s7676_s25 + $0x158] sm:$0xff]  ;;  %v168_v8 = vld [vmem:[%s7676_s25 + $0x160] sm:$0xff] }
  0x16   : > { %165 = vst [vmem:[%s7681_s26 + $0x38] sm:$0xff] %v164_v6  ;;  %167 = vst [vmem:[%s7681_s26 + $0x40] sm:$0xff] %v166_v7  ;;  %v170_v9 = vld [vmem:[%s7676_s25 + $0x1f8] sm:$0xff]  ;;  %v172_v10 = vld [vmem:[%s7676_s25 + $0x200] sm:$0xff] }
  0x17   : > { %169 = vst [vmem:[%s7681_s26 + $0x48] sm:$0xff] %v168_v8  ;;  %v174_v11 = vld [vmem:[%s7676_s25 + $0x208] sm:$0xff]  ;;  %171 = vst [vmem:[%s7681_s26 + $0x54] sm:$0xff] %v170_v9  ;;  %v176_v12 = vld [vmem:[%s7676_s25 + $0x2a0] sm:$0xff] }
  0x18   : > { %173 = vst [vmem:[%s7681_s26 + $0x5c] sm:$0xff] %v172_v10  ;;  %175 = vst [vmem:[%s7681_s26 + $0x64] sm:$0xff] %v174_v11  ;;  %v178_v13 = vld [vmem:[%s7676_s25 + $0x2a8] sm:$0xff]  ;;  %v180_v14 = vld [vmem:[%s7676_s25 + $0x2b0] sm:$0xff] }
  0x19   : > { %177 = vst [vmem:[%s7681_s26 + $0x70] sm:$0xff] %v176_v12  ;;  %179 = vst [vmem:[%s7681_s26 + $0x78] sm:$0xff] %v178_v13  ;;  %v182_v15 = vld [vmem:[%s7676_s25 + $0x348] sm:$0xff]  ;;  %v184_v16 = vld [vmem:[%s7676_s25 + $0x350] sm:$0xff] }
  0x1a   : > { %181 = vst [vmem:[%s7681_s26 + $0x80] sm:$0xff] %v180_v14  ;;  %v186_v17 = vld [vmem:[%s7676_s25 + $0x358] sm:$0xff]  ;;  %183 = vst [vmem:[%s7681_s26 + $0x8c] sm:$0xff] %v182_v15  ;;  %v188_v18 = vld [vmem:[%s7676_s25 + $0x3f0] sm:$0xff] }
  0x1b   : > { %185 = vst [vmem:[%s7681_s26 + $0x94] sm:$0xff] %v184_v16  ;;  %187 = vst [vmem:[%s7681_s26 + $0x9c] sm:$0xff] %v186_v17  ;;  %v190_v19 = vld [vmem:[%s7676_s25 + $0x3f8] sm:$0xff]  ;;  %v192_v20 = vld [vmem:[%s7676_s25 + $0x400] sm:$0xff] }
  0x1c   : > { %189 = vst [vmem:[%s7681_s26 + $0xa8] sm:$0xff] %v188_v18  ;;  %191 = vst [vmem:[%s7681_s26 + $0xb0] sm:$0xff] %v190_v19  ;;  %v194_v21 = vld [vmem:[%s7676_s25 + $0x498] sm:$0xff]  ;;  %v196_v22 = vld [vmem:[%s7676_s25 + $0x4a0] sm:$0xff] }
  0x1d   : > { %193 = vst [vmem:[%s7681_s26 + $0xb8] sm:$0xff] %v192_v20  ;;  %v198_v23 = vld [vmem:[%s7676_s25 + $0x4a8] sm:$0xff]  ;;  %195 = vst [vmem:[%s7681_s26 + $0xc4] sm:$0xff] %v194_v21  ;;  %v200_v24 = vld [vmem:[%s7676_s25 + $0x540] sm:$0xff] }
  0x1e   : > { %197 = vst [vmem:[%s7681_s26 + $0xcc] sm:$0xff] %v196_v22  ;;  %199 = vst [vmem:[%s7681_s26 + $0xd4] sm:$0xff] %v198_v23  ;;  %v202_v25 = vld [vmem:[%s7676_s25 + $0x548] sm:$0xff]  ;;  %v204_v26 = vld [vmem:[%s7676_s25 + $0x550] sm:$0xff] }
  0x1f   : > { %201 = vst [vmem:[%s7681_s26 + $0xe0] sm:$0xff] %v200_v24  ;;  %203 = vst [vmem:[%s7681_s26 + $0xe8] sm:$0xff] %v202_v25  ;;  %v206_v27 = vld [vmem:[%s7676_s25 + $0x5e8] sm:$0xff]  ;;  %v208_v28 = vld [vmem:[%s7676_s25 + $0x5f0] sm:$0xff] }
  0x20   : > { %205 = vst [vmem:[%s7681_s26 + $0xf0] sm:$0xff] %v204_v26  ;;  %v210_v29 = vld [vmem:[%s7676_s25 + $0x5f8] sm:$0xff]  ;;  %207 = vst [vmem:[%s7681_s26 + $0xfc] sm:$0xff] %v206_v27  ;;  %v212_v30 = vld [vmem:[%s7676_s25 + $0x690] sm:$0xff] }
  0x21   : > { %209 = vst [vmem:[%s7681_s26 + $0x104] sm:$0xff] %v208_v28  ;;  %211 = vst [vmem:[%s7681_s26 + $0x10c] sm:$0xff] %v210_v29  ;;  %v214_v31 = vld [vmem:[%s7676_s25 + $0x698] sm:$0xff]  ;;  %v216_v32 = vld [vmem:[%s7676_s25 + $0x6a0] sm:$0xff] }
  0x22   : > { %213 = vst [vmem:[%s7681_s26 + $0x118] sm:$0xff] %v212_v30  ;;  %215 = vst [vmem:[%s7681_s26 + $0x120] sm:$0xff] %v214_v31  ;;  %v218_v33 = vld [vmem:[%s7676_s25 + $0x738] sm:$0xff]  ;;  %v220_v34 = vld [vmem:[%s7676_s25 + $0x740] sm:$0xff] }
  0x23   : > { %217 = vst [vmem:[%s7681_s26 + $0x128] sm:$0xff] %v216_v32  ;;  %v222_v35 = vld [vmem:[%s7676_s25 + $0x748] sm:$0xff]  ;;  %219 = vst [vmem:[%s7681_s26 + $0x134] sm:$0xff] %v218_v33  ;;  %v224_v36 = vld [vmem:[%s7676_s25 + $0x7e0] sm:$0xff] }
  0x24   : > { %221 = vst [vmem:[%s7681_s26 + $0x13c] sm:$0xff] %v220_v34  ;;  %223 = vst [vmem:[%s7681_s26 + $0x144] sm:$0xff] %v222_v35  ;;  %v226_v37 = vld [vmem:[%s7676_s25 + $0x7e8] sm:$0xff]  ;;  %v228_v38 = vld [vmem:[%s7676_s25 + $0x7f0] sm:$0xff] }
  0x25   : > { %225 = vst [vmem:[%s7681_s26 + $0x150] sm:$0xff] %v224_v36  ;;  %227 = vst [vmem:[%s7681_s26 + $0x158] sm:$0xff] %v226_v37  ;;  %v230_v39 = vld [vmem:[%s7676_s25 + $0x888] sm:$0xff]  ;;  %v232_v40 = vld [vmem:[%s7676_s25 + $0x890] sm:$0xff] }
  0x26   : > { %229 = vst [vmem:[%s7681_s26 + $0x160] sm:$0xff] %v228_v38  ;;  %v234_v41 = vld [vmem:[%s7676_s25 + $0x898] sm:$0xff]  ;;  %231 = vst [vmem:[%s7681_s26 + $0x16c] sm:$0xff] %v230_v39  ;;  %v236_v42 = vld [vmem:[%s7676_s25 + $0x930] sm:$0xff] }
  0x27   : > { %233 = vst [vmem:[%s7681_s26 + $0x174] sm:$0xff] %v232_v40  ;;  %235 = vst [vmem:[%s7681_s26 + $0x17c] sm:$0xff] %v234_v41  ;;  %v238_v43 = vld [vmem:[%s7676_s25 + $0x938] sm:$0xff]  ;;  %v240_v44 = vld [vmem:[%s7676_s25 + $0x940] sm:$0xff] }
  0x28   : > { %237 = vst [vmem:[%s7681_s26 + $0x188] sm:$0xff] %v236_v42  ;;  %239 = vst [vmem:[%s7681_s26 + $0x190] sm:$0xff] %v238_v43  ;;  %v242_v45 = vld [vmem:[%s7676_s25 + $0x9d8] sm:$0xff]  ;;  %v244_v46 = vld [vmem:[%s7676_s25 + $0x9e0] sm:$0xff] }
  0x29   : > { %241 = vst [vmem:[%s7681_s26 + $0x198] sm:$0xff] %v240_v44  ;;  %v246_v47 = vld [vmem:[%s7676_s25 + $0x9e8] sm:$0xff]  ;;  %243 = vst [vmem:[%s7681_s26 + $0x1a4] sm:$0xff] %v242_v45  ;;  %v248_v48 = vld [vmem:[%s7676_s25 + $0xa80] sm:$0xff] }
  0x2a   : > { %245 = vst [vmem:[%s7681_s26 + $0x1ac] sm:$0xff] %v244_v46  ;;  %247 = vst [vmem:[%s7681_s26 + $0x1b4] sm:$0xff] %v246_v47  ;;  %v250_v49 = vld [vmem:[%s7676_s25 + $0xa88] sm:$0xff]  ;;  %v252_v50 = vld [vmem:[%s7676_s25 + $0xa90] sm:$0xff] }
  0x2b   : > { %249 = vst [vmem:[%s7681_s26 + $0x1c0] sm:$0xff] %v248_v48  ;;  %251 = vst [vmem:[%s7681_s26 + $0x1c8] sm:$0xff] %v250_v49  ;;  %v254_v51 = vld [vmem:[%s7676_s25 + $0xb28] sm:$0xff]  ;;  %v256_v52 = vld [vmem:[%s7676_s25 + $0xb30] sm:$0xff] }
  0x2c   : > { %253 = vst [vmem:[%s7681_s26 + $0x1d0] sm:$0xff] %v252_v50  ;;  %v258_v53 = vld [vmem:[%s7676_s25 + $0xb38] sm:$0xff]  ;;  %255 = vst [vmem:[%s7681_s26 + $0x1dc] sm:$0xff] %v254_v51  ;;  %v260_v54 = vld [vmem:[%s7676_s25 + $0xbd0] sm:$0xff] }
  0x2d   : > { %257 = vst [vmem:[%s7681_s26 + $0x1e4] sm:$0xff] %v256_v52  ;;  %259 = vst [vmem:[%s7681_s26 + $0x1ec] sm:$0xff] %v258_v53  ;;  %v262_v55 = vld [vmem:[%s7676_s25 + $0xbd8] sm:$0xff]  ;;  %v264_v56 = vld [vmem:[%s7676_s25 + $0xbe0] sm:$0xff] }
  0x2e   : > { %261 = vst [vmem:[%s7681_s26 + $0x1f8] sm:$0xff] %v260_v54  ;;  %263 = vst [vmem:[%s7681_s26 + $0x200] sm:$0xff] %v262_v55  ;;  %v266_v57 = vld [vmem:[%s7676_s25 + $0xc78] sm:$0xff]  ;;  %v268_v58 = vld [vmem:[%s7676_s25 + $0xc80] sm:$0xff] }
  0x2f   : > { %265 = vst [vmem:[%s7681_s26 + $0x208] sm:$0xff] %v264_v56  ;;  %v270_v59 = vld [vmem:[%s7676_s25 + $0xc88] sm:$0xff]  ;;  %267 = vst [vmem:[%s7681_s26 + $0x214] sm:$0xff] %v266_v57  ;;  %v272_v60 = vld [vmem:[%s7676_s25 + $0xd20] sm:$0xff] }
  0x30   : > { %269 = vst [vmem:[%s7681_s26 + $0x21c] sm:$0xff] %v268_v58  ;;  %271 = vst [vmem:[%s7681_s26 + $0x224] sm:$0xff] %v270_v59  ;;  %v274_v61 = vld [vmem:[%s7676_s25 + $0xd28] sm:$0xff]  ;;  %v276_v62 = vld [vmem:[%s7676_s25 + $0xd30] sm:$0xff] }
  0x31   : > { %273 = vst [vmem:[%s7681_s26 + $0x230] sm:$0xff] %v272_v60  ;;  %275 = vst [vmem:[%s7681_s26 + $0x238] sm:$0xff] %v274_v61  ;;  %v278_v63 = vld [vmem:[%s7676_s25 + $0xdc8] sm:$0xff]  ;;  %v280_v0 = vld [vmem:[%s7676_s25 + $0xdd0] sm:$0xff] }
  0x32   : > { %277 = vst [vmem:[%s7681_s26 + $0x240] sm:$0xff] %v276_v62  ;;  %v282_v1 = vld [vmem:[%s7676_s25 + $0xdd8] sm:$0xff]  ;;  %279 = vst [vmem:[%s7681_s26 + $0x24c] sm:$0xff] %v278_v63  ;;  %v284_v2 = vld [vmem:[%s7676_s25 + $0xe70] sm:$0xff] }
  0x33   : > { %281 = vst [vmem:[%s7681_s26 + $0x254] sm:$0xff] %v280_v0  ;;  %283 = vst [vmem:[%s7681_s26 + $0x25c] sm:$0xff] %v282_v1  ;;  %v286_v3 = vld [vmem:[%s7676_s25 + $0xe78] sm:$0xff]  ;;  %v288_v4 = vld [vmem:[%s7676_s25 + $0xe80] sm:$0xff] }
  0x34   : > { %285 = vst [vmem:[%s7681_s26 + $0x268] sm:$0xff] %v284_v2  ;;  %287 = vst [vmem:[%s7681_s26 + $0x270] sm:$0xff] %v286_v3  ;;  %v290_v5 = vld [vmem:[%s7676_s25 + $0xf18] sm:$0xff]  ;;  %v292_v6 = vld [vmem:[%s7676_s25 + $0xf20] sm:$0xff] }
  0x35   : > { %289 = vst [vmem:[%s7681_s26 + $0x278] sm:$0xff] %v288_v4  ;;  %v294_v7 = vld [vmem:[%s7676_s25 + $0xf28] sm:$0xff]  ;;  %291 = vst [vmem:[%s7681_s26 + $0x284] sm:$0xff] %v290_v5  ;;  %v296_v8 = vld [vmem:[%s7676_s25 + $0xfc0] sm:$0xff] }
  0x36   : > { %293 = vst [vmem:[%s7681_s26 + $0x28c] sm:$0xff] %v292_v6  ;;  %295 = vst [vmem:[%s7681_s26 + $0x294] sm:$0xff] %v294_v7  ;;  %v298_v9 = vld [vmem:[%s7676_s25 + $0xfc8] sm:$0xff]  ;;  %v300_v10 = vld [vmem:[%s7676_s25 + $0xfd0] sm:$0xff] }
  0x37   : > { %297 = vst [vmem:[%s7681_s26 + $0x2a0] sm:$0xff] %v296_v8  ;;  %299 = vst [vmem:[%s7681_s26 + $0x2a8] sm:$0xff] %v298_v9  ;;  %v302_v11 = vld [vmem:[%s7676_s25 + $0x1068] sm:$0xff]  ;;  %v304_v12 = vld [vmem:[%s7676_s25 + $0x1070] sm:$0xff] }
  0x38   : > { %301 = vst [vmem:[%s7681_s26 + $0x2b0] sm:$0xff] %v300_v10  ;;  %v306_v13 = vld [vmem:[%s7676_s25 + $0x1078] sm:$0xff]  ;;  %303 = vst [vmem:[%s7681_s26 + $0x2bc] sm:$0xff] %v302_v11  ;;  %v308_v14 = vld [vmem:[%s7676_s25 + $0x1110] sm:$0xff] }
  0x39   : > { %305 = vst [vmem:[%s7681_s26 + $0x2c4] sm:$0xff] %v304_v12  ;;  %307 = vst [vmem:[%s7681_s26 + $0x2cc] sm:$0xff] %v306_v13  ;;  %v310_v15 = vld [vmem:[%s7676_s25 + $0x1118] sm:$0xff]  ;;  %v312_v16 = vld [vmem:[%s7676_s25 + $0x1120] sm:$0xff] }
  0x3a   : > { %309 = vst [vmem:[%s7681_s26 + $0x2d8] sm:$0xff] %v308_v14  ;;  %311 = vst [vmem:[%s7681_s26 + $0x2e0] sm:$0xff] %v310_v15  ;;  %v314_v17 = vld [vmem:[%s7676_s25 + $0x11b8] sm:$0xff]  ;;  %v316_v18 = vld [vmem:[%s7676_s25 + $0x11c0] sm:$0xff] }
  0x3b   : > { %313 = vst [vmem:[%s7681_s26 + $0x2e8] sm:$0xff] %v312_v16  ;;  %v318_v19 = vld [vmem:[%s7676_s25 + $0x11c8] sm:$0xff]  ;;  %315 = vst [vmem:[%s7681_s26 + $0x2f4] sm:$0xff] %v314_v17  ;;  %v320_v20 = vld [vmem:[%s7676_s25 + $0x1260] sm:$0xff] }
  0x3c   : > { %317 = vst [vmem:[%s7681_s26 + $0x2fc] sm:$0xff] %v316_v18  ;;  %319 = vst [vmem:[%s7681_s26 + $0x304] sm:$0xff] %v318_v19  ;;  %v322_v21 = vld [vmem:[%s7676_s25 + $0x1268] sm:$0xff]  ;;  %v324_v22 = vld [vmem:[%s7676_s25 + $0x1270] sm:$0xff] }
  0x3d   : > { %321 = vst [vmem:[%s7681_s26 + $0x310] sm:$0xff] %v320_v20  ;;  %323 = vst [vmem:[%s7681_s26 + $0x318] sm:$0xff] %v322_v21  ;;  %v326_v23 = vld [vmem:[%s7676_s25 + $0x1308] sm:$0xff]  ;;  %v328_v24 = vld [vmem:[%s7676_s25 + $0x1310] sm:$0xff] }
  0x3e   : > { %325 = vst [vmem:[%s7681_s26 + $0x320] sm:$0xff] %v324_v22  ;;  %v330_v25 = vld [vmem:[%s7676_s25 + $0x1318] sm:$0xff]  ;;  %327 = vst [vmem:[%s7681_s26 + $0x32c] sm:$0xff] %v326_v23  ;;  %v332_v26 = vld [vmem:[%s7676_s25 + $0x13b0] sm:$0xff] }
  0x3f   : > { %329 = vst [vmem:[%s7681_s26 + $0x334] sm:$0xff] %v328_v24  ;;  %331 = vst [vmem:[%s7681_s26 + $0x33c] sm:$0xff] %v330_v25  ;;  %v334_v27 = vld [vmem:[%s7676_s25 + $0x13b8] sm:$0xff]  ;;  %v336_v28 = vld [vmem:[%s7676_s25 + $0x13c0] sm:$0xff] }
  0x40   : > { %333 = vst [vmem:[%s7681_s26 + $0x348] sm:$0xff] %v332_v26  ;;  %335 = vst [vmem:[%s7681_s26 + $0x350] sm:$0xff] %v334_v27  ;;  %v338_v29 = vld [vmem:[%s7676_s25 + $0x1458] sm:$0xff]  ;;  %v340_v30 = vld [vmem:[%s7676_s25 + $0x1460] sm:$0xff] }
  0x41   : > { %337 = vst [vmem:[%s7681_s26 + $0x358] sm:$0xff] %v336_v28  ;;  %v342_v31 = vld [vmem:[%s7676_s25 + $0x1468] sm:$0xff]  ;;  %339 = vst [vmem:[%s7681_s26 + $0x364] sm:$0xff] %v338_v29  ;;  %v344_v32 = vld [vmem:[%s7676_s25 + $0x1500] sm:$0xff] }
  0x42   : > { %341 = vst [vmem:[%s7681_s26 + $0x36c] sm:$0xff] %v340_v30  ;;  %343 = vst [vmem:[%s7681_s26 + $0x374] sm:$0xff] %v342_v31  ;;  %v346_v33 = vld [vmem:[%s7676_s25 + $0x1508] sm:$0xff]  ;;  %v348_v34 = vld [vmem:[%s7676_s25 + $0x1510] sm:$0xff] }
  0x43   : > { %345 = vst [vmem:[%s7681_s26 + $0x380] sm:$0xff] %v344_v32  ;;  %347 = vst [vmem:[%s7681_s26 + $0x388] sm:$0xff] %v346_v33  ;;  %v350_v35 = vld [vmem:[%s7676_s25 + $0x15a8] sm:$0xff]  ;;  %v352_v36 = vld [vmem:[%s7676_s25 + $0x15b0] sm:$0xff] }
  0x44   : > { %349 = vst [vmem:[%s7681_s26 + $0x390] sm:$0xff] %v348_v34  ;;  %v354_v37 = vld [vmem:[%s7676_s25 + $0x15b8] sm:$0xff]  ;;  %351 = vst [vmem:[%s7681_s26 + $0x39c] sm:$0xff] %v350_v35  ;;  %v356_v38 = vld [vmem:[%s7676_s25 + $0x1650] sm:$0xff] }
  0x45   : > { %353 = vst [vmem:[%s7681_s26 + $0x3a4] sm:$0xff] %v352_v36  ;;  %355 = vst [vmem:[%s7681_s26 + $0x3ac] sm:$0xff] %v354_v37  ;;  %v358_v39 = vld [vmem:[%s7676_s25 + $0x1658] sm:$0xff]  ;;  %v360_v40 = vld [vmem:[%s7676_s25 + $0x1660] sm:$0xff] }
  0x46   : > { %357 = vst [vmem:[%s7681_s26 + $0x3b8] sm:$0xff] %v356_v38  ;;  %359 = vst [vmem:[%s7681_s26 + $0x3c0] sm:$0xff] %v358_v39  ;;  %v362_v41 = vld [vmem:[%s7676_s25 + $0x16f8] sm:$0xff]  ;;  %v364_v42 = vld [vmem:[%s7676_s25 + $0x1700] sm:$0xff] }
  0x47   : > { %361 = vst [vmem:[%s7681_s26 + $0x3c8] sm:$0xff] %v360_v40  ;;  %v366_v43 = vld [vmem:[%s7676_s25 + $0x1708] sm:$0xff]  ;;  %363 = vst [vmem:[%s7681_s26 + $0x3d4] sm:$0xff] %v362_v41  ;;  %v368_v44 = vld [vmem:[%s7676_s25 + $0x17a0] sm:$0xff] }
  0x48   : > { %365 = vst [vmem:[%s7681_s26 + $0x3dc] sm:$0xff] %v364_v42  ;;  %367 = vst [vmem:[%s7681_s26 + $0x3e4] sm:$0xff] %v366_v43  ;;  %v370_v45 = vld [vmem:[%s7676_s25 + $0x17a8] sm:$0xff]  ;;  %v372_v46 = vld [vmem:[%s7676_s25 + $0x17b0] sm:$0xff] }
  0x49   : > { %369 = vst [vmem:[%s7681_s26 + $0x3f0] sm:$0xff] %v368_v44  ;;  %371 = vst [vmem:[%s7681_s26 + $0x3f8] sm:$0xff] %v370_v45  ;;  %v374_v47 = vld [vmem:[%s7676_s25 + $0x1848] sm:$0xff]  ;;  %v376_v48 = vld [vmem:[%s7676_s25 + $0x1850] sm:$0xff] }
  0x4a   : > { %373 = vst [vmem:[%s7681_s26 + $0x400] sm:$0xff] %v372_v46  ;;  %v378_v49 = vld [vmem:[%s7676_s25 + $0x1858] sm:$0xff]  ;;  %375 = vst [vmem:[%s7681_s26 + $0x40c] sm:$0xff] %v374_v47  ;;  %v380_v50 = vld [vmem:[%s7676_s25 + $0x18f0] sm:$0xff] }
  0x4b   : > { %377 = vst [vmem:[%s7681_s26 + $0x414] sm:$0xff] %v376_v48  ;;  %379 = vst [vmem:[%s7681_s26 + $0x41c] sm:$0xff] %v378_v49  ;;  %v382_v51 = vld [vmem:[%s7676_s25 + $0x18f8] sm:$0xff]  ;;  %v384_v52 = vld [vmem:[%s7676_s25 + $0x1900] sm:$0xff] }
  0x4c   : > { %381 = vst [vmem:[%s7681_s26 + $0x428] sm:$0xff] %v380_v50  ;;  %383 = vst [vmem:[%s7681_s26 + $0x430] sm:$0xff] %v382_v51  ;;  %v386_v53 = vld [vmem:[%s7676_s25 + $0x1998] sm:$0xff]  ;;  %v388_v54 = vld [vmem:[%s7676_s25 + $0x19a0] sm:$0xff] }
  0x4d   : > { %385 = vst [vmem:[%s7681_s26 + $0x438] sm:$0xff] %v384_v52  ;;  %v390_v55 = vld [vmem:[%s7676_s25 + $0x19a8] sm:$0xff]  ;;  %387 = vst [vmem:[%s7681_s26 + $0x444] sm:$0xff] %v386_v53  ;;  %v392_v56 = vld [vmem:[%s7676_s25 + $0x1a40] sm:$0xff] }
  0x4e   : > { %389 = vst [vmem:[%s7681_s26 + $0x44c] sm:$0xff] %v388_v54  ;;  %391 = vst [vmem:[%s7681_s26 + $0x454] sm:$0xff] %v390_v55  ;;  %v394_v57 = vld [vmem:[%s7676_s25 + $0x1a48] sm:$0xff]  ;;  %v396_v58 = vld [vmem:[%s7676_s25 + $0x1a50] sm:$0xff] }
  0x4f   : > { %393 = vst [vmem:[%s7681_s26 + $0x460] sm:$0xff] %v392_v56  ;;  %395 = vst [vmem:[%s7681_s26 + $0x468] sm:$0xff] %v394_v57  ;;  %v398_v59 = vld [vmem:[%s7676_s25 + $0x1ae8] sm:$0xff]  ;;  %v400_v60 = vld [vmem:[%s7676_s25 + $0x1af0] sm:$0xff] }
  0x50   : > { %397 = vst [vmem:[%s7681_s26 + $0x470] sm:$0xff] %v396_v58  ;;  %v402_v61 = vld [vmem:[%s7676_s25 + $0x1af8] sm:$0xff]  ;;  %399 = vst [vmem:[%s7681_s26 + $0x47c] sm:$0xff] %v398_v59  ;;  %v404_v62 = vld [vmem:[%s7676_s25 + $0x1b90] sm:$0xff] }
  0x51   : > { %401 = vst [vmem:[%s7681_s26 + $0x484] sm:$0xff] %v400_v60  ;;  %403 = vst [vmem:[%s7681_s26 + $0x48c] sm:$0xff] %v402_v61  ;;  %v406_v63 = vld [vmem:[%s7676_s25 + $0x1b98] sm:$0xff]  ;;  %v408_v0 = vld [vmem:[%s7676_s25 + $0x1ba0] sm:$0xff] }
  0x52   : > { %405 = vst [vmem:[%s7681_s26 + $0x498] sm:$0xff] %v404_v62  ;;  %407 = vst [vmem:[%s7681_s26 + $0x4a0] sm:$0xff] %v406_v63  ;;  %v410_v1 = vld [vmem:[%s7676_s25 + $0x1c38] sm:$0xff]  ;;  %v412_v2 = vld [vmem:[%s7676_s25 + $0x1c40] sm:$0xff] }
  0x53   : > { %409 = vst [vmem:[%s7681_s26 + $0x4a8] sm:$0xff] %v408_v0  ;;  %v414_v3 = vld [vmem:[%s7676_s25 + $0x1c48] sm:$0xff]  ;;  %411 = vst [vmem:[%s7681_s26 + $0x4b4] sm:$0xff] %v410_v1  ;;  %v416_v4 = vld [vmem:[%s7676_s25 + $0x1ce0] sm:$0xff] }
  0x54   : > { %413 = vst [vmem:[%s7681_s26 + $0x4bc] sm:$0xff] %v412_v2  ;;  %415 = vst [vmem:[%s7681_s26 + $0x4c4] sm:$0xff] %v414_v3  ;;  %v418_v5 = vld [vmem:[%s7676_s25 + $0x1ce8] sm:$0xff]  ;;  %v420_v6 = vld [vmem:[%s7676_s25 + $0x1cf0] sm:$0xff] }
  0x55   : > { %417 = vst [vmem:[%s7681_s26 + $0x4d0] sm:$0xff] %v416_v4  ;;  %419 = vst [vmem:[%s7681_s26 + $0x4d8] sm:$0xff] %v418_v5  ;;  %v422_v7 = vld [vmem:[%s7676_s25 + $0x1d88] sm:$0xff]  ;;  %v424_v8 = vld [vmem:[%s7676_s25 + $0x1d90] sm:$0xff] }
  0x56   : > { %421 = vst [vmem:[%s7681_s26 + $0x4e0] sm:$0xff] %v420_v6  ;;  %v426_v9 = vld [vmem:[%s7676_s25 + $0x1d98] sm:$0xff]  ;;  %423 = vst [vmem:[%s7681_s26 + $0x4ec] sm:$0xff] %v422_v7  ;;  %v428_v10 = vld [vmem:[%s7676_s25 + $0x1e30] sm:$0xff] }
  0x57   : > { %425 = vst [vmem:[%s7681_s26 + $0x4f4] sm:$0xff] %v424_v8  ;;  %427 = vst [vmem:[%s7681_s26 + $0x4fc] sm:$0xff] %v426_v9  ;;  %v430_v11 = vld [vmem:[%s7676_s25 + $0x1e38] sm:$0xff]  ;;  %v432_v12 = vld [vmem:[%s7676_s25 + $0x1e40] sm:$0xff] }
  0x58   : > { %429 = vst [vmem:[%s7681_s26 + $0x508] sm:$0xff] %v428_v10  ;;  %431 = vst [vmem:[%s7681_s26 + $0x510] sm:$0xff] %v430_v11  ;;  %v434_v13 = vld [vmem:[%s7676_s25 + $0x1ed8] sm:$0xff]  ;;  %v436_v14 = vld [vmem:[%s7676_s25 + $0x1ee0] sm:$0xff] }
  0x59   : > { %433 = vst [vmem:[%s7681_s26 + $0x518] sm:$0xff] %v432_v12  ;;  %v438_v15 = vld [vmem:[%s7676_s25 + $0x1ee8] sm:$0xff]  ;;  %435 = vst [vmem:[%s7681_s26 + $0x524] sm:$0xff] %v434_v13  ;;  %v440_v16 = vld [vmem:[%s7676_s25 + $0x1f80] sm:$0xff] }
  0x5a   : > { %437 = vst [vmem:[%s7681_s26 + $0x52c] sm:$0xff] %v436_v14  ;;  %439 = vst [vmem:[%s7681_s26 + $0x534] sm:$0xff] %v438_v15  ;;  %v442_v17 = vld [vmem:[%s7676_s25 + $0x1f88] sm:$0xff]  ;;  %v444_v18 = vld [vmem:[%s7676_s25 + $0x1f90] sm:$0xff] }
  0x5b   : > { %441 = vst [vmem:[%s7681_s26 + $0x540] sm:$0xff] %v440_v16  ;;  %443 = vst [vmem:[%s7681_s26 + $0x548] sm:$0xff] %v442_v17  ;;  %v446_v19 = vld [vmem:[%s7676_s25 + $0x2028] sm:$0xff]  ;;  %v448_v20 = vld [vmem:[%s7676_s25 + $0x2030] sm:$0xff] }
  0x5c   : > { %445 = vst [vmem:[%s7681_s26 + $0x550] sm:$0xff] %v444_v18  ;;  %v450_v21 = vld [vmem:[%s7676_s25 + $0x2038] sm:$0xff]  ;;  %447 = vst [vmem:[%s7681_s26 + $0x55c] sm:$0xff] %v446_v19  ;;  %v452_v22 = vld [vmem:[%s7676_s25 + $0x20d0] sm:$0xff] }
  0x5d   : > { %449 = vst [vmem:[%s7681_s26 + $0x564] sm:$0xff] %v448_v20  ;;  %451 = vst [vmem:[%s7681_s26 + $0x56c] sm:$0xff] %v450_v21  ;;  %v454_v23 = vld [vmem:[%s7676_s25 + $0x20d8] sm:$0xff]  ;;  %v456_v24 = vld [vmem:[%s7676_s25 + $0x20e0] sm:$0xff] }
  0x5e   : > { %453 = vst [vmem:[%s7681_s26 + $0x578] sm:$0xff] %v452_v22  ;;  %455 = vst [vmem:[%s7681_s26 + $0x580] sm:$0xff] %v454_v23  ;;  %v458_v25 = vld [vmem:[%s7676_s25 + $0x2178] sm:$0xff]  ;;  %v460_v26 = vld [vmem:[%s7676_s25 + $0x2180] sm:$0xff] }
  0x5f   : > { %457 = vst [vmem:[%s7681_s26 + $0x588] sm:$0xff] %v456_v24  ;;  %v462_v27 = vld [vmem:[%s7676_s25 + $0x2188] sm:$0xff]  ;;  %459 = vst [vmem:[%s7681_s26 + $0x594] sm:$0xff] %v458_v25  ;;  %v464_v28 = vld [vmem:[%s7676_s25 + $0x2220] sm:$0xff] }
  0x60   : > { %461 = vst [vmem:[%s7681_s26 + $0x59c] sm:$0xff] %v460_v26  ;;  %463 = vst [vmem:[%s7681_s26 + $0x5a4] sm:$0xff] %v462_v27  ;;  %v466_v29 = vld [vmem:[%s7676_s25 + $0x2228] sm:$0xff]  ;;  %v468_v30 = vld [vmem:[%s7676_s25 + $0x2230] sm:$0xff] }
  0x61   : > { %465 = vst [vmem:[%s7681_s26 + $0x5b0] sm:$0xff] %v464_v28  ;;  %467 = vst [vmem:[%s7681_s26 + $0x5b8] sm:$0xff] %v466_v29  ;;  %v470_v31 = vld [vmem:[%s7676_s25 + $0x22c8] sm:$0xff]  ;;  %v472_v32 = vld [vmem:[%s7676_s25 + $0x22d0] sm:$0xff] }
  0x62   : > { %469 = vst [vmem:[%s7681_s26 + $0x5c0] sm:$0xff] %v468_v30  ;;  %v474_v33 = vld [vmem:[%s7676_s25 + $0x22d8] sm:$0xff]  ;;  %471 = vst [vmem:[%s7681_s26 + $0x5cc] sm:$0xff] %v470_v31  ;;  %v476_v34 = vld [vmem:[%s7676_s25 + $0x2370] sm:$0xff] }
  0x63   : > { %473 = vst [vmem:[%s7681_s26 + $0x5d4] sm:$0xff] %v472_v32  ;;  %475 = vst [vmem:[%s7681_s26 + $0x5dc] sm:$0xff] %v474_v33  ;;  %v478_v35 = vld [vmem:[%s7676_s25 + $0x2378] sm:$0xff]  ;;  %v480_v36 = vld [vmem:[%s7676_s25 + $0x2380] sm:$0xff] }
  0x64   : > { %477 = vst [vmem:[%s7681_s26 + $0x5e8] sm:$0xff] %v476_v34  ;;  %479 = vst [vmem:[%s7681_s26 + $0x5f0] sm:$0xff] %v478_v35  ;;  %v482_v37 = vld [vmem:[%s7676_s25 + $0x2418] sm:$0xff]  ;;  %v484_v38 = vld [vmem:[%s7676_s25 + $0x2420] sm:$0xff] }
  0x65   : > { %481 = vst [vmem:[%s7681_s26 + $0x5f8] sm:$0xff] %v480_v36  ;;  %v486_v39 = vld [vmem:[%s7676_s25 + $0x2428] sm:$0xff]  ;;  %483 = vst [vmem:[%s7681_s26 + $0x604] sm:$0xff] %v482_v37  ;;  %v488_v40 = vld [vmem:[%s7676_s25 + $0x24c0] sm:$0xff] }
  0x66   : > { %485 = vst [vmem:[%s7681_s26 + $0x60c] sm:$0xff] %v484_v38  ;;  %487 = vst [vmem:[%s7681_s26 + $0x614] sm:$0xff] %v486_v39  ;;  %v490_v41 = vld [vmem:[%s7676_s25 + $0x24c8] sm:$0xff]  ;;  %v492_v42 = vld [vmem:[%s7676_s25 + $0x24d0] sm:$0xff] }
  0x67   : > { %489 = vst [vmem:[%s7681_s26 + $0x620] sm:$0xff] %v488_v40  ;;  %491 = vst [vmem:[%s7681_s26 + $0x628] sm:$0xff] %v490_v41  ;;  %v494_v43 = vld [vmem:[%s7676_s25 + $0x2568] sm:$0xff]  ;;  %v496_v44 = vld [vmem:[%s7676_s25 + $0x2570] sm:$0xff] }
  0x68   : > { %493 = vst [vmem:[%s7681_s26 + $0x630] sm:$0xff] %v492_v42  ;;  %v498_v45 = vld [vmem:[%s7676_s25 + $0x2578] sm:$0xff]  ;;  %495 = vst [vmem:[%s7681_s26 + $0x63c] sm:$0xff] %v494_v43  ;;  %v500_v46 = vld [vmem:[%s7676_s25 + $0x2610] sm:$0xff] }
  0x69   : > { %497 = vst [vmem:[%s7681_s26 + $0x644] sm:$0xff] %v496_v44  ;;  %499 = vst [vmem:[%s7681_s26 + $0x64c] sm:$0xff] %v498_v45  ;;  %v502_v47 = vld [vmem:[%s7676_s25 + $0x2618] sm:$0xff]  ;;  %v504_v48 = vld [vmem:[%s7676_s25 + $0x2620] sm:$0xff] }
  0x6a   : > { %501 = vst [vmem:[%s7681_s26 + $0x658] sm:$0xff] %v500_v46  ;;  %503 = vst [vmem:[%s7681_s26 + $0x660] sm:$0xff] %v502_v47  ;;  %v506_v49 = vld [vmem:[%s7676_s25 + $0x26b8] sm:$0xff]  ;;  %v508_v50 = vld [vmem:[%s7676_s25 + $0x26c0] sm:$0xff] }
  0x6b   : > { %505 = vst [vmem:[%s7681_s26 + $0x668] sm:$0xff] %v504_v48  ;;  %v510_v51 = vld [vmem:[%s7676_s25 + $0x26c8] sm:$0xff]  ;;  %507 = vst [vmem:[%s7681_s26 + $0x674] sm:$0xff] %v506_v49  ;;  %v512_v52 = vld [vmem:[%s7676_s25 + $0x2760] sm:$0xff] }
  0x6c   : > { %509 = vst [vmem:[%s7681_s26 + $0x67c] sm:$0xff] %v508_v50  ;;  %511 = vst [vmem:[%s7681_s26 + $0x684] sm:$0xff] %v510_v51  ;;  %v514_v53 = vld [vmem:[%s7676_s25 + $0x2768] sm:$0xff]  ;;  %v516_v54 = vld [vmem:[%s7676_s25 + $0x2770] sm:$0xff] }
  0x6d   : > { %513 = vst [vmem:[%s7681_s26 + $0x690] sm:$0xff] %v512_v52  ;;  %515 = vst [vmem:[%s7681_s26 + $0x698] sm:$0xff] %v514_v53  ;;  %v518_v55 = vld [vmem:[%s7676_s25 + $0x2808] sm:$0xff]  ;;  %v520_v56 = vld [vmem:[%s7676_s25 + $0x2810] sm:$0xff] }
  0x6e   : > { %517 = vst [vmem:[%s7681_s26 + $0x6a0] sm:$0xff] %v516_v54  ;;  %v522_v57 = vld [vmem:[%s7676_s25 + $0x2818] sm:$0xff]  ;;  %519 = vst [vmem:[%s7681_s26 + $0x6ac] sm:$0xff] %v518_v55  ;;  %v524_v58 = vld [vmem:[%s7676_s25 + $0x28b0] sm:$0xff] }
  0x6f   : > { %521 = vst [vmem:[%s7681_s26 + $0x6b4] sm:$0xff] %v520_v56  ;;  %523 = vst [vmem:[%s7681_s26 + $0x6bc] sm:$0xff] %v522_v57  ;;  %v526_v59 = vld [vmem:[%s7676_s25 + $0x28b8] sm:$0xff]  ;;  %v528_v60 = vld [vmem:[%s7676_s25 + $0x28c0] sm:$0xff] }
  0x70   : > { %525 = vst [vmem:[%s7681_s26 + $0x6c8] sm:$0xff] %v524_v58  ;;  %527 = vst [vmem:[%s7681_s26 + $0x6d0] sm:$0xff] %v526_v59  ;;  %v530_v61 = vld [vmem:[%s7676_s25 + $0x2958] sm:$0xff]  ;;  %v532_v62 = vld [vmem:[%s7676_s25 + $0x2960] sm:$0xff] }
  0x71   : > { %529 = vst [vmem:[%s7681_s26 + $0x6d8] sm:$0xff] %v528_v60  ;;  %v534_v63 = vld [vmem:[%s7676_s25 + $0x2968] sm:$0xff]  ;;  %531 = vst [vmem:[%s7681_s26 + $0x6e4] sm:$0xff] %v530_v61  ;;  %v536_v0 = vld [vmem:[%s7676_s25 + $0x2a00] sm:$0xff] }
  0x72   : > { %533 = vst [vmem:[%s7681_s26 + $0x6ec] sm:$0xff] %v532_v62  ;;  %535 = vst [vmem:[%s7681_s26 + $0x6f4] sm:$0xff] %v534_v63  ;;  %v538_v1 = vld [vmem:[%s7676_s25 + $0x2a08] sm:$0xff]  ;;  %v540_v2 = vld [vmem:[%s7676_s25 + $0x2a10] sm:$0xff] }
  0x73   : > { %537 = vst [vmem:[%s7681_s26 + $0x700] sm:$0xff] %v536_v0  ;;  %539 = vst [vmem:[%s7681_s26 + $0x708] sm:$0xff] %v538_v1  ;;  %v542_v3 = vld [vmem:[%s7676_s25 + $0x2aa8] sm:$0xff]  ;;  %v544_v4 = vld [vmem:[%s7676_s25 + $0x2ab0] sm:$0xff] }
  0x74   : > { %541 = vst [vmem:[%s7681_s26 + $0x710] sm:$0xff] %v540_v2  ;;  %v546_v5 = vld [vmem:[%s7676_s25 + $0x2ab8] sm:$0xff]  ;;  %543 = vst [vmem:[%s7681_s26 + $0x71c] sm:$0xff] %v542_v3  ;;  %v548_v6 = vld [vmem:[%s7676_s25 + $0x2b50] sm:$0xff] }
  0x75   : > { %545 = vst [vmem:[%s7681_s26 + $0x724] sm:$0xff] %v544_v4  ;;  %547 = vst [vmem:[%s7681_s26 + $0x72c] sm:$0xff] %v546_v5  ;;  %v550_v7 = vld [vmem:[%s7676_s25 + $0x2b58] sm:$0xff]  ;;  %v552_v8 = vld [vmem:[%s7676_s25 + $0x2b60] sm:$0xff] }
  0x76   : > { %549 = vst [vmem:[%s7681_s26 + $0x738] sm:$0xff] %v548_v6  ;;  %551 = vst [vmem:[%s7681_s26 + $0x740] sm:$0xff] %v550_v7  ;;  %v554_v9 = vld [vmem:[%s7676_s25 + $0x2bf8] sm:$0xff]  ;;  %v556_v10 = vld [vmem:[%s7676_s25 + $0x2c00] sm:$0xff] }
  0x77   : > { %553 = vst [vmem:[%s7681_s26 + $0x748] sm:$0xff] %v552_v8  ;;  %v558_v11 = vld [vmem:[%s7676_s25 + $0x2c08] sm:$0xff]  ;;  %555 = vst [vmem:[%s7681_s26 + $0x754] sm:$0xff] %v554_v9  ;;  %v560_v12 = vld [vmem:[%s7676_s25 + $0x2ca0] sm:$0xff] }
  0x78   : > { %557 = vst [vmem:[%s7681_s26 + $0x75c] sm:$0xff] %v556_v10  ;;  %559 = vst [vmem:[%s7681_s26 + $0x764] sm:$0xff] %v558_v11  ;;  %v562_v13 = vld [vmem:[%s7676_s25 + $0x2ca8] sm:$0xff]  ;;  %v564_v14 = vld [vmem:[%s7676_s25 + $0x2cb0] sm:$0xff] }
  0x79   : > { %561 = vst [vmem:[%s7681_s26 + $0x770] sm:$0xff] %v560_v12  ;;  %563 = vst [vmem:[%s7681_s26 + $0x778] sm:$0xff] %v562_v13  ;;  %v566_v15 = vld [vmem:[%s7676_s25 + $0x2d48] sm:$0xff]  ;;  %v568_v16 = vld [vmem:[%s7676_s25 + $0x2d50] sm:$0xff] }
  0x7a   : > { %565 = vst [vmem:[%s7681_s26 + $0x780] sm:$0xff] %v564_v14  ;;  %v570_v17 = vld [vmem:[%s7676_s25 + $0x2d58] sm:$0xff]  ;;  %567 = vst [vmem:[%s7681_s26 + $0x78c] sm:$0xff] %v566_v15  ;;  %v572_v18 = vld [vmem:[%s7676_s25 + $0x2df0] sm:$0xff] }
  0x7b   : > { %569 = vst [vmem:[%s7681_s26 + $0x794] sm:$0xff] %v568_v16  ;;  %571 = vst [vmem:[%s7681_s26 + $0x79c] sm:$0xff] %v570_v17  ;;  %v574_v19 = vld [vmem:[%s7676_s25 + $0x2df8] sm:$0xff]  ;;  %v576_v20 = vld [vmem:[%s7676_s25 + $0x2e00] sm:$0xff] }
  0x7c   : > { %573 = vst [vmem:[%s7681_s26 + $0x7a8] sm:$0xff] %v572_v18  ;;  %575 = vst [vmem:[%s7681_s26 + $0x7b0] sm:$0xff] %v574_v19  ;;  %v578_v21 = vld [vmem:[%s7676_s25 + $0x2e98] sm:$0xff]  ;;  %v580_v22 = vld [vmem:[%s7676_s25 + $0x2ea0] sm:$0xff] }
  0x7d   : > { %577 = vst [vmem:[%s7681_s26 + $0x7b8] sm:$0xff] %v576_v20  ;;  %v582_v23 = vld [vmem:[%s7676_s25 + $0x2ea8] sm:$0xff]  ;;  %579 = vst [vmem:[%s7681_s26 + $0x7c4] sm:$0xff] %v578_v21  ;;  %v584_v24 = vld [vmem:[%s7676_s25 + $0x2f40] sm:$0xff] }
  0x7e   : > { %581 = vst [vmem:[%s7681_s26 + $0x7cc] sm:$0xff] %v580_v22  ;;  %583 = vst [vmem:[%s7681_s26 + $0x7d4] sm:$0xff] %v582_v23  ;;  %v586_v25 = vld [vmem:[%s7676_s25 + $0x2f48] sm:$0xff]  ;;  %v588_v26 = vld [vmem:[%s7676_s25 + $0x2f50] sm:$0xff] }
  0x7f   : > { %585 = vst [vmem:[%s7681_s26 + $0x7e0] sm:$0xff] %v584_v24  ;;  %587 = vst [vmem:[%s7681_s26 + $0x7e8] sm:$0xff] %v586_v25  ;;  %v590_v27 = vld [vmem:[%s7676_s25 + $0x2fe8] sm:$0xff]  ;;  %v592_v28 = vld [vmem:[%s7676_s25 + $0x2ff0] sm:$0xff] }
  0x80   : > { %589 = vst [vmem:[%s7681_s26 + $0x7f0] sm:$0xff] %v588_v26  ;;  %v594_v29 = vld [vmem:[%s7676_s25 + $0x2ff8] sm:$0xff]  ;;  %591 = vst [vmem:[%s7681_s26 + $0x7fc] sm:$0xff] %v590_v27  ;;  %v596_v30 = vld [vmem:[%s7676_s25 + $0x3090] sm:$0xff] }
  0x81   : > { %593 = vst [vmem:[%s7681_s26 + $0x804] sm:$0xff] %v592_v28  ;;  %595 = vst [vmem:[%s7681_s26 + $0x80c] sm:$0xff] %v594_v29  ;;  %v598_v31 = vld [vmem:[%s7676_s25 + $0x3098] sm:$0xff]  ;;  %v600_v32 = vld [vmem:[%s7676_s25 + $0x30a0] sm:$0xff] }
  0x82   : > { %597 = vst [vmem:[%s7681_s26 + $0x818] sm:$0xff] %v596_v30  ;;  %599 = vst [vmem:[%s7681_s26 + $0x820] sm:$0xff] %v598_v31  ;;  %v602_v33 = vld [vmem:[%s7676_s25 + $0x3138] sm:$0xff]  ;;  %v604_v34 = vld [vmem:[%s7676_s25 + $0x3140] sm:$0xff] }
  0x83   : > { %601 = vst [vmem:[%s7681_s26 + $0x828] sm:$0xff] %v600_v32  ;;  %v606_v35 = vld [vmem:[%s7676_s25 + $0x3148] sm:$0xff]  ;;  %603 = vst [vmem:[%s7681_s26 + $0x834] sm:$0xff] %v602_v33  ;;  %v608_v36 = vld [vmem:[%s7676_s25 + $0x31e0] sm:$0xff] }
  0x84   : > { %605 = vst [vmem:[%s7681_s26 + $0x83c] sm:$0xff] %v604_v34  ;;  %607 = vst [vmem:[%s7681_s26 + $0x844] sm:$0xff] %v606_v35  ;;  %v610_v37 = vld [vmem:[%s7676_s25 + $0x31e8] sm:$0xff]  ;;  %v612_v38 = vld [vmem:[%s7676_s25 + $0x31f0] sm:$0xff] }
  0x85   : > { %609 = vst [vmem:[%s7681_s26 + $0x850] sm:$0xff] %v608_v36  ;;  %611 = vst [vmem:[%s7681_s26 + $0x858] sm:$0xff] %v610_v37  ;;  %v614_v39 = vld [vmem:[%s7676_s25 + $0x3288] sm:$0xff]  ;;  %v616_v40 = vld [vmem:[%s7676_s25 + $0x3290] sm:$0xff] }
  0x86   : > { %613 = vst [vmem:[%s7681_s26 + $0x860] sm:$0xff] %v612_v38  ;;  %v618_v41 = vld [vmem:[%s7676_s25 + $0x3298] sm:$0xff]  ;;  %615 = vst [vmem:[%s7681_s26 + $0x86c] sm:$0xff] %v614_v39  ;;  %v620_v42 = vld [vmem:[%s7676_s25 + $0x3330] sm:$0xff] }
  0x87   : > { %617 = vst [vmem:[%s7681_s26 + $0x874] sm:$0xff] %v616_v40  ;;  %619 = vst [vmem:[%s7681_s26 + $0x87c] sm:$0xff] %v618_v41  ;;  %v622_v43 = vld [vmem:[%s7676_s25 + $0x3338] sm:$0xff]  ;;  %v624_v44 = vld [vmem:[%s7676_s25 + $0x3340] sm:$0xff] }
  0x88   : > { %621 = vst [vmem:[%s7681_s26 + $0x888] sm:$0xff] %v620_v42  ;;  %623 = vst [vmem:[%s7681_s26 + $0x890] sm:$0xff] %v622_v43  ;;  %v626_v45 = vld [vmem:[%s7676_s25 + $0x33d8] sm:$0xff]  ;;  %v628_v46 = vld [vmem:[%s7676_s25 + $0x33e0] sm:$0xff] }
  0x89   : > { %625 = vst [vmem:[%s7681_s26 + $0x898] sm:$0xff] %v624_v44  ;;  %v630_v47 = vld [vmem:[%s7676_s25 + $0x33e8] sm:$0xff]  ;;  %627 = vst [vmem:[%s7681_s26 + $0x8a4] sm:$0xff] %v626_v45  ;;  %v632_v48 = vld [vmem:[%s7676_s25 + $0x3480] sm:$0xff] }
  0x8a   : > { %629 = vst [vmem:[%s7681_s26 + $0x8ac] sm:$0xff] %v628_v46  ;;  %631 = vst [vmem:[%s7681_s26 + $0x8b4] sm:$0xff] %v630_v47  ;;  %v634_v49 = vld [vmem:[%s7676_s25 + $0x3488] sm:$0xff]  ;;  %v636_v50 = vld [vmem:[%s7676_s25 + $0x3490] sm:$0xff] }
  0x8b   : > { %633 = vst [vmem:[%s7681_s26 + $0x8c0] sm:$0xff] %v632_v48  ;;  %635 = vst [vmem:[%s7681_s26 + $0x8c8] sm:$0xff] %v634_v49  ;;  %v638_v51 = vld [vmem:[%s7676_s25 + $0x3528] sm:$0xff]  ;;  %v640_v52 = vld [vmem:[%s7676_s25 + $0x3530] sm:$0xff] }
  0x8c   : > { %637 = vst [vmem:[%s7681_s26 + $0x8d0] sm:$0xff] %v636_v50  ;;  %v642_v53 = vld [vmem:[%s7676_s25 + $0x3538] sm:$0xff]  ;;  %639 = vst [vmem:[%s7681_s26 + $0x8dc] sm:$0xff] %v638_v51  ;;  %v644_v54 = vld [vmem:[%s7676_s25 + $0x35d0] sm:$0xff] }
  0x8d   : > { %641 = vst [vmem:[%s7681_s26 + $0x8e4] sm:$0xff] %v640_v52  ;;  %643 = vst [vmem:[%s7681_s26 + $0x8ec] sm:$0xff] %v642_v53  ;;  %v646_v55 = vld [vmem:[%s7676_s25 + $0x35d8] sm:$0xff]  ;;  %v648_v56 = vld [vmem:[%s7676_s25 + $0x35e0] sm:$0xff] }
  0x8e   : > { %645 = vst [vmem:[%s7681_s26 + $0x8f8] sm:$0xff] %v644_v54  ;;  %647 = vst [vmem:[%s7681_s26 + $0x900] sm:$0xff] %v646_v55  ;;  %v650_v57 = vld [vmem:[%s7676_s25 + $0x3678] sm:$0xff]  ;;  %v652_v58 = vld [vmem:[%s7676_s25 + $0x3680] sm:$0xff] }
  0x8f   : > { %649 = vst [vmem:[%s7681_s26 + $0x908] sm:$0xff] %v648_v56  ;;  %v654_v59 = vld [vmem:[%s7676_s25 + $0x3688] sm:$0xff]  ;;  %651 = vst [vmem:[%s7681_s26 + $0x914] sm:$0xff] %v650_v57  ;;  %v656_v60 = vld [vmem:[%s7676_s25 + $0x3720] sm:$0xff] }
  0x90   : > { %653 = vst [vmem:[%s7681_s26 + $0x91c] sm:$0xff] %v652_v58  ;;  %655 = vst [vmem:[%s7681_s26 + $0x924] sm:$0xff] %v654_v59  ;;  %v658_v61 = vld [vmem:[%s7676_s25 + $0x3728] sm:$0xff]  ;;  %v660_v62 = vld [vmem:[%s7676_s25 + $0x3730] sm:$0xff] }
  0x91   : > { %657 = vst [vmem:[%s7681_s26 + $0x930] sm:$0xff] %v656_v60  ;;  %659 = vst [vmem:[%s7681_s26 + $0x938] sm:$0xff] %v658_v61  ;;  %v662_v63 = vld [vmem:[%s7676_s25 + $0x37c8] sm:$0xff]  ;;  %v664_v0 = vld [vmem:[%s7676_s25 + $0x37d0] sm:$0xff] }
  0x92   : > { %661 = vst [vmem:[%s7681_s26 + $0x940] sm:$0xff] %v660_v62  ;;  %v666_v1 = vld [vmem:[%s7676_s25 + $0x37d8] sm:$0xff]  ;;  %663 = vst [vmem:[%s7681_s26 + $0x94c] sm:$0xff] %v662_v63  ;;  %v668_v2 = vld [vmem:[%s7676_s25 + $0x3870] sm:$0xff] }
  0x93   : > { %665 = vst [vmem:[%s7681_s26 + $0x954] sm:$0xff] %v664_v0  ;;  %667 = vst [vmem:[%s7681_s26 + $0x95c] sm:$0xff] %v666_v1  ;;  %v670_v3 = vld [vmem:[%s7676_s25 + $0x3878] sm:$0xff]  ;;  %v672_v4 = vld [vmem:[%s7676_s25 + $0x3880] sm:$0xff] }
  0x94   : > { %669 = vst [vmem:[%s7681_s26 + $0x968] sm:$0xff] %v668_v2  ;;  %671 = vst [vmem:[%s7681_s26 + $0x970] sm:$0xff] %v670_v3  ;;  %v674_v5 = vld [vmem:[%s7676_s25 + $0x3918] sm:$0xff]  ;;  %v676_v6 = vld [vmem:[%s7676_s25 + $0x3920] sm:$0xff] }
  0x95   : > { %673 = vst [vmem:[%s7681_s26 + $0x978] sm:$0xff] %v672_v4  ;;  %v678_v7 = vld [vmem:[%s7676_s25 + $0x3928] sm:$0xff]  ;;  %675 = vst [vmem:[%s7681_s26 + $0x984] sm:$0xff] %v674_v5  ;;  %v680_v8 = vld [vmem:[%s7676_s25 + $0x39c0] sm:$0xff] }
  0x96   : > { %677 = vst [vmem:[%s7681_s26 + $0x98c] sm:$0xff] %v676_v6  ;;  %679 = vst [vmem:[%s7681_s26 + $0x994] sm:$0xff] %v678_v7  ;;  %v682_v9 = vld [vmem:[%s7676_s25 + $0x39c8] sm:$0xff]  ;;  %v684_v10 = vld [vmem:[%s7676_s25 + $0x39d0] sm:$0xff] }
  0x97   : > { %681 = vst [vmem:[%s7681_s26 + $0x9a0] sm:$0xff] %v680_v8  ;;  %683 = vst [vmem:[%s7681_s26 + $0x9a8] sm:$0xff] %v682_v9  ;;  %v686_v11 = vld [vmem:[%s7676_s25 + $0x3a68] sm:$0xff]  ;;  %v688_v12 = vld [vmem:[%s7676_s25 + $0x3a70] sm:$0xff] }
  0x98   : > { %685 = vst [vmem:[%s7681_s26 + $0x9b0] sm:$0xff] %v684_v10  ;;  %v690_v13 = vld [vmem:[%s7676_s25 + $0x3a78] sm:$0xff]  ;;  %687 = vst [vmem:[%s7681_s26 + $0x9bc] sm:$0xff] %v686_v11  ;;  %v692_v14 = vld [vmem:[%s7676_s25 + $0x3b10] sm:$0xff] }
  0x99   : > { %689 = vst [vmem:[%s7681_s26 + $0x9c4] sm:$0xff] %v688_v12  ;;  %691 = vst [vmem:[%s7681_s26 + $0x9cc] sm:$0xff] %v690_v13  ;;  %v694_v15 = vld [vmem:[%s7676_s25 + $0x3b18] sm:$0xff]  ;;  %v696_v16 = vld [vmem:[%s7676_s25 + $0x3b20] sm:$0xff] }
  0x9a   : > { %693 = vst [vmem:[%s7681_s26 + $0x9d8] sm:$0xff] %v692_v14  ;;  %695 = vst [vmem:[%s7681_s26 + $0x9e0] sm:$0xff] %v694_v15  ;;  %v698_v17 = vld [vmem:[%s7676_s25 + $0x3bb8] sm:$0xff]  ;;  %v700_v18 = vld [vmem:[%s7676_s25 + $0x3bc0] sm:$0xff] }
  0x9b   : > { %697 = vst [vmem:[%s7681_s26 + $0x9e8] sm:$0xff] %v696_v16  ;;  %v702_v19 = vld [vmem:[%s7676_s25 + $0x3bc8] sm:$0xff]  ;;  %699 = vst [vmem:[%s7681_s26 + $0x9f4] sm:$0xff] %v698_v17  ;;  %v704_v20 = vld [vmem:[%s7676_s25 + $0x3c60] sm:$0xff] }
  0x9c   : > { %701 = vst [vmem:[%s7681_s26 + $0x9fc] sm:$0xff] %v700_v18  ;;  %703 = vst [vmem:[%s7681_s26 + $0xa04] sm:$0xff] %v702_v19  ;;  %v706_v21 = vld [vmem:[%s7676_s25 + $0x3c68] sm:$0xff]  ;;  %v708_v22 = vld [vmem:[%s7676_s25 + $0x3c70] sm:$0xff] }
  0x9d   : > { %705 = vst [vmem:[%s7681_s26 + $0xa10] sm:$0xff] %v704_v20  ;;  %707 = vst [vmem:[%s7681_s26 + $0xa18] sm:$0xff] %v706_v21  ;;  %v710_v23 = vld [vmem:[%s7676_s25 + $0x3d08] sm:$0xff]  ;;  %v712_v24 = vld [vmem:[%s7676_s25 + $0x3d10] sm:$0xff] }
  0x9e   : > { %709 = vst [vmem:[%s7681_s26 + $0xa20] sm:$0xff] %v708_v22  ;;  %v714_v25 = vld [vmem:[%s7676_s25 + $0x3d18] sm:$0xff]  ;;  %711 = vst [vmem:[%s7681_s26 + $0xa2c] sm:$0xff] %v710_v23  ;;  %v716_v26 = vld [vmem:[%s7676_s25 + $0x3db0] sm:$0xff] }
  0x9f   : > { %713 = vst [vmem:[%s7681_s26 + $0xa34] sm:$0xff] %v712_v24  ;;  %715 = vst [vmem:[%s7681_s26 + $0xa3c] sm:$0xff] %v714_v25  ;;  %v718_v27 = vld [vmem:[%s7676_s25 + $0x3db8] sm:$0xff]  ;;  %v720_v28 = vld [vmem:[%s7676_s25 + $0x3dc0] sm:$0xff] }
  0xa0   : > { %717 = vst [vmem:[%s7681_s26 + $0xa48] sm:$0xff] %v716_v26  ;;  %719 = vst [vmem:[%s7681_s26 + $0xa50] sm:$0xff] %v718_v27  ;;  %v722_v29 = vld [vmem:[%s7676_s25 + $0x3e58] sm:$0xff]  ;;  %v724_v30 = vld [vmem:[%s7676_s25 + $0x3e60] sm:$0xff] }
  0xa1   : > { %721 = vst [vmem:[%s7681_s26 + $0xa58] sm:$0xff] %v720_v28  ;;  %v726_v31 = vld [vmem:[%s7676_s25 + $0x3e68] sm:$0xff]  ;;  %723 = vst [vmem:[%s7681_s26 + $0xa64] sm:$0xff] %v722_v29  ;;  %v728_v32 = vld [vmem:[%s7676_s25 + $0x3f00] sm:$0xff] }
  0xa2   : > { %725 = vst [vmem:[%s7681_s26 + $0xa6c] sm:$0xff] %v724_v30  ;;  %727 = vst [vmem:[%s7681_s26 + $0xa74] sm:$0xff] %v726_v31  ;;  %v730_v33 = vld [vmem:[%s7676_s25 + $0x3f08] sm:$0xff]  ;;  %v732_v34 = vld [vmem:[%s7676_s25 + $0x3f10] sm:$0xff] }
  0xa3   : > { %729 = vst [vmem:[%s7681_s26 + $0xa80] sm:$0xff] %v728_v32  ;;  %731 = vst [vmem:[%s7681_s26 + $0xa88] sm:$0xff] %v730_v33  ;;  %v734_v35 = vld [vmem:[%s7676_s25 + $0x3fa8] sm:$0xff]  ;;  %v736_v36 = vld [vmem:[%s7676_s25 + $0x3fb0] sm:$0xff] }
  0xa4   : > { %733 = vst [vmem:[%s7681_s26 + $0xa90] sm:$0xff] %v732_v34  ;;  %v738_v37 = vld [vmem:[%s7676_s25 + $0x3fb8] sm:$0xff]  ;;  %735 = vst [vmem:[%s7681_s26 + $0xa9c] sm:$0xff] %v734_v35  ;;  %v740_v38 = vld [vmem:[%s7676_s25 + $0x4050] sm:$0xff] }
  0xa5   : > { %737 = vst [vmem:[%s7681_s26 + $0xaa4] sm:$0xff] %v736_v36  ;;  %739 = vst [vmem:[%s7681_s26 + $0xaac] sm:$0xff] %v738_v37  ;;  %v742_v39 = vld [vmem:[%s7676_s25 + $0x4058] sm:$0xff]  ;;  %v744_v40 = vld [vmem:[%s7676_s25 + $0x4060] sm:$0xff] }
  0xa6   : > { %741 = vst [vmem:[%s7681_s26 + $0xab8] sm:$0xff] %v740_v38  ;;  %743 = vst [vmem:[%s7681_s26 + $0xac0] sm:$0xff] %v742_v39  ;;  %v746_v41 = vld [vmem:[%s7676_s25 + $0x40f8] sm:$0xff]  ;;  %v748_v42 = vld [vmem:[%s7676_s25 + $0x4100] sm:$0xff] }
  0xa7   : > { %745 = vst [vmem:[%s7681_s26 + $0xac8] sm:$0xff] %v744_v40  ;;  %v750_v43 = vld [vmem:[%s7676_s25 + $0x4108] sm:$0xff]  ;;  %747 = vst [vmem:[%s7681_s26 + $0xad4] sm:$0xff] %v746_v41  ;;  %v752_v44 = vld [vmem:[%s7676_s25 + $0x41a0] sm:$0xff] }
  0xa8   : > { %749 = vst [vmem:[%s7681_s26 + $0xadc] sm:$0xff] %v748_v42  ;;  %751 = vst [vmem:[%s7681_s26 + $0xae4] sm:$0xff] %v750_v43  ;;  %v754_v45 = vld [vmem:[%s7676_s25 + $0x41a8] sm:$0xff]  ;;  %v756_v46 = vld [vmem:[%s7676_s25 + $0x41b0] sm:$0xff] }
  0xa9   : > { %753 = vst [vmem:[%s7681_s26 + $0xaf0] sm:$0xff] %v752_v44  ;;  %755 = vst [vmem:[%s7681_s26 + $0xaf8] sm:$0xff] %v754_v45  ;;  %v758_v47 = vld [vmem:[%s7676_s25 + $0x4248] sm:$0xff]  ;;  %v760_v48 = vld [vmem:[%s7676_s25 + $0x4250] sm:$0xff] }
  0xaa   : > { %757 = vst [vmem:[%s7681_s26 + $0xb00] sm:$0xff] %v756_v46  ;;  %v762_v49 = vld [vmem:[%s7676_s25 + $0x4258] sm:$0xff]  ;;  %759 = vst [vmem:[%s7681_s26 + $0xb0c] sm:$0xff] %v758_v47  ;;  %v764_v50 = vld [vmem:[%s7676_s25 + $0x42f0] sm:$0xff] }
  0xab   : > { %761 = vst [vmem:[%s7681_s26 + $0xb14] sm:$0xff] %v760_v48  ;;  %763 = vst [vmem:[%s7681_s26 + $0xb1c] sm:$0xff] %v762_v49  ;;  %v766_v51 = vld [vmem:[%s7676_s25 + $0x42f8] sm:$0xff]  ;;  %v768_v52 = vld [vmem:[%s7676_s25 + $0x4300] sm:$0xff] }
  0xac   : > { %765 = vst [vmem:[%s7681_s26 + $0xb28] sm:$0xff] %v764_v50  ;;  %767 = vst [vmem:[%s7681_s26 + $0xb30] sm:$0xff] %v766_v51  ;;  %v770_v53 = vld [vmem:[%s7676_s25 + $0x4398] sm:$0xff]  ;;  %v772_v54 = vld [vmem:[%s7676_s25 + $0x43a0] sm:$0xff] }
  0xad   : > { %769 = vst [vmem:[%s7681_s26 + $0xb38] sm:$0xff] %v768_v52  ;;  %v774_v55 = vld [vmem:[%s7676_s25 + $0x43a8] sm:$0xff]  ;;  %771 = vst [vmem:[%s7681_s26 + $0xb44] sm:$0xff] %v770_v53  ;;  %v776_v56 = vld [vmem:[%s7676_s25 + $0x4440] sm:$0xff] }
  0xae   : > { %773 = vst [vmem:[%s7681_s26 + $0xb4c] sm:$0xff] %v772_v54  ;;  %775 = vst [vmem:[%s7681_s26 + $0xb54] sm:$0xff] %v774_v55  ;;  %v778_v57 = vld [vmem:[%s7676_s25 + $0x4448] sm:$0xff]  ;;  %v780_v58 = vld [vmem:[%s7676_s25 + $0x4450] sm:$0xff] }
  0xaf   : > { %777 = vst [vmem:[%s7681_s26 + $0xb60] sm:$0xff] %v776_v56  ;;  %779 = vst [vmem:[%s7681_s26 + $0xb68] sm:$0xff] %v778_v57  ;;  %v782_v59 = vld [vmem:[%s7676_s25 + $0x44e8] sm:$0xff]  ;;  %v784_v60 = vld [vmem:[%s7676_s25 + $0x44f0] sm:$0xff] }
  0xb0   : > { %781 = vst [vmem:[%s7681_s26 + $0xb70] sm:$0xff] %v780_v58  ;;  %v786_v61 = vld [vmem:[%s7676_s25 + $0x44f8] sm:$0xff]  ;;  %783 = vst [vmem:[%s7681_s26 + $0xb7c] sm:$0xff] %v782_v59  ;;  %v788_v62 = vld [vmem:[%s7676_s25 + $0x4590] sm:$0xff] }
  0xb1   : > { %785 = vst [vmem:[%s7681_s26 + $0xb84] sm:$0xff] %v784_v60  ;;  %787 = vst [vmem:[%s7681_s26 + $0xb8c] sm:$0xff] %v786_v61  ;;  %v790_v63 = vld [vmem:[%s7676_s25 + $0x4598] sm:$0xff]  ;;  %v792_v0 = vld [vmem:[%s7676_s25 + $0x45a0] sm:$0xff] }
  0xb2   : > { %789 = vst [vmem:[%s7681_s26 + $0xb98] sm:$0xff] %v788_v62  ;;  %791 = vst [vmem:[%s7681_s26 + $0xba0] sm:$0xff] %v790_v63  ;;  %v794_v1 = vld [vmem:[%s7676_s25 + $0x4638] sm:$0xff]  ;;  %v796_v2 = vld [vmem:[%s7676_s25 + $0x4640] sm:$0xff] }
  0xb3   : > { %793 = vst [vmem:[%s7681_s26 + $0xba8] sm:$0xff] %v792_v0  ;;  %v798_v3 = vld [vmem:[%s7676_s25 + $0x4648] sm:$0xff]  ;;  %795 = vst [vmem:[%s7681_s26 + $0xbb4] sm:$0xff] %v794_v1  ;;  %v800_v4 = vld [vmem:[%s7676_s25 + $0x46e0] sm:$0xff] }
  0xb4   : > { %797 = vst [vmem:[%s7681_s26 + $0xbbc] sm:$0xff] %v796_v2  ;;  %799 = vst [vmem:[%s7681_s26 + $0xbc4] sm:$0xff] %v798_v3  ;;  %v802_v5 = vld [vmem:[%s7676_s25 + $0x46e8] sm:$0xff]  ;;  %v804_v6 = vld [vmem:[%s7676_s25 + $0x46f0] sm:$0xff] }
  0xb5   : > { %801 = vst [vmem:[%s7681_s26 + $0xbd0] sm:$0xff] %v800_v4  ;;  %803 = vst [vmem:[%s7681_s26 + $0xbd8] sm:$0xff] %v802_v5  ;;  %v806_v7 = vld [vmem:[%s7676_s25 + $0x4788] sm:$0xff]  ;;  %v808_v8 = vld [vmem:[%s7676_s25 + $0x4790] sm:$0xff] }
  0xb6   : > { %805 = vst [vmem:[%s7681_s26 + $0xbe0] sm:$0xff] %v804_v6  ;;  %v810_v9 = vld [vmem:[%s7676_s25 + $0x4798] sm:$0xff]  ;;  %807 = vst [vmem:[%s7681_s26 + $0xbec] sm:$0xff] %v806_v7  ;;  %v812_v10 = vld [vmem:[%s7676_s25 + $0x4830] sm:$0xff] }
  0xb7   : > { %809 = vst [vmem:[%s7681_s26 + $0xbf4] sm:$0xff] %v808_v8  ;;  %811 = vst [vmem:[%s7681_s26 + $0xbfc] sm:$0xff] %v810_v9  ;;  %v814_v11 = vld [vmem:[%s7676_s25 + $0x4838] sm:$0xff]  ;;  %v816_v12 = vld [vmem:[%s7676_s25 + $0x4840] sm:$0xff] }
  0xb8   : > { %813 = vst [vmem:[%s7681_s26 + $0xc08] sm:$0xff] %v812_v10  ;;  %815 = vst [vmem:[%s7681_s26 + $0xc10] sm:$0xff] %v814_v11  ;;  %v818_v13 = vld [vmem:[%s7676_s25 + $0x48d8] sm:$0xff]  ;;  %v820_v14 = vld [vmem:[%s7676_s25 + $0x48e0] sm:$0xff] }
  0xb9   : > { %817 = vst [vmem:[%s7681_s26 + $0xc18] sm:$0xff] %v816_v12  ;;  %v822_v15 = vld [vmem:[%s7676_s25 + $0x48e8] sm:$0xff]  ;;  %819 = vst [vmem:[%s7681_s26 + $0xc24] sm:$0xff] %v818_v13  ;;  %v824_v16 = vld [vmem:[%s7676_s25 + $0x4980] sm:$0xff] }
  0xba   : > { %821 = vst [vmem:[%s7681_s26 + $0xc2c] sm:$0xff] %v820_v14  ;;  %823 = vst [vmem:[%s7681_s26 + $0xc34] sm:$0xff] %v822_v15  ;;  %v826_v17 = vld [vmem:[%s7676_s25 + $0x4988] sm:$0xff]  ;;  %v828_v18 = vld [vmem:[%s7676_s25 + $0x4990] sm:$0xff] }
  0xbb   : > { %825 = vst [vmem:[%s7681_s26 + $0xc40] sm:$0xff] %v824_v16  ;;  %827 = vst [vmem:[%s7681_s26 + $0xc48] sm:$0xff] %v826_v17  ;;  %v830_v19 = vld [vmem:[%s7676_s25 + $0x4a28] sm:$0xff]  ;;  %v832_v20 = vld [vmem:[%s7676_s25 + $0x4a30] sm:$0xff] }
  0xbc   : > { %829 = vst [vmem:[%s7681_s26 + $0xc50] sm:$0xff] %v828_v18  ;;  %v834_v21 = vld [vmem:[%s7676_s25 + $0x4a38] sm:$0xff]  ;;  %831 = vst [vmem:[%s7681_s26 + $0xc5c] sm:$0xff] %v830_v19  ;;  %v836_v22 = vld [vmem:[%s7676_s25 + $0x4ad0] sm:$0xff] }
  0xbd   : > { %833 = vst [vmem:[%s7681_s26 + $0xc64] sm:$0xff] %v832_v20  ;;  %835 = vst [vmem:[%s7681_s26 + $0xc6c] sm:$0xff] %v834_v21  ;;  %v838_v23 = vld [vmem:[%s7676_s25 + $0x4ad8] sm:$0xff]  ;;  %v840_v24 = vld [vmem:[%s7676_s25 + $0x4ae0] sm:$0xff] }
  0xbe   : > { %837 = vst [vmem:[%s7681_s26 + $0xc78] sm:$0xff] %v836_v22  ;;  %839 = vst [vmem:[%s7681_s26 + $0xc80] sm:$0xff] %v838_v23  ;;  %v842_v25 = vld [vmem:[%s7676_s25 + $0x4b78] sm:$0xff]  ;;  %v844_v26 = vld [vmem:[%s7676_s25 + $0x4b80] sm:$0xff] }
  0xbf   : > { %841 = vst [vmem:[%s7681_s26 + $0xc88] sm:$0xff] %v840_v24  ;;  %v846_v27 = vld [vmem:[%s7676_s25 + $0x4b88] sm:$0xff]  ;;  %843 = vst [vmem:[%s7681_s26 + $0xc94] sm:$0xff] %v842_v25  ;;  %v848_v28 = vld [vmem:[%s7676_s25 + $0x4c20] sm:$0xff] }
  0xc0   : > { %845 = vst [vmem:[%s7681_s26 + $0xc9c] sm:$0xff] %v844_v26  ;;  %847 = vst [vmem:[%s7681_s26 + $0xca4] sm:$0xff] %v846_v27  ;;  %v850_v29 = vld [vmem:[%s7676_s25 + $0x4c28] sm:$0xff]  ;;  %v852_v30 = vld [vmem:[%s7676_s25 + $0x4c30] sm:$0xff] }
  0xc1   : > { %849 = vst [vmem:[%s7681_s26 + $0xcb0] sm:$0xff] %v848_v28  ;;  %851 = vst [vmem:[%s7681_s26 + $0xcb8] sm:$0xff] %v850_v29  ;;  %v854_v31 = vld [vmem:[%s7676_s25 + $0x4cc8] sm:$0xff]  ;;  %v856_v32 = vld [vmem:[%s7676_s25 + $0x4cd0] sm:$0xff] }
  0xc2   : > { %853 = vst [vmem:[%s7681_s26 + $0xcc0] sm:$0xff] %v852_v30  ;;  %v858_v33 = vld [vmem:[%s7676_s25 + $0x4cd8] sm:$0xff]  ;;  %855 = vst [vmem:[%s7681_s26 + $0xccc] sm:$0xff] %v854_v31  ;;  %v860_v34 = vld [vmem:[%s7676_s25 + $0x4d70] sm:$0xff] }
  0xc3   : > { %857 = vst [vmem:[%s7681_s26 + $0xcd4] sm:$0xff] %v856_v32  ;;  %859 = vst [vmem:[%s7681_s26 + $0xcdc] sm:$0xff] %v858_v33  ;;  %v862_v35 = vld [vmem:[%s7676_s25 + $0x4d78] sm:$0xff]  ;;  %v864_v36 = vld [vmem:[%s7676_s25 + $0x4d80] sm:$0xff] }
  0xc4   : > { %861 = vst [vmem:[%s7681_s26 + $0xce8] sm:$0xff] %v860_v34  ;;  %863 = vst [vmem:[%s7681_s26 + $0xcf0] sm:$0xff] %v862_v35  ;;  %v866_v37 = vld [vmem:[%s7676_s25 + $0x4e18] sm:$0xff]  ;;  %v868_v38 = vld [vmem:[%s7676_s25 + $0x4e20] sm:$0xff] }
  0xc5   : > { %865 = vst [vmem:[%s7681_s26 + $0xcf8] sm:$0xff] %v864_v36  ;;  %v870_v39 = vld [vmem:[%s7676_s25 + $0x4e28] sm:$0xff]  ;;  %867 = vst [vmem:[%s7681_s26 + $0xd04] sm:$0xff] %v866_v37  ;;  %v872_v40 = vld [vmem:[%s7676_s25 + $0x4ec0] sm:$0xff] }
  0xc6   : > { %869 = vst [vmem:[%s7681_s26 + $0xd0c] sm:$0xff] %v868_v38  ;;  %871 = vst [vmem:[%s7681_s26 + $0xd14] sm:$0xff] %v870_v39  ;;  %v874_v41 = vld [vmem:[%s7676_s25 + $0x4ec8] sm:$0xff]  ;;  %v876_v42 = vld [vmem:[%s7676_s25 + $0x4ed0] sm:$0xff] }
  0xc7   : > { %873 = vst [vmem:[%s7681_s26 + $0xd20] sm:$0xff] %v872_v40  ;;  %875 = vst [vmem:[%s7681_s26 + $0xd28] sm:$0xff] %v874_v41  ;;  %v878_v43 = vld [vmem:[%s7676_s25 + $0x4f68] sm:$0xff]  ;;  %v880_v44 = vld [vmem:[%s7676_s25 + $0x4f70] sm:$0xff] }
  0xc8   : > { %877 = vst [vmem:[%s7681_s26 + $0xd30] sm:$0xff] %v876_v42  ;;  %v882_v45 = vld [vmem:[%s7676_s25 + $0x4f78] sm:$0xff]  ;;  %879 = vst [vmem:[%s7681_s26 + $0xd3c] sm:$0xff] %v878_v43  ;;  %v884_v46 = vld [vmem:[%s7676_s25 + $0x5010] sm:$0xff] }
  0xc9   : > { %881 = vst [vmem:[%s7681_s26 + $0xd44] sm:$0xff] %v880_v44  ;;  %883 = vst [vmem:[%s7681_s26 + $0xd4c] sm:$0xff] %v882_v45  ;;  %v886_v47 = vld [vmem:[%s7676_s25 + $0x5018] sm:$0xff]  ;;  %v888_v48 = vld [vmem:[%s7676_s25 + $0x5020] sm:$0xff] }
  0xca   : > { %885 = vst [vmem:[%s7681_s26 + $0xd58] sm:$0xff] %v884_v46  ;;  %887 = vst [vmem:[%s7681_s26 + $0xd60] sm:$0xff] %v886_v47  ;;  %v890_v49 = vld [vmem:[%s7676_s25 + $0x50b8] sm:$0xff]  ;;  %v892_v50 = vld [vmem:[%s7676_s25 + $0x50c0] sm:$0xff] }
  0xcb   : > { %889 = vst [vmem:[%s7681_s26 + $0xd68] sm:$0xff] %v888_v48  ;;  %v894_v51 = vld [vmem:[%s7676_s25 + $0x50c8] sm:$0xff]  ;;  %891 = vst [vmem:[%s7681_s26 + $0xd74] sm:$0xff] %v890_v49  ;;  %v896_v52 = vld [vmem:[%s7676_s25 + $0x5160] sm:$0xff] }
  0xcc   : > { %893 = vst [vmem:[%s7681_s26 + $0xd7c] sm:$0xff] %v892_v50  ;;  %895 = vst [vmem:[%s7681_s26 + $0xd84] sm:$0xff] %v894_v51  ;;  %v898_v53 = vld [vmem:[%s7676_s25 + $0x5168] sm:$0xff]  ;;  %v900_v54 = vld [vmem:[%s7676_s25 + $0x5170] sm:$0xff] }
  0xcd   : > { %897 = vst [vmem:[%s7681_s26 + $0xd90] sm:$0xff] %v896_v52  ;;  %899 = vst [vmem:[%s7681_s26 + $0xd98] sm:$0xff] %v898_v53  ;;  %v902_v55 = vld [vmem:[%s7676_s25 + $0x5208] sm:$0xff]  ;;  %v904_v56 = vld [vmem:[%s7676_s25 + $0x5210] sm:$0xff] }
  0xce   : > { %901 = vst [vmem:[%s7681_s26 + $0xda0] sm:$0xff] %v900_v54  ;;  %v906_v57 = vld [vmem:[%s7676_s25 + $0x5218] sm:$0xff]  ;;  %903 = vst [vmem:[%s7681_s26 + $0xdac] sm:$0xff] %v902_v55  ;;  %v908_v58 = vld [vmem:[%s7676_s25 + $0x52b0] sm:$0xff] }
  0xcf   : > { %905 = vst [vmem:[%s7681_s26 + $0xdb4] sm:$0xff] %v904_v56  ;;  %907 = vst [vmem:[%s7681_s26 + $0xdbc] sm:$0xff] %v906_v57  ;;  %v910_v59 = vld [vmem:[%s7676_s25 + $0x52b8] sm:$0xff]  ;;  %v912_v60 = vld [vmem:[%s7676_s25 + $0x52c0] sm:$0xff] }
  0xd0   : > { %909 = vst [vmem:[%s7681_s26 + $0xdc8] sm:$0xff] %v908_v58  ;;  %911 = vst [vmem:[%s7681_s26 + $0xdd0] sm:$0xff] %v910_v59  ;;  %v914_v61 = vld [vmem:[%s7676_s25 + $0x5358] sm:$0xff]  ;;  %v916_v62 = vld [vmem:[%s7676_s25 + $0x5360] sm:$0xff] }
  0xd1   : > { %913 = vst [vmem:[%s7681_s26 + $0xdd8] sm:$0xff] %v912_v60  ;;  %v918_v63 = vld [vmem:[%s7676_s25 + $0x5368] sm:$0xff]  ;;  %915 = vst [vmem:[%s7681_s26 + $0xde4] sm:$0xff] %v914_v61  ;;  %v5526_v0 = vld [vmem:[%s7676_s25 + $0x18] sm:$0xf] }
  0xd2   : > { %917 = vst [vmem:[%s7681_s26 + $0xdec] sm:$0xff] %v916_v62  ;;  %919 = vst [vmem:[%s7681_s26 + $0xdf4] sm:$0xff] %v918_v63  ;;  %v5528_v1 = vld [vmem:[%s7676_s25 + $0xc0] sm:$0xf]  ;;  %v5530_v2 = vld [vmem:[%s7676_s25 + $0x168] sm:$0xf] }
  0xd3   : > { %5527 = vst [vmem:[%s7681_s26 + $0x18] sm:$0xf] %v5526_v0  ;;  %5529 = vst [vmem:[%s7681_s26 + $0x34] sm:$0xf] %v5528_v1  ;;  %v5532_v3 = vld [vmem:[%s7676_s25 + $0x210] sm:$0xf] }
  0xd4   : > { %5531 = vst [vmem:[%s7681_s26 + $0x50] sm:$0xf] %v5530_v2  ;;  %v5534_v4 = vld [vmem:[%s7676_s25 + $0x2b8] sm:$0xf]  ;;  %v5536_v5 = vld [vmem:[%s7676_s25 + $0x360] sm:$0xf] }
  0xd5   : > { %5533 = vst [vmem:[%s7681_s26 + $0x6c] sm:$0xf] %v5532_v3  ;;  %5535 = vst [vmem:[%s7681_s26 + $0x88] sm:$0xf] %v5534_v4  ;;  %v5538_v6 = vld [vmem:[%s7676_s25 + $0x408] sm:$0xf] }
  0xd6   : > { %5537 = vst [vmem:[%s7681_s26 + $0xa4] sm:$0xf] %v5536_v5  ;;  %v5540_v7 = vld [vmem:[%s7676_s25 + $0x4b0] sm:$0xf]  ;;  %v5542_v8 = vld [vmem:[%s7676_s25 + $0x558] sm:$0xf] }
  0xd7   : > { %5539 = vst [vmem:[%s7681_s26 + $0xc0] sm:$0xf] %v5538_v6  ;;  %5541 = vst [vmem:[%s7681_s26 + $0xdc] sm:$0xf] %v5540_v7  ;;  %v5544_v9 = vld [vmem:[%s7676_s25 + $0x600] sm:$0xf] }
  0xd8   : > { %5543 = vst [vmem:[%s7681_s26 + $0xf8] sm:$0xf] %v5542_v8  ;;  %v5546_v10 = vld [vmem:[%s7676_s25 + $0x6a8] sm:$0xf]  ;;  %v5548_v11 = vld [vmem:[%s7676_s25 + $0x750] sm:$0xf] }
  0xd9   : > { %5545 = vst [vmem:[%s7681_s26 + $0x114] sm:$0xf] %v5544_v9  ;;  %5547 = vst [vmem:[%s7681_s26 + $0x130] sm:$0xf] %v5546_v10  ;;  %v5550_v12 = vld [vmem:[%s7676_s25 + $0x7f8] sm:$0xf] }
  0xda   : > { %5549 = vst [vmem:[%s7681_s26 + $0x14c] sm:$0xf] %v5548_v11  ;;  %v5552_v13 = vld [vmem:[%s7676_s25 + $0x8a0] sm:$0xf]  ;;  %v5554_v14 = vld [vmem:[%s7676_s25 + $0x948] sm:$0xf] }
  0xdb   : > { %5551 = vst [vmem:[%s7681_s26 + $0x168] sm:$0xf] %v5550_v12  ;;  %5553 = vst [vmem:[%s7681_s26 + $0x184] sm:$0xf] %v5552_v13  ;;  %v5556_v15 = vld [vmem:[%s7676_s25 + $0x9f0] sm:$0xf] }
  0xdc   : > { %5555 = vst [vmem:[%s7681_s26 + $0x1a0] sm:$0xf] %v5554_v14  ;;  %v5558_v16 = vld [vmem:[%s7676_s25 + $0xa98] sm:$0xf]  ;;  %v5560_v17 = vld [vmem:[%s7676_s25 + $0xb40] sm:$0xf] }
  0xdd   : > { %5557 = vst [vmem:[%s7681_s26 + $0x1bc] sm:$0xf] %v5556_v15  ;;  %5559 = vst [vmem:[%s7681_s26 + $0x1d8] sm:$0xf] %v5558_v16  ;;  %v5562_v18 = vld [vmem:[%s7676_s25 + $0xbe8] sm:$0xf] }
  0xde   : > { %5561 = vst [vmem:[%s7681_s26 + $0x1f4] sm:$0xf] %v5560_v17  ;;  %v5564_v19 = vld [vmem:[%s7676_s25 + $0xc90] sm:$0xf]  ;;  %v5566_v20 = vld [vmem:[%s7676_s25 + $0xd38] sm:$0xf] }
  0xdf   : > { %5563 = vst [vmem:[%s7681_s26 + $0x210] sm:$0xf] %v5562_v18  ;;  %5565 = vst [vmem:[%s7681_s26 + $0x22c] sm:$0xf] %v5564_v19  ;;  %v5568_v21 = vld [vmem:[%s7676_s25 + $0xde0] sm:$0xf] }
  0xe0   : > { %5567 = vst [vmem:[%s7681_s26 + $0x248] sm:$0xf] %v5566_v20  ;;  %v5570_v22 = vld [vmem:[%s7676_s25 + $0xe88] sm:$0xf]  ;;  %v5572_v23 = vld [vmem:[%s7676_s25 + $0xf30] sm:$0xf] }
  0xe1   : > { %5569 = vst [vmem:[%s7681_s26 + $0x264] sm:$0xf] %v5568_v21  ;;  %5571 = vst [vmem:[%s7681_s26 + $0x280] sm:$0xf] %v5570_v22  ;;  %v5574_v24 = vld [vmem:[%s7676_s25 + $0xfd8] sm:$0xf] }
  0xe2   : > { %5573 = vst [vmem:[%s7681_s26 + $0x29c] sm:$0xf] %v5572_v23  ;;  %v5576_v25 = vld [vmem:[%s7676_s25 + $0x1080] sm:$0xf]  ;;  %v5578_v26 = vld [vmem:[%s7676_s25 + $0x1128] sm:$0xf] }
  0xe3   : > { %5575 = vst [vmem:[%s7681_s26 + $0x2b8] sm:$0xf] %v5574_v24  ;;  %5577 = vst [vmem:[%s7681_s26 + $0x2d4] sm:$0xf] %v5576_v25  ;;  %v5580_v27 = vld [vmem:[%s7676_s25 + $0x11d0] sm:$0xf] }
  0xe4   : > { %5579 = vst [vmem:[%s7681_s26 + $0x2f0] sm:$0xf] %v5578_v26  ;;  %v5582_v28 = vld [vmem:[%s7676_s25 + $0x1278] sm:$0xf]  ;;  %v5584_v29 = vld [vmem:[%s7676_s25 + $0x1320] sm:$0xf] }
  0xe5   : > { %5581 = vst [vmem:[%s7681_s26 + $0x30c] sm:$0xf] %v5580_v27  ;;  %5583 = vst [vmem:[%s7681_s26 + $0x328] sm:$0xf] %v5582_v28  ;;  %v5586_v30 = vld [vmem:[%s7676_s25 + $0x13c8] sm:$0xf] }
  0xe6   : > { %5585 = vst [vmem:[%s7681_s26 + $0x344] sm:$0xf] %v5584_v29  ;;  %v5588_v31 = vld [vmem:[%s7676_s25 + $0x1470] sm:$0xf]  ;;  %v5590_v32 = vld [vmem:[%s7676_s25 + $0x1518] sm:$0xf] }
  0xe7   : > { %5587 = vst [vmem:[%s7681_s26 + $0x360] sm:$0xf] %v5586_v30  ;;  %5589 = vst [vmem:[%s7681_s26 + $0x37c] sm:$0xf] %v5588_v31  ;;  %v5592_v33 = vld [vmem:[%s7676_s25 + $0x15c0] sm:$0xf] }
  0xe8   : > { %5591 = vst [vmem:[%s7681_s26 + $0x398] sm:$0xf] %v5590_v32  ;;  %v5594_v34 = vld [vmem:[%s7676_s25 + $0x1668] sm:$0xf]  ;;  %v5596_v35 = vld [vmem:[%s7676_s25 + $0x1710] sm:$0xf] }
  0xe9   : > { %5593 = vst [vmem:[%s7681_s26 + $0x3b4] sm:$0xf] %v5592_v33  ;;  %5595 = vst [vmem:[%s7681_s26 + $0x3d0] sm:$0xf] %v5594_v34  ;;  %v5598_v36 = vld [vmem:[%s7676_s25 + $0x17b8] sm:$0xf] }
  0xea   : > { %5597 = vst [vmem:[%s7681_s26 + $0x3ec] sm:$0xf] %v5596_v35  ;;  %v5600_v37 = vld [vmem:[%s7676_s25 + $0x1860] sm:$0xf]  ;;  %v5602_v38 = vld [vmem:[%s7676_s25 + $0x1908] sm:$0xf] }
  0xeb   : > { %5599 = vst [vmem:[%s7681_s26 + $0x408] sm:$0xf] %v5598_v36  ;;  %5601 = vst [vmem:[%s7681_s26 + $0x424] sm:$0xf] %v5600_v37  ;;  %v5604_v39 = vld [vmem:[%s7676_s25 + $0x19b0] sm:$0xf] }
  0xec   : > { %5603 = vst [vmem:[%s7681_s26 + $0x440] sm:$0xf] %v5602_v38  ;;  %v5606_v40 = vld [vmem:[%s7676_s25 + $0x1a58] sm:$0xf]  ;;  %v5608_v41 = vld [vmem:[%s7676_s25 + $0x1b00] sm:$0xf] }
  0xed   : > { %5605 = vst [vmem:[%s7681_s26 + $0x45c] sm:$0xf] %v5604_v39  ;;  %5607 = vst [vmem:[%s7681_s26 + $0x478] sm:$0xf] %v5606_v40  ;;  %v5610_v42 = vld [vmem:[%s7676_s25 + $0x1ba8] sm:$0xf] }
  0xee   : > { %5609 = vst [vmem:[%s7681_s26 + $0x494] sm:$0xf] %v5608_v41  ;;  %v5612_v43 = vld [vmem:[%s7676_s25 + $0x1c50] sm:$0xf]  ;;  %v5614_v44 = vld [vmem:[%s7676_s25 + $0x1cf8] sm:$0xf] }
  0xef   : > { %5611 = vst [vmem:[%s7681_s26 + $0x4b0] sm:$0xf] %v5610_v42  ;;  %5613 = vst [vmem:[%s7681_s26 + $0x4cc] sm:$0xf] %v5612_v43  ;;  %v5616_v45 = vld [vmem:[%s7676_s25 + $0x1da0] sm:$0xf] }
  0xf0   : > { %5615 = vst [vmem:[%s7681_s26 + $0x4e8] sm:$0xf] %v5614_v44  ;;  %v5618_v46 = vld [vmem:[%s7676_s25 + $0x1e48] sm:$0xf]  ;;  %v5620_v47 = vld [vmem:[%s7676_s25 + $0x1ef0] sm:$0xf] }
  0xf1   : > { %5617 = vst [vmem:[%s7681_s26 + $0x504] sm:$0xf] %v5616_v45  ;;  %5619 = vst [vmem:[%s7681_s26 + $0x520] sm:$0xf] %v5618_v46  ;;  %v5622_v48 = vld [vmem:[%s7676_s25 + $0x1f98] sm:$0xf] }
  0xf2   : > { %5621 = vst [vmem:[%s7681_s26 + $0x53c] sm:$0xf] %v5620_v47  ;;  %v5624_v49 = vld [vmem:[%s7676_s25 + $0x2040] sm:$0xf]  ;;  %v5626_v50 = vld [vmem:[%s7676_s25 + $0x20e8] sm:$0xf] }
  0xf3   : > { %5623 = vst [vmem:[%s7681_s26 + $0x558] sm:$0xf] %v5622_v48  ;;  %5625 = vst [vmem:[%s7681_s26 + $0x574] sm:$0xf] %v5624_v49  ;;  %v5628_v51 = vld [vmem:[%s7676_s25 + $0x2190] sm:$0xf] }
  0xf4   : > { %5627 = vst [vmem:[%s7681_s26 + $0x590] sm:$0xf] %v5626_v50  ;;  %v5630_v52 = vld [vmem:[%s7676_s25 + $0x2238] sm:$0xf]  ;;  %v5632_v53 = vld [vmem:[%s7676_s25 + $0x22e0] sm:$0xf] }
  0xf5   : > { %5629 = vst [vmem:[%s7681_s26 + $0x5ac] sm:$0xf] %v5628_v51  ;;  %5631 = vst [vmem:[%s7681_s26 + $0x5c8] sm:$0xf] %v5630_v52  ;;  %v5634_v54 = vld [vmem:[%s7676_s25 + $0x2388] sm:$0xf] }
  0xf6   : > { %5633 = vst [vmem:[%s7681_s26 + $0x5e4] sm:$0xf] %v5632_v53  ;;  %v5636_v55 = vld [vmem:[%s7676_s25 + $0x2430] sm:$0xf]  ;;  %v5638_v56 = vld [vmem:[%s7676_s25 + $0x24d8] sm:$0xf] }
  0xf7   : > { %5635 = vst [vmem:[%s7681_s26 + $0x600] sm:$0xf] %v5634_v54  ;;  %5637 = vst [vmem:[%s7681_s26 + $0x61c] sm:$0xf] %v5636_v55  ;;  %v5640_v57 = vld [vmem:[%s7676_s25 + $0x2580] sm:$0xf] }
  0xf8   : > { %5639 = vst [vmem:[%s7681_s26 + $0x638] sm:$0xf] %v5638_v56  ;;  %v5642_v58 = vld [vmem:[%s7676_s25 + $0x2628] sm:$0xf]  ;;  %v5644_v59 = vld [vmem:[%s7676_s25 + $0x26d0] sm:$0xf] }
  0xf9   : > { %5641 = vst [vmem:[%s7681_s26 + $0x654] sm:$0xf] %v5640_v57  ;;  %5643 = vst [vmem:[%s7681_s26 + $0x670] sm:$0xf] %v5642_v58  ;;  %v5646_v60 = vld [vmem:[%s7676_s25 + $0x2778] sm:$0xf] }
  0xfa   : > { %5645 = vst [vmem:[%s7681_s26 + $0x68c] sm:$0xf] %v5644_v59  ;;  %v5648_v61 = vld [vmem:[%s7676_s25 + $0x2820] sm:$0xf]  ;;  %v5650_v62 = vld [vmem:[%s7676_s25 + $0x28c8] sm:$0xf] }
  0xfb   : > { %5647 = vst [vmem:[%s7681_s26 + $0x6a8] sm:$0xf] %v5646_v60  ;;  %5649 = vst [vmem:[%s7681_s26 + $0x6c4] sm:$0xf] %v5648_v61  ;;  %v5652_v63 = vld [vmem:[%s7676_s25 + $0x2970] sm:$0xf] }
  0xfc   : > { %5651 = vst [vmem:[%s7681_s26 + $0x6e0] sm:$0xf] %v5650_v62  ;;  %v5654_v0 = vld [vmem:[%s7676_s25 + $0x2a18] sm:$0xf]  ;;  %v5656_v1 = vld [vmem:[%s7676_s25 + $0x2ac0] sm:$0xf] }
  0xfd   : > { %5653 = vst [vmem:[%s7681_s26 + $0x6fc] sm:$0xf] %v5652_v63  ;;  %5655 = vst [vmem:[%s7681_s26 + $0x718] sm:$0xf] %v5654_v0  ;;  %v5658_v2 = vld [vmem:[%s7676_s25 + $0x2b68] sm:$0xf] }
  0xfe   : > { %5657 = vst [vmem:[%s7681_s26 + $0x734] sm:$0xf] %v5656_v1  ;;  %v5660_v3 = vld [vmem:[%s7676_s25 + $0x2c10] sm:$0xf]  ;;  %v5662_v4 = vld [vmem:[%s7676_s25 + $0x2cb8] sm:$0xf] }
  0xff   : > { %5659 = vst [vmem:[%s7681_s26 + $0x750] sm:$0xf] %v5658_v2  ;;  %5661 = vst [vmem:[%s7681_s26 + $0x76c] sm:$0xf] %v5660_v3  ;;  %v5664_v5 = vld [vmem:[%s7676_s25 + $0x2d60] sm:$0xf] }
 0x100   : > { %5663 = vst [vmem:[%s7681_s26 + $0x788] sm:$0xf] %v5662_v4  ;;  %v5666_v6 = vld [vmem:[%s7676_s25 + $0x2e08] sm:$0xf]  ;;  %v5668_v7 = vld [vmem:[%s7676_s25 + $0x2eb0] sm:$0xf] }
 0x101   : > { %5665 = vst [vmem:[%s7681_s26 + $0x7a4] sm:$0xf] %v5664_v5  ;;  %5667 = vst [vmem:[%s7681_s26 + $0x7c0] sm:$0xf] %v5666_v6  ;;  %v5670_v8 = vld [vmem:[%s7676_s25 + $0x2f58] sm:$0xf] }
 0x102   : > { %5669 = vst [vmem:[%s7681_s26 + $0x7dc] sm:$0xf] %v5668_v7  ;;  %v5672_v9 = vld [vmem:[%s7676_s25 + $0x3000] sm:$0xf]  ;;  %v5674_v10 = vld [vmem:[%s7676_s25 + $0x30a8] sm:$0xf] }
 0x103   : > { %5671 = vst [vmem:[%s7681_s26 + $0x7f8] sm:$0xf] %v5670_v8  ;;  %5673 = vst [vmem:[%s7681_s26 + $0x814] sm:$0xf] %v5672_v9  ;;  %v5676_v11 = vld [vmem:[%s7676_s25 + $0x3150] sm:$0xf] }
 0x104   : > { %5675 = vst [vmem:[%s7681_s26 + $0x830] sm:$0xf] %v5674_v10  ;;  %v5678_v12 = vld [vmem:[%s7676_s25 + $0x31f8] sm:$0xf]  ;;  %v5680_v13 = vld [vmem:[%s7676_s25 + $0x32a0] sm:$0xf] }
 0x105   : > { %5677 = vst [vmem:[%s7681_s26 + $0x84c] sm:$0xf] %v5676_v11  ;;  %5679 = vst [vmem:[%s7681_s26 + $0x868] sm:$0xf] %v5678_v12  ;;  %v5682_v14 = vld [vmem:[%s7676_s25 + $0x3348] sm:$0xf] }
 0x106   : > { %5681 = vst [vmem:[%s7681_s26 + $0x884] sm:$0xf] %v5680_v13  ;;  %v5684_v15 = vld [vmem:[%s7676_s25 + $0x33f0] sm:$0xf]  ;;  %v5686_v16 = vld [vmem:[%s7676_s25 + $0x3498] sm:$0xf] }
 0x107   : > { %5683 = vst [vmem:[%s7681_s26 + $0x8a0] sm:$0xf] %v5682_v14  ;;  %5685 = vst [vmem:[%s7681_s26 + $0x8bc] sm:$0xf] %v5684_v15  ;;  %v5688_v17 = vld [vmem:[%s7676_s25 + $0x3540] sm:$0xf] }
 0x108   : > { %5687 = vst [vmem:[%s7681_s26 + $0x8d8] sm:$0xf] %v5686_v16  ;;  %v5690_v18 = vld [vmem:[%s7676_s25 + $0x35e8] sm:$0xf]  ;;  %v5692_v19 = vld [vmem:[%s7676_s25 + $0x3690] sm:$0xf] }
 0x109   : > { %5689 = vst [vmem:[%s7681_s26 + $0x8f4] sm:$0xf] %v5688_v17  ;;  %5691 = vst [vmem:[%s7681_s26 + $0x910] sm:$0xf] %v5690_v18  ;;  %v5694_v20 = vld [vmem:[%s7676_s25 + $0x3738] sm:$0xf] }
 0x10a   : > { %5693 = vst [vmem:[%s7681_s26 + $0x92c] sm:$0xf] %v5692_v19  ;;  %v5696_v21 = vld [vmem:[%s7676_s25 + $0x37e0] sm:$0xf]  ;;  %v5698_v22 = vld [vmem:[%s7676_s25 + $0x3888] sm:$0xf] }
 0x10b   : > { %5695 = vst [vmem:[%s7681_s26 + $0x948] sm:$0xf] %v5694_v20  ;;  %5697 = vst [vmem:[%s7681_s26 + $0x964] sm:$0xf] %v5696_v21  ;;  %v5700_v23 = vld [vmem:[%s7676_s25 + $0x3930] sm:$0xf] }
 0x10c   : > { %5699 = vst [vmem:[%s7681_s26 + $0x980] sm:$0xf] %v5698_v22  ;;  %v5702_v24 = vld [vmem:[%s7676_s25 + $0x39d8] sm:$0xf]  ;;  %v5704_v25 = vld [vmem:[%s7676_s25 + $0x3a80] sm:$0xf] }
 0x10d   : > { %5701 = vst [vmem:[%s7681_s26 + $0x99c] sm:$0xf] %v5700_v23  ;;  %5703 = vst [vmem:[%s7681_s26 + $0x9b8] sm:$0xf] %v5702_v24  ;;  %v5706_v26 = vld [vmem:[%s7676_s25 + $0x3b28] sm:$0xf] }
 0x10e   : > { %5705 = vst [vmem:[%s7681_s26 + $0x9d4] sm:$0xf] %v5704_v25  ;;  %v5708_v27 = vld [vmem:[%s7676_s25 + $0x3bd0] sm:$0xf]  ;;  %v5710_v28 = vld [vmem:[%s7676_s25 + $0x3c78] sm:$0xf] }
 0x10f   : > { %5707 = vst [vmem:[%s7681_s26 + $0x9f0] sm:$0xf] %v5706_v26  ;;  %5709 = vst [vmem:[%s7681_s26 + $0xa0c] sm:$0xf] %v5708_v27  ;;  %v5712_v29 = vld [vmem:[%s7676_s25 + $0x3d20] sm:$0xf] }
 0x110   : > { %5711 = vst [vmem:[%s7681_s26 + $0xa28] sm:$0xf] %v5710_v28  ;;  %v5714_v30 = vld [vmem:[%s7676_s25 + $0x3dc8] sm:$0xf]  ;;  %v5716_v31 = vld [vmem:[%s7676_s25 + $0x3e70] sm:$0xf] }
 0x111   : > { %5713 = vst [vmem:[%s7681_s26 + $0xa44] sm:$0xf] %v5712_v29  ;;  %5715 = vst [vmem:[%s7681_s26 + $0xa60] sm:$0xf] %v5714_v30  ;;  %v5718_v32 = vld [vmem:[%s7676_s25 + $0x3f18] sm:$0xf] }
 0x112   : > { %5717 = vst [vmem:[%s7681_s26 + $0xa7c] sm:$0xf] %v5716_v31  ;;  %v5720_v33 = vld [vmem:[%s7676_s25 + $0x3fc0] sm:$0xf]  ;;  %v5722_v34 = vld [vmem:[%s7676_s25 + $0x4068] sm:$0xf] }
 0x113   : > { %5719 = vst [vmem:[%s7681_s26 + $0xa98] sm:$0xf] %v5718_v32  ;;  %5721 = vst [vmem:[%s7681_s26 + $0xab4] sm:$0xf] %v5720_v33  ;;  %v5724_v35 = vld [vmem:[%s7676_s25 + $0x4110] sm:$0xf] }
 0x114   : > { %5723 = vst [vmem:[%s7681_s26 + $0xad0] sm:$0xf] %v5722_v34  ;;  %v5726_v36 = vld [vmem:[%s7676_s25 + $0x41b8] sm:$0xf]  ;;  %v5728_v37 = vld [vmem:[%s7676_s25 + $0x4260] sm:$0xf] }
 0x115   : > { %5725 = vst [vmem:[%s7681_s26 + $0xaec] sm:$0xf] %v5724_v35  ;;  %5727 = vst [vmem:[%s7681_s26 + $0xb08] sm:$0xf] %v5726_v36  ;;  %v5730_v38 = vld [vmem:[%s7676_s25 + $0x4308] sm:$0xf] }
 0x116   : > { %5729 = vst [vmem:[%s7681_s26 + $0xb24] sm:$0xf] %v5728_v37  ;;  %v5732_v39 = vld [vmem:[%s7676_s25 + $0x43b0] sm:$0xf]  ;;  %v5734_v40 = vld [vmem:[%s7676_s25 + $0x4458] sm:$0xf] }
 0x117   : > { %5731 = vst [vmem:[%s7681_s26 + $0xb40] sm:$0xf] %v5730_v38  ;;  %5733 = vst [vmem:[%s7681_s26 + $0xb5c] sm:$0xf] %v5732_v39  ;;  %v5736_v41 = vld [vmem:[%s7676_s25 + $0x4500] sm:$0xf] }
 0x118   : > { %5735 = vst [vmem:[%s7681_s26 + $0xb78] sm:$0xf] %v5734_v40  ;;  %v5738_v42 = vld [vmem:[%s7676_s25 + $0x45a8] sm:$0xf]  ;;  %v5740_v43 = vld [vmem:[%s7676_s25 + $0x4650] sm:$0xf] }
 0x119   : > { %5737 = vst [vmem:[%s7681_s26 + $0xb94] sm:$0xf] %v5736_v41  ;;  %5739 = vst [vmem:[%s7681_s26 + $0xbb0] sm:$0xf] %v5738_v42  ;;  %v5742_v44 = vld [vmem:[%s7676_s25 + $0x46f8] sm:$0xf] }
 0x11a   : > { %5741 = vst [vmem:[%s7681_s26 + $0xbcc] sm:$0xf] %v5740_v43  ;;  %v5744_v45 = vld [vmem:[%s7676_s25 + $0x47a0] sm:$0xf]  ;;  %v5746_v46 = vld [vmem:[%s7676_s25 + $0x4848] sm:$0xf] }
 0x11b   : > { %5743 = vst [vmem:[%s7681_s26 + $0xbe8] sm:$0xf] %v5742_v44  ;;  %5745 = vst [vmem:[%s7681_s26 + $0xc04] sm:$0xf] %v5744_v45  ;;  %v5748_v47 = vld [vmem:[%s7676_s25 + $0x48f0] sm:$0xf] }
 0x11c   : > { %5747 = vst [vmem:[%s7681_s26 + $0xc20] sm:$0xf] %v5746_v46  ;;  %v5750_v48 = vld [vmem:[%s7676_s25 + $0x4998] sm:$0xf]  ;;  %v5752_v49 = vld [vmem:[%s7676_s25 + $0x4a40] sm:$0xf] }
 0x11d   : > { %5749 = vst [vmem:[%s7681_s26 + $0xc3c] sm:$0xf] %v5748_v47  ;;  %5751 = vst [vmem:[%s7681_s26 + $0xc58] sm:$0xf] %v5750_v48  ;;  %v5754_v50 = vld [vmem:[%s7676_s25 + $0x4ae8] sm:$0xf] }
 0x11e   : > { %5753 = vst [vmem:[%s7681_s26 + $0xc74] sm:$0xf] %v5752_v49  ;;  %v5756_v51 = vld [vmem:[%s7676_s25 + $0x4b90] sm:$0xf]  ;;  %v5758_v52 = vld [vmem:[%s7676_s25 + $0x4c38] sm:$0xf] }
 0x11f   : > { %5755 = vst [vmem:[%s7681_s26 + $0xc90] sm:$0xf] %v5754_v50  ;;  %5757 = vst [vmem:[%s7681_s26 + $0xcac] sm:$0xf] %v5756_v51  ;;  %v5760_v53 = vld [vmem:[%s7676_s25 + $0x4ce0] sm:$0xf] }
 0x120   : > { %5759 = vst [vmem:[%s7681_s26 + $0xcc8] sm:$0xf] %v5758_v52  ;;  %v5762_v54 = vld [vmem:[%s7676_s25 + $0x4d88] sm:$0xf]  ;;  %v5764_v55 = vld [vmem:[%s7676_s25 + $0x4e30] sm:$0xf] }
 0x121   : > { %5761 = vst [vmem:[%s7681_s26 + $0xce4] sm:$0xf] %v5760_v53  ;;  %5763 = vst [vmem:[%s7681_s26 + $0xd00] sm:$0xf] %v5762_v54  ;;  %v5766_v56 = vld [vmem:[%s7676_s25 + $0x4ed8] sm:$0xf] }
 0x122   : > { %5765 = vst [vmem:[%s7681_s26 + $0xd1c] sm:$0xf] %v5764_v55  ;;  %v5768_v57 = vld [vmem:[%s7676_s25 + $0x4f80] sm:$0xf]  ;;  %v5770_v58 = vld [vmem:[%s7676_s25 + $0x5028] sm:$0xf] }
 0x123   : > { %5767 = vst [vmem:[%s7681_s26 + $0xd38] sm:$0xf] %v5766_v56  ;;  %5769 = vst [vmem:[%s7681_s26 + $0xd54] sm:$0xf] %v5768_v57  ;;  %v5772_v59 = vld [vmem:[%s7676_s25 + $0x50d0] sm:$0xf] }
 0x124   : > { %5771 = vst [vmem:[%s7681_s26 + $0xd70] sm:$0xf] %v5770_v58  ;;  %v5774_v60 = vld [vmem:[%s7676_s25 + $0x5178] sm:$0xf]  ;;  %v5776_v61 = vld [vmem:[%s7676_s25 + $0x5220] sm:$0xf] }
 0x125   : > { %5773 = vst [vmem:[%s7681_s26 + $0xd8c] sm:$0xf] %v5772_v59  ;;  %5775 = vst [vmem:[%s7681_s26 + $0xda8] sm:$0xf] %v5774_v60  ;;  %v5778_v62 = vld [vmem:[%s7676_s25 + $0x52c8] sm:$0xf] }
 0x126   : > { %5777 = vst [vmem:[%s7681_s26 + $0xdc4] sm:$0xf] %v5776_v61  ;;  %v5780_v63 = vld [vmem:[%s7676_s25 + $0x5370] sm:$0xf]  ;;  %5779 = vst [vmem:[%s7681_s26 + $0xde0] sm:$0xf] %v5778_v62 }
 0x127   : > { %5781 = vst [vmem:[%s7681_s26 + $0xdfc] sm:$0xf] %v5780_v63 }
 0x128 PF: > { %p5782_p5 = scmp.ge.s32.totalorder %s7617_s14, 1  ;;  %p1187_p6 = scmp.lt.s32.totalorder %s7617_s14, 7 }
 0x12a   : > { %p1188_p7 = pnand %p5782_p5, %p1187_p6 }
 0x12b   : > { %s1194_s27 = sand.u32 (!%p1188_p7), 1, %s7609_s12   ;;  %v7619_v0 = vmov (!%p1188_p7), 0   ;;  %v8748_v34 = vld [vmem:[%s9465_s0] sm:$0xf] (!%p1188_p7)  ;;  %v7620_v37 = vmov (!%p1188_p7), 0.0   ;;  %vm7621_vm0 = vmmov (!%p1188_p7), 0  }
 0x12c   : > { %1191 = sbr.rel (%p1188_p7) target bundleno = 1039 (0x40f), region = 54  ;;  %1610 = vmatprep.mubr.bf16.mxu0 (!%p1188_p7), %v7619_v0  ;;  %1651 = vmatprep.mubr.bf16.mxu1 (!%p1188_p7), %v7619_v0 }
 0x12d   : > { %s6924_s28 = smul.u32 (!%p1188_p7), 3584, %s1194_s27  ;;  %6952 = vset.pattern.permute.xlu0 (!%p1188_p7), %v7619_v0 }
 0x12e   : > { %s1218_s11 = smul.u32 (!%p1188_p7), 7, %s5521_s15 }
 0x12f   : > { %s8710_s29 = scalar_lea.vmem (!%p1188_p7), [#allocation2], %s6924_s28 }
 0x130   : > { %v6953_v1 = vld [vmem:[%s8710_s29 + $0x4] ss:$28 sps:$4 sm:$0xff] (!%p1188_p7)   ;;  %v6955_v2 = vld [vmem:[%s8710_s29 + $0xc] ss:$28 sps:$4 sm:$0xff] (!%p1188_p7)   ;;  %v6959_v5 = vld [vmem:[%s8710_s29 + $0x3c] ss:$28 sps:$4 sm:$0xff] (!%p1188_p7)  }
 0x131   : > { %1578 = vmatprep.subr.bf16.mxu0 (!%p1188_p7), %v6953_v1  ;;  %v6957_v3 = vld [vmem:[%s8710_s29] ss:$28 sps:$4 sm:$0xff] (!%p1188_p7)   ;;  %v6958_v4 = vld [vmem:[%s8710_s29 + $0x8] ss:$28 sps:$4 sm:$0xff] (!%p1188_p7)   ;;  %1619 = vmatprep.subr.bf16.mxu1 (!%p1188_p7), %v6955_v2  ;;  %v6963_v7 = vld [vmem:[%s8710_s29 + $0x38] ss:$28 sps:$4 sm:$0xff] (!%p1188_p7)  }
 0x132   : > { %1579 = vmatpush1.bf16.msra.mxu0 (!%p1188_p7), %v6957_v3  ;;  %1620 = vmatpush1.bf16.msra.mxu1 (!%p1188_p7), %v6958_v4  ;;  %v6961_v6 = vld [vmem:[%s8710_s29 + $0x44] ss:$28 sps:$4 sm:$0xff] (!%p1188_p7)   ;;  %v6965_v9 = vld [vmem:[%s8710_s29 + $0x74] ss:$28 sps:$4 sm:$0xff] (!%p1188_p7)   ;;  %v6967_v10 = vld [vmem:[%s8710_s29 + $0x7c] ss:$28 sps:$4 sm:$0xff] (!%p1188_p7)  }
 0x133   : > { %1580 = vmatprep.subr.bf16.mxu0 %v6959_v5  ;;  %v6964_v8 = vld [vmem:[%s8710_s29 + $0x40] ss:$28 sps:$4 sm:$0xff]   ;;  %1621 = vmatprep.subr.bf16.mxu1 %v6961_v6  ;;  %v6969_v11 = vld [vmem:[%s8710_s29 + $0x70] ss:$28 sps:$4 sm:$0xff]   ;;  %v6970_v12 = vld [vmem:[%s8710_s29 + $0x78] ss:$28 sps:$4 sm:$0xff]  }
 0x134   : > { %v6971_v13 = vld [vmem:[%s8710_s29 + $0xac] ss:$28 sps:$4 sm:$0xff]   ;;  %v6973_v14 = vld [vmem:[%s8710_s29 + $0xb4] ss:$28 sps:$4 sm:$0xff]   ;;  %v6977_v17 = vld [vmem:[%s8710_s29 + $0xe4] ss:$28 sps:$4 sm:$0xff]  }
 0x135   : > { %v6975_v15 = vld [vmem:[%s8710_s29 + $0xa8] ss:$28 sps:$4 sm:$0xff]   ;;  %v6976_v16 = vld [vmem:[%s8710_s29 + $0xb0] ss:$28 sps:$4 sm:$0xff]   ;;  %v6981_v19 = vld [vmem:[%s8710_s29 + $0xe0] ss:$28 sps:$4 sm:$0xff]  }
 0x136   : > { %1581 = vmatpush1.bf16.msra.mxu0 %v6963_v7  ;;  %1622 = vmatpush1.bf16.msra.mxu1 %v6964_v8  ;;  %v6979_v18 = vld [vmem:[%s8710_s29 + $0xec] ss:$28 sps:$4 sm:$0xff]   ;;  %v6983_v21 = vld [vmem:[%s8710_s29 + $0x11c] ss:$28 sps:$4 sm:$0xff]   ;;  %v6985_v22 = vld [vmem:[%s8710_s29 + $0x124] ss:$28 sps:$4 sm:$0xff]  }
 0x137   : > { %1582 = vmatprep.subr.bf16.mxu0 %v6965_v9  ;;  %1623 = vmatprep.subr.bf16.mxu1 %v6967_v10  ;;  %v6982_v20 = vld [vmem:[%s8710_s29 + $0xe8] ss:$28 sps:$4 sm:$0xff]   ;;  %v6987_v23 = vld [vmem:[%s8710_s29 + $0x118] ss:$28 sps:$4 sm:$0xff]   ;;  %v6988_v24 = vld [vmem:[%s8710_s29 + $0x120] ss:$28 sps:$4 sm:$0xff]  }
 0x138   : > { %v6989_v25 = vld [vmem:[%s8710_s29 + $0x154] ss:$28 sps:$4 sm:$0xff]   ;;  %v6991_v26 = vld [vmem:[%s8710_s29 + $0x15c] ss:$28 sps:$4 sm:$0xff]   ;;  %v6995_v29 = vld [vmem:[%s8710_s29 + $0x18c] ss:$28 sps:$4 sm:$0xff]  }
 0x139   : > { %v6993_v27 = vld [vmem:[%s8710_s29 + $0x150] ss:$28 sps:$4 sm:$0xff]   ;;  %v6994_v28 = vld [vmem:[%s8710_s29 + $0x158] ss:$28 sps:$4 sm:$0xff]   ;;  %v6999_v31 = vld [vmem:[%s8710_s29 + $0x188] ss:$28 sps:$4 sm:$0xff]  }
 0x13a   : > { %1583 = vmatpush1.bf16.msra.mxu0 %v6969_v11  ;;  %1624 = vmatpush1.bf16.msra.mxu1 %v6970_v12  ;;  %v6997_v30 = vld [vmem:[%s8710_s29 + $0x194] ss:$28 sps:$4 sm:$0xff]   ;;  %v7007_v38 = vld [vmem:[%s8710_s29 + $0x4c] ss:$28 sps:$4 sm:$0xff]   ;;  %v7011_v41 = vld [vmem:[%s8710_s29 + $0x84] ss:$28 sps:$4 sm:$0xff]  }
 0x13b   : > { %1584 = vmatprep.subr.bf16.mxu0 %v6971_v13  ;;  %1625 = vmatprep.subr.bf16.mxu1 %v6973_v14  ;;  %v7000_v32 = vld [vmem:[%s8710_s29 + $0x190] ss:$28 sps:$4 sm:$0xff]   ;;  %v7004_v36 = vld [vmem:[%s8710_s29 + $0x18] ss:$28 sps:$4 sm:$0xff]   ;;  %v7005_v39 = vld [vmem:[%s8710_s29 + $0x48] ss:$28 sps:$4 sm:$0xff]  }
 0x13c   : > { %v7003_v33 = vld [vmem:[%s8710_s29 + $0x14] ss:$28 sps:$4 sm:$0xff]   ;;  %v7009_v42 = vld [vmem:[%s8710_s29 + $0x80] ss:$28 sps:$4 sm:$0xff]   ;;  %v7012_v43 = vld [vmem:[%s8710_s29 + $0x88] ss:$28 sps:$4 sm:$0xff]  }
 0x13d   : > { %v7001_v35 = vld [vmem:[%s8710_s29 + $0x10] ss:$28 sps:$4 sm:$0xff]   ;;  %v7015_v44 = vld [vmem:[%s8710_s29 + $0xbc] ss:$28 sps:$4 sm:$0xff]   ;;  %v7021_v51 = vld [vmem:[%s8710_s29 + $0x128] ss:$28 sps:$4 sm:$0xff]  }
 0x13e   : > { %1585 = vmatpush1.bf16.msra.mxu0 %v6975_v15  ;;  %1626 = vmatpush1.bf16.msra.mxu1 %v6976_v16  ;;  %v7008_v40 = vld [vmem:[%s8710_s29 + $0x50] ss:$28 sps:$4 sm:$0xff]   ;;  %v7013_v45 = vld [vmem:[%s8710_s29 + $0xb8] ss:$28 sps:$4 sm:$0xff]   ;;  %v7016_v46 = vld [vmem:[%s8710_s29 + $0xc0] ss:$28 sps:$4 sm:$0xff]  }
 0x13f   : > { %1586 = vmatprep.subr.bf16.mxu0 %v6977_v17  ;;  %1627 = vmatprep.subr.bf16.mxu1 %v6979_v18  ;;  %v7019_v47 = vld [vmem:[%s8710_s29 + $0xf4] ss:$28 sps:$4 sm:$0xff]   ;;  %v7023_v50 = vld [vmem:[%s8710_s29 + $0x12c] ss:$28 sps:$4 sm:$0xff]   ;;  %v7027_v53 = vld [vmem:[%s8710_s29 + $0x164] ss:$28 sps:$4 sm:$0xff]  }
 0x140   : > { %v7017_v48 = vld [vmem:[%s8710_s29 + $0xf0] ss:$28 sps:$4 sm:$0xff]   ;;  %v7020_v49 = vld [vmem:[%s8710_s29 + $0xf8] ss:$28 sps:$4 sm:$0xff]   ;;  %v7025_v54 = vld [vmem:[%s8710_s29 + $0x160] ss:$28 sps:$4 sm:$0xff]  }
 0x141   : > { %v7024_v52 = vld [vmem:[%s8710_s29 + $0x130] ss:$28 sps:$4 sm:$0xff]   ;;  %v7028_v55 = vld [vmem:[%s8710_s29 + $0x168] ss:$28 sps:$4 sm:$0xff]   ;;  %v7031_v56 = vld [vmem:[%s8710_s29 + $0x19c] ss:$28 sps:$4 sm:$0xff]  }
 0x142   : > { %1587 = vmatpush1.bf16.msra.mxu0 %v6981_v19  ;;  %1628 = vmatpush1.bf16.msra.mxu1 %v6982_v20  ;;  %v7029_v57 = vld [vmem:[%s8710_s29 + $0x198] ss:$28 sps:$4 sm:$0xff]   ;;  %v7032_v58 = vld [vmem:[%s8710_s29 + $0x1a0] ss:$28 sps:$4 sm:$0xff]   ;;  %v7038_v60 = vld [vmem:[%s8710_s29 + $0x1cc] ss:$28 sps:$4 sm:$0xff]  }
 0x143   : > { %1588 = vmatprep.subr.bf16.mxu0 %v6983_v21  ;;  %1629 = vmatprep.subr.bf16.mxu1 %v6985_v22  ;;  %v7035_v59 = vld [vmem:[%s8710_s29 + $0x1c4] ss:$28 sps:$4 sm:$0xff]   ;;  %v7041_v63 = vld [vmem:[%s8710_s29 + $0x1fc] ss:$28 sps:$4 sm:$0xff]   ;;  %v7047_v4 = vld [vmem:[%s8710_s29 + $0x234] ss:$28 sps:$4 sm:$0xff]  }
 0x144   : > { %v7033_v61 = vld [vmem:[%s8710_s29 + $0x1c0] ss:$28 sps:$4 sm:$0xff]   ;;  %v7036_v62 = vld [vmem:[%s8710_s29 + $0x1c8] ss:$28 sps:$4 sm:$0xff]   ;;  %v7039_v2 = vld [vmem:[%s8710_s29 + $0x1f8] ss:$28 sps:$4 sm:$0xff]  }
 0x145   : > { %v7044_v1 = vld [vmem:[%s8710_s29 + $0x204] ss:$28 sps:$4 sm:$0xff]   ;;  %v7050_v5 = vld [vmem:[%s8710_s29 + $0x23c] ss:$28 sps:$4 sm:$0xff]   ;;  %v7045_v6 = vld [vmem:[%s8710_s29 + $0x230] ss:$28 sps:$4 sm:$0xff]  }
 0x146   : > { %1589 = vmatpush1.bf16.msra.mxu0 %v6987_v23  ;;  %1630 = vmatpush1.bf16.msra.mxu1 %v6988_v24  ;;  %v7042_v3 = vld [vmem:[%s8710_s29 + $0x200] ss:$28 sps:$4 sm:$0xff]   ;;  %v7048_v7 = vld [vmem:[%s8710_s29 + $0x238] ss:$28 sps:$4 sm:$0xff]   ;;  %v7053_v8 = vld [vmem:[%s8710_s29 + $0x26c] ss:$28 sps:$4 sm:$0xff]  }
 0x147   : > { %1590 = vmatprep.subr.bf16.mxu0 %v6989_v25  ;;  %1631 = vmatprep.subr.bf16.mxu1 %v6991_v26  ;;  %v7056_v9 = vld [vmem:[%s8710_s29 + $0x274] ss:$28 sps:$4 sm:$0xff]   ;;  %v7051_v10 = vld [vmem:[%s8710_s29 + $0x268] ss:$28 sps:$4 sm:$0xff]   ;;  %v7057_v14 = vld [vmem:[%s8710_s29 + $0x2a0] ss:$28 sps:$4 sm:$0xff]  }
 0x148   : > { %v7054_v11 = vld [vmem:[%s8710_s29 + $0x270] ss:$28 sps:$4 sm:$0xff]   ;;  %v7059_v12 = vld [vmem:[%s8710_s29 + $0x2a4] ss:$28 sps:$4 sm:$0xff]   ;;  %v7065_v16 = vld [vmem:[%s8710_s29 + $0x2dc] ss:$28 sps:$4 sm:$0xff]  }
 0x149   : > { %v7062_v13 = vld [vmem:[%s8710_s29 + $0x2ac] ss:$28 sps:$4 sm:$0xff]   ;;  %v7068_v17 = vld [vmem:[%s8710_s29 + $0x2e4] ss:$28 sps:$4 sm:$0xff]   ;;  %v7063_v18 = vld [vmem:[%s8710_s29 + $0x2d8] ss:$28 sps:$4 sm:$0xff]  }
 0x14a   : > { %1591 = vmatpush1.bf16.msra.mxu0 %v6993_v27  ;;  %1632 = vmatpush1.bf16.msra.mxu1 %v6994_v28  ;;  %v7060_v15 = vld [vmem:[%s8710_s29 + $0x2a8] ss:$28 sps:$4 sm:$0xff]   ;;  %v7066_v19 = vld [vmem:[%s8710_s29 + $0x2e0] ss:$28 sps:$4 sm:$0xff]   ;;  %v7071_v20 = vld [vmem:[%s8710_s29 + $0x314] ss:$28 sps:$4 sm:$0xff]  }
 0x14b   : > { %1592 = vmatprep.subr.bf16.mxu0 %v6995_v29  ;;  %1633 = vmatprep.subr.bf16.mxu1 %v6997_v30  ;;  %v7074_v21 = vld [vmem:[%s8710_s29 + $0x31c] ss:$28 sps:$4 sm:$0xff]   ;;  %v7069_v22 = vld [vmem:[%s8710_s29 + $0x310] ss:$28 sps:$4 sm:$0xff]   ;;  %v7075_v26 = vld [vmem:[%s8710_s29 + $0x348] ss:$28 sps:$4 sm:$0xff]  }
 0x14c   : > { %v7072_v23 = vld [vmem:[%s8710_s29 + $0x318] ss:$28 sps:$4 sm:$0xff]   ;;  %v7077_v24 = vld [vmem:[%s8710_s29 + $0x34c] ss:$28 sps:$4 sm:$0xff]   ;;  %p1219_p8 = scmp.lt.s32.totalorder %s1218_s11, 41 }
 0x14d   : > { %v7080_v25 = vld [vmem:[%s8710_s29 + $0x354] ss:$28 sps:$4 sm:$0xff]  }
 0x14e   : > { %1593 = vmatpush1.bf16.msra.mxu0 %v6999_v31  ;;  %1634 = vmatpush1.bf16.msra.mxu1 %v7000_v32  ;;  %v7078_v27 = vld [vmem:[%s8710_s29 + $0x350] ss:$28 sps:$4 sm:$0xff]   ;;  %v7084_v30 = vld [vmem:[%s8710_s29 + $0x1d8] ss:$28 sps:$4 sm:$0xff]   ;;  %v7085_v32 = vld [vmem:[%s8710_s29 + $0x208] ss:$28 sps:$4 sm:$0xff]  }
 0x14f   : > { %1660 = vmatprep.subr.bf16.mxu0 %v7003_v33  ;;  %6763 = vmatprep.subr.bf16.mxu1 %v7620_v37  ;;  %v7083_v28 = vld [vmem:[%s8710_s29 + $0x1d4] ss:$28 sps:$4 sm:$0xff]   ;;  %v7087_v31 = vld [vmem:[%s8710_s29 + $0x20c] ss:$28 sps:$4 sm:$0xff]   ;;  %s9473_s11 = smov (!%p1219_p8, %s1218_s11), 41 }
 0x150   : > { %v7081_v29 = vld [vmem:[%s8710_s29 + $0x1d0] ss:$28 sps:$4 sm:$0xff]   ;;  %s5783_s12 = sshll.u32 %s9473_s11, 2 }
 0x151   : > { %1611 = vmatmul.mubr.bf16.vlgmr.msra.gmra.mrb[0].mxu0 %v8748_v34  ;;  %1652 = vmatmul.mubr.bf16.vlgmr.msra.gmra.mrb[0].mxu1 %v8748_v34  ;;  %v7088_v33 = vld [vmem:[%s8710_s29 + $0x210] ss:$28 sps:$4 sm:$0xff]   ;;  %s1222_s17 = scalar_lea.vmem %s9468_s3, %s5783_s12 }
 0x152   : > { %1661 = vmatpush1.bf16.msra.mxu0 %v7001_v35  ;;  %6764 = vmatpush3.bf16.msra.mxu1 %v7004_v36  ;;  %v7091_v35 = vld [vmem:[%s8710_s29 + $0x244] ss:$28 sps:$4 sm:$0xff]  }
 0x153   : > { %1662 = vmatprep.subr.bf16.mxu0 %v7007_v38  ;;  %6765 = vmatprep.subr.bf16.mxu1 %v7620_v37  ;;  %v7089_v36 = vld [vmem:[%s8710_s29 + $0x240] ss:$28 sps:$4 sm:$0xff]   ;;  %v7092_v38 = vld [vmem:[%s8710_s29 + $0x248] ss:$28 sps:$4 sm:$0xff]  }
 0x154   : > { %1692 = vmatprep.mubr.bf16.mxu0 %v7619_v0  ;;  %6779 = vmatprep.mubr.msk.bf16.mxu1 %vm7621_vm0, %v7620_v37 }
 0x156   : > { %1663 = vmatpush1.bf16.msra.mxu0 %v7005_v39  ;;  %6766 = vmatpush3.bf16.msra.mxu1 %v7008_v40  ;;  %v7095_v39 = vld [vmem:[%s8710_s29 + $0x27c] ss:$28 sps:$4 sm:$0xff]  }
 0x157   : > { %1664 = vmatprep.subr.bf16.mxu0 %v7011_v41  ;;  %6767 = vmatprep.subr.bf16.mxu1 %v7620_v37  ;;  %v7093_v40 = vld [vmem:[%s8710_s29 + $0x278] ss:$28 sps:$4 sm:$0xff]   ;;  %v7096_v41 = vld [vmem:[%s8710_s29 + $0x280] ss:$28 sps:$4 sm:$0xff]  }
 0x15a   : > { %1665 = vmatpush1.bf16.msra.mxu0 %v7009_v42  ;;  %6768 = vmatpush3.bf16.msra.mxu1 %v7012_v43  ;;  %v7099_v42 = vld [vmem:[%s8710_s29 + $0x2b4] ss:$28 sps:$4 sm:$0xff]  }
 0x15b   : > { %1666 = vmatprep.subr.bf16.mxu0 %v7015_v44  ;;  %6769 = vmatprep.subr.bf16.mxu1 %v7620_v37  ;;  %v7097_v43 = vld [vmem:[%s8710_s29 + $0x2b0] ss:$28 sps:$4 sm:$0xff]   ;;  %v7100_v44 = vld [vmem:[%s8710_s29 + $0x2b8] ss:$28 sps:$4 sm:$0xff]  }
 0x15e   : > { %1667 = vmatpush1.bf16.msra.mxu0 %v7013_v45  ;;  %6770 = vmatpush3.bf16.msra.mxu1 %v7016_v46  ;;  %v7103_v45 = vld [vmem:[%s8710_s29 + $0x2ec] ss:$28 sps:$4 sm:$0xff]  }
 0x15f   : > { %1668 = vmatprep.subr.bf16.mxu0 %v7019_v47  ;;  %6771 = vmatprep.subr.bf16.mxu1 %v7620_v37  ;;  %v7101_v46 = vld [vmem:[%s8710_s29 + $0x2e8] ss:$28 sps:$4 sm:$0xff]   ;;  %v7104_v47 = vld [vmem:[%s8710_s29 + $0x2f0] ss:$28 sps:$4 sm:$0xff]  }
 0x162   : > { %1669 = vmatpush1.bf16.msra.mxu0 %v7017_v48  ;;  %6772 = vmatpush3.bf16.msra.mxu1 %v7020_v49  ;;  %v7107_v48 = vld [vmem:[%s8710_s29 + $0x324] ss:$28 sps:$4 sm:$0xff]  }
 0x163   : > { %1670 = vmatprep.subr.bf16.mxu0 %v7023_v50  ;;  %6773 = vmatprep.subr.bf16.mxu1 %v7620_v37  ;;  %v7105_v49 = vld [vmem:[%s8710_s29 + $0x320] ss:$28 sps:$4 sm:$0xff]   ;;  %v7108_v50 = vld [vmem:[%s8710_s29 + $0x328] ss:$28 sps:$4 sm:$0xff]  }
 0x166   : > { %1671 = vmatpush1.bf16.msra.mxu0 %v7021_v51  ;;  %6774 = vmatpush3.bf16.msra.mxu1 %v7024_v52  ;;  %v7111_v51 = vld [vmem:[%s8710_s29 + $0x35c] ss:$28 sps:$4 sm:$0xff]  }
 0x167   : > { %1672 = vmatprep.subr.bf16.mxu0 %v7027_v53  ;;  %6775 = vmatprep.subr.bf16.mxu1 %v7620_v37  ;;  %v7109_v52 = vld [vmem:[%s8710_s29 + $0x358] ss:$28 sps:$4 sm:$0xff]   ;;  %v7112_v53 = vld [vmem:[%s8710_s29 + $0x360] ss:$28 sps:$4 sm:$0xff]  }
 0x16a   : > { %1673 = vmatpush1.bf16.msra.mxu0 %v7025_v54  ;;  %6776 = vmatpush3.bf16.msra.mxu1 %v7028_v55  ;;  %v7115_v54 = vld [vmem:[%s8710_s29 + $0x384] ss:$28 sps:$4 sm:$0xff]   ;;  %v7118_v55 = vld [vmem:[%s8710_s29 + $0x38c] ss:$28 sps:$4 sm:$0xff]  }
 0x16b   : > { %1674 = vmatprep.subr.bf16.mxu0 %v7031_v56  ;;  %6777 = vmatprep.subr.bf16.mxu1 %v7620_v37  ;;  %v7113_v56 = vld [vmem:[%s8710_s29 + $0x380] ss:$28 sps:$4 sm:$0xff]  }
 0x16e   : > { %1675 = vmatpush1.bf16.msra.mxu0 %v7029_v57  ;;  %6778 = vmatpush3.bf16.msra.mxu1 %v7032_v58  ;;  %v7116_v57 = vld [vmem:[%s8710_s29 + $0x388] ss:$28 sps:$4 sm:$0xff]   ;;  %v7121_v58 = vld [vmem:[%s8710_s29 + $0x3bc] ss:$28 sps:$4 sm:$0xff]  }
 0x16f   : > { %2094 = vmatprep.subr.bf16.mxu0 %v7035_v59  ;;  %2135 = vmatprep.subr.bf16.mxu1 %v7038_v60  ;;  %v7124_v59 = vld [vmem:[%s8710_s29 + $0x3c4] ss:$28 sps:$4 sm:$0xff]   ;;  %v7119_v60 = vld [vmem:[%s8710_s29 + $0x3b8] ss:$28 sps:$4 sm:$0xff]  }
 0x171   : > { %1693 = vmatmul.mubr.bf16.vlgmr.msra.gmra.mrb[4].mxu0 %v8748_v34  ;;  %6780 = vmatmul.mubr.bf16.vlgmr.msra.gmra.mrb[4].mxu1 %v8748_v34 }
 0x172   : > { %2095 = vmatpush1.bf16.msra.mxu0 %v7033_v61  ;;  %2136 = vmatpush1.bf16.msra.mxu1 %v7036_v62  ;;  %v7122_v61 = vld [vmem:[%s8710_s29 + $0x3c0] ss:$28 sps:$4 sm:$0xff]   ;;  %v7127_v62 = vld [vmem:[%s8710_s29 + $0x3f4] ss:$28 sps:$4 sm:$0xff]  }
 0x173   : > { %2096 = vmatprep.subr.bf16.mxu0 %v7041_v63  ;;  %2137 = vmatprep.subr.bf16.mxu1 %v7044_v1  ;;  %v7130_v63 = vld [vmem:[%s8710_s29 + $0x3fc] ss:$28 sps:$4 sm:$0xff]   ;;  %v7125_v1 = vld [vmem:[%s8710_s29 + $0x3f0] ss:$28 sps:$4 sm:$0xff]  }
 0x174   : > { %2126 = vmatprep.mubr.bf16.mxu0 %v7619_v0  ;;  %2167 = vmatprep.mubr.bf16.mxu1 %v7619_v0 }
 0x176   : > { %2097 = vmatpush1.bf16.msra.mxu0 %v7039_v2  ;;  %2138 = vmatpush1.bf16.msra.mxu1 %v7042_v3  ;;  %v7128_v2 = vld [vmem:[%s8710_s29 + $0x3f8] ss:$28 sps:$4 sm:$0xff]   ;;  %v7133_v3 = vld [vmem:[%s8710_s29 + $0x42c] ss:$28 sps:$4 sm:$0xff]  }
 0x177   : > { %2098 = vmatprep.subr.bf16.mxu0 %v7047_v4  ;;  %2139 = vmatprep.subr.bf16.mxu1 %v7050_v5  ;;  %v7136_v4 = vld [vmem:[%s8710_s29 + $0x434] ss:$28 sps:$4 sm:$0xff]   ;;  %v7131_v5 = vld [vmem:[%s8710_s29 + $0x428] ss:$28 sps:$4 sm:$0xff]  }
 0x17a   : > { %2099 = vmatpush1.bf16.msra.mxu0 %v7045_v6  ;;  %2140 = vmatpush1.bf16.msra.mxu1 %v7048_v7  ;;  %v7134_v6 = vld [vmem:[%s8710_s29 + $0x430] ss:$28 sps:$4 sm:$0xff]   ;;  %v7139_v7 = vld [vmem:[%s8710_s29 + $0x464] ss:$28 sps:$4 sm:$0xff]  }
 0x17b   : > { %2100 = vmatprep.subr.bf16.mxu0 %v7053_v8  ;;  %2141 = vmatprep.subr.bf16.mxu1 %v7056_v9  ;;  %v7142_v8 = vld [vmem:[%s8710_s29 + $0x46c] ss:$28 sps:$4 sm:$0xff]   ;;  %v7137_v9 = vld [vmem:[%s8710_s29 + $0x460] ss:$28 sps:$4 sm:$0xff]  }
 0x17e   : > { %2101 = vmatpush1.bf16.msra.mxu0 %v7051_v10  ;;  %2142 = vmatpush1.bf16.msra.mxu1 %v7054_v11  ;;  %v7140_v10 = vld [vmem:[%s8710_s29 + $0x468] ss:$28 sps:$4 sm:$0xff]   ;;  %v7145_v11 = vld [vmem:[%s8710_s29 + $0x49c] ss:$28 sps:$4 sm:$0xff]  }
 0x17f   : > { %2102 = vmatprep.subr.bf16.mxu0 %v7059_v12  ;;  %2143 = vmatprep.subr.bf16.mxu1 %v7062_v13  ;;  %v7148_v12 = vld [vmem:[%s8710_s29 + $0x4a4] ss:$28 sps:$4 sm:$0xff]   ;;  %v7143_v13 = vld [vmem:[%s8710_s29 + $0x498] ss:$28 sps:$4 sm:$0xff]  }
 0x182   : > { %2103 = vmatpush1.bf16.msra.mxu0 %v7057_v14  ;;  %2144 = vmatpush1.bf16.msra.mxu1 %v7060_v15  ;;  %v7146_v14 = vld [vmem:[%s8710_s29 + $0x4a0] ss:$28 sps:$4 sm:$0xff]   ;;  %v7151_v15 = vld [vmem:[%s8710_s29 + $0x4d4] ss:$28 sps:$4 sm:$0xff]  }
 0x183   : > { %2104 = vmatprep.subr.bf16.mxu0 %v7065_v16  ;;  %2145 = vmatprep.subr.bf16.mxu1 %v7068_v17  ;;  %v7154_v16 = vld [vmem:[%s8710_s29 + $0x4dc] ss:$28 sps:$4 sm:$0xff]   ;;  %v7149_v17 = vld [vmem:[%s8710_s29 + $0x4d0] ss:$28 sps:$4 sm:$0xff]  }
 0x186   : > { %2105 = vmatpush1.bf16.msra.mxu0 %v7063_v18  ;;  %2146 = vmatpush1.bf16.msra.mxu1 %v7066_v19  ;;  %v7152_v18 = vld [vmem:[%s8710_s29 + $0x4d8] ss:$28 sps:$4 sm:$0xff]   ;;  %v7157_v19 = vld [vmem:[%s8710_s29 + $0x50c] ss:$28 sps:$4 sm:$0xff]  }
 0x187   : > { %2106 = vmatprep.subr.bf16.mxu0 %v7071_v20  ;;  %2147 = vmatprep.subr.bf16.mxu1 %v7074_v21  ;;  %v7160_v20 = vld [vmem:[%s8710_s29 + $0x514] ss:$28 sps:$4 sm:$0xff]   ;;  %v7155_v21 = vld [vmem:[%s8710_s29 + $0x508] ss:$28 sps:$4 sm:$0xff]  }
 0x18a   : > { %2107 = vmatpush1.bf16.msra.mxu0 %v7069_v22  ;;  %2148 = vmatpush1.bf16.msra.mxu1 %v7072_v23  ;;  %v7158_v22 = vld [vmem:[%s8710_s29 + $0x510] ss:$28 sps:$4 sm:$0xff]  }
 0x18b   : > { %2108 = vmatprep.subr.bf16.mxu0 %v7077_v24  ;;  %2149 = vmatprep.subr.bf16.mxu1 %v7080_v25  ;;  %v7163_v23 = vld [vmem:[%s8710_s29 + $0x394] ss:$28 sps:$4 sm:$0xff]  }
 0x18c   : > { %v7161_v24 = vld [vmem:[%s8710_s29 + $0x390] ss:$28 sps:$4 sm:$0xff]   ;;  %v7164_v25 = vld [vmem:[%s8710_s29 + $0x398] ss:$28 sps:$4 sm:$0xff]  }
 0x18e   : > { %2109 = vmatpush1.bf16.msra.mxu0 %v7075_v26  ;;  %2150 = vmatpush1.bf16.msra.mxu1 %v7078_v27  ;;  %v7167_v26 = vld [vmem:[%s8710_s29 + $0x3cc] ss:$28 sps:$4 sm:$0xff]  }
 0x18f   : > { %2176 = vmatprep.subr.bf16.mxu0 %v7083_v28  ;;  %6783 = vmatprep.subr.bf16.mxu1 %v7620_v37  ;;  %v7165_v27 = vld [vmem:[%s8710_s29 + $0x3c8] ss:$28 sps:$4 sm:$0xff]   ;;  %v7168_v28 = vld [vmem:[%s8710_s29 + $0x3d0] ss:$28 sps:$4 sm:$0xff]  }
 0x191   : > { %2127 = vmatmul.mubr.bf16.vlgmr.msra.gmra.mrb[8].mxu0 %v8748_v34  ;;  %2168 = vmatmul.mubr.bf16.vlgmr.msra.gmra.mrb[8].mxu1 %v8748_v34 }
 0x192   : > { %2177 = vmatpush1.bf16.msra.mxu0 %v7081_v29  ;;  %6784 = vmatpush3.bf16.msra.mxu1 %v7084_v30  ;;  %v7171_v29 = vld [vmem:[%s8710_s29 + $0x404] ss:$28 sps:$4 sm:$0xff]  }
 0x193   : > { %2178 = vmatprep.subr.bf16.mxu0 %v7087_v31  ;;  %6785 = vmatprep.subr.bf16.mxu1 %v7620_v37  ;;  %v7169_v30 = vld [vmem:[%s8710_s29 + $0x400] ss:$28 sps:$4 sm:$0xff]  }
 0x194   : > { %2208 = vmatprep.mubr.bf16.mxu0 %v7619_v0  ;;  %6799 = vmatprep.mubr.msk.bf16.mxu1 %vm7621_vm0, %v7620_v37  ;;  %v7175_v31 = vld [vmem:[%s8710_s29 + $0x43c] ss:$28 sps:$4 sm:$0xff]  }
 0x196   : > { %2179 = vmatpush1.bf16.msra.mxu0 %v7085_v32  ;;  %6786 = vmatpush3.bf16.msra.mxu1 %v7088_v33  ;;  %v7173_v32 = vld [vmem:[%s8710_s29 + $0x438] ss:$28 sps:$4 sm:$0xff]   ;;  %v7176_v33 = vld [vmem:[%s8710_s29 + $0x440] ss:$28 sps:$4 sm:$0xff]  }
 0x197   : > { %2180 = vmatprep.subr.bf16.mxu0 %v7091_v35  ;;  %6787 = vmatprep.subr.bf16.mxu1 %v7620_v37  ;;  %v7179_v35 = vld [vmem:[%s8710_s29 + $0x474] ss:$28 sps:$4 sm:$0xff]  }
 0x19a   : > { %2181 = vmatpush1.bf16.msra.mxu0 %v7089_v36  ;;  %6788 = vmatpush3.bf16.msra.mxu1 %v7092_v38  ;;  %v7177_v36 = vld [vmem:[%s8710_s29 + $0x470] ss:$28 sps:$4 sm:$0xff]   ;;  %v7180_v38 = vld [vmem:[%s8710_s29 + $0x478] ss:$28 sps:$4 sm:$0xff]  }
 0x19b   : > { %2182 = vmatprep.subr.bf16.mxu0 %v7095_v39  ;;  %6789 = vmatprep.subr.bf16.mxu1 %v7620_v37  ;;  %v7183_v39 = vld [vmem:[%s8710_s29 + $0x4ac] ss:$28 sps:$4 sm:$0xff]  }
 0x19e   : > { %2183 = vmatpush1.bf16.msra.mxu0 %v7093_v40  ;;  %6790 = vmatpush3.bf16.msra.mxu1 %v7096_v41  ;;  %v7181_v40 = vld [vmem:[%s8710_s29 + $0x4a8] ss:$28 sps:$4 sm:$0xff]   ;;  %v7184_v41 = vld [vmem:[%s8710_s29 + $0x4b0] ss:$28 sps:$4 sm:$0xff]  }
 0x19f   : > { %2184 = vmatprep.subr.bf16.mxu0 %v7099_v42  ;;  %6791 = vmatprep.subr.bf16.mxu1 %v7620_v37  ;;  %v7187_v42 = vld [vmem:[%s8710_s29 + $0x4e4] ss:$28 sps:$4 sm:$0xff]  }
 0x1a2   : > { %2185 = vmatpush1.bf16.msra.mxu0 %v7097_v43  ;;  %6792 = vmatpush3.bf16.msra.mxu1 %v7100_v44  ;;  %v7185_v43 = vld [vmem:[%s8710_s29 + $0x4e0] ss:$28 sps:$4 sm:$0xff]   ;;  %v7188_v44 = vld [vmem:[%s8710_s29 + $0x4e8] ss:$28 sps:$4 sm:$0xff]  }
 0x1a3   : > { %2186 = vmatprep.subr.bf16.mxu0 %v7103_v45  ;;  %6793 = vmatprep.subr.bf16.mxu1 %v7620_v37  ;;  %v7191_v45 = vld [vmem:[%s8710_s29 + $0x51c] ss:$28 sps:$4 sm:$0xff]  }
 0x1a6   : > { %2187 = vmatpush1.bf16.msra.mxu0 %v7101_v46  ;;  %6794 = vmatpush3.bf16.msra.mxu1 %v7104_v47  ;;  %v7189_v46 = vld [vmem:[%s8710_s29 + $0x518] ss:$28 sps:$4 sm:$0xff]   ;;  %v7192_v47 = vld [vmem:[%s8710_s29 + $0x520] ss:$28 sps:$4 sm:$0xff]  }
 0x1a7   : > { %2188 = vmatprep.subr.bf16.mxu0 %v7107_v48  ;;  %6795 = vmatprep.subr.bf16.mxu1 %v7620_v37  ;;  %v7195_v48 = vld [vmem:[%s8710_s29 + $0x544] ss:$28 sps:$4 sm:$0xff]  }
 0x1aa   : > { %2189 = vmatpush1.bf16.msra.mxu0 %v7105_v49  ;;  %6796 = vmatpush3.bf16.msra.mxu1 %v7108_v50  ;;  %v7198_v49 = vld [vmem:[%s8710_s29 + $0x54c] ss:$28 sps:$4 sm:$0xff]   ;;  %v7193_v50 = vld [vmem:[%s8710_s29 + $0x540] ss:$28 sps:$4 sm:$0xff]  }
 0x1ab   : > { %2190 = vmatprep.subr.bf16.mxu0 %v7111_v51  ;;  %6797 = vmatprep.subr.bf16.mxu1 %v7620_v37  ;;  %v7196_v51 = vld [vmem:[%s8710_s29 + $0x548] ss:$28 sps:$4 sm:$0xff]  }
 0x1ae   : > { %2191 = vmatpush1.bf16.msra.mxu0 %v7109_v52  ;;  %6798 = vmatpush3.bf16.msra.mxu1 %v7112_v53  ;;  %v7201_v52 = vld [vmem:[%s8710_s29 + $0x57c] ss:$28 sps:$4 sm:$0xff]   ;;  %v7204_v53 = vld [vmem:[%s8710_s29 + $0x584] ss:$28 sps:$4 sm:$0xff]  }
 0x1af   : > { %2617 = vmatprep.subr.bf16.mxu0 %v7115_v54  ;;  %2658 = vmatprep.subr.bf16.mxu1 %v7118_v55  ;;  %v8941_v54 = vld [vmem:[%s9465_s0] sm:$0xf]  ;;  %v7199_v55 = vld [vmem:[%s8710_s29 + $0x578] ss:$28 sps:$4 sm:$0xff]  }
 0x1b1   : > { %2209 = vmatmul.mubr.bf16.vlgmr.msra.gmra.mrb[12].mxu0 %v8748_v34  ;;  %6800 = vmatmul.mubr.bf16.vlgmr.msra.gmra.mrb[12].mxu1 %v8748_v34 }
 0x1b2   : > { %2618 = vmatpush1.bf16.msra.mxu0 %v7113_v56  ;;  %2659 = vmatpush1.bf16.msra.mxu1 %v7116_v57  ;;  %v7202_v56 = vld [vmem:[%s8710_s29 + $0x580] ss:$28 sps:$4 sm:$0xff]   ;;  %v7207_v57 = vld [vmem:[%s8710_s29 + $0x5b4] ss:$28 sps:$4 sm:$0xff]  }
 0x1b3   : > { %2619 = vmatprep.subr.bf16.mxu0 %v7121_v58  ;;  %2660 = vmatprep.subr.bf16.mxu1 %v7124_v59  ;;  %v7210_v58 = vld [vmem:[%s8710_s29 + $0x5bc] ss:$28 sps:$4 sm:$0xff]   ;;  %v7205_v59 = vld [vmem:[%s8710_s29 + $0x5b0] ss:$28 sps:$4 sm:$0xff]  }
 0x1b4   : > { %2649 = vmatprep.mubr.bf16.mxu0 %v7619_v0  ;;  %2690 = vmatprep.mubr.bf16.mxu1 %v7619_v0 }
 0x1b6   : > { %2620 = vmatpush1.bf16.msra.mxu0 %v7119_v60  ;;  %2661 = vmatpush1.bf16.msra.mxu1 %v7122_v61  ;;  %v7208_v60 = vld [vmem:[%s8710_s29 + $0x5b8] ss:$28 sps:$4 sm:$0xff]   ;;  %v7213_v61 = vld [vmem:[%s8710_s29 + $0x5ec] ss:$28 sps:$4 sm:$0xff]  }
 0x1b7   : > { %2621 = vmatprep.subr.bf16.mxu0 %v7127_v62  ;;  %2662 = vmatprep.subr.bf16.mxu1 %v7130_v63  ;;  %v7216_v62 = vld [vmem:[%s8710_s29 + $0x5f4] ss:$28 sps:$4 sm:$0xff]   ;;  %v7211_v63 = vld [vmem:[%s8710_s29 + $0x5e8] ss:$28 sps:$4 sm:$0xff]  }
 0x1ba   : > { %2622 = vmatpush1.bf16.msra.mxu0 %v7125_v1  ;;  %2663 = vmatpush1.bf16.msra.mxu1 %v7128_v2  ;;  %v7214_v1 = vld [vmem:[%s8710_s29 + $0x5f0] ss:$28 sps:$4 sm:$0xff]   ;;  %v7219_v2 = vld [vmem:[%s8710_s29 + $0x624] ss:$28 sps:$4 sm:$0xff]  }
 0x1bb   : > { %2623 = vmatprep.subr.bf16.mxu0 %v7133_v3  ;;  %2664 = vmatprep.subr.bf16.mxu1 %v7136_v4  ;;  %v7222_v3 = vld [vmem:[%s8710_s29 + $0x62c] ss:$28 sps:$4 sm:$0xff]   ;;  %v7217_v4 = vld [vmem:[%s8710_s29 + $0x620] ss:$28 sps:$4 sm:$0xff]  }
 0x1be   : > { %2624 = vmatpush1.bf16.msra.mxu0 %v7131_v5  ;;  %2665 = vmatpush1.bf16.msra.mxu1 %v7134_v6  ;;  %v7220_v5 = vld [vmem:[%s8710_s29 + $0x628] ss:$28 sps:$4 sm:$0xff]   ;;  %v7225_v6 = vld [vmem:[%s8710_s29 + $0x65c] ss:$28 sps:$4 sm:$0xff]  }
 0x1bf   : > { %2625 = vmatprep.subr.bf16.mxu0 %v7139_v7  ;;  %2666 = vmatprep.subr.bf16.mxu1 %v7142_v8  ;;  %v7228_v7 = vld [vmem:[%s8710_s29 + $0x664] ss:$28 sps:$4 sm:$0xff]   ;;  %v7223_v8 = vld [vmem:[%s8710_s29 + $0x658] ss:$28 sps:$4 sm:$0xff]  }
 0x1c2   : > { %2626 = vmatpush1.bf16.msra.mxu0 %v7137_v9  ;;  %2667 = vmatpush1.bf16.msra.mxu1 %v7140_v10  ;;  %v7226_v9 = vld [vmem:[%s8710_s29 + $0x660] ss:$28 sps:$4 sm:$0xff]   ;;  %v7231_v10 = vld [vmem:[%s8710_s29 + $0x694] ss:$28 sps:$4 sm:$0xff]  }
 0x1c3   : > { %2627 = vmatprep.subr.bf16.mxu0 %v7145_v11  ;;  %2668 = vmatprep.subr.bf16.mxu1 %v7148_v12  ;;  %v7234_v11 = vld [vmem:[%s8710_s29 + $0x69c] ss:$28 sps:$4 sm:$0xff]   ;;  %v7229_v12 = vld [vmem:[%s8710_s29 + $0x690] ss:$28 sps:$4 sm:$0xff]  }
 0x1c6   : > { %2628 = vmatpush1.bf16.msra.mxu0 %v7143_v13  ;;  %2669 = vmatpush1.bf16.msra.mxu1 %v7146_v14  ;;  %v7232_v13 = vld [vmem:[%s8710_s29 + $0x698] ss:$28 sps:$4 sm:$0xff]   ;;  %v7237_v14 = vld [vmem:[%s8710_s29 + $0x6cc] ss:$28 sps:$4 sm:$0xff]  }
 0x1c7   : > { %2629 = vmatprep.subr.bf16.mxu0 %v7151_v15  ;;  %2670 = vmatprep.subr.bf16.mxu1 %v7154_v16  ;;  %v7240_v15 = vld [vmem:[%s8710_s29 + $0x6d4] ss:$28 sps:$4 sm:$0xff]   ;;  %v7235_v16 = vld [vmem:[%s8710_s29 + $0x6c8] ss:$28 sps:$4 sm:$0xff]  }
 0x1ca   : > { %2630 = vmatpush1.bf16.msra.mxu0 %v7149_v17  ;;  %2671 = vmatpush1.bf16.msra.mxu1 %v7152_v18  ;;  %v7238_v17 = vld [vmem:[%s8710_s29 + $0x6d0] ss:$28 sps:$4 sm:$0xff]  }
 0x1cb   : > { %2631 = vmatprep.subr.bf16.mxu0 %v7157_v19  ;;  %2672 = vmatprep.subr.bf16.mxu1 %v7160_v20  ;;  %v7243_v18 = vld [vmem:[%s8710_s29 + $0x554] ss:$28 sps:$4 sm:$0xff]  }
 0x1cc   : > { %v7241_v19 = vld [vmem:[%s8710_s29 + $0x550] ss:$28 sps:$4 sm:$0xff]   ;;  %v7244_v20 = vld [vmem:[%s8710_s29 + $0x558] ss:$28 sps:$4 sm:$0xff]  }
 0x1ce   : > { %2632 = vmatpush1.bf16.msra.mxu0 %v7155_v21  ;;  %2673 = vmatpush1.bf16.msra.mxu1 %v7158_v22  ;;  %v7247_v21 = vld [vmem:[%s8710_s29 + $0x58c] ss:$28 sps:$4 sm:$0xff]  }
 0x1cf   : > { %2699 = vmatprep.subr.bf16.mxu0 %v7163_v23  ;;  %6803 = vmatprep.subr.bf16.mxu1 %v7620_v37  ;;  %v7245_v22 = vld [vmem:[%s8710_s29 + $0x588] ss:$28 sps:$4 sm:$0xff]   ;;  %v7248_v23 = vld [vmem:[%s8710_s29 + $0x590] ss:$28 sps:$4 sm:$0xff]  }
 0x1d1   : > { %2650 = vmatmul.mubr.bf16.vlgmr.msra.gmra.mrb[16].mxu0 %v8748_v34  ;;  %2691 = vmatmul.mubr.bf16.vlgmr.msra.gmra.mrb[16].mxu1 %v8748_v34  ;;  %v7172_v34 = vld [vmem:[%s8710_s29 + $0x408] ss:$28 sps:$4 sm:$0xff]  }
 0x1d2   : > { %2700 = vmatpush1.bf16.msra.mxu0 %v7161_v24  ;;  %6804 = vmatpush3.bf16.msra.mxu1 %v7164_v25  ;;  %v7251_v24 = vld [vmem:[%s8710_s29 + $0x5c4] ss:$28 sps:$4 sm:$0xff]  }
 0x1d3   : > { %2701 = vmatprep.subr.bf16.mxu0 %v7167_v26  ;;  %6805 = vmatprep.subr.bf16.mxu1 %v7620_v37  ;;  %v7249_v25 = vld [vmem:[%s8710_s29 + $0x5c0] ss:$28 sps:$4 sm:$0xff]   ;;  %v7252_v26 = vld [vmem:[%s8710_s29 + $0x5c8] ss:$28 sps:$4 sm:$0xff]  }
 0x1d4   : > { %2731 = vmatprep.mubr.bf16.mxu0 %v7619_v0  ;;  %6819 = vmatprep.mubr.msk.bf16.mxu1 %vm7621_vm0, %v7620_v37 }
 0x1d6   : > { %2702 = vmatpush1.bf16.msra.mxu0 %v7165_v27  ;;  %6806 = vmatpush3.bf16.msra.mxu1 %v7168_v28  ;;  %v7255_v27 = vld [vmem:[%s8710_s29 + $0x5fc] ss:$28 sps:$4 sm:$0xff]  }
 0x1d7   : > { %2703 = vmatprep.subr.bf16.mxu0 %v7171_v29  ;;  %6807 = vmatprep.subr.bf16.mxu1 %v7620_v37  ;;  %v7253_v28 = vld [vmem:[%s8710_s29 + $0x5f8] ss:$28 sps:$4 sm:$0xff]   ;;  %v7256_v29 = vld [vmem:[%s8710_s29 + $0x600] ss:$28 sps:$4 sm:$0xff]  }
 0x1da   : > { %2704 = vmatpush1.bf16.msra.mxu0 %v7169_v30  ;;  %6808 = vmatpush3.bf16.msra.mxu1 %v7172_v34  ;;  %v7259_v30 = vld [vmem:[%s8710_s29 + $0x634] ss:$28 sps:$4 sm:$0xff]  }
 0x1db   : > { %2705 = vmatprep.subr.bf16.mxu0 %v7175_v31  ;;  %6809 = vmatprep.subr.bf16.mxu1 %v7620_v37  ;;  %v7257_v34 = vld [vmem:[%s8710_s29 + $0x630] ss:$28 sps:$4 sm:$0xff]   ;;  %v7260_v31 = vld [vmem:[%s8710_s29 + $0x638] ss:$28 sps:$4 sm:$0xff]  }
 0x1de   : > { %2706 = vmatpush1.bf16.msra.mxu0 %v7173_v32  ;;  %6810 = vmatpush3.bf16.msra.mxu1 %v7176_v33  ;;  %v7263_v32 = vld [vmem:[%s8710_s29 + $0x66c] ss:$28 sps:$4 sm:$0xff]  }
 0x1df   : > { %2707 = vmatprep.subr.bf16.mxu0 %v7179_v35  ;;  %6811 = vmatprep.subr.bf16.mxu1 %v7620_v37  ;;  %v7261_v33 = vld [vmem:[%s8710_s29 + $0x668] ss:$28 sps:$4 sm:$0xff]   ;;  %v7264_v35 = vld [vmem:[%s8710_s29 + $0x670] ss:$28 sps:$4 sm:$0xff]  }
 0x1e2   : > { %2708 = vmatpush1.bf16.msra.mxu0 %v7177_v36  ;;  %6812 = vmatpush3.bf16.msra.mxu1 %v7180_v38  ;;  %v7267_v36 = vld [vmem:[%s8710_s29 + $0x6a4] ss:$28 sps:$4 sm:$0xff]  }
 0x1e3   : > { %2709 = vmatprep.subr.bf16.mxu0 %v7183_v39  ;;  %6813 = vmatprep.subr.bf16.mxu1 %v7620_v37 }
 0x1e6   : > { %2710 = vmatpush1.bf16.msra.mxu0 %v7181_v40  ;;  %6814 = vmatpush3.bf16.msra.mxu1 %v7184_v41  ;;  %v7265_v40 = vld [vmem:[%s8710_s29 + $0x6a0] ss:$28 sps:$4 sm:$0xff]   ;;  %v7268_v41 = vld [vmem:[%s8710_s29 + $0x6a8] ss:$28 sps:$4 sm:$0xff]  }
 0x1e7   : > { %2711 = vmatprep.subr.bf16.mxu0 %v7187_v42  ;;  %6815 = vmatprep.subr.bf16.mxu1 %v7620_v37 }
 0x1ea   : > { %2712 = vmatpush1.bf16.msra.mxu0 %v7185_v43  ;;  %6816 = vmatpush3.bf16.msra.mxu1 %v7188_v44 }
 0x1eb   : > { %2713 = vmatprep.subr.bf16.mxu0 %v7191_v45  ;;  %6817 = vmatprep.subr.bf16.mxu1 %v7620_v37 }
 0x1ee   : > { %2714 = vmatpush1.bf16.msra.mxu0 %v7189_v46  ;;  %6818 = vmatpush3.bf16.msra.mxu1 %v7192_v47 }
 0x1ef   : > { %3140 = vmatprep.subr.bf16.mxu0 %v7195_v48  ;;  %3181 = vmatprep.subr.bf16.mxu1 %v7198_v49  ;;  %v7271_v48 = vld [vmem:[%s8710_s29 + $0x6dc] ss:$28 sps:$4 sm:$0xff]  }
 0x1f0   : > { %v7269_v49 = vld [vmem:[%s8710_s29 + $0x6d8] ss:$28 sps:$4 sm:$0xff]  }
 0x1f1   : > { %2732 = vmatmul.mubr.bf16.vlgmr.msra.gmra.mrb[20].mxu0 %v8941_v54  ;;  %6820 = vmatmul.mubr.bf16.vlgmr.msra.gmra.mrb[20].mxu1 %v8941_v54 }
 0x1f2   : > { %3141 = vmatpush1.bf16.msra.mxu0 %v7193_v50  ;;  %3182 = vmatpush1.bf16.msra.mxu1 %v7196_v51  ;;  %v7272_v50 = vld [vmem:[%s8710_s29 + $0x6e0] ss:$28 sps:$4 sm:$0xff]  }
 0x1f3   : > { %3142 = vmatprep.subr.bf16.mxu0 %v7201_v52  ;;  %3183 = vmatprep.subr.bf16.mxu1 %v7204_v53  ;;  %v7275_v51 = vld [vmem:[%s8710_s29 + $0x704] ss:$28 sps:$4 sm:$0xff]   ;;  %v7278_v52 = vld [vmem:[%s8710_s29 + $0x70c] ss:$28 sps:$4 sm:$0xff]  }
 0x1f4   : > { %3172 = vmatprep.mubr.bf16.mxu0 %v7619_v0  ;;  %3213 = vmatprep.mubr.bf16.mxu1 %v7619_v0  ;;  %v7273_v53 = vld [vmem:[%s8710_s29 + $0x700] ss:$28 sps:$4 sm:$0xff]  }
 0x1f6   : > { %3143 = vmatpush1.bf16.msra.mxu0 %v7199_v55  ;;  %3184 = vmatpush1.bf16.msra.mxu1 %v7202_v56  ;;  %v7276_v55 = vld [vmem:[%s8710_s29 + $0x708] ss:$28 sps:$4 sm:$0xff]   ;;  %v7281_v56 = vld [vmem:[%s8710_s29 + $0x73c] ss:$28 sps:$4 sm:$0xff]  }
 0x1f7   : > { %3144 = vmatprep.subr.bf16.mxu0 %v7207_v57  ;;  %3185 = vmatprep.subr.bf16.mxu1 %v7210_v58  ;;  %v7284_v57 = vld [vmem:[%s8710_s29 + $0x744] ss:$28 sps:$4 sm:$0xff]   ;;  %v7279_v58 = vld [vmem:[%s8710_s29 + $0x738] ss:$28 sps:$4 sm:$0xff]  }
 0x1fa   : > { %3145 = vmatpush1.bf16.msra.mxu0 %v7205_v59  ;;  %3186 = vmatpush1.bf16.msra.mxu1 %v7208_v60  ;;  %v7282_v59 = vld [vmem:[%s8710_s29 + $0x740] ss:$28 sps:$4 sm:$0xff]   ;;  %v7287_v60 = vld [vmem:[%s8710_s29 + $0x774] ss:$28 sps:$4 sm:$0xff]  }
 0x1fb   : > { %3146 = vmatprep.subr.bf16.mxu0 %v7213_v61  ;;  %3187 = vmatprep.subr.bf16.mxu1 %v7216_v62  ;;  %v7290_v61 = vld [vmem:[%s8710_s29 + $0x77c] ss:$28 sps:$4 sm:$0xff]   ;;  %v7285_v62 = vld [vmem:[%s8710_s29 + $0x770] ss:$28 sps:$4 sm:$0xff]  }
 0x1fe   : > { %3147 = vmatpush1.bf16.msra.mxu0 %v7211_v63  ;;  %3188 = vmatpush1.bf16.msra.mxu1 %v7214_v1  ;;  %v7288_v63 = vld [vmem:[%s8710_s29 + $0x778] ss:$28 sps:$4 sm:$0xff]   ;;  %v7293_v1 = vld [vmem:[%s8710_s29 + $0x7ac] ss:$28 sps:$4 sm:$0xff]  }
 0x1ff   : > { %3148 = vmatprep.subr.bf16.mxu0 %v7219_v2  ;;  %3189 = vmatprep.subr.bf16.mxu1 %v7222_v3  ;;  %v7296_v2 = vld [vmem:[%s8710_s29 + $0x7b4] ss:$28 sps:$4 sm:$0xff]   ;;  %v7291_v3 = vld [vmem:[%s8710_s29 + $0x7a8] ss:$28 sps:$4 sm:$0xff]  }
 0x202   : > { %3149 = vmatpush1.bf16.msra.mxu0 %v7217_v4  ;;  %3190 = vmatpush1.bf16.msra.mxu1 %v7220_v5  ;;  %v7294_v4 = vld [vmem:[%s8710_s29 + $0x7b0] ss:$28 sps:$4 sm:$0xff]   ;;  %v7299_v5 = vld [vmem:[%s8710_s29 + $0x7e4] ss:$28 sps:$4 sm:$0xff]  }
 0x203   : > { %3150 = vmatprep.subr.bf16.mxu0 %v7225_v6  ;;  %3191 = vmatprep.subr.bf16.mxu1 %v7228_v7  ;;  %v7302_v6 = vld [vmem:[%s8710_s29 + $0x7ec] ss:$28 sps:$4 sm:$0xff]   ;;  %v7297_v7 = vld [vmem:[%s8710_s29 + $0x7e0] ss:$28 sps:$4 sm:$0xff]  }
 0x206   : > { %3151 = vmatpush1.bf16.msra.mxu0 %v7223_v8  ;;  %3192 = vmatpush1.bf16.msra.mxu1 %v7226_v9  ;;  %v7300_v8 = vld [vmem:[%s8710_s29 + $0x7e8] ss:$28 sps:$4 sm:$0xff]   ;;  %v7305_v9 = vld [vmem:[%s8710_s29 + $0x81c] ss:$28 sps:$4 sm:$0xff]  }
 0x207   : > { %3152 = vmatprep.subr.bf16.mxu0 %v7231_v10  ;;  %3193 = vmatprep.subr.bf16.mxu1 %v7234_v11  ;;  %v7308_v10 = vld [vmem:[%s8710_s29 + $0x824] ss:$28 sps:$4 sm:$0xff]   ;;  %v7303_v11 = vld [vmem:[%s8710_s29 + $0x818] ss:$28 sps:$4 sm:$0xff]  }
 0x20a   : > { %3153 = vmatpush1.bf16.msra.mxu0 %v7229_v12  ;;  %3194 = vmatpush1.bf16.msra.mxu1 %v7232_v13  ;;  %v7306_v12 = vld [vmem:[%s8710_s29 + $0x820] ss:$28 sps:$4 sm:$0xff]   ;;  %v7311_v13 = vld [vmem:[%s8710_s29 + $0x854] ss:$28 sps:$4 sm:$0xff]  }
 0x20b   : > { %3154 = vmatprep.subr.bf16.mxu0 %v7237_v14  ;;  %3195 = vmatprep.subr.bf16.mxu1 %v7240_v15  ;;  %v7314_v14 = vld [vmem:[%s8710_s29 + $0x85c] ss:$28 sps:$4 sm:$0xff]  }
 0x20e   : > { %3155 = vmatpush1.bf16.msra.mxu0 %v7235_v16  ;;  %3196 = vmatpush1.bf16.msra.mxu1 %v7238_v17  ;;  %v7309_v17 = vld [vmem:[%s8710_s29 + $0x850] ss:$28 sps:$4 sm:$0xff]  }
 0x20f   : > { %3222 = vmatprep.subr.bf16.mxu0 %v7243_v18  ;;  %6823 = vmatprep.subr.bf16.mxu1 %v7620_v37  ;;  %v7312_v18 = vld [vmem:[%s8710_s29 + $0x858] ss:$28 sps:$4 sm:$0xff]  }
 0x211   : > { %3173 = vmatmul.mubr.bf16.vlgmr.msra.gmra.mrb[24].mxu0 %v8941_v54  ;;  %3214 = vmatmul.mubr.bf16.vlgmr.msra.gmra.mrb[24].mxu1 %v8941_v54 }
 0x212   : > { %3223 = vmatpush1.bf16.msra.mxu0 %v7241_v19  ;;  %6824 = vmatpush3.bf16.msra.mxu1 %v7244_v20 }
 0x213   : > { %3224 = vmatprep.subr.bf16.mxu0 %v7247_v21  ;;  %6825 = vmatprep.subr.bf16.mxu1 %v7620_v37 }
 0x214   : > { %3254 = vmatprep.mubr.bf16.mxu0 %v7619_v0  ;;  %6839 = vmatprep.mubr.msk.bf16.mxu1 %vm7621_vm0, %v7620_v37 }
 0x216   : > { %3225 = vmatpush1.bf16.msra.mxu0 %v7245_v22  ;;  %6826 = vmatpush3.bf16.msra.mxu1 %v7248_v23 }
 0x217   : > { %3226 = vmatprep.subr.bf16.mxu0 %v7251_v24  ;;  %6827 = vmatprep.subr.bf16.mxu1 %v7620_v37 }
 0x21a   : > { %3227 = vmatpush1.bf16.msra.mxu0 %v7249_v25  ;;  %6828 = vmatpush3.bf16.msra.mxu1 %v7252_v26  ;;  %v7317_v25 = vld [vmem:[%s8710_s29 + $0x88c] ss:$28 sps:$4 sm:$0xff]   ;;  %v7320_v26 = vld [vmem:[%s8710_s29 + $0x894] ss:$28 sps:$4 sm:$0xff]  }
 0x21b   : > { %3228 = vmatprep.subr.bf16.mxu0 %v7255_v27  ;;  %6829 = vmatprep.subr.bf16.mxu1 %v7620_v37  ;;  %v7315_v27 = vld [vmem:[%s8710_s29 + $0x888] ss:$28 sps:$4 sm:$0xff]  }
 0x21e   : > { %3229 = vmatpush1.bf16.msra.mxu0 %v7253_v28  ;;  %6830 = vmatpush3.bf16.msra.mxu1 %v7256_v29  ;;  %v7318_v28 = vld [vmem:[%s8710_s29 + $0x890] ss:$28 sps:$4 sm:$0xff]  }
 0x21f   : > { %3230 = vmatprep.subr.bf16.mxu0 %v7259_v30  ;;  %6831 = vmatprep.subr.bf16.mxu1 %v7620_v37  ;;  %v7323_v29 = vld [vmem:[%s8710_s29 + $0x714] ss:$28 sps:$4 sm:$0xff]  }
 0x220   : > { %v7321_v30 = vld [vmem:[%s8710_s29 + $0x710] ss:$28 sps:$4 sm:$0xff]  }
 0x222   : > { %3231 = vmatpush1.bf16.msra.mxu0 %v7257_v34  ;;  %6832 = vmatpush3.bf16.msra.mxu1 %v7260_v31  ;;  %v7324_v34 = vld [vmem:[%s8710_s29 + $0x718] ss:$28 sps:$4 sm:$0xff]   ;;  %v7327_v31 = vld [vmem:[%s8710_s29 + $0x74c] ss:$28 sps:$4 sm:$0xff]  }
 0x223   : > { %3232 = vmatprep.subr.bf16.mxu0 %v7263_v32  ;;  %6833 = vmatprep.subr.bf16.mxu1 %v7620_v37  ;;  %v7325_v32 = vld [vmem:[%s8710_s29 + $0x748] ss:$28 sps:$4 sm:$0xff]  }
 0x224   : > { %v9003_v38 = vpop.f32.mrb[0].mxu0  ;;  %v9005_v39 = vpop.f32.mrb[0].mxu1 }
 0x225   : > { %v9009_v42 = vpop.f32.mrb[1].mxu0  ;;  %v9011_v43 = vpop.f32.mrb[1].mxu1 }
 0x226   : > { %v1616_v44 = vpop.f32.mrb[2].mxu0  ;;  %v1657_v45 = vpop.f32.mrb[2].mxu1  ;;  %3233 = vmatpush1.bf16.msra.mxu0 %v7261_v33  ;;  %6834 = vmatpush3.bf16.msra.mxu1 %v7264_v35  ;;  %v7328_v33 = vld [vmem:[%s8710_s29 + $0x750] ss:$28 sps:$4 sm:$0xff]   ;;  %v7331_v35 = vld [vmem:[%s8710_s29 + $0x784] ss:$28 sps:$4 sm:$0xff]  }
 0x227   : > { %v1617_v46 = vpop.f32.mrb[3].mxu0  ;;  %v1658_v47 = vpop.f32.mrb[3].mxu1  ;;  %3234 = vmatprep.subr.bf16.mxu0 %v7267_v36  ;;  %6835 = vmatprep.subr.bf16.mxu1 %v7620_v37  ;;  %v7329_v36 = vld [vmem:[%s8710_s29 + $0x780] ss:$28 sps:$4 sm:$0xff]   ;;  %v7333_v44 = vld [vmem:[%s8710_s29 + $0x7b8] ss:$28 sps:$4 sm:$0xff]  }
 0x228   : > { %v7336_v45 = vld [vmem:[%s8710_s29 + $0x7c0] ss:$28 sps:$4 sm:$0xff]   ;;  %v7339_v46 = vld [vmem:[%s8710_s29 + $0x7f4] ss:$28 sps:$4 sm:$0xff]  }
 0x229   : > { %v7337_v47 = vld [vmem:[%s8710_s29 + $0x7f0] ss:$28 sps:$4 sm:$0xff]  }
 0x22a   : > { %3235 = vmatpush1.bf16.msra.mxu0 %v7265_v40  ;;  %6836 = vmatpush3.bf16.msra.mxu1 %v7268_v41  ;;  %v7332_v40 = vld [vmem:[%s8710_s29 + $0x788] ss:$28 sps:$4 sm:$0xff]   ;;  %v7335_v41 = vld [vmem:[%s8710_s29 + $0x7bc] ss:$28 sps:$4 sm:$0xff]  }
 0x22b   : > { %3236 = vmatprep.subr.bf16.mxu0 %v7271_v48  ;;  %6837 = vmatprep.subr.bf16.mxu1 %v7620_v37  ;;  %v7340_v48 = vld [vmem:[%s8710_s29 + $0x7f8] ss:$28 sps:$4 sm:$0xff]  }
 0x22e   : > { %3237 = vmatpush1.bf16.msra.mxu0 %v7269_v49  ;;  %6838 = vmatpush3.bf16.msra.mxu1 %v7272_v50  ;;  %v7343_v49 = vld [vmem:[%s8710_s29 + $0x82c] ss:$28 sps:$4 sm:$0xff]  }
 0x22f   : > { %3663 = vmatprep.subr.bf16.mxu0 %v7275_v51  ;;  %3704 = vmatprep.subr.bf16.mxu1 %v7278_v52  ;;  %v7341_v50 = vld [vmem:[%s8710_s29 + $0x828] ss:$28 sps:$4 sm:$0xff]   ;;  %v7344_v51 = vld [vmem:[%s8710_s29 + $0x830] ss:$28 sps:$4 sm:$0xff]  }
 0x230   : > { %v7347_v52 = vld [vmem:[%s8710_s29 + $0x864] ss:$28 sps:$4 sm:$0xff]  }
 0x231   : > { %3255 = vmatmul.mubr.bf16.vlgmr.msra.gmra.mrb[28].mxu0 %v8941_v54  ;;  %6840 = vmatmul.mubr.bf16.vlgmr.msra.gmra.mrb[28].mxu1 %v8941_v54 }
 0x232   : > { %3664 = vmatpush1.bf16.msra.mxu0 %v7273_v53  ;;  %3705 = vmatpush1.bf16.msra.mxu1 %v7276_v55 }
 0x233   : > { %3665 = vmatprep.subr.bf16.mxu0 %v7281_v56  ;;  %3706 = vmatprep.subr.bf16.mxu1 %v7284_v57 }
 0x234   : > { %3695 = vmatprep.mubr.bf16.mxu0 %v7619_v0  ;;  %3736 = vmatprep.mubr.bf16.mxu1 %v7619_v0 }
 0x236   : > { %3666 = vmatpush1.bf16.msra.mxu0 %v7279_v58  ;;  %3707 = vmatpush1.bf16.msra.mxu1 %v7282_v59 }
 0x237   : > { %3667 = vmatprep.subr.bf16.mxu0 %v7287_v60  ;;  %3708 = vmatprep.subr.bf16.mxu1 %v7290_v61 }
 0x23a   : > { %3668 = vmatpush1.bf16.msra.mxu0 %v7285_v62  ;;  %3709 = vmatpush1.bf16.msra.mxu1 %v7288_v63 }
 0x23b   : > { %3669 = vmatprep.subr.bf16.mxu0 %v7293_v1  ;;  %3710 = vmatprep.subr.bf16.mxu1 %v7296_v2  ;;  %v7345_v1 = vld [vmem:[%s8710_s29 + $0x860] ss:$28 sps:$4 sm:$0xff]   ;;  %v7348_v2 = vld [vmem:[%s8710_s29 + $0x868] ss:$28 sps:$4 sm:$0xff]  }
 0x23e   : > { %3670 = vmatpush1.bf16.msra.mxu0 %v7291_v3  ;;  %3711 = vmatpush1.bf16.msra.mxu1 %v7294_v4 }
 0x23f   : > { %3671 = vmatprep.subr.bf16.mxu0 %v7299_v5  ;;  %3712 = vmatprep.subr.bf16.mxu1 %v7302_v6  ;;  %v7351_v5 = vld [vmem:[%s8710_s29 + $0x89c] ss:$28 sps:$4 sm:$0xff]  }
 0x240   : > { %v7349_v6 = vld [vmem:[%s8710_s29 + $0x898] ss:$28 sps:$4 sm:$0xff]  }
 0x242   : > { %3672 = vmatpush1.bf16.msra.mxu0 %v7297_v7  ;;  %3713 = vmatpush1.bf16.msra.mxu1 %v7300_v8  ;;  %v7352_v7 = vld [vmem:[%s8710_s29 + $0x8a0] ss:$28 sps:$4 sm:$0xff]  }
 0x243   : > { %3673 = vmatprep.subr.bf16.mxu0 %v7305_v9  ;;  %3714 = vmatprep.subr.bf16.mxu1 %v7308_v10  ;;  %v7355_v8 = vld [vmem:[%s8710_s29 + $0x8c4] ss:$28 sps:$4 sm:$0xff]   ;;  %v7358_v9 = vld [vmem:[%s8710_s29 + $0x8cc] ss:$28 sps:$4 sm:$0xff]  }
 0x244   : > { %v9048_v15 = vpop.f32.mrb[4].mxu0  ;;  %v9050_v16 = vpop.f32.mrb[4].mxu1  ;;  %v7353_v10 = vld [vmem:[%s8710_s29 + $0x8c0] ss:$28 sps:$4 sm:$0xff]  }
 0x245   : > { %v9054_v19 = vpop.f32.mrb[5].mxu0  ;;  %v6781_v20 = vpop.f32.mrb[5].mxu1 }
 0x246   : > { %v1698_v21 = vpop.f32.mrb[6].mxu0  ;;  %v1738_v22 = vpop.f32.mrb[6].mxu1  ;;  %3674 = vmatpush1.bf16.msra.mxu0 %v7303_v11  ;;  %3715 = vmatpush1.bf16.msra.mxu1 %v7306_v12  ;;  %v7356_v11 = vld [vmem:[%s8710_s29 + $0x8c8] ss:$28 sps:$4 sm:$0xff]   ;;  %v7361_v12 = vld [vmem:[%s8710_s29 + $0x8fc] ss:$28 sps:$4 sm:$0xff]  }
 0x247   : > { %v1699_v23 = vpop.f32.mrb[7].mxu0  ;;  %v6782_v24 = vpop.f32.mrb[7].mxu1  ;;  %3675 = vmatprep.subr.bf16.mxu0 %v7311_v13  ;;  %3716 = vmatprep.subr.bf16.mxu1 %v7314_v14  ;;  %v7364_v13 = vld [vmem:[%s8710_s29 + $0x904] ss:$28 sps:$4 sm:$0xff]   ;;  %v7359_v14 = vld [vmem:[%s8710_s29 + $0x8f8] ss:$28 sps:$4 sm:$0xff]  }
 0x248   : > { %v7370_v20 = vld [vmem:[%s8710_s29 + $0x93c] ss:$28 sps:$4 sm:$0xff]   ;;  %v7373_v22 = vld [vmem:[%s8710_s29 + $0x96c] ss:$28 sps:$4 sm:$0xff]   ;;  %v7376_v23 = vld [vmem:[%s8710_s29 + $0x974] ss:$28 sps:$4 sm:$0xff]  }
 0x249   : > { %v7368_v21 = vld [vmem:[%s8710_s29 + $0x938] ss:$28 sps:$4 sm:$0xff]   ;;  %v7371_v24 = vld [vmem:[%s8710_s29 + $0x968] ss:$28 sps:$4 sm:$0xff]  }
 0x24a   : > { %3676 = vmatpush1.bf16.msra.mxu0 %v7309_v17  ;;  %3717 = vmatpush1.bf16.msra.mxu1 %v7312_v18  ;;  %v7362_v17 = vld [vmem:[%s8710_s29 + $0x900] ss:$28 sps:$4 sm:$0xff]   ;;  %v7367_v18 = vld [vmem:[%s8710_s29 + $0x934] ss:$28 sps:$4 sm:$0xff]  }
 0x24b   : > { %3677 = vmatprep.subr.bf16.mxu0 %v7317_v25  ;;  %3718 = vmatprep.subr.bf16.mxu1 %v7320_v26  ;;  %v7374_v25 = vld [vmem:[%s8710_s29 + $0x970] ss:$28 sps:$4 sm:$0xff]   ;;  %v7379_v26 = vld [vmem:[%s8710_s29 + $0x9a4] ss:$28 sps:$4 sm:$0xff]  }
 0x24e   : > { %3678 = vmatpush1.bf16.msra.mxu0 %v7315_v27  ;;  %3719 = vmatpush1.bf16.msra.mxu1 %v7318_v28  ;;  %v7382_v27 = vld [vmem:[%s8710_s29 + $0x9ac] ss:$28 sps:$4 sm:$0xff]   ;;  %v7377_v28 = vld [vmem:[%s8710_s29 + $0x9a0] ss:$28 sps:$4 sm:$0xff]  }
 0x24f   : > { %3745 = vmatprep.subr.bf16.mxu0 %v7323_v29  ;;  %6843 = vmatprep.subr.bf16.mxu1 %v7620_v37  ;;  %v7380_v29 = vld [vmem:[%s8710_s29 + $0x9a8] ss:$28 sps:$4 sm:$0xff]  }
 0x251   : > { %3696 = vmatmul.mubr.bf16.vlgmr.msra.gmra.mrb[32].mxu0 %v8941_v54  ;;  %3737 = vmatmul.mubr.bf16.vlgmr.msra.gmra.mrb[32].mxu1 %v8941_v54 }
 0x252   : > { %3746 = vmatpush1.bf16.msra.mxu0 %v7321_v30  ;;  %6844 = vmatpush3.bf16.msra.mxu1 %v7324_v34  ;;  %v7385_v30 = vld [vmem:[%s8710_s29 + $0x9dc] ss:$28 sps:$4 sm:$0xff]   ;;  %v7388_v34 = vld [vmem:[%s8710_s29 + $0x9e4] ss:$28 sps:$4 sm:$0xff]  }
 0x253   : > { %3747 = vmatprep.subr.bf16.mxu0 %v7327_v31  ;;  %6845 = vmatprep.subr.bf16.mxu1 %v7620_v37  ;;  %v7383_v31 = vld [vmem:[%s8710_s29 + $0x9d8] ss:$28 sps:$4 sm:$0xff]  }
 0x254   : > { %3777 = vmatprep.mubr.bf16.mxu0 %v7619_v0  ;;  %6859 = vmatprep.mubr.msk.bf16.mxu1 %vm7621_vm0, %v7620_v37 }
 0x256   : > { %3748 = vmatpush1.bf16.msra.mxu0 %v7325_v32  ;;  %6846 = vmatpush3.bf16.msra.mxu1 %v7328_v33  ;;  %v7386_v32 = vld [vmem:[%s8710_s29 + $0x9e0] ss:$28 sps:$4 sm:$0xff]   ;;  %v7391_v33 = vld [vmem:[%s8710_s29 + $0xa14] ss:$28 sps:$4 sm:$0xff]  }
 0x257   : > { %3749 = vmatprep.subr.bf16.mxu0 %v7331_v35  ;;  %6847 = vmatprep.subr.bf16.mxu1 %v7620_v37  ;;  %v7394_v35 = vld [vmem:[%s8710_s29 + $0xa1c] ss:$28 sps:$4 sm:$0xff]  }
 0x25a   : > { %3750 = vmatpush1.bf16.msra.mxu0 %v7329_v36  ;;  %6848 = vmatpush3.bf16.msra.mxu1 %v7332_v40 }
 0x25b   : > { %3751 = vmatprep.subr.bf16.mxu0 %v7335_v41  ;;  %6849 = vmatprep.subr.bf16.mxu1 %v7620_v37 }
 0x25e   : > { %3752 = vmatpush1.bf16.msra.mxu0 %v7333_v44  ;;  %6850 = vmatpush3.bf16.msra.mxu1 %v7336_v45 }
 0x25f   : > { %3753 = vmatprep.subr.bf16.mxu0 %v7339_v46  ;;  %6851 = vmatprep.subr.bf16.mxu1 %v7620_v37 }
 0x262   : > { %3754 = vmatpush1.bf16.msra.mxu0 %v7337_v47  ;;  %6852 = vmatpush3.bf16.msra.mxu1 %v7340_v48 }
 0x263   : > { %3755 = vmatprep.subr.bf16.mxu0 %v7343_v49  ;;  %6853 = vmatprep.subr.bf16.mxu1 %v7620_v37 }
 0x264   : > { %v9090_v53 = vpop.f32.mrb[8].mxu0  ;;  %v9092_v55 = vpop.f32.mrb[8].mxu1 }
 0x265   : > { %v2257_v56 = vmax.f32 %v9003_v38, %v9090_v53  ;;  %v2259_v57 = vmax.f32 %v9005_v39, %v9092_v55  ;;  %v9098_v58 = vpop.f32.mrb[9].mxu0  ;;  %v9100_v59 = vpop.f32.mrb[9].mxu1  ;;  %v7425_v39 = vld [vmem:[%s8710_s29 + $0xa20] ss:$28 sps:$4 sm:$0xff]   ;;  %v7428_v55 = vld [vmem:[%s8710_s29 + $0xa28] ss:$28 sps:$4 sm:$0xff]  }
 0x266   : > { %v2258_v60 = vmax.f32 %v9009_v42, %v9098_v58  ;;  %v2260_v61 = vmax.f32 %v9011_v43, %v9100_v59  ;;  %v2132_v62 = vpop.f32.mrb[10].mxu0  ;;  %v2173_v63 = vpop.f32.mrb[10].mxu1  ;;  %3756 = vmatpush1.bf16.msra.mxu0 %v7341_v50  ;;  %6854 = vmatpush3.bf16.msra.mxu1 %v7344_v51  ;;  %v7389_v50 = vld [vmem:[%s8710_s29 + $0xa10] ss:$28 sps:$4 sm:$0xff]   ;;  %v7392_v51 = vld [vmem:[%s8710_s29 + $0xa18] ss:$28 sps:$4 sm:$0xff]  }
 0x267   : > { %v2133_v3 = vpop.f32.mrb[11].mxu0  ;;  %v2174_v4 = vpop.f32.mrb[11].mxu1  ;;  %3757 = vmatprep.subr.bf16.mxu0 %v7347_v52  ;;  %6855 = vmatprep.subr.bf16.mxu1 %v7620_v37  ;;  %v7397_v63 = vld [vmem:[%s8710_s29 + $0xa4c] ss:$28 sps:$4 sm:$0xff]   ;;  %v7431_v43 = vld [vmem:[%s8710_s29 + $0xa5c] ss:$28 sps:$4 sm:$0xff]  }
 0x268   : > { %v7398_v3 = vld [vmem:[%s8710_s29 + $0xa50] ss:$28 sps:$4 sm:$0xff]   ;;  %v7429_v58 = vld [vmem:[%s8710_s29 + $0xa58] ss:$28 sps:$4 sm:$0xff]   ;;  %v7432_v59 = vld [vmem:[%s8710_s29 + $0xa60] ss:$28 sps:$4 sm:$0xff]  }
 0x269   : > { %v7403_v4 = vld [vmem:[%s8710_s29 + $0x8d4] ss:$28 sps:$4 sm:$0xff]  }
 0x26a   : > { %3758 = vmatpush1.bf16.msra.mxu0 %v7345_v1  ;;  %6856 = vmatpush3.bf16.msra.mxu1 %v7348_v2  ;;  %v7400_v1 = vld [vmem:[%s8710_s29 + $0xa54] ss:$28 sps:$4 sm:$0xff]   ;;  %v7395_v2 = vld [vmem:[%s8710_s29 + $0xa48] ss:$28 sps:$4 sm:$0xff]  }
 0x26b   : > { %3759 = vmatprep.subr.bf16.mxu0 %v7351_v5  ;;  %6857 = vmatprep.subr.bf16.mxu1 %v7620_v37  ;;  %v7401_v5 = vld [vmem:[%s8710_s29 + $0x8d0] ss:$28 sps:$4 sm:$0xff]  }
 0x26e   : > { %3760 = vmatpush1.bf16.msra.mxu0 %v7349_v6  ;;  %6858 = vmatpush3.bf16.msra.mxu1 %v7352_v7  ;;  %v7404_v6 = vld [vmem:[%s8710_s29 + $0x8d8] ss:$28 sps:$4 sm:$0xff]   ;;  %v7407_v7 = vld [vmem:[%s8710_s29 + $0x90c] ss:$28 sps:$4 sm:$0xff]  }
 0x26f   : > { %4186 = vmatprep.subr.bf16.mxu0 %v7355_v8  ;;  %4227 = vmatprep.subr.bf16.mxu1 %v7358_v9  ;;  %v9169_v8 = vld [vmem:[%s9465_s0] sm:$0xf]  ;;  %v7405_v9 = vld [vmem:[%s8710_s29 + $0x908] ss:$28 sps:$4 sm:$0xff]  }
 0x271   : > { %3778 = vmatmul.mubr.bf16.vlgmr.msra.gmra.mrb[36].mxu0 %v8941_v54  ;;  %6860 = vmatmul.mubr.bf16.vlgmr.msra.gmra.mrb[36].mxu1 %v8941_v54  ;;  %v7365_v54 = vld [vmem:[%s8710_s29 + $0x930] ss:$28 sps:$4 sm:$0xff]  }
 0x272   : > { %4187 = vmatpush1.bf16.msra.mxu0 %v7353_v10  ;;  %4228 = vmatpush1.bf16.msra.mxu1 %v7356_v11  ;;  %v7408_v10 = vld [vmem:[%s8710_s29 + $0x910] ss:$28 sps:$4 sm:$0xff]   ;;  %v7411_v11 = vld [vmem:[%s8710_s29 + $0x944] ss:$28 sps:$4 sm:$0xff]  }
 0x273   : > { %4188 = vmatprep.subr.bf16.mxu0 %v7361_v12  ;;  %4229 = vmatprep.subr.bf16.mxu1 %v7364_v13  ;;  %v7409_v12 = vld [vmem:[%s8710_s29 + $0x940] ss:$28 sps:$4 sm:$0xff]   ;;  %v7412_v13 = vld [vmem:[%s8710_s29 + $0x948] ss:$28 sps:$4 sm:$0xff]  }
 0x274   : > { %4218 = vmatprep.mubr.bf16.mxu0 %v7619_v0  ;;  %4259 = vmatprep.mubr.bf16.mxu1 %v7619_v0 }
 0x276   : > { %4189 = vmatpush1.bf16.msra.mxu0 %v7359_v14  ;;  %4230 = vmatpush1.bf16.msra.mxu1 %v7362_v17  ;;  %v7415_v14 = vld [vmem:[%s8710_s29 + $0x97c] ss:$28 sps:$4 sm:$0xff]  }
 0x277   : > { %4190 = vmatprep.subr.bf16.mxu0 %v7367_v18  ;;  %4231 = vmatprep.subr.bf16.mxu1 %v7370_v20  ;;  %v7413_v17 = vld [vmem:[%s8710_s29 + $0x978] ss:$28 sps:$4 sm:$0xff]   ;;  %v7416_v18 = vld [vmem:[%s8710_s29 + $0x980] ss:$28 sps:$4 sm:$0xff]  }
 0x278   : > { %v7419_v20 = vld [vmem:[%s8710_s29 + $0x9b4] ss:$28 sps:$4 sm:$0xff]  }
 0x27a   : > { %4191 = vmatpush1.bf16.msra.mxu0 %v7365_v54  ;;  %4232 = vmatpush1.bf16.msra.mxu1 %v7368_v21  ;;  %v7417_v54 = vld [vmem:[%s8710_s29 + $0x9b0] ss:$28 sps:$4 sm:$0xff]   ;;  %v7420_v21 = vld [vmem:[%s8710_s29 + $0x9b8] ss:$28 sps:$4 sm:$0xff]  }
 0x27b   : > { %4192 = vmatprep.subr.bf16.mxu0 %v7373_v22  ;;  %4233 = vmatprep.subr.bf16.mxu1 %v7376_v23  ;;  %v7423_v22 = vld [vmem:[%s8710_s29 + $0x9ec] ss:$28 sps:$4 sm:$0xff]  }
 0x27c   : > { %v7421_v23 = vld [vmem:[%s8710_s29 + $0x9e8] ss:$28 sps:$4 sm:$0xff]  }
 0x27e   : > { %4193 = vmatpush1.bf16.msra.mxu0 %v7371_v24  ;;  %4234 = vmatpush1.bf16.msra.mxu1 %v7374_v25  ;;  %v7424_v24 = vld [vmem:[%s8710_s29 + $0x9f0] ss:$28 sps:$4 sm:$0xff]   ;;  %v7427_v25 = vld [vmem:[%s8710_s29 + $0xa24] ss:$28 sps:$4 sm:$0xff]  }
 0x27f   : > { %4194 = vmatprep.subr.bf16.mxu0 %v7379_v26  ;;  %4235 = vmatprep.subr.bf16.mxu1 %v7382_v27 }
 0x282   : > { %4195 = vmatpush1.bf16.msra.mxu0 %v7377_v28  ;;  %4236 = vmatpush1.bf16.msra.mxu1 %v7380_v29 }
 0x283   : > { %4196 = vmatprep.subr.bf16.mxu0 %v7385_v30  ;;  %4237 = vmatprep.subr.bf16.mxu1 %v7388_v34 }
 0x284   : > { %v9143_v36 = vpop.f32.mrb[12].mxu0  ;;  %v9145_v40 = vpop.f32.mrb[12].mxu1 }
 0x285   : > { %v2261_v41 = vmax.f32 %v9048_v15, %v9143_v36  ;;  %v2263_v44 = vmax.f32 %v9050_v16, %v9145_v40  ;;  %v9151_v45 = vpop.f32.mrb[13].mxu0  ;;  %v6801_v46 = vpop.f32.mrb[13].mxu1  ;;  %v7469_v36 = vld [vmem:[%s8710_s29 + $0xbd0] ss:$28 sps:$4 sm:$0xff]  }
 0x286   : > { %v2262_v47 = vmax.f32 %v9054_v19, %v9151_v45  ;;  %v2214_v48 = vpop.f32.mrb[14].mxu0  ;;  %v2254_v49 = vpop.f32.mrb[14].mxu1  ;;  %4197 = vmatpush1.bf16.msra.mxu0 %v7383_v31  ;;  %4238 = vmatpush1.bf16.msra.mxu1 %v7386_v32  ;;  %v7433_v32 = vld [vmem:[%s8710_s29 + $0xa80] ss:$28 sps:$4 sm:$0xff]   ;;  %v7480_v19 = vld [vmem:[%s8710_s29 + $0xc14] ss:$28 sps:$4 sm:$0xff]  }
 0x287   : > { %v2215_v52 = vpop.f32.mrb[15].mxu0  ;;  %v6802_v62 = vpop.f32.mrb[15].mxu1  ;;  %4198 = vmatprep.subr.bf16.mxu0 %v7391_v33  ;;  %4239 = vmatprep.subr.bf16.mxu1 %v7394_v35  ;;  %v7436_v33 = vld [vmem:[%s8710_s29 + $0xa88] ss:$28 sps:$4 sm:$0xff]   ;;  %v7441_v35 = vld [vmem:[%s8710_s29 + $0xabc] ss:$28 sps:$4 sm:$0xff]  }
 0x288   : > { %v7444_v46 = vld [vmem:[%s8710_s29 + $0xac4] ss:$28 sps:$4 sm:$0xff]   ;;  %v7439_v48 = vld [vmem:[%s8710_s29 + $0xab8] ss:$28 sps:$4 sm:$0xff]   ;;  %v7445_v52 = vld [vmem:[%s8710_s29 + $0xaf0] ss:$28 sps:$4 sm:$0xff]  }
 0x289   : > { %v7442_v49 = vld [vmem:[%s8710_s29 + $0xac0] ss:$28 sps:$4 sm:$0xff]   ;;  %v7448_v62 = vld [vmem:[%s8710_s29 + $0xaf8] ss:$28 sps:$4 sm:$0xff]   ;;  %v7475_v45 = vld [vmem:[%s8710_s29 + $0xc08] ss:$28 sps:$4 sm:$0xff]  }
 0x28a   : > { %4199 = vmatpush1.bf16.msra.mxu0 %v7389_v50  ;;  %4240 = vmatpush1.bf16.msra.mxu1 %v7392_v51  ;;  %v7447_v50 = vld [vmem:[%s8710_s29 + $0xaf4] ss:$28 sps:$4 sm:$0xff]   ;;  %v7450_v51 = vld [vmem:[%s8710_s29 + $0xafc] ss:$28 sps:$4 sm:$0xff]  }
 0x28b   : > { %4200 = vmatprep.subr.bf16.mxu0 %v7397_v63  ;;  %4241 = vmatprep.subr.bf16.mxu1 %v7400_v1  ;;  %v7453_v63 = vld [vmem:[%s8710_s29 + $0xb2c] ss:$28 sps:$4 sm:$0xff]   ;;  %v7456_v1 = vld [vmem:[%s8710_s29 + $0xb34] ss:$28 sps:$4 sm:$0xff]  }
 0x28e   : > { %4201 = vmatpush1.bf16.msra.mxu0 %v7395_v2  ;;  %4242 = vmatpush1.bf16.msra.mxu1 %v7398_v3  ;;  %v7451_v2 = vld [vmem:[%s8710_s29 + $0xb28] ss:$28 sps:$4 sm:$0xff]   ;;  %v7454_v3 = vld [vmem:[%s8710_s29 + $0xb30] ss:$28 sps:$4 sm:$0xff]  }
 0x28f   : > { %4268 = vmatprep.subr.bf16.mxu0 %v7403_v4  ;;  %6863 = vmatprep.subr.bf16.mxu1 %v7620_v37  ;;  %v7459_v4 = vld [vmem:[%s8710_s29 + $0xb64] ss:$28 sps:$4 sm:$0xff]  }
 0x291   : > { %4219 = vmatmul.mubr.bf16.vlgmr.msra.gmra.mrb[40].mxu0 %v9169_v8  ;;  %4260 = vmatmul.mubr.bf16.vlgmr.msra.gmra.mrb[40].mxu1 %v9169_v8 }
 0x292   : > { %4269 = vmatpush1.bf16.msra.mxu0 %v7401_v5  ;;  %6864 = vmatpush3.bf16.msra.mxu1 %v7404_v6  ;;  %v7462_v5 = vld [vmem:[%s8710_s29 + $0xb6c] ss:$28 sps:$4 sm:$0xff]   ;;  %v7457_v6 = vld [vmem:[%s8710_s29 + $0xb60] ss:$28 sps:$4 sm:$0xff]  }
 0x293   : > { %4270 = vmatprep.subr.bf16.mxu0 %v7407_v7  ;;  %6865 = vmatprep.subr.bf16.mxu1 %v7620_v37  ;;  %v7460_v7 = vld [vmem:[%s8710_s29 + $0xb68] ss:$28 sps:$4 sm:$0xff]  }
 0x294   : > { %4300 = vmatprep.mubr.bf16.mxu0 %v7619_v0  ;;  %6879 = vmatprep.mubr.msk.bf16.mxu1 %vm7621_vm0, %v7620_v37 }
 0x296   : > { %4271 = vmatpush1.bf16.msra.mxu0 %v7405_v9  ;;  %6866 = vmatpush3.bf16.msra.mxu1 %v7408_v10  ;;  %v7465_v9 = vld [vmem:[%s8710_s29 + $0xb9c] ss:$28 sps:$4 sm:$0xff]   ;;  %v7468_v10 = vld [vmem:[%s8710_s29 + $0xba4] ss:$28 sps:$4 sm:$0xff]  }
 0x297   : > { %4272 = vmatprep.subr.bf16.mxu0 %v7411_v11  ;;  %6867 = vmatprep.subr.bf16.mxu1 %v7620_v37  ;;  %v7463_v11 = vld [vmem:[%s8710_s29 + $0xb98] ss:$28 sps:$4 sm:$0xff]  }
 0x29a   : > { %4273 = vmatpush1.bf16.msra.mxu0 %v7409_v12  ;;  %6868 = vmatpush3.bf16.msra.mxu1 %v7412_v13  ;;  %v7466_v12 = vld [vmem:[%s8710_s29 + $0xba0] ss:$28 sps:$4 sm:$0xff]   ;;  %v7471_v13 = vld [vmem:[%s8710_s29 + $0xbd4] ss:$28 sps:$4 sm:$0xff]  }
 0x29b   : > { %4274 = vmatprep.subr.bf16.mxu0 %v7415_v14  ;;  %6869 = vmatprep.subr.bf16.mxu1 %v7620_v37  ;;  %v7474_v14 = vld [vmem:[%s8710_s29 + $0xbdc] ss:$28 sps:$4 sm:$0xff]  }
 0x29e   : > { %4275 = vmatpush1.bf16.msra.mxu0 %v7413_v17  ;;  %6870 = vmatpush3.bf16.msra.mxu1 %v7416_v18 }
 0x29f   : > { %4276 = vmatprep.subr.bf16.mxu0 %v7419_v20  ;;  %6871 = vmatprep.subr.bf16.mxu1 %v7620_v37 }
 0x2a2   : > { %4277 = vmatpush1.bf16.msra.mxu0 %v7417_v54  ;;  %6872 = vmatpush3.bf16.msra.mxu1 %v7420_v21 }
 0x2a3   : > { %4278 = vmatprep.subr.bf16.mxu0 %v7423_v22  ;;  %6873 = vmatprep.subr.bf16.mxu1 %v7620_v37 }
 0x2a4   : > { %v2651_v26 = vpop.f32.mrb[16].mxu0  ;;  %v2692_v27 = vpop.f32.mrb[16].mxu1 }
 0x2a5   : > { %v9199_v28 = vmax.f32 %v2257_v56, %v2651_v26  ;;  %v9204_v29 = vmax.f32 %v2259_v57, %v2692_v27  ;;  %v2653_v30 = vpop.f32.mrb[17].mxu0  ;;  %v2694_v34 = vpop.f32.mrb[17].mxu1  ;;  %v7481_v26 = vld [vmem:[%s8710_s29 + $0xa90] ss:$28 sps:$4 sm:$0xff]   ;;  %v7484_v27 = vld [vmem:[%s8710_s29 + $0xa98] ss:$28 sps:$4 sm:$0xff]  }
 0x2a6   : > { %v9209_v31 = vmax.f32 %v2258_v60, %v2653_v30  ;;  %v9214_v38 = vmax.f32 %v2260_v61, %v2694_v34  ;;  %v2655_v53 = vpop.f32.mrb[18].mxu0  ;;  %v2696_v56 = vpop.f32.mrb[18].mxu1  ;;  %4279 = vmatpush1.bf16.msra.mxu0 %v7421_v23  ;;  %6874 = vmatpush3.bf16.msra.mxu1 %v7424_v24  ;;  %v7435_v60 = vld [vmem:[%s8710_s29 + $0xa84] ss:$28 sps:$4 sm:$0xff]   ;;  %v7438_v61 = vld [vmem:[%s8710_s29 + $0xa8c] ss:$28 sps:$4 sm:$0xff]  }
 0x2a7   : > { %v2656_v57 = vpop.f32.mrb[19].mxu0  ;;  %v2697_v42 = vpop.f32.mrb[19].mxu1  ;;  %4280 = vmatprep.subr.bf16.mxu0 %v7427_v25  ;;  %6875 = vmatprep.subr.bf16.mxu1 %v7620_v37  ;;  %v7483_v25 = vld [vmem:[%s8710_s29 + $0xa94] ss:$28 sps:$4 sm:$0xff]   ;;  %v7487_v30 = vld [vmem:[%s8710_s29 + $0xacc] ss:$28 sps:$4 sm:$0xff]  }
 0x2a8   : > { %v7485_v34 = vld [vmem:[%s8710_s29 + $0xac8] ss:$28 sps:$4 sm:$0xff]   ;;  %v7488_v53 = vld [vmem:[%s8710_s29 + $0xad0] ss:$28 sps:$4 sm:$0xff]   ;;  %v7495_v57 = vld [vmem:[%s8710_s29 + $0xb3c] ss:$28 sps:$4 sm:$0xff]  }
 0x2a9   : > { %v7491_v56 = vld [vmem:[%s8710_s29 + $0xb04] ss:$28 sps:$4 sm:$0xff]   ;;  %v7493_v42 = vld [vmem:[%s8710_s29 + $0xb38] ss:$28 sps:$4 sm:$0xff]  }
 0x2aa   : > { %4281 = vmatpush1.bf16.msra.mxu0 %v7425_v39  ;;  %6876 = vmatpush3.bf16.msra.mxu1 %v7428_v55  ;;  %v7489_v39 = vld [vmem:[%s8710_s29 + $0xb00] ss:$28 sps:$4 sm:$0xff]   ;;  %v7492_v55 = vld [vmem:[%s8710_s29 + $0xb08] ss:$28 sps:$4 sm:$0xff]  }
 0x2ab   : > { %4282 = vmatprep.subr.bf16.mxu0 %v7431_v43  ;;  %6877 = vmatprep.subr.bf16.mxu1 %v7620_v37  ;;  %v7496_v43 = vld [vmem:[%s8710_s29 + $0xb40] ss:$28 sps:$4 sm:$0xff]  }
 0x2ae   : > { %4283 = vmatpush1.bf16.msra.mxu0 %v7429_v58  ;;  %6878 = vmatpush3.bf16.msra.mxu1 %v7432_v59  ;;  %v7499_v58 = vld [vmem:[%s8710_s29 + $0xb74] ss:$28 sps:$4 sm:$0xff]  }
 0x2af   : > { %4709 = vmatprep.subr.bf16.mxu0 %v7435_v60  ;;  %4750 = vmatprep.subr.bf16.mxu1 %v7438_v61  ;;  %v7497_v59 = vld [vmem:[%s8710_s29 + $0xb70] ss:$28 sps:$4 sm:$0xff]   ;;  %v7500_v60 = vld [vmem:[%s8710_s29 + $0xb78] ss:$28 sps:$4 sm:$0xff]  }
 0x2b0   : > { %v7503_v61 = vld [vmem:[%s8710_s29 + $0xbac] ss:$28 sps:$4 sm:$0xff]  }
 0x2b1   : > { %4301 = vmatmul.mubr.bf16.vlgmr.msra.gmra.mrb[44].mxu0 %v9169_v8  ;;  %6880 = vmatmul.mubr.bf16.vlgmr.msra.gmra.mrb[44].mxu1 %v9169_v8 }
 0x2b2   : > { %4710 = vmatpush1.bf16.msra.mxu0 %v7433_v32  ;;  %4751 = vmatpush1.bf16.msra.mxu1 %v7436_v33  ;;  %v7501_v32 = vld [vmem:[%s8710_s29 + $0xba8] ss:$28 sps:$4 sm:$0xff]   ;;  %v7504_v33 = vld [vmem:[%s8710_s29 + $0xbb0] ss:$28 sps:$4 sm:$0xff]  }
 0x2b3   : > { %4711 = vmatprep.subr.bf16.mxu0 %v7441_v35  ;;  %4752 = vmatprep.subr.bf16.mxu1 %v7444_v46  ;;  %v7507_v35 = vld [vmem:[%s8710_s29 + $0xbe4] ss:$28 sps:$4 sm:$0xff]  }
 0x2b4   : > { %4741 = vmatprep.mubr.bf16.mxu0 %v7619_v0  ;;  %4782 = vmatprep.mubr.bf16.mxu1 %v7619_v0 }
 0x2b6   : > { %4712 = vmatpush1.bf16.msra.mxu0 %v7439_v48  ;;  %4753 = vmatpush1.bf16.msra.mxu1 %v7442_v49 }
 0x2b7   : > { %4713 = vmatprep.subr.bf16.mxu0 %v7447_v50  ;;  %4754 = vmatprep.subr.bf16.mxu1 %v7450_v51 }
 0x2ba   : > { %4714 = vmatpush1.bf16.msra.mxu0 %v7445_v52  ;;  %4755 = vmatpush1.bf16.msra.mxu1 %v7448_v62  ;;  %v7505_v62 = vld [vmem:[%s8710_s29 + $0xbe0] ss:$28 sps:$4 sm:$0xff]  }
 0x2bb   : > { %4715 = vmatprep.subr.bf16.mxu0 %v7453_v63  ;;  %4756 = vmatprep.subr.bf16.mxu1 %v7456_v1 }
 0x2be   : > { %4716 = vmatpush1.bf16.msra.mxu0 %v7451_v2  ;;  %4757 = vmatpush1.bf16.msra.mxu1 %v7454_v3 }
 0x2bf   : > { %4717 = vmatprep.subr.bf16.mxu0 %v7459_v4  ;;  %4758 = vmatprep.subr.bf16.mxu1 %v7462_v5  ;;  %v7508_v4 = vld [vmem:[%s8710_s29 + $0xbe8] ss:$28 sps:$4 sm:$0xff]  }
 0x2c0   : > { %v5402_v5 = vld [vmem:[%s9466_s1] sm:$0xff] }
 0x2c1   : > { %5405 = vperm.xlu0 %6952, %v5402_v5   ;;  %v7560_v5 = vld [vmem:[%s8710_s29 + $0xdd4] ss:$28 sps:$4 sm:$0xff]  }
 0x2c2   : > { %4718 = vmatpush1.bf16.msra.mxu0 %v7457_v6  ;;  %4759 = vmatpush1.bf16.msra.mxu1 %v7460_v7 }
 0x2c3   : > { %4719 = vmatprep.subr.bf16.mxu0 %v7465_v9  ;;  %4760 = vmatprep.subr.bf16.mxu1 %v7468_v10  ;;  %v7511_v9 = vld [vmem:[%s8710_s29 + $0xc1c] ss:$28 sps:$4 sm:$0xff]  }
 0x2c4   : > { %v2733_v17 = vpop.f32.mrb[20].mxu0  ;;  %v2774_v18 = vpop.f32.mrb[20].mxu1  ;;  %v7509_v10 = vld [vmem:[%s8710_s29 + $0xc18] ss:$28 sps:$4 sm:$0xff]  }
 0x2c5   : > { %v9256_v20 = vmax.f32 %v2261_v41, %v2733_v17  ;;  %v9261_v54 = vmax.f32 %v2263_v44, %v2774_v18  ;;  %v2735_v21 = vpop.f32.mrb[21].mxu0  ;;  %v6821_v22 = vpop.f32.mrb[21].mxu1  ;;  %v7472_v41 = vld [vmem:[%s8710_s29 + $0xbd8] ss:$28 sps:$4 sm:$0xff]   ;;  %v7477_v44 = vld [vmem:[%s8710_s29 + $0xc0c] ss:$28 sps:$4 sm:$0xff]  }
 0x2c6   : > { %v9266_v23 = vmax.f32 %v2262_v47, %v2735_v21  ;;  %v2737_v24 = vpop.f32.mrb[22].mxu0  ;;  %v2777_v15 = vpop.f32.mrb[22].mxu1  ;;  %4720 = vmatpush1.bf16.msra.mxu0 %v7463_v11  ;;  %4761 = vmatpush1.bf16.msra.mxu1 %v7466_v12  ;;  %v7478_v47 = vld [vmem:[%s8710_s29 + $0xc10] ss:$28 sps:$4 sm:$0xff]   ;;  %v7512_v11 = vld [vmem:[%s8710_s29 + $0xc20] ss:$28 sps:$4 sm:$0xff]  }
 0x2c7   : > { %v2738_v16 = vpop.f32.mrb[23].mxu0  ;;  %v6822_v40 = vpop.f32.mrb[23].mxu1  ;;  %4721 = vmatprep.subr.bf16.mxu0 %v7471_v13  ;;  %4762 = vmatprep.subr.bf16.mxu1 %v7474_v14  ;;  %v7515_v12 = vld [vmem:[%s8710_s29 + $0xc44] ss:$28 sps:$4 sm:$0xff]   ;;  %v7518_v13 = vld [vmem:[%s8710_s29 + $0xc4c] ss:$28 sps:$4 sm:$0xff]  }
 0x2c8   : > { %v7513_v14 = vld [vmem:[%s8710_s29 + $0xc40] ss:$28 sps:$4 sm:$0xff]   ;;  %v7516_v17 = vld [vmem:[%s8710_s29 + $0xc48] ss:$28 sps:$4 sm:$0xff]   ;;  %v7519_v22 = vld [vmem:[%s8710_s29 + $0xc78] ss:$28 sps:$4 sm:$0xff]  }
 0x2c9   : > { %v7521_v18 = vld [vmem:[%s8710_s29 + $0xc7c] ss:$28 sps:$4 sm:$0xff]   ;;  %v7524_v21 = vld [vmem:[%s8710_s29 + $0xc84] ss:$28 sps:$4 sm:$0xff]   ;;  %v7527_v15 = vld [vmem:[%s8710_s29 + $0xcb4] ss:$28 sps:$4 sm:$0xff]  }
 0x2ca   : > { %4722 = vmatpush1.bf16.msra.mxu0 %v7469_v36  ;;  %4763 = vmatpush1.bf16.msra.mxu1 %v7472_v41  ;;  %v7522_v24 = vld [vmem:[%s8710_s29 + $0xc80] ss:$28 sps:$4 sm:$0xff]   ;;  %v7525_v41 = vld [vmem:[%s8710_s29 + $0xcb0] ss:$28 sps:$4 sm:$0xff]   ;;  %v7528_v16 = vld [vmem:[%s8710_s29 + $0xcb8] ss:$28 sps:$4 sm:$0xff]  }
 0x2cb   : > { %4723 = vmatprep.subr.bf16.mxu0 %v7477_v44  ;;  %4764 = vmatprep.subr.bf16.mxu1 %v7480_v19  ;;  %v7530_v36 = vld [vmem:[%s8710_s29 + $0xcbc] ss:$28 sps:$4 sm:$0xff]   ;;  %v7533_v40 = vld [vmem:[%s8710_s29 + $0xcec] ss:$28 sps:$4 sm:$0xff]   ;;  %v7536_v44 = vld [vmem:[%s8710_s29 + $0xcf4] ss:$28 sps:$4 sm:$0xff]  }
 0x2cc   : > { %v7531_v19 = vld [vmem:[%s8710_s29 + $0xce8] ss:$28 sps:$4 sm:$0xff]  }
 0x2ce   : > { %4724 = vmatpush1.bf16.msra.mxu0 %v7475_v45  ;;  %4765 = vmatpush1.bf16.msra.mxu1 %v7478_v47  ;;  %v7534_v45 = vld [vmem:[%s8710_s29 + $0xcf0] ss:$28 sps:$4 sm:$0xff]   ;;  %v7539_v47 = vld [vmem:[%s8710_s29 + $0xd24] ss:$28 sps:$4 sm:$0xff]  }
 0x2cf   : > { %4791 = vmatprep.subr.bf16.mxu0 %v7483_v25  ;;  %6883 = vmatprep.subr.bf16.mxu1 %v7620_v37  ;;  %v7542_v25 = vld [vmem:[%s8710_s29 + $0xd2c] ss:$28 sps:$4 sm:$0xff]  }
 0x2d1   : > { %4742 = vmatmul.mubr.bf16.vlgmr.msra.gmra.mrb[48].mxu0 %v9169_v8  ;;  %4783 = vmatmul.mubr.bf16.vlgmr.msra.gmra.mrb[48].mxu1 %v9169_v8 }
 0x2d2   : > { %4792 = vmatpush1.bf16.msra.mxu0 %v7481_v26  ;;  %6884 = vmatpush3.bf16.msra.mxu1 %v7484_v27  ;;  %v7537_v26 = vld [vmem:[%s8710_s29 + $0xd20] ss:$28 sps:$4 sm:$0xff]   ;;  %v7540_v27 = vld [vmem:[%s8710_s29 + $0xd28] ss:$28 sps:$4 sm:$0xff]  }
 0x2d3   : > { %4793 = vmatprep.subr.bf16.mxu0 %v7487_v30  ;;  %6885 = vmatprep.subr.bf16.mxu1 %v7620_v37  ;;  %v7545_v30 = vld [vmem:[%s8710_s29 + $0xd5c] ss:$28 sps:$4 sm:$0xff]  }
 0x2d4   : > { %4823 = vmatprep.mubr.bf16.mxu0 %v7619_v0  ;;  %6899 = vmatprep.mubr.msk.bf16.mxu1 %vm7621_vm0, %v7620_v37 }
 0x2d6   : > { %4794 = vmatpush1.bf16.msra.mxu0 %v7485_v34  ;;  %6886 = vmatpush3.bf16.msra.mxu1 %v7488_v53  ;;  %v7548_v34 = vld [vmem:[%s8710_s29 + $0xd64] ss:$28 sps:$4 sm:$0xff]   ;;  %v7543_v53 = vld [vmem:[%s8710_s29 + $0xd58] ss:$28 sps:$4 sm:$0xff]  }
 0x2d7   : > { %4795 = vmatprep.subr.bf16.mxu0 %v7491_v56  ;;  %6887 = vmatprep.subr.bf16.mxu1 %v7620_v37  ;;  %v7546_v56 = vld [vmem:[%s8710_s29 + $0xd60] ss:$28 sps:$4 sm:$0xff]  }
 0x2da   : > { %4796 = vmatpush1.bf16.msra.mxu0 %v7489_v39  ;;  %6888 = vmatpush3.bf16.msra.mxu1 %v7492_v55  ;;  %v7551_v39 = vld [vmem:[%s8710_s29 + $0xd94] ss:$28 sps:$4 sm:$0xff]   ;;  %v7554_v55 = vld [vmem:[%s8710_s29 + $0xd9c] ss:$28 sps:$4 sm:$0xff]  }
 0x2db   : > { %4797 = vmatprep.subr.bf16.mxu0 %v7495_v57  ;;  %6889 = vmatprep.subr.bf16.mxu1 %v7620_v37 }
 0x2de   : > { %4798 = vmatpush1.bf16.msra.mxu0 %v7493_v42  ;;  %6890 = vmatpush3.bf16.msra.mxu1 %v7496_v43 }
 0x2df   : > { %4799 = vmatprep.subr.bf16.mxu0 %v7499_v58  ;;  %6891 = vmatprep.subr.bf16.mxu1 %v7620_v37 }
 0x2e2   : > { %4800 = vmatpush1.bf16.msra.mxu0 %v7497_v59  ;;  %6892 = vmatpush3.bf16.msra.mxu1 %v7500_v60 }
 0x2e3   : > { %4801 = vmatprep.subr.bf16.mxu0 %v7503_v61  ;;  %6893 = vmatprep.subr.bf16.mxu1 %v7620_v37 }
 0x2e4   : > { %v9304_v46 = vpop.f32.mrb[24].mxu0  ;;  %v9306_v48 = vpop.f32.mrb[24].mxu1 }
 0x2e5   : > { %v3303_v49 = vmax.f32 %v9199_v28, %v9304_v46  ;;  %v3305_v50 = vmax.f32 %v9204_v29, %v9306_v48  ;;  %v9312_v51 = vpop.f32.mrb[25].mxu0  ;;  %v9314_v52 = vpop.f32.mrb[25].mxu1  ;;  %v7585_v29 = vld [vmem:[%s8710_s29 + $0xda0] ss:$28 sps:$4 sm:$0xff]   ;;  %v7588_v48 = vld [vmem:[%s8710_s29 + $0xda8] ss:$28 sps:$4 sm:$0xff]  }
 0x2e6   : > { %v3304_v63 = vmax.f32 %v9209_v31, %v9312_v51  ;;  %v3306_v1 = vmax.f32 %v9214_v38, %v9314_v52  ;;  %v3178_v2 = vpop.f32.mrb[26].mxu0  ;;  %v3219_v3 = vpop.f32.mrb[26].mxu1  ;;  %4802 = vmatpush1.bf16.msra.mxu0 %v7501_v32  ;;  %6894 = vmatpush3.bf16.msra.mxu1 %v7504_v33  ;;  %v7591_v31 = vld [vmem:[%s8710_s29 + $0xddc] ss:$28 sps:$4 sm:$0xff]  }
 0x2e7   : > { %v3179_v6 = vpop.f32.mrb[27].mxu0  ;;  %v3220_v7 = vpop.f32.mrb[27].mxu1  ;;  %4803 = vmatprep.subr.bf16.mxu0 %v7507_v35  ;;  %6895 = vmatprep.subr.bf16.mxu1 %v7620_v37  ;;  %v7549_v35 = vld [vmem:[%s8710_s29 + $0xd90] ss:$28 sps:$4 sm:$0xff]   ;;  %v7589_v51 = vld [vmem:[%s8710_s29 + $0xdd8] ss:$28 sps:$4 sm:$0xff]  }
 0x2e8   : > { %v7555_v6 = vld [vmem:[%s8710_s29 + $0xdc8] ss:$28 sps:$4 sm:$0xff]   ;;  %v7558_v7 = vld [vmem:[%s8710_s29 + $0xdd0] ss:$28 sps:$4 sm:$0xff]  }
 0x2ea   : > { %4804 = vmatpush1.bf16.msra.mxu0 %v7505_v62  ;;  %6896 = vmatpush3.bf16.msra.mxu1 %v7508_v4  ;;  %v7552_v62 = vld [vmem:[%s8710_s29 + $0xd98] ss:$28 sps:$4 sm:$0xff]   ;;  %v7557_v4 = vld [vmem:[%s8710_s29 + $0xdcc] ss:$28 sps:$4 sm:$0xff]  }
 0x2eb   : > { %4805 = vmatprep.subr.bf16.mxu0 %v7511_v9  ;;  %6897 = vmatprep.subr.bf16.mxu1 %v7620_v37  ;;  %v7563_v9 = vld [vmem:[%s8710_s29 + $0xc54] ss:$28 sps:$4 sm:$0xff]  }
 0x2ee   : > { %4806 = vmatpush1.bf16.msra.mxu0 %v7509_v10  ;;  %6898 = vmatpush3.bf16.msra.mxu1 %v7512_v11  ;;  %v7561_v10 = vld [vmem:[%s8710_s29 + $0xc50] ss:$28 sps:$4 sm:$0xff]   ;;  %v7564_v11 = vld [vmem:[%s8710_s29 + $0xc58] ss:$28 sps:$4 sm:$0xff]  }
 0x2ef   : > { %5232 = vmatprep.subr.bf16.mxu0 %v7515_v12  ;;  %5273 = vmatprep.subr.bf16.mxu1 %v7518_v13  ;;  %v7567_v12 = vld [vmem:[%s8710_s29 + $0xc8c] ss:$28 sps:$4 sm:$0xff]  }
 0x2f0   : > { %v7565_v13 = vld [vmem:[%s8710_s29 + $0xc88] ss:$28 sps:$4 sm:$0xff]  }
 0x2f1   : > { %4824 = vmatmul.mubr.bf16.vlgmr.msra.gmra.mrb[52].mxu0 %v9169_v8  ;;  %6900 = vmatmul.mubr.bf16.vlgmr.msra.gmra.mrb[52].mxu1 %v9169_v8 }
 0x2f2   : > { %5233 = vmatpush1.bf16.msra.mxu0 %v7513_v14  ;;  %5274 = vmatpush1.bf16.msra.mxu1 %v7516_v17  ;;  %v7568_v14 = vld [vmem:[%s8710_s29 + $0xc90] ss:$28 sps:$4 sm:$0xff]   ;;  %v7571_v17 = vld [vmem:[%s8710_s29 + $0xcc4] ss:$28 sps:$4 sm:$0xff]  }
 0x2f3   : > { %5234 = vmatprep.subr.bf16.mxu0 %v7521_v18  ;;  %5275 = vmatprep.subr.bf16.mxu1 %v7524_v21  ;;  %v7569_v18 = vld [vmem:[%s8710_s29 + $0xcc0] ss:$28 sps:$4 sm:$0xff]   ;;  %v7572_v21 = vld [vmem:[%s8710_s29 + $0xcc8] ss:$28 sps:$4 sm:$0xff]  }
 0x2f4   : > { %5264 = vmatprep.mubr.bf16.mxu0 %v7619_v0  ;;  %5305 = vmatprep.mubr.bf16.mxu1 %v7619_v0 }
 0x2f6   : > { %5235 = vmatpush1.bf16.msra.mxu0 %v7519_v22  ;;  %5276 = vmatpush1.bf16.msra.mxu1 %v7522_v24  ;;  %v7575_v22 = vld [vmem:[%s8710_s29 + $0xcfc] ss:$28 sps:$4 sm:$0xff]  }
 0x2f7   : > { %5236 = vmatprep.subr.bf16.mxu0 %v7527_v15  ;;  %5277 = vmatprep.subr.bf16.mxu1 %v7530_v36  ;;  %v7573_v24 = vld [vmem:[%s8710_s29 + $0xcf8] ss:$28 sps:$4 sm:$0xff]   ;;  %v7577_v36 = vld [vmem:[%s8710_s29 + $0xd30] ss:$28 sps:$4 sm:$0xff]  }
 0x2f8   : > { %v7579_v15 = vld [vmem:[%s8710_s29 + $0xd34] ss:$28 sps:$4 sm:$0xff]  }
 0x2fa   : > { %5237 = vmatpush1.bf16.msra.mxu0 %v7525_v41  ;;  %5278 = vmatpush1.bf16.msra.mxu1 %v7528_v16  ;;  %v7580_v41 = vld [vmem:[%s8710_s29 + $0xd38] ss:$28 sps:$4 sm:$0xff]   ;;  %v7583_v16 = vld [vmem:[%s8710_s29 + $0xd6c] ss:$28 sps:$4 sm:$0xff]  }
 0x2fb   : > { %5238 = vmatprep.subr.bf16.mxu0 %v7533_v40  ;;  %5279 = vmatprep.subr.bf16.mxu1 %v7536_v44  ;;  %v7581_v40 = vld [vmem:[%s8710_s29 + $0xd68] ss:$28 sps:$4 sm:$0xff]   ;;  %v7584_v44 = vld [vmem:[%s8710_s29 + $0xd70] ss:$28 sps:$4 sm:$0xff]  }
 0x2fe   : > { %5239 = vmatpush1.bf16.msra.mxu0 %v7531_v19  ;;  %5280 = vmatpush1.bf16.msra.mxu1 %v7534_v45  ;;  %v7587_v19 = vld [vmem:[%s8710_s29 + $0xda4] ss:$28 sps:$4 sm:$0xff]  }
 0x2ff   : > { %5240 = vmatprep.subr.bf16.mxu0 %v7539_v47  ;;  %5281 = vmatprep.subr.bf16.mxu1 %v7542_v25 }
 0x302   : > { %5241 = vmatpush1.bf16.msra.mxu0 %v7537_v26  ;;  %5282 = vmatpush1.bf16.msra.mxu1 %v7540_v27 }
 0x303   : > { %5242 = vmatprep.subr.bf16.mxu0 %v7545_v30  ;;  %5283 = vmatprep.subr.bf16.mxu1 %v7548_v34 }
 0x304   : > { %v9360_v57 = vpop.f32.mrb[28].mxu0  ;;  %v9362_v42 = vpop.f32.mrb[28].mxu1 }
 0x305   : > { %v3307_v43 = vmax.f32 %v9256_v20, %v9360_v57  ;;  %v3309_v58 = vmax.f32 %v9261_v54, %v9362_v42  ;;  %v9368_v59 = vpop.f32.mrb[29].mxu0  ;;  %v6841_v60 = vpop.f32.mrb[29].mxu1 }
 0x306   : > { %v3308_v61 = vmax.f32 %v9266_v23, %v9368_v59  ;;  %v3260_v32 = vpop.f32.mrb[30].mxu0  ;;  %v3300_v33 = vpop.f32.mrb[30].mxu1  ;;  %5243 = vmatpush1.bf16.msra.mxu0 %v7543_v53  ;;  %5284 = vmatpush1.bf16.msra.mxu1 %v7546_v56 }
 0x307   : > { %v3261_v2 = vpop.f32.mrb[31].mxu0  ;;  %v6842_v3 = vpop.f32.mrb[31].mxu1  ;;  %5244 = vmatprep.subr.bf16.mxu0 %v7551_v39  ;;  %5285 = vmatprep.subr.bf16.mxu1 %v7554_v55 }
 0x30a   : > { %5245 = vmatpush1.bf16.msra.mxu0 %v7549_v35  ;;  %5286 = vmatpush1.bf16.msra.mxu1 %v7552_v62 }
 0x30b   : > { %5246 = vmatprep.subr.bf16.mxu0 %v7557_v4  ;;  %5287 = vmatprep.subr.bf16.mxu1 %v7560_v5 }
 0x30e   : > { %5247 = vmatpush1.bf16.msra.mxu0 %v7555_v6  ;;  %5288 = vmatpush1.bf16.msra.mxu1 %v7558_v7 }
 0x30f   : > { %5314 = vmatprep.subr.bf16.mxu0 %v7563_v9  ;;  %6903 = vmatprep.subr.bf16.mxu1 %v7620_v37 }
 0x311   : > { %5265 = vmatmul.mubr.bf16.vlgmr.msra.gmra.mrb[56].mxu0 %v9169_v8  ;;  %5306 = vmatmul.mubr.bf16.vlgmr.msra.gmra.mrb[56].mxu1 %v9169_v8 }
 0x312   : > { %5315 = vmatpush1.bf16.msra.mxu0 %v7561_v10  ;;  %6904 = vmatpush3.bf16.msra.mxu1 %v7564_v11 }
 0x313   : > { %5316 = vmatprep.subr.bf16.mxu0 %v7567_v12  ;;  %6905 = vmatprep.subr.bf16.mxu1 %v7620_v37 }
 0x314   : > { %5346 = vmatprep.mubr.bf16.mxu0 %v7619_v0  ;;  %6919 = vmatprep.mubr.msk.bf16.mxu1 %vm7621_vm0, %v7620_v37  ;;  %v7576_v0 = vld [vmem:[%s8710_s29 + $0xd00] ss:$28 sps:$4 sm:$0xff]  }
 0x316   : > { %5317 = vmatpush1.bf16.msra.mxu0 %v7565_v13  ;;  %6906 = vmatpush3.bf16.msra.mxu1 %v7568_v14 }
 0x317   : > { %5318 = vmatprep.subr.bf16.mxu0 %v7571_v17  ;;  %6907 = vmatprep.subr.bf16.mxu1 %v7620_v37 }
 0x31a   : > { %5319 = vmatpush1.bf16.msra.mxu0 %v7569_v18  ;;  %6908 = vmatpush3.bf16.msra.mxu1 %v7572_v21 }
 0x31b   : > { %5320 = vmatprep.subr.bf16.mxu0 %v7575_v22  ;;  %6909 = vmatprep.subr.bf16.mxu1 %v7620_v37 }
 0x31e   : > { %5321 = vmatpush1.bf16.msra.mxu0 %v7573_v24  ;;  %6910 = vmatpush3.bf16.msra.mxu1 %v7576_v0 }
 0x31f   : > { %5322 = vmatprep.subr.bf16.mxu0 %v7579_v15  ;;  %6911 = vmatprep.subr.bf16.mxu1 %v7620_v37 }
 0x322   : > { %5323 = vmatpush1.bf16.msra.mxu0 %v7577_v36  ;;  %6912 = vmatpush3.bf16.msra.mxu1 %v7580_v41 }
 0x323   : > { %5324 = vmatprep.subr.bf16.mxu0 %v7583_v16  ;;  %6913 = vmatprep.subr.bf16.mxu1 %v7620_v37 }
 0x324   : > { %v3697_v45 = vpop.f32.mrb[32].mxu0  ;;  %v3738_v47 = vpop.f32.mrb[32].mxu1 }
 0x325   : > { %v9411_v25 = vmax.f32 %v3303_v49, %v3697_v45  ;;  %v9416_v26 = vmax.f32 %v3305_v50, %v3738_v47  ;;  %v3699_v27 = vpop.f32.mrb[33].mxu0  ;;  %v3740_v30 = vpop.f32.mrb[33].mxu1 }
 0x326   : > { %v9421_v34 = vmax.f32 %v3304_v63, %v3699_v27  ;;  %v9426_v28 = vmax.f32 %v3306_v1, %v3740_v30  ;;  %v3701_v46 = vpop.f32.mrb[34].mxu0  ;;  %v3742_v49 = vpop.f32.mrb[34].mxu1  ;;  %5325 = vmatpush1.bf16.msra.mxu0 %v7581_v40  ;;  %6914 = vmatpush3.bf16.msra.mxu1 %v7584_v44  ;;  %v7592_v63 = vld [vmem:[%s8710_s29 + $0xde0] ss:$28 sps:$4 sm:$0xff]  }
 0x327   : > { %v3702_v50 = vpop.f32.mrb[35].mxu0  ;;  %v3743_v53 = vpop.f32.mrb[35].mxu1  ;;  %5326 = vmatprep.subr.bf16.mxu0 %v7587_v19  ;;  %6915 = vmatprep.subr.bf16.mxu1 %v7620_v37 }
 0x32a   : > { %5327 = vmatpush1.bf16.msra.mxu0 %v7585_v29  ;;  %6916 = vmatpush3.bf16.msra.mxu1 %v7588_v48 }
 0x32b   : > { %5328 = vmatprep.subr.bf16.mxu0 %v7591_v31  ;;  %6917 = vmatprep.subr.bf16.mxu1 %v7620_v37 }
 0x32e   : > { %5329 = vmatpush1.bf16.msra.mxu0 %v7589_v51  ;;  %6918 = vmatpush3.bf16.msra.mxu1 %v7592_v63 }
 0x331   : > { %5347 = vmatmul.mubr.bf16.vlgmr.msra.gmra.mrb[60].mxu0 %v9169_v8  ;;  %6920 = vmatmul.mubr.bf16.vlgmr.msra.gmra.mrb[60].mxu1 %v9169_v8 }
 0x340   : > { %v5406_v29 = vpop.permute.xlu0 %5405 }
 0x344   : > { %v3779_v38 = vpop.f32.mrb[36].mxu0  ;;  %v3820_v52 = vpop.f32.mrb[36].mxu1 }
 0x345   : > { %v3830_v1 = vmax.f32 %v3307_v43, %v3779_v38  ;;  %v3832_v56 = vmax.f32 %v3309_v58, %v3820_v52  ;;  %v3781_v39 = vpop.f32.mrb[37].mxu0  ;;  %v6861_v55 = vpop.f32.mrb[37].mxu1 }
 0x346   : > { %v3831_v37 = vmax.f32 %v3308_v61, %v3781_v39  ;;  %v3783_v60 = vpop.f32.mrb[38].mxu0  ;;  %v3823_v32 = vpop.f32.mrb[38].mxu1 }
 0x347   : > { %v3784_v33 = vpop.f32.mrb[39].mxu0  ;;  %v6862_v8 = vpop.f32.mrb[39].mxu1 }
 0x364   : > { %v4220_v35 = vpop.f32.mrb[40].mxu0  ;;  %v4261_v62 = vpop.f32.mrb[40].mxu1 }
 0x365   : > { %v4349_v2 = vmax.f32 %v9411_v25, %v4220_v35  ;;  %v4351_v20 = vmax.f32 %v9416_v26, %v4261_v62  ;;  %v4222_v57 = vpop.f32.mrb[41].mxu0  ;;  %v4263_v43 = vpop.f32.mrb[41].mxu1 }
 0x366   : > { %v4350_v54 = vmax.f32 %v9421_v34, %v4222_v57  ;;  %v4352_v42 = vmax.f32 %v9426_v28, %v4263_v43  ;;  %v4224_v58 = vpop.f32.mrb[42].mxu0  ;;  %v4265_v3 = vpop.f32.mrb[42].mxu1 }
 0x367   : > { %v4225_v23 = vpop.f32.mrb[43].mxu0  ;;  %v4266_v59 = vpop.f32.mrb[43].mxu1 }
 0x384   : > { %v4302_v61 = vpop.f32.mrb[44].mxu0  ;;  %v4343_v4 = vpop.f32.mrb[44].mxu1 }
 0x385   : > { %v4353_v5 = vmax.f32 %v3830_v1, %v4302_v61  ;;  %v4355_v6 = vmax.f32 %v3832_v56, %v4343_v4  ;;  %v4304_v7 = vpop.f32.mrb[45].mxu0  ;;  %v6881_v9 = vpop.f32.mrb[45].mxu1 }
 0x386   : > { %v4354_v10 = vmax.f32 %v3831_v37, %v4304_v7  ;;  %v4306_v11 = vpop.f32.mrb[46].mxu0  ;;  %v4346_v12 = vpop.f32.mrb[46].mxu1 }
 0x387   : > { %v4307_v13 = vpop.f32.mrb[47].mxu0  ;;  %v6882_v14 = vpop.f32.mrb[47].mxu1 }
 0x3a4   : > { %v4743_v17 = vpop.f32.mrb[48].mxu0  ;;  %v4784_v18 = vpop.f32.mrb[48].mxu1 }
 0x3a5   : > { %v4872_v21 = vmax.f32 %v4349_v2, %v4743_v17  ;;  %v4874_v22 = vmax.f32 %v4351_v20, %v4784_v18  ;;  %v4745_v24 = vpop.f32.mrb[49].mxu0  ;;  %v4786_v0 = vpop.f32.mrb[49].mxu1 }
 0x3a6   : > { %v4873_v15 = vmax.f32 %v4350_v54, %v4745_v24  ;;  %v4875_v36 = vmax.f32 %v4352_v42, %v4786_v0  ;;  %v4747_v41 = vpop.f32.mrb[50].mxu0  ;;  %v4788_v16 = vpop.f32.mrb[50].mxu1 }
 0x3a7   : > { %v4748_v40 = vpop.f32.mrb[51].mxu0  ;;  %v4789_v44 = vpop.f32.mrb[51].mxu1 }
 0x3c4   : > { %v4825_v19 = vpop.f32.mrb[52].mxu0  ;;  %v4866_v45 = vpop.f32.mrb[52].mxu1 }
 0x3c5   : > { %v4876_v47 = vmax.f32 %v4353_v5, %v4825_v19  ;;  %v4878_v25 = vmax.f32 %v4355_v6, %v4866_v45  ;;  %v4827_v26 = vpop.f32.mrb[53].mxu0  ;;  %v6901_v27 = vpop.f32.mrb[53].mxu1 }
 0x3c6   : > { %v4877_v30 = vmax.f32 %v4354_v10, %v4827_v26  ;;  %v4829_v34 = vpop.f32.mrb[54].mxu0  ;;  %v4869_v28 = vpop.f32.mrb[54].mxu1 }
 0x3c7   : > { %v4830_v46 = vpop.f32.mrb[55].mxu0  ;;  %v6902_v49 = vpop.f32.mrb[55].mxu1 }
 0x3e4   : > { %v5266_v48 = vpop.f32.mrb[56].mxu0  ;;  %v5307_v50 = vpop.f32.mrb[56].mxu1 }
 0x3e5   : > { %v5395_v53 = vmax.f32 %v4872_v21, %v5266_v48  ;;  %v5397_v31 = vmax.f32 %v4874_v22, %v5307_v50  ;;  %v5268_v51 = vpop.f32.mrb[57].mxu0  ;;  %v5309_v63 = vpop.f32.mrb[57].mxu1 }
 0x3e6   : > { %v5396_v38 = vmax.f32 %v4873_v15, %v5268_v51  ;;  %v5398_v52 = vmax.f32 %v4875_v36, %v5309_v63  ;;  %v5270_v1 = vpop.f32.mrb[58].mxu0  ;;  %v5311_v56 = vpop.f32.mrb[58].mxu1 }
 0x3e7   : > { %v5408_v39 = vadd.f32 %v5406_v29, %v5395_v53  ;;  %v5410_v55 = vadd.f32 %v5406_v29, %v5397_v31  ;;  %v5271_v37 = vpop.f32.mrb[59].mxu0  ;;  %v5312_v60 = vpop.f32.mrb[59].mxu1 }
 0x3e8   : > { %v5409_v32 = vadd.f32 %v5406_v29, %v5396_v38  ;;  %v5411_v33 = vadd.f32 %v5406_v29, %v5398_v52 }
 0x3e9   : > { %v5415_v8 = vmax.f32 %v5408_v39, 0.0  ;;  %v5417_v35 = vmax.f32 %v5410_v55, 0.0 }
 0x3ea   : > { %v5416_v62 = vmax.f32 %v5409_v32, 0.0  ;;  %v5418_v2 = vmax.f32 %v5411_v33, 0.0 }
 0x3ec   : > { %v6687_v20 = vpack.c.bf16 %v5416_v62, %v5415_v8  ;;  %v6688_v57 = vpack.c.bf16 %v5418_v2, %v5417_v35 }
 0x3ee   : > { %5451 = vst [vmem:[%s1222_s17] sm:$0xff] %v6687_v20  ;;  %5452 = vst [vmem:[%s1222_s17 + $0x8] sm:$0xff] %v6688_v57 }
 0x404   : > { %v5348_v43 = vpop.f32.mrb[60].mxu0  ;;  %v5389_v54 = vpop.f32.mrb[60].mxu1 }
 0x405   : > { %v5399_v42 = vmax.f32 %v4876_v47, %v5348_v43  ;;  %v5401_v58 = vmax.f32 %v4878_v25, %v5389_v54  ;;  %v5350_v3 = vpop.f32.mrb[61].mxu0  ;;  %v6921_v23 = vpop.f32.mrb[61].mxu1 }
 0x406   : > { %v5400_v59 = vmax.f32 %v4877_v30, %v5350_v3  ;;  %v5352_v61 = vpop.f32.mrb[62].mxu0  ;;  %v5392_v4 = vpop.f32.mrb[62].mxu1 }
 0x407   : > { %v5412_v5 = vadd.f32 %v5406_v29, %v5399_v42  ;;  %v5414_v6 = vadd.f32 %v5406_v29, %v5401_v58  ;;  %v5353_v7 = vpop.f32.mrb[63].mxu0  ;;  %v6922_v9 = vpop.f32.mrb[63].mxu1 }
 0x408   : > { %v5413_v10 = vadd.f32 %v5406_v29, %v5400_v59 }
 0x409   : > { %v5419_v11 = vmax.f32 %v5412_v5, 0.0  ;;  %v5421_v12 = vmax.f32 %v5414_v6, 0.0 }
 0x40a   : > { %v5420_v13 = vmax.f32 %v5413_v10, 0.0 }
 0x40b   : > { %v6690_v14 = vpack.c.bf16 %v5421_v12, %v5421_v12 }
 0x40c   : > { %v6689_v17 = vpack.c.bf16 %v5420_v13, %v5419_v11 }
 0x40d   : > { %5454 = vst [vmem:[%s1222_s17 + $0x18] sm:$0xf] %v6690_v14 }
 0x40e   : > { %5453 = vst [vmem:[%s1222_s17 + $0x10] sm:$0xff] %v6689_v17 }
 0x40f PF: > { %p10_p9 = scmp.ge.s32.totalorder %s7659_s16, 8   ;;  %s9469_s12 = smov %s7613_s13 }
 0x410   : > { %s9470_s13 = smov %s7668_s19  ;;  %s9471_s14 = smov %s7659_s16 }
 0x411   :  { %12 = sbr.rel (!%p10_p9) target bundleno = 2 (0x2), region = 106 }

// kernel: lenet_forward.4
= control target key start
LH: loop header
LB: loop body
LE: loop exit
PB: predicated region body
PF: predicated region fallthrough
CT: control target
= control target key end

     0   :  { %vm5757_vm0 = vcmask 1043456   ;;  %vm5758_vm1 = vcmask 588804   ;;  %s10952_s2 = inlined_call_operand.vmem [shape: bf16[8,768,200], index: 2, kind: input, shape index: {}]   ;;  %s10953_s0 = inlined_call_operand.vmem [shape: bf16[16,768], index: 0, kind: input, shape index: {}]   ;;  %s10954_s1 = inlined_call_operand.vmem [shape: f32[16,1], index: 1, kind: input, shape index: {}]   ;;  %s10955_s3 = inlined_call_operand.vmem [shape: bf16[16,200], index: 3, kind: output, shape index: {}]  }
   0x1   :  { %v7282_v0 = vld [vmem:[%s10952_s2 + $0x4] ss:$8 sps:$4 sm:$0xff]   ;;  %v7286_v2 = vld [vmem:[%s10952_s2] ss:$8 sps:$4 sm:$0xff]   ;;  %v7288_v4 = vld [vmem:[%s10952_s2 + $0x14] ss:$8 sps:$4 sm:$0xff]  }
   0x2   :  { %v7284_v1 = vld [vmem:[%s10952_s2 + $0x304] ss:$8 sps:$4 sm:$0xff]   ;;  %626 = vmatprep.subr.bf16.mxu0 %v7282_v0  ;;  %v7287_v3 = vld [vmem:[%s10952_s2 + $0x300] ss:$8 sps:$4 sm:$0xff]   ;;  %v7290_v5 = vld [vmem:[%s10952_s2 + $0x314] ss:$8 sps:$4 sm:$0xff]  }
   0x3   :  { %1332 = vmatprep.subr.bf16.mxu1 %v7284_v1  ;;  %627 = vmatpush1.bf16.msra.mxu0 %v7286_v2  ;;  %v7292_v6 = vld [vmem:[%s10952_s2 + $0x10] ss:$8 sps:$4 sm:$0xff]   ;;  %v7294_v8 = vld [vmem:[%s10952_s2 + $0x24] ss:$8 sps:$4 sm:$0xff]   ;;  %v7298_v10 = vld [vmem:[%s10952_s2 + $0x20] ss:$8 sps:$4 sm:$0xff]  }
   0x4   :  { %1333 = vmatpush1.bf16.msra.mxu1 %v7287_v3  ;;  %628 = vmatprep.subr.bf16.mxu0 %v7288_v4  ;;  %v7293_v7 = vld [vmem:[%s10952_s2 + $0x310] ss:$8 sps:$4 sm:$0xff]   ;;  %v7296_v9 = vld [vmem:[%s10952_s2 + $0x324] ss:$8 sps:$4 sm:$0xff]   ;;  %v7299_v11 = vld [vmem:[%s10952_s2 + $0x320] ss:$8 sps:$4 sm:$0xff]  }
   0x5   :  { %1334 = vmatprep.subr.bf16.mxu1 %v7290_v5  ;;  %v7300_v12 = vld [vmem:[%s10952_s2 + $0x34] ss:$8 sps:$4 sm:$0xff]   ;;  %v7304_v14 = vld [vmem:[%s10952_s2 + $0x30] ss:$8 sps:$4 sm:$0xff]   ;;  %v7306_v16 = vld [vmem:[%s10952_s2 + $0x44] ss:$8 sps:$4 sm:$0xff]  }
   0x6   :  { %v7302_v13 = vld [vmem:[%s10952_s2 + $0x334] ss:$8 sps:$4 sm:$0xff]   ;;  %v7305_v15 = vld [vmem:[%s10952_s2 + $0x330] ss:$8 sps:$4 sm:$0xff]   ;;  %v7308_v17 = vld [vmem:[%s10952_s2 + $0x344] ss:$8 sps:$4 sm:$0xff]  }
   0x7   :  { %629 = vmatpush1.bf16.msra.mxu0 %v7292_v6  ;;  %v7310_v18 = vld [vmem:[%s10952_s2 + $0x40] ss:$8 sps:$4 sm:$0xff]   ;;  %v7312_v20 = vld [vmem:[%s10952_s2 + $0x54] ss:$8 sps:$4 sm:$0xff]   ;;  %v7316_v22 = vld [vmem:[%s10952_s2 + $0x50] ss:$8 sps:$4 sm:$0xff]  }
   0x8   :  { %1335 = vmatpush1.bf16.msra.mxu1 %v7293_v7  ;;  %630 = vmatprep.subr.bf16.mxu0 %v7294_v8  ;;  %v7311_v19 = vld [vmem:[%s10952_s2 + $0x340] ss:$8 sps:$4 sm:$0xff]   ;;  %v7314_v21 = vld [vmem:[%s10952_s2 + $0x354] ss:$8 sps:$4 sm:$0xff]   ;;  %v7317_v23 = vld [vmem:[%s10952_s2 + $0x350] ss:$8 sps:$4 sm:$0xff]  }
   0x9   :  { %1336 = vmatprep.subr.bf16.mxu1 %v7296_v9  ;;  %v7318_v24 = vld [vmem:[%s10952_s2 + $0x64] ss:$8 sps:$4 sm:$0xff]   ;;  %v7322_v26 = vld [vmem:[%s10952_s2 + $0x60] ss:$8 sps:$4 sm:$0xff]   ;;  %v7324_v28 = vld [vmem:[%s10952_s2 + $0x74] ss:$8 sps:$4 sm:$0xff]  }
   0xa   :  { %v7320_v25 = vld [vmem:[%s10952_s2 + $0x364] ss:$8 sps:$4 sm:$0xff]   ;;  %v7323_v27 = vld [vmem:[%s10952_s2 + $0x360] ss:$8 sps:$4 sm:$0xff]   ;;  %v7326_v29 = vld [vmem:[%s10952_s2 + $0x374] ss:$8 sps:$4 sm:$0xff]  }
   0xb   :  { %631 = vmatpush1.bf16.msra.mxu0 %v7298_v10  ;;  %v7328_v30 = vld [vmem:[%s10952_s2 + $0x70] ss:$8 sps:$4 sm:$0xff]   ;;  %v7330_v32 = vld [vmem:[%s10952_s2 + $0x84] ss:$8 sps:$4 sm:$0xff]   ;;  %v7334_v34 = vld [vmem:[%s10952_s2 + $0x80] ss:$8 sps:$4 sm:$0xff]  }
   0xc   :  { %1337 = vmatpush1.bf16.msra.mxu1 %v7299_v11  ;;  %632 = vmatprep.subr.bf16.mxu0 %v7300_v12  ;;  %v7329_v31 = vld [vmem:[%s10952_s2 + $0x370] ss:$8 sps:$4 sm:$0xff]   ;;  %v7332_v33 = vld [vmem:[%s10952_s2 + $0x384] ss:$8 sps:$4 sm:$0xff]   ;;  %v7335_v35 = vld [vmem:[%s10952_s2 + $0x380] ss:$8 sps:$4 sm:$0xff]  }
   0xd   :  { %1338 = vmatprep.subr.bf16.mxu1 %v7302_v13  ;;  %v7336_v36 = vld [vmem:[%s10952_s2 + $0x94] ss:$8 sps:$4 sm:$0xff]   ;;  %v7340_v38 = vld [vmem:[%s10952_s2 + $0x90] ss:$8 sps:$4 sm:$0xff]   ;;  %v7342_v40 = vld [vmem:[%s10952_s2 + $0xa4] ss:$8 sps:$4 sm:$0xff]  }
   0xe   :  { %v7338_v37 = vld [vmem:[%s10952_s2 + $0x394] ss:$8 sps:$4 sm:$0xff]   ;;  %v7341_v39 = vld [vmem:[%s10952_s2 + $0x390] ss:$8 sps:$4 sm:$0xff]   ;;  %v7344_v41 = vld [vmem:[%s10952_s2 + $0x3a4] ss:$8 sps:$4 sm:$0xff]  }
   0xf   :  { %633 = vmatpush1.bf16.msra.mxu0 %v7304_v14  ;;  %v7346_v42 = vld [vmem:[%s10952_s2 + $0xa0] ss:$8 sps:$4 sm:$0xff]   ;;  %v7348_v44 = vld [vmem:[%s10952_s2 + $0xb4] ss:$8 sps:$4 sm:$0xff]   ;;  %v7352_v46 = vld [vmem:[%s10952_s2 + $0xb0] ss:$8 sps:$4 sm:$0xff]  }
  0x10   :  { %1339 = vmatpush1.bf16.msra.mxu1 %v7305_v15  ;;  %634 = vmatprep.subr.bf16.mxu0 %v7306_v16  ;;  %v7347_v43 = vld [vmem:[%s10952_s2 + $0x3a0] ss:$8 sps:$4 sm:$0xff]   ;;  %v7350_v45 = vld [vmem:[%s10952_s2 + $0x3b4] ss:$8 sps:$4 sm:$0xff]   ;;  %v7353_v48 = vld [vmem:[%s10952_s2 + $0x3b0] ss:$8 sps:$4 sm:$0xff]  }
  0x11   :  { %1340 = vmatprep.subr.bf16.mxu1 %v7308_v17  ;;  %v7378_v47 = vld [vmem:[%s10953_s0 + $0x4] ss:$24 sps:$4 sm:$0xff]   ;;  %v7358_v51 = vld [vmem:[%s10952_s2 + $0xc0] ss:$8 sps:$4 sm:$0xff]   ;;  %v7364_v55 = vld [vmem:[%s10952_s2 + $0xd0] ss:$8 sps:$4 sm:$0xff]  }
  0x12   :  { %v7354_v49 = vld [vmem:[%s10952_s2 + $0xc4] ss:$8 sps:$4 sm:$0xff]   ;;  %658 = vmatprep.mubr.bf16.mxu0 %v7378_v47  ;;  %1364 = vmatprep.mubr.bf16.mxu1 %v7378_v47  ;;  %v7359_v52 = vld [vmem:[%s10952_s2 + $0x3c0] ss:$8 sps:$4 sm:$0xff]   ;;  %v7360_v53 = vld [vmem:[%s10952_s2 + $0xd4] ss:$8 sps:$4 sm:$0xff]  }
  0x13   :  { %635 = vmatpush1.bf16.msra.mxu0 %v7310_v18  ;;  %v7356_v50 = vld [vmem:[%s10952_s2 + $0x3c4] ss:$8 sps:$4 sm:$0xff]   ;;  %v7362_v54 = vld [vmem:[%s10952_s2 + $0x3d4] ss:$8 sps:$4 sm:$0xff]   ;;  %v7365_v56 = vld [vmem:[%s10952_s2 + $0x3d0] ss:$8 sps:$4 sm:$0xff]  }
  0x14   :  { %1341 = vmatpush1.bf16.msra.mxu1 %v7311_v19  ;;  %636 = vmatprep.subr.bf16.mxu0 %v7312_v20  ;;  %v7366_v57 = vld [vmem:[%s10952_s2 + $0xe4] ss:$8 sps:$4 sm:$0xff]   ;;  %v7370_v59 = vld [vmem:[%s10952_s2 + $0xe0] ss:$8 sps:$4 sm:$0xff]   ;;  %v7372_v61 = vld [vmem:[%s10952_s2 + $0xf4] ss:$8 sps:$4 sm:$0xff]  }
  0x15   :  { %1342 = vmatprep.subr.bf16.mxu1 %v7314_v21  ;;  %v7368_v58 = vld [vmem:[%s10952_s2 + $0x3e4] ss:$8 sps:$4 sm:$0xff]   ;;  %v7371_v60 = vld [vmem:[%s10952_s2 + $0x3e0] ss:$8 sps:$4 sm:$0xff]   ;;  %v7374_v62 = vld [vmem:[%s10952_s2 + $0x3f4] ss:$8 sps:$4 sm:$0xff]  }
  0x16   :  { %v7376_v63 = vld [vmem:[%s10952_s2 + $0xf0] ss:$8 sps:$4 sm:$0xff]   ;;  %v7382_v1 = vld [vmem:[%s10952_s2 + $0x104] ss:$8 sps:$4 sm:$0xff]   ;;  %v7380_v3 = vld [vmem:[%s10952_s2 + $0x100] ss:$8 sps:$4 sm:$0xff]  }
  0x17   :  { %637 = vmatpush1.bf16.msra.mxu0 %v7316_v22  ;;  %v7377_v0 = vld [vmem:[%s10952_s2 + $0x3f0] ss:$8 sps:$4 sm:$0xff]   ;;  %v7385_v2 = vld [vmem:[%s10952_s2 + $0x404] ss:$8 sps:$4 sm:$0xff]   ;;  %v7383_v4 = vld [vmem:[%s10952_s2 + $0x400] ss:$8 sps:$4 sm:$0xff]  }
  0x18   :  { %1343 = vmatpush1.bf16.msra.mxu1 %v7317_v23  ;;  %638 = vmatprep.subr.bf16.mxu0 %v7318_v24  ;;  %v7386_v5 = vld [vmem:[%s10953_s0] ss:$24 sps:$4 sm:$0xff]   ;;  %v7389_v6 = vld [vmem:[%s10952_s2 + $0x114] ss:$8 sps:$4 sm:$0xff]   ;;  %v7395_v10 = vld [vmem:[%s10952_s2 + $0x124] ss:$8 sps:$4 sm:$0xff]  }
  0x19   :  { %1344 = vmatprep.subr.bf16.mxu1 %v7320_v25  ;;  %v7392_v7 = vld [vmem:[%s10952_s2 + $0x414] ss:$8 sps:$4 sm:$0xff]   ;;  %v7387_v8 = vld [vmem:[%s10952_s2 + $0x110] ss:$8 sps:$4 sm:$0xff]   ;;  %v7398_v11 = vld [vmem:[%s10952_s2 + $0x424] ss:$8 sps:$4 sm:$0xff]  }
  0x1a   :  { %v7390_v9 = vld [vmem:[%s10952_s2 + $0x410] ss:$8 sps:$4 sm:$0xff]   ;;  %v7393_v12 = vld [vmem:[%s10952_s2 + $0x120] ss:$8 sps:$4 sm:$0xff]   ;;  %v7401_v14 = vld [vmem:[%s10952_s2 + $0x134] ss:$8 sps:$4 sm:$0xff]  }
  0x1b   :  { %639 = vmatpush1.bf16.msra.mxu0 %v7322_v26  ;;  %v7396_v13 = vld [vmem:[%s10952_s2 + $0x420] ss:$8 sps:$4 sm:$0xff]   ;;  %v7404_v15 = vld [vmem:[%s10952_s2 + $0x434] ss:$8 sps:$4 sm:$0xff]   ;;  %v7399_v16 = vld [vmem:[%s10952_s2 + $0x130] ss:$8 sps:$4 sm:$0xff]  }
  0x1c   :  { %1345 = vmatpush1.bf16.msra.mxu1 %v7323_v27  ;;  %640 = vmatprep.subr.bf16.mxu0 %v7324_v28  ;;  %v7402_v17 = vld [vmem:[%s10952_s2 + $0x430] ss:$8 sps:$4 sm:$0xff]   ;;  %v7407_v18 = vld [vmem:[%s10952_s2 + $0x144] ss:$8 sps:$4 sm:$0xff]   ;;  %v7405_v20 = vld [vmem:[%s10952_s2 + $0x140] ss:$8 sps:$4 sm:$0xff]  }
  0x1d   :  { %1346 = vmatprep.subr.bf16.mxu1 %v7326_v29  ;;  %v7410_v19 = vld [vmem:[%s10952_s2 + $0x444] ss:$8 sps:$4 sm:$0xff]   ;;  %v7408_v21 = vld [vmem:[%s10952_s2 + $0x440] ss:$8 sps:$4 sm:$0xff]   ;;  %v7413_v22 = vld [vmem:[%s10952_s2 + $0x154] ss:$8 sps:$4 sm:$0xff]  }
  0x1e   :  { %v7416_v23 = vld [vmem:[%s10952_s2 + $0x454] ss:$8 sps:$4 sm:$0xff]   ;;  %v7411_v24 = vld [vmem:[%s10952_s2 + $0x150] ss:$8 sps:$4 sm:$0xff]   ;;  %v7419_v26 = vld [vmem:[%s10952_s2 + $0x164] ss:$8 sps:$4 sm:$0xff]  }
  0x1f   :  { %641 = vmatpush1.bf16.msra.mxu0 %v7328_v30  ;;  %v7414_v25 = vld [vmem:[%s10952_s2 + $0x450] ss:$8 sps:$4 sm:$0xff]   ;;  %v7422_v27 = vld [vmem:[%s10952_s2 + $0x464] ss:$8 sps:$4 sm:$0xff]   ;;  %v7417_v28 = vld [vmem:[%s10952_s2 + $0x160] ss:$8 sps:$4 sm:$0xff]  }
  0x20   :  { %1347 = vmatpush1.bf16.msra.mxu1 %v7329_v31  ;;  %642 = vmatprep.subr.bf16.mxu0 %v7330_v32  ;;  %v7477_v29 = vld [vmem:[%s10953_s0 + $0xc] ss:$24 sps:$4 sm:$0xff]   ;;  %v7420_v30 = vld [vmem:[%s10952_s2 + $0x460] ss:$8 sps:$4 sm:$0xff]   ;;  %v7425_v31 = vld [vmem:[%s10952_s2 + $0x174] ss:$8 sps:$4 sm:$0xff]  }
  0x21   :  { %1348 = vmatprep.subr.bf16.mxu1 %v7332_v33  ;;  %v7428_v32 = vld [vmem:[%s10952_s2 + $0x474] ss:$8 sps:$4 sm:$0xff]   ;;  %v7423_v33 = vld [vmem:[%s10952_s2 + $0x170] ss:$8 sps:$4 sm:$0xff]   ;;  %vm5759_vm2 = vmor %vm5758_vm1, %vm5757_vm0 }
  0x22   :  { %v7449_v47 = vld [vmem:[%s10952_s2 + $0x1b4] ss:$8 sps:$4 sm:$0xff]  }
  0x23   :  { %643 = vmatpush1.bf16.msra.mxu0 %v7334_v34  ;;  %v7426_v34 = vld [vmem:[%s10952_s2 + $0x470] ss:$8 sps:$4 sm:$0xff]  }
  0x24   :  { %1349 = vmatpush1.bf16.msra.mxu1 %v7335_v35  ;;  %644 = vmatprep.subr.bf16.mxu0 %v7336_v36  ;;  %v7431_v35 = vld [vmem:[%s10952_s2 + $0x184] ss:$8 sps:$4 sm:$0xff]  }
  0x25   :  { %1350 = vmatprep.subr.bf16.mxu1 %v7338_v37  ;;  %v7434_v36 = vld [vmem:[%s10952_s2 + $0x484] ss:$8 sps:$4 sm:$0xff]   ;;  %v7429_v37 = vld [vmem:[%s10952_s2 + $0x180] ss:$8 sps:$4 sm:$0xff]  }
  0x27   :  { %645 = vmatpush1.bf16.msra.mxu0 %v7340_v38  ;;  %v7432_v38 = vld [vmem:[%s10952_s2 + $0x480] ss:$8 sps:$4 sm:$0xff]  }
  0x28   :  { %1351 = vmatpush1.bf16.msra.mxu1 %v7341_v39  ;;  %646 = vmatprep.subr.bf16.mxu0 %v7342_v40  ;;  %v7437_v39 = vld [vmem:[%s10952_s2 + $0x194] ss:$8 sps:$4 sm:$0xff]  }
  0x29   :  { %1352 = vmatprep.subr.bf16.mxu1 %v7344_v41  ;;  %v7440_v40 = vld [vmem:[%s10952_s2 + $0x494] ss:$8 sps:$4 sm:$0xff]   ;;  %v7435_v41 = vld [vmem:[%s10952_s2 + $0x190] ss:$8 sps:$4 sm:$0xff]  }
  0x2b   :  { %647 = vmatpush1.bf16.msra.mxu0 %v7346_v42  ;;  %v7438_v42 = vld [vmem:[%s10952_s2 + $0x490] ss:$8 sps:$4 sm:$0xff]  }
  0x2c   :  { %1353 = vmatpush1.bf16.msra.mxu1 %v7347_v43  ;;  %648 = vmatprep.subr.bf16.mxu0 %v7348_v44  ;;  %v7443_v43 = vld [vmem:[%s10952_s2 + $0x1a4] ss:$8 sps:$4 sm:$0xff]  }
  0x2d   :  { %1354 = vmatprep.subr.bf16.mxu1 %v7350_v45  ;;  %v7446_v44 = vld [vmem:[%s10952_s2 + $0x4a4] ss:$8 sps:$4 sm:$0xff]   ;;  %v7441_v45 = vld [vmem:[%s10952_s2 + $0x1a0] ss:$8 sps:$4 sm:$0xff]  }
  0x2f   :  { %649 = vmatpush1.bf16.msra.mxu0 %v7352_v46  ;;  %v7444_v46 = vld [vmem:[%s10952_s2 + $0x4a0] ss:$8 sps:$4 sm:$0xff]  }
  0x30   :  { %1355 = vmatpush1.bf16.msra.mxu1 %v7353_v48  ;;  %650 = vmatprep.subr.bf16.mxu0 %v7354_v49  ;;  %v7452_v48 = vld [vmem:[%s10952_s2 + $0x4b4] ss:$8 sps:$4 sm:$0xff]   ;;  %v7447_v49 = vld [vmem:[%s10952_s2 + $0x1b0] ss:$8 sps:$4 sm:$0xff]  }
  0x31   :  { %1356 = vmatprep.subr.bf16.mxu1 %v7356_v50  ;;  %v7450_v50 = vld [vmem:[%s10952_s2 + $0x4b0] ss:$8 sps:$4 sm:$0xff]  }
  0x33   :  { %651 = vmatpush1.bf16.msra.mxu0 %v7358_v51  ;;  %v7455_v51 = vld [vmem:[%s10952_s2 + $0x1c4] ss:$8 sps:$4 sm:$0xff]  }
  0x34   :  { %1357 = vmatpush1.bf16.msra.mxu1 %v7359_v52  ;;  %652 = vmatprep.subr.bf16.mxu0 %v7360_v53  ;;  %v7458_v52 = vld [vmem:[%s10952_s2 + $0x4c4] ss:$8 sps:$4 sm:$0xff]   ;;  %v7453_v53 = vld [vmem:[%s10952_s2 + $0x1c0] ss:$8 sps:$4 sm:$0xff]  }
  0x35   :  { %1358 = vmatprep.subr.bf16.mxu1 %v7362_v54  ;;  %v7456_v54 = vld [vmem:[%s10952_s2 + $0x4c0] ss:$8 sps:$4 sm:$0xff]  }
  0x37   :  { %653 = vmatpush1.bf16.msra.mxu0 %v7364_v55  ;;  %v7461_v55 = vld [vmem:[%s10952_s2 + $0x1d4] ss:$8 sps:$4 sm:$0xff]  }
  0x38   :  { %1359 = vmatpush1.bf16.msra.mxu1 %v7365_v56  ;;  %654 = vmatprep.subr.bf16.mxu0 %v7366_v57  ;;  %v7464_v56 = vld [vmem:[%s10952_s2 + $0x4d4] ss:$8 sps:$4 sm:$0xff]   ;;  %v7459_v57 = vld [vmem:[%s10952_s2 + $0x1d0] ss:$8 sps:$4 sm:$0xff]  }
  0x39   :  { %1360 = vmatprep.subr.bf16.mxu1 %v7368_v58  ;;  %v7462_v58 = vld [vmem:[%s10952_s2 + $0x4d0] ss:$8 sps:$4 sm:$0xff]  }
  0x3b   :  { %655 = vmatpush1.bf16.msra.mxu0 %v7370_v59  ;;  %v7467_v59 = vld [vmem:[%s10952_s2 + $0x1e4] ss:$8 sps:$4 sm:$0xff]  }
  0x3c   :  { %1361 = vmatpush1.bf16.msra.mxu1 %v7371_v60  ;;  %656 = vmatprep.subr.bf16.mxu0 %v7372_v61  ;;  %v7470_v60 = vld [vmem:[%s10952_s2 + $0x4e4] ss:$8 sps:$4 sm:$0xff]   ;;  %v7465_v61 = vld [vmem:[%s10952_s2 + $0x1e0] ss:$8 sps:$4 sm:$0xff]  }
  0x3d   :  { %1362 = vmatprep.subr.bf16.mxu1 %v7374_v62  ;;  %v7468_v62 = vld [vmem:[%s10952_s2 + $0x4e0] ss:$8 sps:$4 sm:$0xff]  }
  0x3f   :  { %657 = vmatpush1.bf16.msra.mxu0 %v7376_v63  ;;  %v7473_v63 = vld [vmem:[%s10952_s2 + $0x1f4] ss:$8 sps:$4 sm:$0xff]  }
  0x40   :  { %1363 = vmatpush1.bf16.msra.mxu1 %v7377_v0  ;;  %669 = vmatprep.subr.bf16.mxu0 %v7382_v1  ;;  %v7476_v0 = vld [vmem:[%s10952_s2 + $0x4f4] ss:$8 sps:$4 sm:$0xff]   ;;  %v7471_v1 = vld [vmem:[%s10952_s2 + $0x1f0] ss:$8 sps:$4 sm:$0xff]  }
  0x41   :  { %1375 = vmatprep.subr.bf16.mxu1 %v7385_v2  ;;  %v7474_v2 = vld [vmem:[%s10952_s2 + $0x4f0] ss:$8 sps:$4 sm:$0xff]  }
  0x42   :  { %659 = vmatmul.mubr.bf16.vlgmr.msra.gmra.mrb[0].mxu0 %v7386_v5 }
  0x43   :  { %1365 = vmatmul.mubr.bf16.vlgmr.msra.gmra.mrb[0].mxu1 %v7386_v5  ;;  %670 = vmatpush1.bf16.msra.mxu0 %v7380_v3  ;;  %v7481_v3 = vld [vmem:[%s10952_s2 + $0x204] ss:$8 sps:$4 sm:$0xff]   ;;  %v7479_v5 = vld [vmem:[%s10952_s2 + $0x200] ss:$8 sps:$4 sm:$0xff]  }
  0x44   :  { %1376 = vmatpush1.bf16.msra.mxu1 %v7383_v4  ;;  %671 = vmatprep.subr.bf16.mxu0 %v7389_v6  ;;  %v7484_v4 = vld [vmem:[%s10952_s2 + $0x504] ss:$8 sps:$4 sm:$0xff]   ;;  %v7482_v6 = vld [vmem:[%s10952_s2 + $0x500] ss:$8 sps:$4 sm:$0xff]  }
  0x45   :  { %1377 = vmatprep.subr.bf16.mxu1 %v7392_v7  ;;  %701 = vmatprep.mubr.bf16.mxu0 %v7477_v29  ;;  %v7485_v7 = vld [vmem:[%s10953_s0 + $0x8] ss:$24 sps:$4 sm:$0xff]  }
  0x46   :  { %1407 = vmatprep.mubr.bf16.mxu1 %v7477_v29  ;;  %v7518_v29 = vld [vmem:[%s10952_s2 + $0x264] ss:$8 sps:$4 sm:$0xff]  }
  0x47   :  { %672 = vmatpush1.bf16.msra.mxu0 %v7387_v8  ;;  %v7488_v8 = vld [vmem:[%s10952_s2 + $0x214] ss:$8 sps:$4 sm:$0xff]  }
  0x48   :  { %1378 = vmatpush1.bf16.msra.mxu1 %v7390_v9  ;;  %673 = vmatprep.subr.bf16.mxu0 %v7395_v10  ;;  %v7491_v9 = vld [vmem:[%s10952_s2 + $0x514] ss:$8 sps:$4 sm:$0xff]   ;;  %v7486_v10 = vld [vmem:[%s10952_s2 + $0x210] ss:$8 sps:$4 sm:$0xff]  }
  0x49   :  { %1379 = vmatprep.subr.bf16.mxu1 %v7398_v11  ;;  %v7489_v11 = vld [vmem:[%s10952_s2 + $0x510] ss:$8 sps:$4 sm:$0xff]  }
  0x4b   :  { %674 = vmatpush1.bf16.msra.mxu0 %v7393_v12  ;;  %v7576_v12 = vld [vmem:[%s10953_s0 + $0x14] ss:$24 sps:$4 sm:$0xff]  }
  0x4c   :  { %1380 = vmatpush1.bf16.msra.mxu1 %v7396_v13  ;;  %675 = vmatprep.subr.bf16.mxu0 %v7401_v14  ;;  %v7494_v13 = vld [vmem:[%s10952_s2 + $0x224] ss:$8 sps:$4 sm:$0xff]  }
  0x4d   :  { %1381 = vmatprep.subr.bf16.mxu1 %v7404_v15  ;;  %v7497_v14 = vld [vmem:[%s10952_s2 + $0x524] ss:$8 sps:$4 sm:$0xff]   ;;  %v7492_v15 = vld [vmem:[%s10952_s2 + $0x220] ss:$8 sps:$4 sm:$0xff]  }
  0x4f   :  { %676 = vmatpush1.bf16.msra.mxu0 %v7399_v16  ;;  %v7495_v16 = vld [vmem:[%s10952_s2 + $0x520] ss:$8 sps:$4 sm:$0xff]  }
  0x50   :  { %1382 = vmatpush1.bf16.msra.mxu1 %v7402_v17  ;;  %677 = vmatprep.subr.bf16.mxu0 %v7407_v18  ;;  %v7500_v17 = vld [vmem:[%s10952_s2 + $0x234] ss:$8 sps:$4 sm:$0xff]  }
  0x51   :  { %1383 = vmatprep.subr.bf16.mxu1 %v7410_v19  ;;  %v7503_v18 = vld [vmem:[%s10952_s2 + $0x534] ss:$8 sps:$4 sm:$0xff]   ;;  %v7498_v19 = vld [vmem:[%s10952_s2 + $0x230] ss:$8 sps:$4 sm:$0xff]  }
  0x53   :  { %678 = vmatpush1.bf16.msra.mxu0 %v7405_v20  ;;  %v7501_v20 = vld [vmem:[%s10952_s2 + $0x530] ss:$8 sps:$4 sm:$0xff]  }
  0x54   :  { %1384 = vmatpush1.bf16.msra.mxu1 %v7408_v21  ;;  %679 = vmatprep.subr.bf16.mxu0 %v7413_v22  ;;  %v7506_v21 = vld [vmem:[%s10952_s2 + $0x244] ss:$8 sps:$4 sm:$0xff]  }
  0x55   :  { %1385 = vmatprep.subr.bf16.mxu1 %v7416_v23  ;;  %v7509_v22 = vld [vmem:[%s10952_s2 + $0x544] ss:$8 sps:$4 sm:$0xff]   ;;  %v7504_v23 = vld [vmem:[%s10952_s2 + $0x240] ss:$8 sps:$4 sm:$0xff]  }
  0x57   :  { %680 = vmatpush1.bf16.msra.mxu0 %v7411_v24  ;;  %v7507_v24 = vld [vmem:[%s10952_s2 + $0x540] ss:$8 sps:$4 sm:$0xff]  }
  0x58   :  { %1386 = vmatpush1.bf16.msra.mxu1 %v7414_v25  ;;  %681 = vmatprep.subr.bf16.mxu0 %v7419_v26  ;;  %v7512_v25 = vld [vmem:[%s10952_s2 + $0x254] ss:$8 sps:$4 sm:$0xff]  }
  0x59   :  { %1387 = vmatprep.subr.bf16.mxu1 %v7422_v27  ;;  %v7515_v26 = vld [vmem:[%s10952_s2 + $0x554] ss:$8 sps:$4 sm:$0xff]   ;;  %v7510_v27 = vld [vmem:[%s10952_s2 + $0x250] ss:$8 sps:$4 sm:$0xff]  }
  0x5b   :  { %682 = vmatpush1.bf16.msra.mxu0 %v7417_v28  ;;  %v7513_v28 = vld [vmem:[%s10952_s2 + $0x550] ss:$8 sps:$4 sm:$0xff]  }
  0x5c   :  { %1388 = vmatpush1.bf16.msra.mxu1 %v7420_v30  ;;  %683 = vmatprep.subr.bf16.mxu0 %v7425_v31  ;;  %v7521_v30 = vld [vmem:[%s10952_s2 + $0x564] ss:$8 sps:$4 sm:$0xff]   ;;  %v7516_v31 = vld [vmem:[%s10952_s2 + $0x260] ss:$8 sps:$4 sm:$0xff]  }
  0x5d   :  { %1389 = vmatprep.subr.bf16.mxu1 %v7428_v32  ;;  %v7519_v32 = vld [vmem:[%s10952_s2 + $0x560] ss:$8 sps:$4 sm:$0xff]  }
  0x5f   :  { %684 = vmatpush1.bf16.msra.mxu0 %v7423_v33  ;;  %v7524_v33 = vld [vmem:[%s10952_s2 + $0x274] ss:$8 sps:$4 sm:$0xff]  }
  0x60   :  { %1390 = vmatpush1.bf16.msra.mxu1 %v7426_v34  ;;  %685 = vmatprep.subr.bf16.mxu0 %v7431_v35  ;;  %v7527_v34 = vld [vmem:[%s10952_s2 + $0x574] ss:$8 sps:$4 sm:$0xff]   ;;  %v7522_v35 = vld [vmem:[%s10952_s2 + $0x270] ss:$8 sps:$4 sm:$0xff]  }
  0x61   :  { %1391 = vmatprep.subr.bf16.mxu1 %v7434_v36  ;;  %v7525_v36 = vld [vmem:[%s10952_s2 + $0x570] ss:$8 sps:$4 sm:$0xff]  }
  0x63   :  { %686 = vmatpush1.bf16.msra.mxu0 %v7429_v37  ;;  %v7530_v37 = vld [vmem:[%s10952_s2 + $0x284] ss:$8 sps:$4 sm:$0xff]  }
  0x64   :  { %1392 = vmatpush1.bf16.msra.mxu1 %v7432_v38  ;;  %687 = vmatprep.subr.bf16.mxu0 %v7437_v39  ;;  %v7533_v38 = vld [vmem:[%s10952_s2 + $0x584] ss:$8 sps:$4 sm:$0xff]   ;;  %v7528_v39 = vld [vmem:[%s10952_s2 + $0x280] ss:$8 sps:$4 sm:$0xff]  }
  0x65   :  { %1393 = vmatprep.subr.bf16.mxu1 %v7440_v40  ;;  %v7531_v40 = vld [vmem:[%s10952_s2 + $0x580] ss:$8 sps:$4 sm:$0xff]  }
  0x67   :  { %688 = vmatpush1.bf16.msra.mxu0 %v7435_v41  ;;  %v7536_v41 = vld [vmem:[%s10952_s2 + $0x294] ss:$8 sps:$4 sm:$0xff]  }
  0x68   :  { %1394 = vmatpush1.bf16.msra.mxu1 %v7438_v42  ;;  %689 = vmatprep.subr.bf16.mxu0 %v7443_v43  ;;  %v7539_v42 = vld [vmem:[%s10952_s2 + $0x594] ss:$8 sps:$4 sm:$0xff]   ;;  %v7534_v43 = vld [vmem:[%s10952_s2 + $0x290] ss:$8 sps:$4 sm:$0xff]  }
  0x69   :  { %1395 = vmatprep.subr.bf16.mxu1 %v7446_v44  ;;  %v7537_v44 = vld [vmem:[%s10952_s2 + $0x590] ss:$8 sps:$4 sm:$0xff]  }
  0x6b   :  { %690 = vmatpush1.bf16.msra.mxu0 %v7441_v45  ;;  %v7542_v45 = vld [vmem:[%s10952_s2 + $0x2a4] ss:$8 sps:$4 sm:$0xff]  }
  0x6c   :  { %1396 = vmatpush1.bf16.msra.mxu1 %v7444_v46  ;;  %691 = vmatprep.subr.bf16.mxu0 %v7449_v47  ;;  %v7545_v46 = vld [vmem:[%s10952_s2 + $0x5a4] ss:$8 sps:$4 sm:$0xff]   ;;  %v7540_v47 = vld [vmem:[%s10952_s2 + $0x2a0] ss:$8 sps:$4 sm:$0xff]  }
  0x6d   :  { %1397 = vmatprep.subr.bf16.mxu1 %v7452_v48  ;;  %v7543_v48 = vld [vmem:[%s10952_s2 + $0x5a0] ss:$8 sps:$4 sm:$0xff]  }
  0x6f   :  { %692 = vmatpush1.bf16.msra.mxu0 %v7447_v49  ;;  %v7548_v49 = vld [vmem:[%s10952_s2 + $0x2b4] ss:$8 sps:$4 sm:$0xff]  }
  0x70   :  { %1398 = vmatpush1.bf16.msra.mxu1 %v7450_v50  ;;  %693 = vmatprep.subr.bf16.mxu0 %v7455_v51  ;;  %v7551_v50 = vld [vmem:[%s10952_s2 + $0x5b4] ss:$8 sps:$4 sm:$0xff]   ;;  %v7546_v51 = vld [vmem:[%s10952_s2 + $0x2b0] ss:$8 sps:$4 sm:$0xff]  }
  0x71   :  { %1399 = vmatprep.subr.bf16.mxu1 %v7458_v52  ;;  %v7549_v52 = vld [vmem:[%s10952_s2 + $0x5b0] ss:$8 sps:$4 sm:$0xff]  }
  0x73   :  { %694 = vmatpush1.bf16.msra.mxu0 %v7453_v53  ;;  %v7554_v53 = vld [vmem:[%s10952_s2 + $0x2c4] ss:$8 sps:$4 sm:$0xff]  }
  0x74   :  { %1400 = vmatpush1.bf16.msra.mxu1 %v7456_v54  ;;  %695 = vmatprep.subr.bf16.mxu0 %v7461_v55  ;;  %v7557_v54 = vld [vmem:[%s10952_s2 + $0x5c4] ss:$8 sps:$4 sm:$0xff]   ;;  %v7552_v55 = vld [vmem:[%s10952_s2 + $0x2c0] ss:$8 sps:$4 sm:$0xff]  }
  0x75   :  { %1401 = vmatprep.subr.bf16.mxu1 %v7464_v56  ;;  %v7555_v56 = vld [vmem:[%s10952_s2 + $0x5c0] ss:$8 sps:$4 sm:$0xff]  }
  0x77   :  { %696 = vmatpush1.bf16.msra.mxu0 %v7459_v57  ;;  %v7560_v57 = vld [vmem:[%s10952_s2 + $0x2d4] ss:$8 sps:$4 sm:$0xff]  }
  0x78   :  { %1402 = vmatpush1.bf16.msra.mxu1 %v7462_v58  ;;  %697 = vmatprep.subr.bf16.mxu0 %v7467_v59  ;;  %v7563_v58 = vld [vmem:[%s10952_s2 + $0x5d4] ss:$8 sps:$4 sm:$0xff]   ;;  %v7558_v59 = vld [vmem:[%s10952_s2 + $0x2d0] ss:$8 sps:$4 sm:$0xff]  }
  0x79   :  { %1403 = vmatprep.subr.bf16.mxu1 %v7470_v60  ;;  %v7561_v60 = vld [vmem:[%s10952_s2 + $0x5d0] ss:$8 sps:$4 sm:$0xff]  }
  0x7b   :  { %698 = vmatpush1.bf16.msra.mxu0 %v7465_v61  ;;  %v7566_v61 = vld [vmem:[%s10952_s2 + $0x2e4] ss:$8 sps:$4 sm:$0xff]  }
  0x7c   :  { %1404 = vmatpush1.bf16.msra.mxu1 %v7468_v62  ;;  %699 = vmatprep.subr.bf16.mxu0 %v7473_v63  ;;  %v7569_v62 = vld [vmem:[%s10952_s2 + $0x5e4] ss:$8 sps:$4 sm:$0xff]   ;;  %v7564_v63 = vld [vmem:[%s10952_s2 + $0x2e0] ss:$8 sps:$4 sm:$0xff]  }
  0x7d   :  { %1405 = vmatprep.subr.bf16.mxu1 %v7476_v0  ;;  %v7567_v0 = vld [vmem:[%s10952_s2 + $0x5e0] ss:$8 sps:$4 sm:$0xff]  }
  0x7f   :  { %700 = vmatpush1.bf16.msra.mxu0 %v7471_v1  ;;  %v7572_v1 = vld [vmem:[%s10952_s2 + $0x2f4] ss:$8 sps:$4 sm:$0xff]  }
  0x80   :  { %1406 = vmatpush1.bf16.msra.mxu1 %v7474_v2  ;;  %712 = vmatprep.subr.bf16.mxu0 %v7481_v3  ;;  %v7575_v2 = vld [vmem:[%s10952_s2 + $0x5f4] ss:$8 sps:$4 sm:$0xff]   ;;  %v7570_v3 = vld [vmem:[%s10952_s2 + $0x2f0] ss:$8 sps:$4 sm:$0xff]  }
  0x81   :  { %1418 = vmatprep.subr.bf16.mxu1 %v7484_v4  ;;  %v7573_v4 = vld [vmem:[%s10952_s2 + $0x5f0] ss:$8 sps:$4 sm:$0xff]  }
  0x82   :  { %702 = vmatmul.mubr.bf16.vlgmr.msra.gmra.mrb[0].mxu0 %v7485_v7 }
  0x83   :  { %1408 = vmatmul.mubr.bf16.vlgmr.msra.gmra.mrb[0].mxu1 %v7485_v7  ;;  %713 = vmatpush1.bf16.msra.mxu0 %v7479_v5  ;;  %v7581_v5 = vld [vmem:[%s10952_s2 + $0x604] ss:$8 sps:$4 sm:$0xff]   ;;  %v7578_v7 = vld [vmem:[%s10953_s0 + $0x10] ss:$24 sps:$4 sm:$0xff]  }
  0x84   :  { %1419 = vmatpush1.bf16.msra.mxu1 %v7482_v6  ;;  %714 = vmatprep.subr.bf16.mxu0 %v7488_v8  ;;  %v7584_v6 = vld [vmem:[%s10952_s2 + $0x904] ss:$8 sps:$4 sm:$0xff]   ;;  %v7579_v8 = vld [vmem:[%s10952_s2 + $0x600] ss:$8 sps:$4 sm:$0xff]  }
  0x85   :  { %1420 = vmatprep.subr.bf16.mxu1 %v7491_v9  ;;  %744 = vmatprep.mubr.bf16.mxu0 %v7576_v12  ;;  %v7582_v9 = vld [vmem:[%s10952_s2 + $0x900] ss:$8 sps:$4 sm:$0xff]  }
  0x86   :  { %1450 = vmatprep.mubr.bf16.mxu1 %v7576_v12  ;;  %v7585_v12 = vld [vmem:[%s10952_s2 + $0x610] ss:$8 sps:$4 sm:$0xff]  }
  0x87   :  { %715 = vmatpush1.bf16.msra.mxu0 %v7486_v10  ;;  %v7587_v10 = vld [vmem:[%s10952_s2 + $0x614] ss:$8 sps:$4 sm:$0xff]  }
  0x88   :  { %1421 = vmatpush1.bf16.msra.mxu1 %v7489_v11  ;;  %716 = vmatprep.subr.bf16.mxu0 %v7494_v13  ;;  %v7590_v11 = vld [vmem:[%s10952_s2 + $0x914] ss:$8 sps:$4 sm:$0xff]   ;;  %v7588_v13 = vld [vmem:[%s10952_s2 + $0x910] ss:$8 sps:$4 sm:$0xff]  }
  0x89   :  { %1422 = vmatprep.subr.bf16.mxu1 %v7497_v14  ;;  %v7593_v14 = vld [vmem:[%s10952_s2 + $0x624] ss:$8 sps:$4 sm:$0xff]  }
  0x8b   :  { %717 = vmatpush1.bf16.msra.mxu0 %v7492_v15  ;;  %v7596_v15 = vld [vmem:[%s10952_s2 + $0x924] ss:$8 sps:$4 sm:$0xff]  }
  0x8c   :  { %1423 = vmatpush1.bf16.msra.mxu1 %v7495_v16  ;;  %718 = vmatprep.subr.bf16.mxu0 %v7500_v17  ;;  %v8443_v16 = vld [vmem:[%s10953_s0 + $0x4] ss:$24 sps:$4 sm:$0xff]   ;;  %v7591_v17 = vld [vmem:[%s10952_s2 + $0x620] ss:$8 sps:$4 sm:$0xff]  }
  0x8d   :  { %1424 = vmatprep.subr.bf16.mxu1 %v7503_v18  ;;  %v7594_v18 = vld [vmem:[%s10952_s2 + $0x920] ss:$8 sps:$4 sm:$0xff]  }
  0x8f   :  { %719 = vmatpush1.bf16.msra.mxu0 %v7498_v19  ;;  %v7599_v19 = vld [vmem:[%s10952_s2 + $0x634] ss:$8 sps:$4 sm:$0xff]  }
  0x90   :  { %1425 = vmatpush1.bf16.msra.mxu1 %v7501_v20  ;;  %720 = vmatprep.subr.bf16.mxu0 %v7506_v21  ;;  %v7602_v20 = vld [vmem:[%s10952_s2 + $0x934] ss:$8 sps:$4 sm:$0xff]   ;;  %v7597_v21 = vld [vmem:[%s10952_s2 + $0x630] ss:$8 sps:$4 sm:$0xff]  }
  0x91   :  { %1426 = vmatprep.subr.bf16.mxu1 %v7509_v22  ;;  %v7600_v22 = vld [vmem:[%s10952_s2 + $0x930] ss:$8 sps:$4 sm:$0xff]  }
  0x93   :  { %721 = vmatpush1.bf16.msra.mxu0 %v7504_v23  ;;  %v7605_v23 = vld [vmem:[%s10952_s2 + $0x644] ss:$8 sps:$4 sm:$0xff]  }
  0x94   :  { %1427 = vmatpush1.bf16.msra.mxu1 %v7507_v24  ;;  %722 = vmatprep.subr.bf16.mxu0 %v7512_v25  ;;  %v7608_v24 = vld [vmem:[%s10952_s2 + $0x944] ss:$8 sps:$4 sm:$0xff]   ;;  %v7603_v25 = vld [vmem:[%s10952_s2 + $0x640] ss:$8 sps:$4 sm:$0xff]  }
  0x95   :  { %1428 = vmatprep.subr.bf16.mxu1 %v7515_v26  ;;  %v7606_v26 = vld [vmem:[%s10952_s2 + $0x940] ss:$8 sps:$4 sm:$0xff]  }
  0x97   :  { %723 = vmatpush1.bf16.msra.mxu0 %v7510_v27  ;;  %v7611_v27 = vld [vmem:[%s10952_s2 + $0x654] ss:$8 sps:$4 sm:$0xff]  }
  0x98   :  { %1429 = vmatpush1.bf16.msra.mxu1 %v7513_v28  ;;  %724 = vmatprep.subr.bf16.mxu0 %v7518_v29  ;;  %v7614_v28 = vld [vmem:[%s10952_s2 + $0x954] ss:$8 sps:$4 sm:$0xff]   ;;  %v7609_v29 = vld [vmem:[%s10952_s2 + $0x650] ss:$8 sps:$4 sm:$0xff]  }
  0x99   :  { %1430 = vmatprep.subr.bf16.mxu1 %v7521_v30  ;;  %v7612_v30 = vld [vmem:[%s10952_s2 + $0x950] ss:$8 sps:$4 sm:$0xff]  }
  0x9b   :  { %725 = vmatpush1.bf16.msra.mxu0 %v7516_v31  ;;  %v7617_v31 = vld [vmem:[%s10952_s2 + $0x664] ss:$8 sps:$4 sm:$0xff]  }
  0x9c   :  { %1431 = vmatpush1.bf16.msra.mxu1 %v7519_v32  ;;  %726 = vmatprep.subr.bf16.mxu0 %v7524_v33  ;;  %v7620_v32 = vld [vmem:[%s10952_s2 + $0x964] ss:$8 sps:$4 sm:$0xff]   ;;  %v7615_v33 = vld [vmem:[%s10952_s2 + $0x660] ss:$8 sps:$4 sm:$0xff]  }
  0x9d   :  { %1432 = vmatprep.subr.bf16.mxu1 %v7527_v34  ;;  %v7618_v34 = vld [vmem:[%s10952_s2 + $0x960] ss:$8 sps:$4 sm:$0xff]  }
  0x9f   :  { %727 = vmatpush1.bf16.msra.mxu0 %v7522_v35  ;;  %v7623_v35 = vld [vmem:[%s10952_s2 + $0x674] ss:$8 sps:$4 sm:$0xff]  }
  0xa0   :  { %1433 = vmatpush1.bf16.msra.mxu1 %v7525_v36  ;;  %728 = vmatprep.subr.bf16.mxu0 %v7530_v37  ;;  %v7626_v36 = vld [vmem:[%s10952_s2 + $0x974] ss:$8 sps:$4 sm:$0xff]   ;;  %v7621_v37 = vld [vmem:[%s10952_s2 + $0x670] ss:$8 sps:$4 sm:$0xff]  }
  0xa1   :  { %1434 = vmatprep.subr.bf16.mxu1 %v7533_v38  ;;  %v7624_v38 = vld [vmem:[%s10952_s2 + $0x970] ss:$8 sps:$4 sm:$0xff]  }
  0xa3   :  { %729 = vmatpush1.bf16.msra.mxu0 %v7528_v39  ;;  %v7629_v39 = vld [vmem:[%s10952_s2 + $0x684] ss:$8 sps:$4 sm:$0xff]  }
  0xa4   :  { %1435 = vmatpush1.bf16.msra.mxu1 %v7531_v40  ;;  %730 = vmatprep.subr.bf16.mxu0 %v7536_v41  ;;  %v7632_v40 = vld [vmem:[%s10952_s2 + $0x984] ss:$8 sps:$4 sm:$0xff]   ;;  %v7627_v41 = vld [vmem:[%s10952_s2 + $0x680] ss:$8 sps:$4 sm:$0xff]  }
  0xa5   :  { %1436 = vmatprep.subr.bf16.mxu1 %v7539_v42  ;;  %v7630_v42 = vld [vmem:[%s10952_s2 + $0x980] ss:$8 sps:$4 sm:$0xff]  }
  0xa7   :  { %731 = vmatpush1.bf16.msra.mxu0 %v7534_v43  ;;  %v7635_v43 = vld [vmem:[%s10952_s2 + $0x694] ss:$8 sps:$4 sm:$0xff]  }
  0xa8   :  { %1437 = vmatpush1.bf16.msra.mxu1 %v7537_v44  ;;  %732 = vmatprep.subr.bf16.mxu0 %v7542_v45  ;;  %v7638_v44 = vld [vmem:[%s10952_s2 + $0x994] ss:$8 sps:$4 sm:$0xff]   ;;  %v7633_v45 = vld [vmem:[%s10952_s2 + $0x690] ss:$8 sps:$4 sm:$0xff]  }
  0xa9   :  { %1438 = vmatprep.subr.bf16.mxu1 %v7545_v46  ;;  %v7636_v46 = vld [vmem:[%s10952_s2 + $0x990] ss:$8 sps:$4 sm:$0xff]  }
  0xab   :  { %733 = vmatpush1.bf16.msra.mxu0 %v7540_v47  ;;  %v7641_v47 = vld [vmem:[%s10952_s2 + $0x6a4] ss:$8 sps:$4 sm:$0xff]  }
  0xac   :  { %1439 = vmatpush1.bf16.msra.mxu1 %v7543_v48  ;;  %734 = vmatprep.subr.bf16.mxu0 %v7548_v49  ;;  %v7644_v48 = vld [vmem:[%s10952_s2 + $0x9a4] ss:$8 sps:$4 sm:$0xff]   ;;  %v7639_v49 = vld [vmem:[%s10952_s2 + $0x6a0] ss:$8 sps:$4 sm:$0xff]  }
  0xad   :  { %1440 = vmatprep.subr.bf16.mxu1 %v7551_v50  ;;  %v7642_v50 = vld [vmem:[%s10952_s2 + $0x9a0] ss:$8 sps:$4 sm:$0xff]  }
  0xaf   :  { %735 = vmatpush1.bf16.msra.mxu0 %v7546_v51  ;;  %v7647_v51 = vld [vmem:[%s10952_s2 + $0x6b4] ss:$8 sps:$4 sm:$0xff]  }
  0xb0   :  { %1441 = vmatpush1.bf16.msra.mxu1 %v7549_v52  ;;  %736 = vmatprep.subr.bf16.mxu0 %v7554_v53  ;;  %v7650_v52 = vld [vmem:[%s10952_s2 + $0x9b4] ss:$8 sps:$4 sm:$0xff]   ;;  %v7645_v53 = vld [vmem:[%s10952_s2 + $0x6b0] ss:$8 sps:$4 sm:$0xff]  }
  0xb1   :  { %1442 = vmatprep.subr.bf16.mxu1 %v7557_v54  ;;  %v7648_v54 = vld [vmem:[%s10952_s2 + $0x9b0] ss:$8 sps:$4 sm:$0xff]  }
  0xb3   :  { %737 = vmatpush1.bf16.msra.mxu0 %v7552_v55  ;;  %v7653_v55 = vld [vmem:[%s10952_s2 + $0x6c4] ss:$8 sps:$4 sm:$0xff]  }
  0xb4   :  { %1443 = vmatpush1.bf16.msra.mxu1 %v7555_v56  ;;  %738 = vmatprep.subr.bf16.mxu0 %v7560_v57  ;;  %v7656_v56 = vld [vmem:[%s10952_s2 + $0x9c4] ss:$8 sps:$4 sm:$0xff]   ;;  %v7651_v57 = vld [vmem:[%s10952_s2 + $0x6c0] ss:$8 sps:$4 sm:$0xff]  }
  0xb5   :  { %1444 = vmatprep.subr.bf16.mxu1 %v7563_v58  ;;  %v7654_v58 = vld [vmem:[%s10952_s2 + $0x9c0] ss:$8 sps:$4 sm:$0xff]  }
  0xb7   :  { %739 = vmatpush1.bf16.msra.mxu0 %v7558_v59  ;;  %v7659_v59 = vld [vmem:[%s10952_s2 + $0x6d4] ss:$8 sps:$4 sm:$0xff]  }
  0xb8   :  { %1445 = vmatpush1.bf16.msra.mxu1 %v7561_v60  ;;  %740 = vmatprep.subr.bf16.mxu0 %v7566_v61  ;;  %v7662_v60 = vld [vmem:[%s10952_s2 + $0x9d4] ss:$8 sps:$4 sm:$0xff]   ;;  %v7657_v61 = vld [vmem:[%s10952_s2 + $0x6d0] ss:$8 sps:$4 sm:$0xff]  }
  0xb9   :  { %1446 = vmatprep.subr.bf16.mxu1 %v7569_v62  ;;  %v7660_v62 = vld [vmem:[%s10952_s2 + $0x9d0] ss:$8 sps:$4 sm:$0xff]  }
  0xbb   :  { %741 = vmatpush1.bf16.msra.mxu0 %v7564_v63  ;;  %v7665_v63 = vld [vmem:[%s10952_s2 + $0x6e4] ss:$8 sps:$4 sm:$0xff]  }
  0xbc   :  { %1447 = vmatpush1.bf16.msra.mxu1 %v7567_v0  ;;  %742 = vmatprep.subr.bf16.mxu0 %v7572_v1  ;;  %v7668_v0 = vld [vmem:[%s10952_s2 + $0x9e4] ss:$8 sps:$4 sm:$0xff]   ;;  %v7663_v1 = vld [vmem:[%s10952_s2 + $0x6e0] ss:$8 sps:$4 sm:$0xff]  }
  0xbd   :  { %1448 = vmatprep.subr.bf16.mxu1 %v7575_v2  ;;  %v7666_v2 = vld [vmem:[%s10952_s2 + $0x9e0] ss:$8 sps:$4 sm:$0xff]  }
  0xbf   :  { %743 = vmatpush1.bf16.msra.mxu0 %v7570_v3  ;;  %v7671_v3 = vld [vmem:[%s10952_s2 + $0x6f4] ss:$8 sps:$4 sm:$0xff]  }
  0xc0   :  { %1449 = vmatpush1.bf16.msra.mxu1 %v7573_v4  ;;  %2042 = vmatprep.subr.bf16.mxu0 %v7581_v5  ;;  %v7674_v4 = vld [vmem:[%s10952_s2 + $0x9f4] ss:$8 sps:$4 sm:$0xff]   ;;  %v7669_v5 = vld [vmem:[%s10952_s2 + $0x6f0] ss:$8 sps:$4 sm:$0xff]  }
  0xc1   :  { %2752 = vmatprep.subr.bf16.mxu1 %v7584_v6  ;;  %v7672_v6 = vld [vmem:[%s10952_s2 + $0x9f0] ss:$8 sps:$4 sm:$0xff]  }
  0xc2   :  { %745 = vmatmul.mubr.bf16.vlgmr.msra.gmra.mrb[0].mxu0 %v7578_v7 }
  0xc3   :  { %1451 = vmatmul.mubr.bf16.vlgmr.msra.gmra.mrb[0].mxu1 %v7578_v7  ;;  %2043 = vmatpush1.bf16.msra.mxu0 %v7579_v8  ;;  %v7677_v7 = vld [vmem:[%s10952_s2 + $0x704] ss:$8 sps:$4 sm:$0xff]  }
  0xc4   :  { %2753 = vmatpush1.bf16.msra.mxu1 %v7582_v9  ;;  %2044 = vmatprep.subr.bf16.mxu0 %v7587_v10  ;;  %v7680_v8 = vld [vmem:[%s10952_s2 + $0xa04] ss:$8 sps:$4 sm:$0xff]   ;;  %v7675_v9 = vld [vmem:[%s10952_s2 + $0x700] ss:$8 sps:$4 sm:$0xff]  }
  0xc5   :  { %2754 = vmatprep.subr.bf16.mxu1 %v7590_v11  ;;  %2074 = vmatprep.mubr.bf16.mxu0 %v8443_v16  ;;  %v7678_v10 = vld [vmem:[%s10952_s2 + $0xa00] ss:$8 sps:$4 sm:$0xff]   ;;  %v7683_v11 = vld [vmem:[%s10952_s2 + $0x714] ss:$8 sps:$4 sm:$0xff]  }
  0xc6   :  { %2784 = vmatprep.mubr.bf16.mxu1 %v8443_v16  ;;  %v7689_v16 = vld [vmem:[%s10952_s2 + $0x724] ss:$8 sps:$4 sm:$0xff]  }
  0xc7   :  { %2045 = vmatpush1.bf16.msra.mxu0 %v7585_v12  ;;  %v7686_v12 = vld [vmem:[%s10952_s2 + $0xa14] ss:$8 sps:$4 sm:$0xff]  }
  0xc8   :  { %2755 = vmatpush1.bf16.msra.mxu1 %v7588_v13  ;;  %2046 = vmatprep.subr.bf16.mxu0 %v7593_v14  ;;  %v8444_v13 = vld [vmem:[%s10953_s0] ss:$24 sps:$4 sm:$0xff]  }
  0xc9   :  { %2756 = vmatprep.subr.bf16.mxu1 %v7596_v15  ;;  %v7681_v14 = vld [vmem:[%s10952_s2 + $0x710] ss:$8 sps:$4 sm:$0xff]  }
  0xca   :  { %v7684_v15 = vld [vmem:[%s10952_s2 + $0xa10] ss:$8 sps:$4 sm:$0xff]  }
  0xcb   :  { %2047 = vmatpush1.bf16.msra.mxu0 %v7591_v17  ;;  %v7692_v17 = vld [vmem:[%s10952_s2 + $0xa24] ss:$8 sps:$4 sm:$0xff]  }
  0xcc   :  { %2757 = vmatpush1.bf16.msra.mxu1 %v7594_v18  ;;  %2048 = vmatprep.subr.bf16.mxu0 %v7599_v19  ;;  %v8445_v18 = vld [vmem:[%s10953_s0 + $0xc] ss:$24 sps:$4 sm:$0xff]   ;;  %v7687_v19 = vld [vmem:[%s10952_s2 + $0x720] ss:$8 sps:$4 sm:$0xff]  }
  0xcd   :  { %2758 = vmatprep.subr.bf16.mxu1 %v7602_v20  ;;  %v7690_v20 = vld [vmem:[%s10952_s2 + $0xa20] ss:$8 sps:$4 sm:$0xff]  }
  0xcf   :  { %2049 = vmatpush1.bf16.msra.mxu0 %v7597_v21  ;;  %v7695_v21 = vld [vmem:[%s10952_s2 + $0x734] ss:$8 sps:$4 sm:$0xff]  }
  0xd0   :  { %2759 = vmatpush1.bf16.msra.mxu1 %v7600_v22  ;;  %2050 = vmatprep.subr.bf16.mxu0 %v7605_v23  ;;  %v7698_v22 = vld [vmem:[%s10952_s2 + $0xa34] ss:$8 sps:$4 sm:$0xff]   ;;  %v7693_v23 = vld [vmem:[%s10952_s2 + $0x730] ss:$8 sps:$4 sm:$0xff]  }
  0xd1   :  { %2760 = vmatprep.subr.bf16.mxu1 %v7608_v24  ;;  %v7696_v24 = vld [vmem:[%s10952_s2 + $0xa30] ss:$8 sps:$4 sm:$0xff]  }
  0xd3   :  { %2051 = vmatpush1.bf16.msra.mxu0 %v7603_v25  ;;  %v7701_v25 = vld [vmem:[%s10952_s2 + $0x744] ss:$8 sps:$4 sm:$0xff]  }
  0xd4   :  { %2761 = vmatpush1.bf16.msra.mxu1 %v7606_v26  ;;  %2052 = vmatprep.subr.bf16.mxu0 %v7611_v27  ;;  %v7704_v26 = vld [vmem:[%s10952_s2 + $0xa44] ss:$8 sps:$4 sm:$0xff]   ;;  %v7699_v27 = vld [vmem:[%s10952_s2 + $0x740] ss:$8 sps:$4 sm:$0xff]  }
  0xd5   :  { %2762 = vmatprep.subr.bf16.mxu1 %v7614_v28  ;;  %v7702_v28 = vld [vmem:[%s10952_s2 + $0xa40] ss:$8 sps:$4 sm:$0xff]  }
  0xd7   :  { %2053 = vmatpush1.bf16.msra.mxu0 %v7609_v29  ;;  %v7707_v29 = vld [vmem:[%s10952_s2 + $0x754] ss:$8 sps:$4 sm:$0xff]  }
  0xd8   :  { %2763 = vmatpush1.bf16.msra.mxu1 %v7612_v30  ;;  %2054 = vmatprep.subr.bf16.mxu0 %v7617_v31  ;;  %v7710_v30 = vld [vmem:[%s10952_s2 + $0xa54] ss:$8 sps:$4 sm:$0xff]   ;;  %v7705_v31 = vld [vmem:[%s10952_s2 + $0x750] ss:$8 sps:$4 sm:$0xff]  }
  0xd9   :  { %2764 = vmatprep.subr.bf16.mxu1 %v7620_v32  ;;  %v7708_v32 = vld [vmem:[%s10952_s2 + $0xa50] ss:$8 sps:$4 sm:$0xff]  }
  0xdb   :  { %2055 = vmatpush1.bf16.msra.mxu0 %v7615_v33  ;;  %v7713_v33 = vld [vmem:[%s10952_s2 + $0x764] ss:$8 sps:$4 sm:$0xff]  }
  0xdc   :  { %2765 = vmatpush1.bf16.msra.mxu1 %v7618_v34  ;;  %2056 = vmatprep.subr.bf16.mxu0 %v7623_v35  ;;  %v7716_v34 = vld [vmem:[%s10952_s2 + $0xa64] ss:$8 sps:$4 sm:$0xff]   ;;  %v7711_v35 = vld [vmem:[%s10952_s2 + $0x760] ss:$8 sps:$4 sm:$0xff]  }
  0xdd   :  { %2766 = vmatprep.subr.bf16.mxu1 %v7626_v36  ;;  %v7714_v36 = vld [vmem:[%s10952_s2 + $0xa60] ss:$8 sps:$4 sm:$0xff]  }
  0xdf   :  { %2057 = vmatpush1.bf16.msra.mxu0 %v7621_v37  ;;  %v7719_v37 = vld [vmem:[%s10952_s2 + $0x774] ss:$8 sps:$4 sm:$0xff]  }
  0xe0   :  { %2767 = vmatpush1.bf16.msra.mxu1 %v7624_v38  ;;  %2058 = vmatprep.subr.bf16.mxu0 %v7629_v39  ;;  %v7722_v38 = vld [vmem:[%s10952_s2 + $0xa74] ss:$8 sps:$4 sm:$0xff]   ;;  %v7717_v39 = vld [vmem:[%s10952_s2 + $0x770] ss:$8 sps:$4 sm:$0xff]  }
  0xe1   :  { %2768 = vmatprep.subr.bf16.mxu1 %v7632_v40  ;;  %v7720_v40 = vld [vmem:[%s10952_s2 + $0xa70] ss:$8 sps:$4 sm:$0xff]  }
  0xe3   :  { %2059 = vmatpush1.bf16.msra.mxu0 %v7627_v41  ;;  %v7725_v41 = vld [vmem:[%s10952_s2 + $0x784] ss:$8 sps:$4 sm:$0xff]  }
  0xe4   :  { %2769 = vmatpush1.bf16.msra.mxu1 %v7630_v42  ;;  %2060 = vmatprep.subr.bf16.mxu0 %v7635_v43  ;;  %v7728_v42 = vld [vmem:[%s10952_s2 + $0xa84] ss:$8 sps:$4 sm:$0xff]   ;;  %v7723_v43 = vld [vmem:[%s10952_s2 + $0x780] ss:$8 sps:$4 sm:$0xff]  }
  0xe5   :  { %2770 = vmatprep.subr.bf16.mxu1 %v7638_v44  ;;  %v7726_v44 = vld [vmem:[%s10952_s2 + $0xa80] ss:$8 sps:$4 sm:$0xff]  }
  0xe7   :  { %2061 = vmatpush1.bf16.msra.mxu0 %v7633_v45  ;;  %v7731_v45 = vld [vmem:[%s10952_s2 + $0x794] ss:$8 sps:$4 sm:$0xff]  }
  0xe8   :  { %2771 = vmatpush1.bf16.msra.mxu1 %v7636_v46  ;;  %2062 = vmatprep.subr.bf16.mxu0 %v7641_v47  ;;  %v7734_v46 = vld [vmem:[%s10952_s2 + $0xa94] ss:$8 sps:$4 sm:$0xff]   ;;  %v7729_v47 = vld [vmem:[%s10952_s2 + $0x790] ss:$8 sps:$4 sm:$0xff]  }
  0xe9   :  { %2772 = vmatprep.subr.bf16.mxu1 %v7644_v48  ;;  %v7732_v48 = vld [vmem:[%s10952_s2 + $0xa90] ss:$8 sps:$4 sm:$0xff]  }
  0xeb   :  { %2063 = vmatpush1.bf16.msra.mxu0 %v7639_v49  ;;  %v7737_v49 = vld [vmem:[%s10952_s2 + $0x7a4] ss:$8 sps:$4 sm:$0xff]  }
  0xec   :  { %2773 = vmatpush1.bf16.msra.mxu1 %v7642_v50  ;;  %2064 = vmatprep.subr.bf16.mxu0 %v7647_v51  ;;  %v7740_v50 = vld [vmem:[%s10952_s2 + $0xaa4] ss:$8 sps:$4 sm:$0xff]   ;;  %v7735_v51 = vld [vmem:[%s10952_s2 + $0x7a0] ss:$8 sps:$4 sm:$0xff]  }
  0xed   :  { %2774 = vmatprep.subr.bf16.mxu1 %v7650_v52  ;;  %v7738_v52 = vld [vmem:[%s10952_s2 + $0xaa0] ss:$8 sps:$4 sm:$0xff]  }
  0xef   :  { %2065 = vmatpush1.bf16.msra.mxu0 %v7645_v53  ;;  %v7743_v53 = vld [vmem:[%s10952_s2 + $0x7b4] ss:$8 sps:$4 sm:$0xff]  }
  0xf0   :  { %2775 = vmatpush1.bf16.msra.mxu1 %v7648_v54  ;;  %2066 = vmatprep.subr.bf16.mxu0 %v7653_v55  ;;  %v7746_v54 = vld [vmem:[%s10952_s2 + $0xab4] ss:$8 sps:$4 sm:$0xff]   ;;  %v7741_v55 = vld [vmem:[%s10952_s2 + $0x7b0] ss:$8 sps:$4 sm:$0xff]  }
  0xf1   :  { %2776 = vmatprep.subr.bf16.mxu1 %v7656_v56  ;;  %v7744_v56 = vld [vmem:[%s10952_s2 + $0xab0] ss:$8 sps:$4 sm:$0xff]  }
  0xf3   :  { %2067 = vmatpush1.bf16.msra.mxu0 %v7651_v57  ;;  %v7749_v57 = vld [vmem:[%s10952_s2 + $0x7c4] ss:$8 sps:$4 sm:$0xff]  }
  0xf4   :  { %2777 = vmatpush1.bf16.msra.mxu1 %v7654_v58  ;;  %2068 = vmatprep.subr.bf16.mxu0 %v7659_v59  ;;  %v7752_v58 = vld [vmem:[%s10952_s2 + $0xac4] ss:$8 sps:$4 sm:$0xff]   ;;  %v7747_v59 = vld [vmem:[%s10952_s2 + $0x7c0] ss:$8 sps:$4 sm:$0xff]  }
  0xf5   :  { %2778 = vmatprep.subr.bf16.mxu1 %v7662_v60  ;;  %v7750_v60 = vld [vmem:[%s10952_s2 + $0xac0] ss:$8 sps:$4 sm:$0xff]  }
  0xf7   :  { %2069 = vmatpush1.bf16.msra.mxu0 %v7657_v61  ;;  %v7755_v61 = vld [vmem:[%s10952_s2 + $0x7d4] ss:$8 sps:$4 sm:$0xff]  }
  0xf8   :  { %2779 = vmatpush1.bf16.msra.mxu1 %v7660_v62  ;;  %2070 = vmatprep.subr.bf16.mxu0 %v7665_v63  ;;  %v7758_v62 = vld [vmem:[%s10952_s2 + $0xad4] ss:$8 sps:$4 sm:$0xff]   ;;  %v7753_v63 = vld [vmem:[%s10952_s2 + $0x7d0] ss:$8 sps:$4 sm:$0xff]  }
  0xf9   :  { %2780 = vmatprep.subr.bf16.mxu1 %v7668_v0  ;;  %v7756_v0 = vld [vmem:[%s10952_s2 + $0xad0] ss:$8 sps:$4 sm:$0xff]  }
  0xfb   :  { %2071 = vmatpush1.bf16.msra.mxu0 %v7663_v1  ;;  %v7761_v1 = vld [vmem:[%s10952_s2 + $0x7e4] ss:$8 sps:$4 sm:$0xff]  }
  0xfc   :  { %2781 = vmatpush1.bf16.msra.mxu1 %v7666_v2  ;;  %2072 = vmatprep.subr.bf16.mxu0 %v7671_v3  ;;  %v7764_v2 = vld [vmem:[%s10952_s2 + $0xae4] ss:$8 sps:$4 sm:$0xff]   ;;  %v7759_v3 = vld [vmem:[%s10952_s2 + $0x7e0] ss:$8 sps:$4 sm:$0xff]  }
  0xfd   :  { %2782 = vmatprep.subr.bf16.mxu1 %v7674_v4  ;;  %v7762_v4 = vld [vmem:[%s10952_s2 + $0xae0] ss:$8 sps:$4 sm:$0xff]  }
  0xff   :  { %2073 = vmatpush1.bf16.msra.mxu0 %v7669_v5  ;;  %v7767_v5 = vld [vmem:[%s10952_s2 + $0x7f4] ss:$8 sps:$4 sm:$0xff]  }
 0x100   :  { %2783 = vmatpush1.bf16.msra.mxu1 %v7672_v6  ;;  %2085 = vmatprep.subr.bf16.mxu0 %v7677_v7  ;;  %v7770_v6 = vld [vmem:[%s10952_s2 + $0xaf4] ss:$8 sps:$4 sm:$0xff]   ;;  %v7765_v7 = vld [vmem:[%s10952_s2 + $0x7f0] ss:$8 sps:$4 sm:$0xff]  }
 0x101   :  { %2795 = vmatprep.subr.bf16.mxu1 %v7680_v8  ;;  %v7768_v8 = vld [vmem:[%s10952_s2 + $0xaf0] ss:$8 sps:$4 sm:$0xff]  }
 0x102   :  { %2075 = vmatmul.mubr.bf16.vlgmr.msra.gmra.mrb[4].mxu0 %v8444_v13 }
 0x103   :  { %2785 = vmatmul.mubr.bf16.vlgmr.msra.gmra.mrb[4].mxu1 %v8444_v13  ;;  %2086 = vmatpush1.bf16.msra.mxu0 %v7675_v9  ;;  %v7773_v9 = vld [vmem:[%s10952_s2 + $0x804] ss:$8 sps:$4 sm:$0xff]   ;;  %v7779_v13 = vld [vmem:[%s10952_s2 + $0x814] ss:$8 sps:$4 sm:$0xff]  }
 0x104   :  { %2796 = vmatpush1.bf16.msra.mxu1 %v7678_v10  ;;  %2087 = vmatprep.subr.bf16.mxu0 %v7683_v11  ;;  %v7776_v10 = vld [vmem:[%s10952_s2 + $0xb04] ss:$8 sps:$4 sm:$0xff]   ;;  %v7771_v11 = vld [vmem:[%s10952_s2 + $0x800] ss:$8 sps:$4 sm:$0xff]  }
 0x105   :  { %2797 = vmatprep.subr.bf16.mxu1 %v7686_v12  ;;  %2117 = vmatprep.mubr.bf16.mxu0 %v8445_v18  ;;  %v7774_v12 = vld [vmem:[%s10952_s2 + $0xb00] ss:$8 sps:$4 sm:$0xff]  }
 0x106   :  { %2827 = vmatprep.mubr.bf16.mxu1 %v8445_v18  ;;  %v7785_v18 = vld [vmem:[%s10952_s2 + $0x824] ss:$8 sps:$4 sm:$0xff]  }
 0x107   :  { %2088 = vmatpush1.bf16.msra.mxu0 %v7681_v14  ;;  %v7782_v14 = vld [vmem:[%s10952_s2 + $0xb14] ss:$8 sps:$4 sm:$0xff]  }
 0x108   :  { %2798 = vmatpush1.bf16.msra.mxu1 %v7684_v15  ;;  %2089 = vmatprep.subr.bf16.mxu0 %v7689_v16  ;;  %v8446_v15 = vld [vmem:[%s10953_s0 + $0x8] ss:$24 sps:$4 sm:$0xff]   ;;  %v7777_v16 = vld [vmem:[%s10952_s2 + $0x810] ss:$8 sps:$4 sm:$0xff]  }
 0x109   :  { %2799 = vmatprep.subr.bf16.mxu1 %v7692_v17  ;;  %v7780_v17 = vld [vmem:[%s10952_s2 + $0xb10] ss:$8 sps:$4 sm:$0xff]  }
 0x10b   :  { %2090 = vmatpush1.bf16.msra.mxu0 %v7687_v19  ;;  %v7788_v19 = vld [vmem:[%s10952_s2 + $0xb24] ss:$8 sps:$4 sm:$0xff]  }
 0x10c   :  { %2800 = vmatpush1.bf16.msra.mxu1 %v7690_v20  ;;  %2091 = vmatprep.subr.bf16.mxu0 %v7695_v21  ;;  %v8447_v20 = vld [vmem:[%s10953_s0 + $0x14] ss:$24 sps:$4 sm:$0xff]   ;;  %v7783_v21 = vld [vmem:[%s10952_s2 + $0x820] ss:$8 sps:$4 sm:$0xff]  }
 0x10d   :  { %2801 = vmatprep.subr.bf16.mxu1 %v7698_v22  ;;  %v7786_v22 = vld [vmem:[%s10952_s2 + $0xb20] ss:$8 sps:$4 sm:$0xff]  }
 0x10f   :  { %2092 = vmatpush1.bf16.msra.mxu0 %v7693_v23  ;;  %v7791_v23 = vld [vmem:[%s10952_s2 + $0x834] ss:$8 sps:$4 sm:$0xff]  }
 0x110   :  { %2802 = vmatpush1.bf16.msra.mxu1 %v7696_v24  ;;  %2093 = vmatprep.subr.bf16.mxu0 %v7701_v25  ;;  %v7794_v24 = vld [vmem:[%s10952_s2 + $0xb34] ss:$8 sps:$4 sm:$0xff]   ;;  %v7789_v25 = vld [vmem:[%s10952_s2 + $0x830] ss:$8 sps:$4 sm:$0xff]  }
 0x111   :  { %2803 = vmatprep.subr.bf16.mxu1 %v7704_v26  ;;  %v7792_v26 = vld [vmem:[%s10952_s2 + $0xb30] ss:$8 sps:$4 sm:$0xff]  }
 0x113   :  { %2094 = vmatpush1.bf16.msra.mxu0 %v7699_v27  ;;  %v7797_v27 = vld [vmem:[%s10952_s2 + $0x844] ss:$8 sps:$4 sm:$0xff]  }
 0x114   :  { %2804 = vmatpush1.bf16.msra.mxu1 %v7702_v28  ;;  %2095 = vmatprep.subr.bf16.mxu0 %v7707_v29  ;;  %v7800_v28 = vld [vmem:[%s10952_s2 + $0xb44] ss:$8 sps:$4 sm:$0xff]   ;;  %v7795_v29 = vld [vmem:[%s10952_s2 + $0x840] ss:$8 sps:$4 sm:$0xff]  }
 0x115   :  { %2805 = vmatprep.subr.bf16.mxu1 %v7710_v30  ;;  %v7798_v30 = vld [vmem:[%s10952_s2 + $0xb40] ss:$8 sps:$4 sm:$0xff]  }
 0x117   :  { %2096 = vmatpush1.bf16.msra.mxu0 %v7705_v31  ;;  %v7803_v31 = vld [vmem:[%s10952_s2 + $0x854] ss:$8 sps:$4 sm:$0xff]  }
 0x118   :  { %2806 = vmatpush1.bf16.msra.mxu1 %v7708_v32  ;;  %2097 = vmatprep.subr.bf16.mxu0 %v7713_v33  ;;  %v7806_v32 = vld [vmem:[%s10952_s2 + $0xb54] ss:$8 sps:$4 sm:$0xff]   ;;  %v7801_v33 = vld [vmem:[%s10952_s2 + $0x850] ss:$8 sps:$4 sm:$0xff]  }
 0x119   :  { %2807 = vmatprep.subr.bf16.mxu1 %v7716_v34  ;;  %v7804_v34 = vld [vmem:[%s10952_s2 + $0xb50] ss:$8 sps:$4 sm:$0xff]  }
 0x11b   :  { %2098 = vmatpush1.bf16.msra.mxu0 %v7711_v35  ;;  %v7809_v35 = vld [vmem:[%s10952_s2 + $0x864] ss:$8 sps:$4 sm:$0xff]  }
 0x11c   :  { %2808 = vmatpush1.bf16.msra.mxu1 %v7714_v36  ;;  %2099 = vmatprep.subr.bf16.mxu0 %v7719_v37  ;;  %v7812_v36 = vld [vmem:[%s10952_s2 + $0xb64] ss:$8 sps:$4 sm:$0xff]   ;;  %v7807_v37 = vld [vmem:[%s10952_s2 + $0x860] ss:$8 sps:$4 sm:$0xff]  }
 0x11d   :  { %2809 = vmatprep.subr.bf16.mxu1 %v7722_v38  ;;  %v7810_v38 = vld [vmem:[%s10952_s2 + $0xb60] ss:$8 sps:$4 sm:$0xff]  }
 0x11f   :  { %2100 = vmatpush1.bf16.msra.mxu0 %v7717_v39  ;;  %v7815_v39 = vld [vmem:[%s10952_s2 + $0x874] ss:$8 sps:$4 sm:$0xff]  }
 0x120   :  { %2810 = vmatpush1.bf16.msra.mxu1 %v7720_v40  ;;  %2101 = vmatprep.subr.bf16.mxu0 %v7725_v41  ;;  %v7818_v40 = vld [vmem:[%s10952_s2 + $0xb74] ss:$8 sps:$4 sm:$0xff]   ;;  %v7813_v41 = vld [vmem:[%s10952_s2 + $0x870] ss:$8 sps:$4 sm:$0xff]  }
 0x121   :  { %2811 = vmatprep.subr.bf16.mxu1 %v7728_v42  ;;  %v7816_v42 = vld [vmem:[%s10952_s2 + $0xb70] ss:$8 sps:$4 sm:$0xff]  }
 0x123   :  { %2102 = vmatpush1.bf16.msra.mxu0 %v7723_v43  ;;  %v7821_v43 = vld [vmem:[%s10952_s2 + $0x884] ss:$8 sps:$4 sm:$0xff]  }
 0x124   :  { %2812 = vmatpush1.bf16.msra.mxu1 %v7726_v44  ;;  %2103 = vmatprep.subr.bf16.mxu0 %v7731_v45  ;;  %v7824_v44 = vld [vmem:[%s10952_s2 + $0xb84] ss:$8 sps:$4 sm:$0xff]   ;;  %v7819_v45 = vld [vmem:[%s10952_s2 + $0x880] ss:$8 sps:$4 sm:$0xff]  }
 0x125   :  { %2813 = vmatprep.subr.bf16.mxu1 %v7734_v46  ;;  %v7822_v46 = vld [vmem:[%s10952_s2 + $0xb80] ss:$8 sps:$4 sm:$0xff]  }
 0x127   :  { %2104 = vmatpush1.bf16.msra.mxu0 %v7729_v47  ;;  %v7827_v47 = vld [vmem:[%s10952_s2 + $0x894] ss:$8 sps:$4 sm:$0xff]  }
 0x128   :  { %2814 = vmatpush1.bf16.msra.mxu1 %v7732_v48  ;;  %2105 = vmatprep.subr.bf16.mxu0 %v7737_v49  ;;  %v7830_v48 = vld [vmem:[%s10952_s2 + $0xb94] ss:$8 sps:$4 sm:$0xff]   ;;  %v7825_v49 = vld [vmem:[%s10952_s2 + $0x890] ss:$8 sps:$4 sm:$0xff]  }
 0x129   :  { %2815 = vmatprep.subr.bf16.mxu1 %v7740_v50  ;;  %v7828_v50 = vld [vmem:[%s10952_s2 + $0xb90] ss:$8 sps:$4 sm:$0xff]  }
 0x12b   :  { %2106 = vmatpush1.bf16.msra.mxu0 %v7735_v51  ;;  %v7833_v51 = vld [vmem:[%s10952_s2 + $0x8a4] ss:$8 sps:$4 sm:$0xff]  }
 0x12c   :  { %2816 = vmatpush1.bf16.msra.mxu1 %v7738_v52  ;;  %2107 = vmatprep.subr.bf16.mxu0 %v7743_v53  ;;  %v7836_v52 = vld [vmem:[%s10952_s2 + $0xba4] ss:$8 sps:$4 sm:$0xff]   ;;  %v7831_v53 = vld [vmem:[%s10952_s2 + $0x8a0] ss:$8 sps:$4 sm:$0xff]  }
 0x12d   :  { %2817 = vmatprep.subr.bf16.mxu1 %v7746_v54  ;;  %v7834_v54 = vld [vmem:[%s10952_s2 + $0xba0] ss:$8 sps:$4 sm:$0xff]  }
 0x12f   :  { %2108 = vmatpush1.bf16.msra.mxu0 %v7741_v55  ;;  %v7839_v55 = vld [vmem:[%s10952_s2 + $0x8b4] ss:$8 sps:$4 sm:$0xff]  }
 0x130   :  { %2818 = vmatpush1.bf16.msra.mxu1 %v7744_v56  ;;  %2109 = vmatprep.subr.bf16.mxu0 %v7749_v57  ;;  %v7842_v56 = vld [vmem:[%s10952_s2 + $0xbb4] ss:$8 sps:$4 sm:$0xff]   ;;  %v7837_v57 = vld [vmem:[%s10952_s2 + $0x8b0] ss:$8 sps:$4 sm:$0xff]  }
 0x131   :  { %2819 = vmatprep.subr.bf16.mxu1 %v7752_v58  ;;  %v7840_v58 = vld [vmem:[%s10952_s2 + $0xbb0] ss:$8 sps:$4 sm:$0xff]  }
 0x133   :  { %2110 = vmatpush1.bf16.msra.mxu0 %v7747_v59  ;;  %v7845_v59 = vld [vmem:[%s10952_s2 + $0x8c4] ss:$8 sps:$4 sm:$0xff]  }
 0x134   :  { %2820 = vmatpush1.bf16.msra.mxu1 %v7750_v60  ;;  %2111 = vmatprep.subr.bf16.mxu0 %v7755_v61  ;;  %v7848_v60 = vld [vmem:[%s10952_s2 + $0xbc4] ss:$8 sps:$4 sm:$0xff]   ;;  %v7843_v61 = vld [vmem:[%s10952_s2 + $0x8c0] ss:$8 sps:$4 sm:$0xff]  }
 0x135   :  { %2821 = vmatprep.subr.bf16.mxu1 %v7758_v62  ;;  %v7846_v62 = vld [vmem:[%s10952_s2 + $0xbc0] ss:$8 sps:$4 sm:$0xff]  }
 0x137   :  { %2112 = vmatpush1.bf16.msra.mxu0 %v7753_v63  ;;  %v7851_v63 = vld [vmem:[%s10952_s2 + $0x8d4] ss:$8 sps:$4 sm:$0xff]  }
 0x138   :  { %2822 = vmatpush1.bf16.msra.mxu1 %v7756_v0  ;;  %2113 = vmatprep.subr.bf16.mxu0 %v7761_v1  ;;  %v7854_v0 = vld [vmem:[%s10952_s2 + $0xbd4] ss:$8 sps:$4 sm:$0xff]   ;;  %v7849_v1 = vld [vmem:[%s10952_s2 + $0x8d0] ss:$8 sps:$4 sm:$0xff]  }
 0x139   :  { %2823 = vmatprep.subr.bf16.mxu1 %v7764_v2  ;;  %v7852_v2 = vld [vmem:[%s10952_s2 + $0xbd0] ss:$8 sps:$4 sm:$0xff]  }
 0x13b   :  { %2114 = vmatpush1.bf16.msra.mxu0 %v7759_v3  ;;  %v7857_v3 = vld [vmem:[%s10952_s2 + $0x8e4] ss:$8 sps:$4 sm:$0xff]  }
 0x13c   :  { %2824 = vmatpush1.bf16.msra.mxu1 %v7762_v4  ;;  %2115 = vmatprep.subr.bf16.mxu0 %v7767_v5  ;;  %v7860_v4 = vld [vmem:[%s10952_s2 + $0xbe4] ss:$8 sps:$4 sm:$0xff]   ;;  %v7855_v5 = vld [vmem:[%s10952_s2 + $0x8e0] ss:$8 sps:$4 sm:$0xff]  }
 0x13d   :  { %2825 = vmatprep.subr.bf16.mxu1 %v7770_v6  ;;  %v7858_v6 = vld [vmem:[%s10952_s2 + $0xbe0] ss:$8 sps:$4 sm:$0xff]  }
 0x13f   :  { %2116 = vmatpush1.bf16.msra.mxu0 %v7765_v7  ;;  %v7863_v7 = vld [vmem:[%s10952_s2 + $0x8f4] ss:$8 sps:$4 sm:$0xff]  }
 0x140   :  { %2826 = vmatpush1.bf16.msra.mxu1 %v7768_v8  ;;  %2128 = vmatprep.subr.bf16.mxu0 %v7773_v9  ;;  %v7866_v8 = vld [vmem:[%s10952_s2 + $0xbf4] ss:$8 sps:$4 sm:$0xff]   ;;  %v7861_v9 = vld [vmem:[%s10952_s2 + $0x8f0] ss:$8 sps:$4 sm:$0xff]  }
 0x141   :  { %2838 = vmatprep.subr.bf16.mxu1 %v7776_v10  ;;  %v7864_v10 = vld [vmem:[%s10952_s2 + $0xbf0] ss:$8 sps:$4 sm:$0xff]  }
 0x142   :  { %2118 = vmatmul.mubr.bf16.vlgmr.msra.gmra.mrb[4].mxu0 %v8446_v15 }
 0x143   :  { %2828 = vmatmul.mubr.bf16.vlgmr.msra.gmra.mrb[4].mxu1 %v8446_v15  ;;  %2129 = vmatpush1.bf16.msra.mxu0 %v7771_v11  ;;  %v7869_v11 = vld [vmem:[%s10952_s2 + $0xc04] ss:$8 sps:$4 sm:$0xff]   ;;  %v7875_v15 = vld [vmem:[%s10952_s2 + $0xc14] ss:$8 sps:$4 sm:$0xff]  }
 0x144   :  { %2839 = vmatpush1.bf16.msra.mxu1 %v7774_v12  ;;  %2130 = vmatprep.subr.bf16.mxu0 %v7779_v13  ;;  %v7872_v12 = vld [vmem:[%s10952_s2 + $0xf04] ss:$8 sps:$4 sm:$0xff]   ;;  %v7867_v13 = vld [vmem:[%s10952_s2 + $0xc00] ss:$8 sps:$4 sm:$0xff]  }
 0x145   :  { %2840 = vmatprep.subr.bf16.mxu1 %v7782_v14  ;;  %2160 = vmatprep.mubr.bf16.mxu0 %v8447_v20  ;;  %v7870_v14 = vld [vmem:[%s10952_s2 + $0xf00] ss:$8 sps:$4 sm:$0xff]  }
 0x146   :  { %2870 = vmatprep.mubr.bf16.mxu1 %v8447_v20  ;;  %v7881_v20 = vld [vmem:[%s10952_s2 + $0xc24] ss:$8 sps:$4 sm:$0xff]  }
 0x147   :  { %2131 = vmatpush1.bf16.msra.mxu0 %v7777_v16  ;;  %v7878_v16 = vld [vmem:[%s10952_s2 + $0xf14] ss:$8 sps:$4 sm:$0xff]  }
 0x148   :  { %2841 = vmatpush1.bf16.msra.mxu1 %v7780_v17  ;;  %2132 = vmatprep.subr.bf16.mxu0 %v7785_v18  ;;  %v8448_v17 = vld [vmem:[%s10953_s0 + $0x10] ss:$24 sps:$4 sm:$0xff]  }
 0x149   :  { %2842 = vmatprep.subr.bf16.mxu1 %v7788_v19  ;;  %v7873_v18 = vld [vmem:[%s10952_s2 + $0xc10] ss:$8 sps:$4 sm:$0xff]  }
 0x14a   :  { %v7876_v19 = vld [vmem:[%s10952_s2 + $0xf10] ss:$8 sps:$4 sm:$0xff]  }
 0x14b   :  { %2133 = vmatpush1.bf16.msra.mxu0 %v7783_v21  ;;  %v7884_v21 = vld [vmem:[%s10952_s2 + $0xf24] ss:$8 sps:$4 sm:$0xff]  }
 0x14c   :  { %2843 = vmatpush1.bf16.msra.mxu1 %v7786_v22  ;;  %2134 = vmatprep.subr.bf16.mxu0 %v7791_v23  ;;  %v8449_v22 = vld [vmem:[%s10953_s0 + $0x4] ss:$24 sps:$4 sm:$0xff]   ;;  %v7879_v23 = vld [vmem:[%s10952_s2 + $0xc20] ss:$8 sps:$4 sm:$0xff]  }
 0x14d   :  { %2844 = vmatprep.subr.bf16.mxu1 %v7794_v24  ;;  %v7882_v24 = vld [vmem:[%s10952_s2 + $0xf20] ss:$8 sps:$4 sm:$0xff]  }
 0x14f   :  { %2135 = vmatpush1.bf16.msra.mxu0 %v7789_v25  ;;  %v7887_v25 = vld [vmem:[%s10952_s2 + $0xc34] ss:$8 sps:$4 sm:$0xff]  }
 0x150   :  { %2845 = vmatpush1.bf16.msra.mxu1 %v7792_v26  ;;  %2136 = vmatprep.subr.bf16.mxu0 %v7797_v27  ;;  %v7890_v26 = vld [vmem:[%s10952_s2 + $0xf34] ss:$8 sps:$4 sm:$0xff]   ;;  %v7885_v27 = vld [vmem:[%s10952_s2 + $0xc30] ss:$8 sps:$4 sm:$0xff]  }
 0x151   :  { %2846 = vmatprep.subr.bf16.mxu1 %v7800_v28  ;;  %v7888_v28 = vld [vmem:[%s10952_s2 + $0xf30] ss:$8 sps:$4 sm:$0xff]  }
 0x153   :  { %2137 = vmatpush1.bf16.msra.mxu0 %v7795_v29  ;;  %v7893_v29 = vld [vmem:[%s10952_s2 + $0xc44] ss:$8 sps:$4 sm:$0xff]  }
 0x154   :  { %2847 = vmatpush1.bf16.msra.mxu1 %v7798_v30  ;;  %2138 = vmatprep.subr.bf16.mxu0 %v7803_v31  ;;  %v7896_v30 = vld [vmem:[%s10952_s2 + $0xf44] ss:$8 sps:$4 sm:$0xff]   ;;  %v7891_v31 = vld [vmem:[%s10952_s2 + $0xc40] ss:$8 sps:$4 sm:$0xff]  }
 0x155   :  { %2848 = vmatprep.subr.bf16.mxu1 %v7806_v32  ;;  %v7894_v32 = vld [vmem:[%s10952_s2 + $0xf40] ss:$8 sps:$4 sm:$0xff]  }
 0x157   :  { %2139 = vmatpush1.bf16.msra.mxu0 %v7801_v33  ;;  %v7899_v33 = vld [vmem:[%s10952_s2 + $0xc54] ss:$8 sps:$4 sm:$0xff]  }
 0x158   :  { %2849 = vmatpush1.bf16.msra.mxu1 %v7804_v34  ;;  %2140 = vmatprep.subr.bf16.mxu0 %v7809_v35  ;;  %v7902_v34 = vld [vmem:[%s10952_s2 + $0xf54] ss:$8 sps:$4 sm:$0xff]   ;;  %v7897_v35 = vld [vmem:[%s10952_s2 + $0xc50] ss:$8 sps:$4 sm:$0xff]  }
 0x159   :  { %2850 = vmatprep.subr.bf16.mxu1 %v7812_v36  ;;  %v7900_v36 = vld [vmem:[%s10952_s2 + $0xf50] ss:$8 sps:$4 sm:$0xff]  }
 0x15b   :  { %2141 = vmatpush1.bf16.msra.mxu0 %v7807_v37  ;;  %v7905_v37 = vld [vmem:[%s10952_s2 + $0xc64] ss:$8 sps:$4 sm:$0xff]  }
 0x15c   :  { %2851 = vmatpush1.bf16.msra.mxu1 %v7810_v38  ;;  %2142 = vmatprep.subr.bf16.mxu0 %v7815_v39  ;;  %v7908_v38 = vld [vmem:[%s10952_s2 + $0xf64] ss:$8 sps:$4 sm:$0xff]  }
 0x15d   :  { %2852 = vmatprep.subr.bf16.mxu1 %v7818_v40 }
 0x15f   :  { %2143 = vmatpush1.bf16.msra.mxu0 %v7813_v41 }
 0x160   :  { %2853 = vmatpush1.bf16.msra.mxu1 %v7816_v42  ;;  %2144 = vmatprep.subr.bf16.mxu0 %v7821_v43 }
 0x161   :  { %2854 = vmatprep.subr.bf16.mxu1 %v7824_v44 }
 0x163   :  { %2145 = vmatpush1.bf16.msra.mxu0 %v7819_v45 }
 0x164   :  { %2855 = vmatpush1.bf16.msra.mxu1 %v7822_v46  ;;  %2146 = vmatprep.subr.bf16.mxu0 %v7827_v47  ;;  %v7903_v47 = vld [vmem:[%s10952_s2 + $0xc60] ss:$8 sps:$4 sm:$0xff]  }
 0x165   :  { %2856 = vmatprep.subr.bf16.mxu1 %v7830_v48  ;;  %v7906_v48 = vld [vmem:[%s10952_s2 + $0xf60] ss:$8 sps:$4 sm:$0xff]  }
 0x167   :  { %2147 = vmatpush1.bf16.msra.mxu0 %v7825_v49 }
 0x168   :  { %2857 = vmatpush1.bf16.msra.mxu1 %v7828_v50  ;;  %2148 = vmatprep.subr.bf16.mxu0 %v7833_v51 }
 0x169   :  { %2858 = vmatprep.subr.bf16.mxu1 %v7836_v52  ;;  %v7911_v52 = vld [vmem:[%s10952_s2 + $0xc74] ss:$8 sps:$4 sm:$0xff]  }
 0x16b   :  { %2149 = vmatpush1.bf16.msra.mxu0 %v7831_v53  ;;  %v7914_v53 = vld [vmem:[%s10952_s2 + $0xf74] ss:$8 sps:$4 sm:$0xff]  }
 0x16c   :  { %2859 = vmatpush1.bf16.msra.mxu1 %v7834_v54  ;;  %2150 = vmatprep.subr.bf16.mxu0 %v7839_v55  ;;  %v7909_v55 = vld [vmem:[%s10952_s2 + $0xc70] ss:$8 sps:$4 sm:$0xff]  }
 0x16d   :  { %2860 = vmatprep.subr.bf16.mxu1 %v7842_v56  ;;  %v7912_v56 = vld [vmem:[%s10952_s2 + $0xf70] ss:$8 sps:$4 sm:$0xff]  }
 0x16f   :  { %2151 = vmatpush1.bf16.msra.mxu0 %v7837_v57  ;;  %v7917_v57 = vld [vmem:[%s10952_s2 + $0xc84] ss:$8 sps:$4 sm:$0xff]  }
 0x170   :  { %2861 = vmatpush1.bf16.msra.mxu1 %v7840_v58  ;;  %2152 = vmatprep.subr.bf16.mxu0 %v7845_v59  ;;  %v7920_v58 = vld [vmem:[%s10952_s2 + $0xf84] ss:$8 sps:$4 sm:$0xff]   ;;  %v7915_v59 = vld [vmem:[%s10952_s2 + $0xc80] ss:$8 sps:$4 sm:$0xff]  }
 0x171   :  { %2862 = vmatprep.subr.bf16.mxu1 %v7848_v60  ;;  %v7918_v60 = vld [vmem:[%s10952_s2 + $0xf80] ss:$8 sps:$4 sm:$0xff]  }
 0x173   :  { %2153 = vmatpush1.bf16.msra.mxu0 %v7843_v61  ;;  %v7923_v61 = vld [vmem:[%s10952_s2 + $0xc94] ss:$8 sps:$4 sm:$0xff]  }
 0x174   :  { %2863 = vmatpush1.bf16.msra.mxu1 %v7846_v62  ;;  %2154 = vmatprep.subr.bf16.mxu0 %v7851_v63  ;;  %v7926_v62 = vld [vmem:[%s10952_s2 + $0xf94] ss:$8 sps:$4 sm:$0xff]   ;;  %v7921_v63 = vld [vmem:[%s10952_s2 + $0xc90] ss:$8 sps:$4 sm:$0xff]  }
 0x175   :  { %2864 = vmatprep.subr.bf16.mxu1 %v7854_v0  ;;  %v7924_v0 = vld [vmem:[%s10952_s2 + $0xf90] ss:$8 sps:$4 sm:$0xff]  }
 0x177   :  { %2155 = vmatpush1.bf16.msra.mxu0 %v7849_v1  ;;  %v7929_v1 = vld [vmem:[%s10952_s2 + $0xca4] ss:$8 sps:$4 sm:$0xff]  }
 0x178   :  { %2865 = vmatpush1.bf16.msra.mxu1 %v7852_v2  ;;  %2156 = vmatprep.subr.bf16.mxu0 %v7857_v3  ;;  %v7932_v2 = vld [vmem:[%s10952_s2 + $0xfa4] ss:$8 sps:$4 sm:$0xff]   ;;  %v7927_v3 = vld [vmem:[%s10952_s2 + $0xca0] ss:$8 sps:$4 sm:$0xff]  }
 0x179   :  { %2866 = vmatprep.subr.bf16.mxu1 %v7860_v4  ;;  %v7930_v4 = vld [vmem:[%s10952_s2 + $0xfa0] ss:$8 sps:$4 sm:$0xff]  }
 0x17b   :  { %2157 = vmatpush1.bf16.msra.mxu0 %v7855_v5  ;;  %v7935_v5 = vld [vmem:[%s10952_s2 + $0xcb4] ss:$8 sps:$4 sm:$0xff]  }
 0x17c   :  { %2867 = vmatpush1.bf16.msra.mxu1 %v7858_v6  ;;  %2158 = vmatprep.subr.bf16.mxu0 %v7863_v7  ;;  %v7938_v6 = vld [vmem:[%s10952_s2 + $0xfb4] ss:$8 sps:$4 sm:$0xff]   ;;  %v7933_v7 = vld [vmem:[%s10952_s2 + $0xcb0] ss:$8 sps:$4 sm:$0xff]  }
 0x17d   :  { %2868 = vmatprep.subr.bf16.mxu1 %v7866_v8  ;;  %v7936_v8 = vld [vmem:[%s10952_s2 + $0xfb0] ss:$8 sps:$4 sm:$0xff]  }
 0x17f   :  { %2159 = vmatpush1.bf16.msra.mxu0 %v7861_v9  ;;  %v7941_v9 = vld [vmem:[%s10952_s2 + $0xcc4] ss:$8 sps:$4 sm:$0xff]  }
 0x180   :  { %2869 = vmatpush1.bf16.msra.mxu1 %v7864_v10  ;;  %3462 = vmatprep.subr.bf16.mxu0 %v7869_v11  ;;  %v7944_v10 = vld [vmem:[%s10952_s2 + $0xfc4] ss:$8 sps:$4 sm:$0xff]   ;;  %v7939_v11 = vld [vmem:[%s10952_s2 + $0xcc0] ss:$8 sps:$4 sm:$0xff]  }
 0x181   :  { %4172 = vmatprep.subr.bf16.mxu1 %v7872_v12  ;;  %v7942_v12 = vld [vmem:[%s10952_s2 + $0xfc0] ss:$8 sps:$4 sm:$0xff]  }
 0x182   :  { %2161 = vmatmul.mubr.bf16.vlgmr.msra.gmra.mrb[4].mxu0 %v8448_v17 }
 0x183   :  { %2871 = vmatmul.mubr.bf16.vlgmr.msra.gmra.mrb[4].mxu1 %v8448_v17  ;;  %3463 = vmatpush1.bf16.msra.mxu0 %v7867_v13  ;;  %v7947_v13 = vld [vmem:[%s10952_s2 + $0xcd4] ss:$8 sps:$4 sm:$0xff]   ;;  %v7953_v17 = vld [vmem:[%s10952_s2 + $0xce4] ss:$8 sps:$4 sm:$0xff]  }
 0x184   :  { %4173 = vmatpush1.bf16.msra.mxu1 %v7870_v14  ;;  %3464 = vmatprep.subr.bf16.mxu0 %v7875_v15  ;;  %v7950_v14 = vld [vmem:[%s10952_s2 + $0xfd4] ss:$8 sps:$4 sm:$0xff]   ;;  %v7945_v15 = vld [vmem:[%s10952_s2 + $0xcd0] ss:$8 sps:$4 sm:$0xff]  }
 0x185   :  { %4174 = vmatprep.subr.bf16.mxu1 %v7878_v16  ;;  %3494 = vmatprep.mubr.bf16.mxu0 %v8449_v22  ;;  %v7948_v16 = vld [vmem:[%s10952_s2 + $0xfd0] ss:$8 sps:$4 sm:$0xff]  }
 0x186   :  { %4204 = vmatprep.mubr.bf16.mxu1 %v8449_v22  ;;  %v7962_v22 = vld [vmem:[%s10952_s2 + $0xff4] ss:$8 sps:$4 sm:$0xff]  }
 0x187   :  { %3465 = vmatpush1.bf16.msra.mxu0 %v7873_v18  ;;  %v7956_v18 = vld [vmem:[%s10952_s2 + $0xfe4] ss:$8 sps:$4 sm:$0xff]  }
 0x188   :  { %4175 = vmatpush1.bf16.msra.mxu1 %v7876_v19  ;;  %3466 = vmatprep.subr.bf16.mxu0 %v7881_v20  ;;  %v7951_v19 = vld [vmem:[%s10952_s2 + $0xce0] ss:$8 sps:$4 sm:$0xff]  }
 0x189   :  { %4176 = vmatprep.subr.bf16.mxu1 %v7884_v21  ;;  %v7954_v20 = vld [vmem:[%s10952_s2 + $0xfe0] ss:$8 sps:$4 sm:$0xff]   ;;  %v7959_v21 = vld [vmem:[%s10952_s2 + $0xcf4] ss:$8 sps:$4 sm:$0xff]  }
 0x18b   :  { %3467 = vmatpush1.bf16.msra.mxu0 %v7879_v23  ;;  %v7957_v23 = vld [vmem:[%s10952_s2 + $0xcf0] ss:$8 sps:$4 sm:$0xff]  }
 0x18c   :  { %4177 = vmatpush1.bf16.msra.mxu1 %v7882_v24  ;;  %3468 = vmatprep.subr.bf16.mxu0 %v7887_v25  ;;  %v7960_v24 = vld [vmem:[%s10952_s2 + $0xff0] ss:$8 sps:$4 sm:$0xff]   ;;  %v7965_v25 = vld [vmem:[%s10952_s2 + $0xd04] ss:$8 sps:$4 sm:$0xff]  }
 0x18d   :  { %4178 = vmatprep.subr.bf16.mxu1 %v7890_v26  ;;  %v7968_v26 = vld [vmem:[%s10952_s2 + $0x1004] ss:$8 sps:$4 sm:$0xff]  }
 0x18f   :  { %3469 = vmatpush1.bf16.msra.mxu0 %v7885_v27  ;;  %v7963_v27 = vld [vmem:[%s10952_s2 + $0xd00] ss:$8 sps:$4 sm:$0xff]  }
 0x190   :  { %4179 = vmatpush1.bf16.msra.mxu1 %v7888_v28  ;;  %3470 = vmatprep.subr.bf16.mxu0 %v7893_v29  ;;  %v7966_v28 = vld [vmem:[%s10952_s2 + $0x1000] ss:$8 sps:$4 sm:$0xff]   ;;  %v7971_v29 = vld [vmem:[%s10952_s2 + $0xd14] ss:$8 sps:$4 sm:$0xff]  }
 0x191   :  { %4180 = vmatprep.subr.bf16.mxu1 %v7896_v30  ;;  %v7974_v30 = vld [vmem:[%s10952_s2 + $0x1014] ss:$8 sps:$4 sm:$0xff]  }
 0x193   :  { %3471 = vmatpush1.bf16.msra.mxu0 %v7891_v31  ;;  %v9905_v31 = vld [vmem:[%s10953_s0] ss:$24 sps:$4 sm:$0xff]  }
 0x194   :  { %4181 = vmatpush1.bf16.msra.mxu1 %v7894_v32  ;;  %3472 = vmatprep.subr.bf16.mxu0 %v7899_v33  ;;  %v7969_v32 = vld [vmem:[%s10952_s2 + $0xd10] ss:$8 sps:$4 sm:$0xff]  }
 0x195   :  { %4182 = vmatprep.subr.bf16.mxu1 %v7902_v34  ;;  %v9746_v39 = vpop.f32.mrb[0].mxu0  ;;  %v7972_v33 = vld [vmem:[%s10952_s2 + $0x1010] ss:$8 sps:$4 sm:$0xff]   ;;  %v7977_v34 = vld [vmem:[%s10952_s2 + $0xd24] ss:$8 sps:$4 sm:$0xff]  }
 0x196   :  { %v9748_v40 = vpop.f32.mrb[0].mxu1  ;;  %v9752_v42 = vpop.f32.mrb[1].mxu0 }
 0x197   :  { %v1461_v41 = vmax.f32 %v9746_v39, %v9748_v40  ;;  %v9754_v43 = vpop.f32.mrb[1].mxu1  ;;  %v9758_v45 = vpop.f32.mrb[2].mxu0  ;;  %3473 = vmatpush1.bf16.msra.mxu0 %v7897_v35  ;;  %v7980_v35 = vld [vmem:[%s10952_s2 + $0x1024] ss:$8 sps:$4 sm:$0xff]   ;;  %v8194_v39 = vld [vmem:[%s10952_s2 + $0x1560] ss:$8 sps:$4 sm:$0xff]  }
 0x198   :  { %v1462_v44 = vmax.f32 %v9752_v42, %v9754_v43  ;;  %v9760_v46 = vpop.f32.mrb[2].mxu1  ;;  %4183 = vmatpush1.bf16.msra.mxu1 %v7900_v36  ;;  %v9770_v50 = vpop.f32.mrb[3].mxu0  ;;  %3474 = vmatprep.subr.bf16.mxu0 %v7905_v37  ;;  %v9924_v36 = vld [vmem:[%s10953_s0 + $0xc] ss:$24 sps:$4 sm:$0xff]   ;;  %v7975_v37 = vld [vmem:[%s10952_s2 + $0xd20] ss:$8 sps:$4 sm:$0xff]  }
 0x199   :  { %v1463_v49 = vmax.f32 %v9758_v45, %v9760_v46  ;;  %v9772_v51 = vpop.f32.mrb[3].mxu1  ;;  %4184 = vmatprep.subr.bf16.mxu1 %v7908_v38  ;;  %v7978_v38 = vld [vmem:[%s10952_s2 + $0x1020] ss:$8 sps:$4 sm:$0xff]  }
 0x19a   :  { %v1464_v54 = vmax.f32 %v9770_v50, %v9772_v51  ;;  %v8205_v50 = vld [vmem:[%s10952_s2 + $0x1284] ss:$8 sps:$4 sm:$0xff]  }
 0x19b   :  { %3475 = vmatpush1.bf16.msra.mxu0 %v7903_v47  ;;  %v7983_v47 = vld [vmem:[%s10952_s2 + $0xd34] ss:$8 sps:$4 sm:$0xff]   ;;  %v8208_v51 = vld [vmem:[%s10952_s2 + $0x1584] ss:$8 sps:$4 sm:$0xff]  }
 0x19c   :  { %4185 = vmatpush1.bf16.msra.mxu1 %v7906_v48  ;;  %3476 = vmatprep.subr.bf16.mxu0 %v7911_v52  ;;  %v7986_v48 = vld [vmem:[%s10952_s2 + $0x1034] ss:$8 sps:$4 sm:$0xff]   ;;  %v7981_v52 = vld [vmem:[%s10952_s2 + $0xd30] ss:$8 sps:$4 sm:$0xff]  }
 0x19d   :  { %4186 = vmatprep.subr.bf16.mxu1 %v7914_v53  ;;  %v7984_v53 = vld [vmem:[%s10952_s2 + $0x1030] ss:$8 sps:$4 sm:$0xff]  }
 0x19f   :  { %3477 = vmatpush1.bf16.msra.mxu0 %v7909_v55  ;;  %v7989_v55 = vld [vmem:[%s10952_s2 + $0xd44] ss:$8 sps:$4 sm:$0xff]  }
 0x1a0   :  { %4187 = vmatpush1.bf16.msra.mxu1 %v7912_v56  ;;  %3478 = vmatprep.subr.bf16.mxu0 %v7917_v57  ;;  %v7992_v56 = vld [vmem:[%s10952_s2 + $0x1044] ss:$8 sps:$4 sm:$0xff]   ;;  %v7987_v57 = vld [vmem:[%s10952_s2 + $0xd40] ss:$8 sps:$4 sm:$0xff]  }
 0x1a1   :  { %4188 = vmatprep.subr.bf16.mxu1 %v7920_v58  ;;  %v7990_v58 = vld [vmem:[%s10952_s2 + $0x1040] ss:$8 sps:$4 sm:$0xff]  }
 0x1a3   :  { %3479 = vmatpush1.bf16.msra.mxu0 %v7915_v59  ;;  %v7995_v59 = vld [vmem:[%s10952_s2 + $0xd54] ss:$8 sps:$4 sm:$0xff]  }
 0x1a4   :  { %4189 = vmatpush1.bf16.msra.mxu1 %v7918_v60  ;;  %3480 = vmatprep.subr.bf16.mxu0 %v7923_v61  ;;  %v7998_v60 = vld [vmem:[%s10952_s2 + $0x1054] ss:$8 sps:$4 sm:$0xff]   ;;  %v7993_v61 = vld [vmem:[%s10952_s2 + $0xd50] ss:$8 sps:$4 sm:$0xff]  }
 0x1a5   :  { %4190 = vmatprep.subr.bf16.mxu1 %v7926_v62  ;;  %v7996_v62 = vld [vmem:[%s10952_s2 + $0x1050] ss:$8 sps:$4 sm:$0xff]  }
 0x1a7   :  { %3481 = vmatpush1.bf16.msra.mxu0 %v7921_v63  ;;  %v8001_v63 = vld [vmem:[%s10952_s2 + $0xd64] ss:$8 sps:$4 sm:$0xff]  }
 0x1a8   :  { %4191 = vmatpush1.bf16.msra.mxu1 %v7924_v0  ;;  %3482 = vmatprep.subr.bf16.mxu0 %v7929_v1  ;;  %v8004_v0 = vld [vmem:[%s10952_s2 + $0x1064] ss:$8 sps:$4 sm:$0xff]   ;;  %v7999_v1 = vld [vmem:[%s10952_s2 + $0xd60] ss:$8 sps:$4 sm:$0xff]  }
 0x1a9   :  { %4192 = vmatprep.subr.bf16.mxu1 %v7932_v2  ;;  %v8002_v2 = vld [vmem:[%s10952_s2 + $0x1060] ss:$8 sps:$4 sm:$0xff]  }
 0x1ab   :  { %3483 = vmatpush1.bf16.msra.mxu0 %v7927_v3  ;;  %v8007_v3 = vld [vmem:[%s10952_s2 + $0xd74] ss:$8 sps:$4 sm:$0xff]  }
 0x1ac   :  { %4193 = vmatpush1.bf16.msra.mxu1 %v7930_v4  ;;  %3484 = vmatprep.subr.bf16.mxu0 %v7935_v5  ;;  %v8010_v4 = vld [vmem:[%s10952_s2 + $0x1074] ss:$8 sps:$4 sm:$0xff]   ;;  %v8005_v5 = vld [vmem:[%s10952_s2 + $0xd70] ss:$8 sps:$4 sm:$0xff]  }
 0x1ad   :  { %4194 = vmatprep.subr.bf16.mxu1 %v7938_v6  ;;  %v8008_v6 = vld [vmem:[%s10952_s2 + $0x1070] ss:$8 sps:$4 sm:$0xff]  }
 0x1af   :  { %3485 = vmatpush1.bf16.msra.mxu0 %v7933_v7  ;;  %v8013_v7 = vld [vmem:[%s10952_s2 + $0xd84] ss:$8 sps:$4 sm:$0xff]  }
 0x1b0   :  { %4195 = vmatpush1.bf16.msra.mxu1 %v7936_v8  ;;  %3486 = vmatprep.subr.bf16.mxu0 %v7941_v9  ;;  %v8016_v8 = vld [vmem:[%s10952_s2 + $0x1084] ss:$8 sps:$4 sm:$0xff]   ;;  %v8011_v9 = vld [vmem:[%s10952_s2 + $0xd80] ss:$8 sps:$4 sm:$0xff]  }
 0x1b1   :  { %4196 = vmatprep.subr.bf16.mxu1 %v7944_v10  ;;  %v8014_v10 = vld [vmem:[%s10952_s2 + $0x1080] ss:$8 sps:$4 sm:$0xff]  }
 0x1b3   :  { %3487 = vmatpush1.bf16.msra.mxu0 %v7939_v11  ;;  %v8019_v11 = vld [vmem:[%s10952_s2 + $0xd94] ss:$8 sps:$4 sm:$0xff]  }
 0x1b4   :  { %4197 = vmatpush1.bf16.msra.mxu1 %v7942_v12  ;;  %3488 = vmatprep.subr.bf16.mxu0 %v7947_v13  ;;  %v8022_v12 = vld [vmem:[%s10952_s2 + $0x1094] ss:$8 sps:$4 sm:$0xff]   ;;  %v8017_v13 = vld [vmem:[%s10952_s2 + $0xd90] ss:$8 sps:$4 sm:$0xff]  }
 0x1b5   :  { %4198 = vmatprep.subr.bf16.mxu1 %v7950_v14  ;;  %v8020_v14 = vld [vmem:[%s10952_s2 + $0x1090] ss:$8 sps:$4 sm:$0xff]  }
 0x1b7   :  { %3489 = vmatpush1.bf16.msra.mxu0 %v7945_v15  ;;  %v8025_v15 = vld [vmem:[%s10952_s2 + $0xda4] ss:$8 sps:$4 sm:$0xff]  }
 0x1b8   :  { %4199 = vmatpush1.bf16.msra.mxu1 %v7948_v16  ;;  %3490 = vmatprep.subr.bf16.mxu0 %v7953_v17  ;;  %v8028_v16 = vld [vmem:[%s10952_s2 + $0x10a4] ss:$8 sps:$4 sm:$0xff]   ;;  %v8023_v17 = vld [vmem:[%s10952_s2 + $0xda0] ss:$8 sps:$4 sm:$0xff]  }
 0x1b9   :  { %4200 = vmatprep.subr.bf16.mxu1 %v7956_v18  ;;  %v8026_v18 = vld [vmem:[%s10952_s2 + $0x10a0] ss:$8 sps:$4 sm:$0xff]  }
 0x1bb   :  { %3491 = vmatpush1.bf16.msra.mxu0 %v7951_v19  ;;  %v8031_v19 = vld [vmem:[%s10952_s2 + $0xdb4] ss:$8 sps:$4 sm:$0xff]  }
 0x1bc   :  { %4201 = vmatpush1.bf16.msra.mxu1 %v7954_v20  ;;  %3492 = vmatprep.subr.bf16.mxu0 %v7959_v21  ;;  %v8034_v20 = vld [vmem:[%s10952_s2 + $0x10b4] ss:$8 sps:$4 sm:$0xff]   ;;  %v8029_v21 = vld [vmem:[%s10952_s2 + $0xdb0] ss:$8 sps:$4 sm:$0xff]  }
 0x1bd   :  { %4202 = vmatprep.subr.bf16.mxu1 %v7962_v22  ;;  %v8032_v22 = vld [vmem:[%s10952_s2 + $0x10b0] ss:$8 sps:$4 sm:$0xff]  }
 0x1bf   :  { %3493 = vmatpush1.bf16.msra.mxu0 %v7957_v23  ;;  %v8037_v23 = vld [vmem:[%s10952_s2 + $0xdc4] ss:$8 sps:$4 sm:$0xff]  }
 0x1c0   :  { %4203 = vmatpush1.bf16.msra.mxu1 %v7960_v24  ;;  %3505 = vmatprep.subr.bf16.mxu0 %v7965_v25  ;;  %v8040_v24 = vld [vmem:[%s10952_s2 + $0x10c4] ss:$8 sps:$4 sm:$0xff]   ;;  %v8035_v25 = vld [vmem:[%s10952_s2 + $0xdc0] ss:$8 sps:$4 sm:$0xff]  }
 0x1c1   :  { %4215 = vmatprep.subr.bf16.mxu1 %v7968_v26  ;;  %v8038_v26 = vld [vmem:[%s10952_s2 + $0x10c0] ss:$8 sps:$4 sm:$0xff]  }
 0x1c2   :  { %3495 = vmatmul.mubr.bf16.vlgmr.msra.gmra.mrb[8].mxu0 %v9905_v31 }
 0x1c3   :  { %4205 = vmatmul.mubr.bf16.vlgmr.msra.gmra.mrb[8].mxu1 %v9905_v31  ;;  %3506 = vmatpush1.bf16.msra.mxu0 %v7963_v27  ;;  %v8043_v27 = vld [vmem:[%s10952_s2 + $0xdd4] ss:$8 sps:$4 sm:$0xff]  }
 0x1c4   :  { %4216 = vmatpush1.bf16.msra.mxu1 %v7966_v28  ;;  %3507 = vmatprep.subr.bf16.mxu0 %v7971_v29  ;;  %v8046_v28 = vld [vmem:[%s10952_s2 + $0x10d4] ss:$8 sps:$4 sm:$0xff]   ;;  %v8041_v29 = vld [vmem:[%s10952_s2 + $0xdd0] ss:$8 sps:$4 sm:$0xff]  }
 0x1c5   :  { %4217 = vmatprep.subr.bf16.mxu1 %v7974_v30  ;;  %3537 = vmatprep.mubr.bf16.mxu0 %v9924_v36  ;;  %v8044_v30 = vld [vmem:[%s10952_s2 + $0x10d0] ss:$8 sps:$4 sm:$0xff]  }
 0x1c6   :  { %4247 = vmatprep.mubr.bf16.mxu1 %v9924_v36 }
 0x1c7   :  { %3508 = vmatpush1.bf16.msra.mxu0 %v7969_v32  ;;  %v8049_v32 = vld [vmem:[%s10952_s2 + $0xde4] ss:$8 sps:$4 sm:$0xff]  }
 0x1c8   :  { %4218 = vmatpush1.bf16.msra.mxu1 %v7972_v33  ;;  %3509 = vmatprep.subr.bf16.mxu0 %v7977_v34  ;;  %v8052_v33 = vld [vmem:[%s10952_s2 + $0x10e4] ss:$8 sps:$4 sm:$0xff]   ;;  %v8047_v34 = vld [vmem:[%s10952_s2 + $0xde0] ss:$8 sps:$4 sm:$0xff]  }
 0x1c9   :  { %4219 = vmatprep.subr.bf16.mxu1 %v7980_v35  ;;  %v8050_v35 = vld [vmem:[%s10952_s2 + $0x10e0] ss:$8 sps:$4 sm:$0xff]  }
 0x1cb   :  { %3510 = vmatpush1.bf16.msra.mxu0 %v7975_v37  ;;  %v8055_v37 = vld [vmem:[%s10952_s2 + $0xdf4] ss:$8 sps:$4 sm:$0xff]  }
 0x1cc   :  { %4220 = vmatpush1.bf16.msra.mxu1 %v7978_v38  ;;  %3511 = vmatprep.subr.bf16.mxu0 %v7983_v47  ;;  %v8058_v38 = vld [vmem:[%s10952_s2 + $0x10f4] ss:$8 sps:$4 sm:$0xff]   ;;  %v8053_v47 = vld [vmem:[%s10952_s2 + $0xdf0] ss:$8 sps:$4 sm:$0xff]  }
 0x1cd   :  { %4221 = vmatprep.subr.bf16.mxu1 %v7986_v48  ;;  %v8056_v48 = vld [vmem:[%s10952_s2 + $0x10f0] ss:$8 sps:$4 sm:$0xff]  }
 0x1cf   :  { %3512 = vmatpush1.bf16.msra.mxu0 %v7981_v52  ;;  %v8061_v52 = vld [vmem:[%s10952_s2 + $0xe04] ss:$8 sps:$4 sm:$0xff]  }
 0x1d0   :  { %4222 = vmatpush1.bf16.msra.mxu1 %v7984_v53  ;;  %3513 = vmatprep.subr.bf16.mxu0 %v7989_v55  ;;  %v8064_v53 = vld [vmem:[%s10952_s2 + $0x1104] ss:$8 sps:$4 sm:$0xff]   ;;  %v8059_v55 = vld [vmem:[%s10952_s2 + $0xe00] ss:$8 sps:$4 sm:$0xff]  }
 0x1d1   :  { %4223 = vmatprep.subr.bf16.mxu1 %v7992_v56  ;;  %v8062_v56 = vld [vmem:[%s10952_s2 + $0x1100] ss:$8 sps:$4 sm:$0xff]  }
 0x1d3   :  { %3514 = vmatpush1.bf16.msra.mxu0 %v7987_v57  ;;  %v8067_v57 = vld [vmem:[%s10952_s2 + $0xe14] ss:$8 sps:$4 sm:$0xff]  }
 0x1d4   :  { %4224 = vmatpush1.bf16.msra.mxu1 %v7990_v58  ;;  %3515 = vmatprep.subr.bf16.mxu0 %v7995_v59  ;;  %v8070_v58 = vld [vmem:[%s10952_s2 + $0x1114] ss:$8 sps:$4 sm:$0xff]   ;;  %v10111_v59 = vld [vmem:[%s10953_s0 + $0x8] ss:$24 sps:$4 sm:$0xff]  }
 0x1d5   :  { %4225 = vmatprep.subr.bf16.mxu1 %v7998_v60  ;;  %v8065_v60 = vld [vmem:[%s10952_s2 + $0xe10] ss:$8 sps:$4 sm:$0xff]  }
 0x1d7   :  { %3516 = vmatpush1.bf16.msra.mxu0 %v7993_v61  ;;  %v8068_v61 = vld [vmem:[%s10952_s2 + $0x1110] ss:$8 sps:$4 sm:$0xff]  }
 0x1d8   :  { %4226 = vmatpush1.bf16.msra.mxu1 %v7996_v62  ;;  %3517 = vmatprep.subr.bf16.mxu0 %v8001_v63  ;;  %v8073_v62 = vld [vmem:[%s10952_s2 + $0xe24] ss:$8 sps:$4 sm:$0xff]  }
 0x1d9   :  { %4227 = vmatprep.subr.bf16.mxu1 %v8004_v0  ;;  %v8076_v63 = vld [vmem:[%s10952_s2 + $0x1124] ss:$8 sps:$4 sm:$0xff]  }
 0x1da   :  { %v10130_v0 = vld [vmem:[%s10953_s0 + $0x14] ss:$24 sps:$4 sm:$0xff]  }
 0x1db   :  { %3518 = vmatpush1.bf16.msra.mxu0 %v7999_v1  ;;  %v8071_v1 = vld [vmem:[%s10952_s2 + $0xe20] ss:$8 sps:$4 sm:$0xff]  }
 0x1dc   :  { %4228 = vmatpush1.bf16.msra.mxu1 %v8002_v2  ;;  %3519 = vmatprep.subr.bf16.mxu0 %v8007_v3  ;;  %v8074_v2 = vld [vmem:[%s10952_s2 + $0x1120] ss:$8 sps:$4 sm:$0xff]   ;;  %v8079_v3 = vld [vmem:[%s10952_s2 + $0xe34] ss:$8 sps:$4 sm:$0xff]  }
 0x1dd   :  { %4229 = vmatprep.subr.bf16.mxu1 %v8010_v4  ;;  %v8082_v4 = vld [vmem:[%s10952_s2 + $0x1134] ss:$8 sps:$4 sm:$0xff]  }
 0x1df   :  { %3520 = vmatpush1.bf16.msra.mxu0 %v8005_v5  ;;  %v8077_v5 = vld [vmem:[%s10952_s2 + $0xe30] ss:$8 sps:$4 sm:$0xff]  }
 0x1e0   :  { %4230 = vmatpush1.bf16.msra.mxu1 %v8008_v6  ;;  %3521 = vmatprep.subr.bf16.mxu0 %v8013_v7  ;;  %v8080_v6 = vld [vmem:[%s10952_s2 + $0x1130] ss:$8 sps:$4 sm:$0xff]   ;;  %v8085_v7 = vld [vmem:[%s10952_s2 + $0xe44] ss:$8 sps:$4 sm:$0xff]  }
 0x1e1   :  { %4231 = vmatprep.subr.bf16.mxu1 %v8016_v8  ;;  %v8088_v8 = vld [vmem:[%s10952_s2 + $0x1144] ss:$8 sps:$4 sm:$0xff]  }
 0x1e3   :  { %3522 = vmatpush1.bf16.msra.mxu0 %v8011_v9  ;;  %v8083_v9 = vld [vmem:[%s10952_s2 + $0xe40] ss:$8 sps:$4 sm:$0xff]  }
 0x1e4   :  { %4232 = vmatpush1.bf16.msra.mxu1 %v8014_v10  ;;  %3523 = vmatprep.subr.bf16.mxu0 %v8019_v11  ;;  %v8086_v10 = vld [vmem:[%s10952_s2 + $0x1140] ss:$8 sps:$4 sm:$0xff]   ;;  %v8091_v11 = vld [vmem:[%s10952_s2 + $0xe54] ss:$8 sps:$4 sm:$0xff]  }
 0x1e5   :  { %4233 = vmatprep.subr.bf16.mxu1 %v8022_v12  ;;  %v8094_v12 = vld [vmem:[%s10952_s2 + $0x1154] ss:$8 sps:$4 sm:$0xff]  }
 0x1e7   :  { %3524 = vmatpush1.bf16.msra.mxu0 %v8017_v13  ;;  %v8089_v13 = vld [vmem:[%s10952_s2 + $0xe50] ss:$8 sps:$4 sm:$0xff]  }
 0x1e8   :  { %4234 = vmatpush1.bf16.msra.mxu1 %v8020_v14  ;;  %3525 = vmatprep.subr.bf16.mxu0 %v8025_v15  ;;  %v8092_v14 = vld [vmem:[%s10952_s2 + $0x1150] ss:$8 sps:$4 sm:$0xff]   ;;  %v8097_v15 = vld [vmem:[%s10952_s2 + $0xe64] ss:$8 sps:$4 sm:$0xff]  }
 0x1e9   :  { %4235 = vmatprep.subr.bf16.mxu1 %v8028_v16  ;;  %v8100_v16 = vld [vmem:[%s10952_s2 + $0x1164] ss:$8 sps:$4 sm:$0xff]  }
 0x1eb   :  { %3526 = vmatpush1.bf16.msra.mxu0 %v8023_v17  ;;  %v8095_v17 = vld [vmem:[%s10952_s2 + $0xe60] ss:$8 sps:$4 sm:$0xff]  }
 0x1ec   :  { %4236 = vmatpush1.bf16.msra.mxu1 %v8026_v18  ;;  %3527 = vmatprep.subr.bf16.mxu0 %v8031_v19  ;;  %v8098_v18 = vld [vmem:[%s10952_s2 + $0x1160] ss:$8 sps:$4 sm:$0xff]   ;;  %v8103_v19 = vld [vmem:[%s10952_s2 + $0xe74] ss:$8 sps:$4 sm:$0xff]  }
 0x1ed   :  { %4237 = vmatprep.subr.bf16.mxu1 %v8034_v20  ;;  %v8106_v20 = vld [vmem:[%s10952_s2 + $0x1174] ss:$8 sps:$4 sm:$0xff]  }
 0x1ef   :  { %3528 = vmatpush1.bf16.msra.mxu0 %v8029_v21  ;;  %v8101_v21 = vld [vmem:[%s10952_s2 + $0xe70] ss:$8 sps:$4 sm:$0xff]  }
 0x1f0   :  { %4238 = vmatpush1.bf16.msra.mxu1 %v8032_v22  ;;  %3529 = vmatprep.subr.bf16.mxu0 %v8037_v23  ;;  %v8104_v22 = vld [vmem:[%s10952_s2 + $0x1170] ss:$8 sps:$4 sm:$0xff]   ;;  %v8109_v23 = vld [vmem:[%s10952_s2 + $0xe84] ss:$8 sps:$4 sm:$0xff]  }
 0x1f1   :  { %4239 = vmatprep.subr.bf16.mxu1 %v8040_v24  ;;  %v8112_v24 = vld [vmem:[%s10952_s2 + $0x1184] ss:$8 sps:$4 sm:$0xff]  }
 0x1f3   :  { %3530 = vmatpush1.bf16.msra.mxu0 %v8035_v25  ;;  %v8107_v25 = vld [vmem:[%s10952_s2 + $0xe80] ss:$8 sps:$4 sm:$0xff]  }
 0x1f4   :  { %4240 = vmatpush1.bf16.msra.mxu1 %v8038_v26  ;;  %3531 = vmatprep.subr.bf16.mxu0 %v8043_v27  ;;  %v8110_v26 = vld [vmem:[%s10952_s2 + $0x1180] ss:$8 sps:$4 sm:$0xff]   ;;  %v8115_v27 = vld [vmem:[%s10952_s2 + $0xe94] ss:$8 sps:$4 sm:$0xff]  }
 0x1f5   :  { %4241 = vmatprep.subr.bf16.mxu1 %v8046_v28  ;;  %v8118_v28 = vld [vmem:[%s10952_s2 + $0x1194] ss:$8 sps:$4 sm:$0xff]  }
 0x1f7   :  { %3532 = vmatpush1.bf16.msra.mxu0 %v8041_v29  ;;  %v8113_v29 = vld [vmem:[%s10952_s2 + $0xe90] ss:$8 sps:$4 sm:$0xff]  }
 0x1f8   :  { %4242 = vmatpush1.bf16.msra.mxu1 %v8044_v30  ;;  %3533 = vmatprep.subr.bf16.mxu0 %v8049_v32  ;;  %v8116_v30 = vld [vmem:[%s10952_s2 + $0x1190] ss:$8 sps:$4 sm:$0xff]   ;;  %v8121_v32 = vld [vmem:[%s10952_s2 + $0xea4] ss:$8 sps:$4 sm:$0xff]  }
 0x1f9   :  { %4243 = vmatprep.subr.bf16.mxu1 %v8052_v33  ;;  %v8124_v33 = vld [vmem:[%s10952_s2 + $0x11a4] ss:$8 sps:$4 sm:$0xff]  }
 0x1fb   :  { %3534 = vmatpush1.bf16.msra.mxu0 %v8047_v34  ;;  %v8119_v34 = vld [vmem:[%s10952_s2 + $0xea0] ss:$8 sps:$4 sm:$0xff]  }
 0x1fc   :  { %4244 = vmatpush1.bf16.msra.mxu1 %v8050_v35  ;;  %3535 = vmatprep.subr.bf16.mxu0 %v8055_v37  ;;  %v8122_v35 = vld [vmem:[%s10952_s2 + $0x11a0] ss:$8 sps:$4 sm:$0xff]   ;;  %v8127_v37 = vld [vmem:[%s10952_s2 + $0xeb4] ss:$8 sps:$4 sm:$0xff]  }
 0x1fd   :  { %4245 = vmatprep.subr.bf16.mxu1 %v8058_v38  ;;  %v8130_v38 = vld [vmem:[%s10952_s2 + $0x11b4] ss:$8 sps:$4 sm:$0xff]  }
 0x1ff   :  { %3536 = vmatpush1.bf16.msra.mxu0 %v8053_v47  ;;  %v8125_v47 = vld [vmem:[%s10952_s2 + $0xeb0] ss:$8 sps:$4 sm:$0xff]  }
 0x200   :  { %4246 = vmatpush1.bf16.msra.mxu1 %v8056_v48  ;;  %3548 = vmatprep.subr.bf16.mxu0 %v8061_v52  ;;  %v8128_v48 = vld [vmem:[%s10952_s2 + $0x11b0] ss:$8 sps:$4 sm:$0xff]   ;;  %v8133_v52 = vld [vmem:[%s10952_s2 + $0xec4] ss:$8 sps:$4 sm:$0xff]  }
 0x201   :  { %4258 = vmatprep.subr.bf16.mxu1 %v8064_v53  ;;  %v8136_v53 = vld [vmem:[%s10952_s2 + $0x11c4] ss:$8 sps:$4 sm:$0xff]  }
 0x202   :  { %3538 = vmatmul.mubr.bf16.vlgmr.msra.gmra.mrb[8].mxu0 %v10111_v59 }
 0x203   :  { %4248 = vmatmul.mubr.bf16.vlgmr.msra.gmra.mrb[8].mxu1 %v10111_v59  ;;  %3549 = vmatpush1.bf16.msra.mxu0 %v8059_v55  ;;  %v8131_v55 = vld [vmem:[%s10952_s2 + $0xec0] ss:$8 sps:$4 sm:$0xff]  }
 0x204   :  { %4259 = vmatpush1.bf16.msra.mxu1 %v8062_v56  ;;  %3550 = vmatprep.subr.bf16.mxu0 %v8067_v57  ;;  %v8134_v56 = vld [vmem:[%s10952_s2 + $0x11c0] ss:$8 sps:$4 sm:$0xff]   ;;  %v8139_v57 = vld [vmem:[%s10952_s2 + $0xed4] ss:$8 sps:$4 sm:$0xff]  }
 0x205   :  { %4260 = vmatprep.subr.bf16.mxu1 %v8070_v58  ;;  %3580 = vmatprep.mubr.bf16.mxu0 %v10130_v0  ;;  %v8142_v58 = vld [vmem:[%s10952_s2 + $0x11d4] ss:$8 sps:$4 sm:$0xff]  }
 0x206   :  { %4290 = vmatprep.mubr.bf16.mxu1 %v10130_v0 }
 0x207   :  { %3551 = vmatpush1.bf16.msra.mxu0 %v8065_v60  ;;  %v8137_v60 = vld [vmem:[%s10952_s2 + $0xed0] ss:$8 sps:$4 sm:$0xff]  }
 0x208   :  { %4261 = vmatpush1.bf16.msra.mxu1 %v8068_v61  ;;  %3552 = vmatprep.subr.bf16.mxu0 %v8073_v62  ;;  %v8140_v61 = vld [vmem:[%s10952_s2 + $0x11d0] ss:$8 sps:$4 sm:$0xff]   ;;  %v8145_v62 = vld [vmem:[%s10952_s2 + $0xee4] ss:$8 sps:$4 sm:$0xff]  }
 0x209   :  { %4262 = vmatprep.subr.bf16.mxu1 %v8076_v63  ;;  %v8148_v63 = vld [vmem:[%s10952_s2 + $0x11e4] ss:$8 sps:$4 sm:$0xff]  }
 0x20b   :  { %3553 = vmatpush1.bf16.msra.mxu0 %v8071_v1  ;;  %v8143_v1 = vld [vmem:[%s10952_s2 + $0xee0] ss:$8 sps:$4 sm:$0xff]  }
 0x20c   :  { %4263 = vmatpush1.bf16.msra.mxu1 %v8074_v2  ;;  %3554 = vmatprep.subr.bf16.mxu0 %v8079_v3  ;;  %v8146_v2 = vld [vmem:[%s10952_s2 + $0x11e0] ss:$8 sps:$4 sm:$0xff]   ;;  %v8151_v3 = vld [vmem:[%s10952_s2 + $0xef4] ss:$8 sps:$4 sm:$0xff]  }
 0x20d   :  { %4264 = vmatprep.subr.bf16.mxu1 %v8082_v4  ;;  %v8154_v4 = vld [vmem:[%s10952_s2 + $0x11f4] ss:$8 sps:$4 sm:$0xff]  }
 0x20f   :  { %3555 = vmatpush1.bf16.msra.mxu0 %v8077_v5  ;;  %v8149_v5 = vld [vmem:[%s10952_s2 + $0xef0] ss:$8 sps:$4 sm:$0xff]  }
 0x210   :  { %4265 = vmatpush1.bf16.msra.mxu1 %v8080_v6  ;;  %3556 = vmatprep.subr.bf16.mxu0 %v8085_v7  ;;  %v8152_v6 = vld [vmem:[%s10952_s2 + $0x11f0] ss:$8 sps:$4 sm:$0xff]   ;;  %v8157_v7 = vld [vmem:[%s10952_s2 + $0x1204] ss:$8 sps:$4 sm:$0xff]  }
 0x211   :  { %4266 = vmatprep.subr.bf16.mxu1 %v8088_v8  ;;  %v8160_v8 = vld [vmem:[%s10952_s2 + $0x1504] ss:$8 sps:$4 sm:$0xff]  }
 0x213   :  { %3557 = vmatpush1.bf16.msra.mxu0 %v8083_v9  ;;  %v8155_v9 = vld [vmem:[%s10952_s2 + $0x1200] ss:$8 sps:$4 sm:$0xff]  }
 0x214   :  { %4267 = vmatpush1.bf16.msra.mxu1 %v8086_v10  ;;  %3558 = vmatprep.subr.bf16.mxu0 %v8091_v11  ;;  %v8158_v10 = vld [vmem:[%s10952_s2 + $0x1500] ss:$8 sps:$4 sm:$0xff]   ;;  %v8163_v11 = vld [vmem:[%s10952_s2 + $0x1214] ss:$8 sps:$4 sm:$0xff]  }
 0x215   :  { %4268 = vmatprep.subr.bf16.mxu1 %v8094_v12  ;;  %v8166_v12 = vld [vmem:[%s10952_s2 + $0x1514] ss:$8 sps:$4 sm:$0xff]  }
 0x217   :  { %3559 = vmatpush1.bf16.msra.mxu0 %v8089_v13  ;;  %v10317_v13 = vld [vmem:[%s10953_s0 + $0x10] ss:$24 sps:$4 sm:$0xff]  }
 0x218   :  { %4269 = vmatpush1.bf16.msra.mxu1 %v8092_v14  ;;  %3560 = vmatprep.subr.bf16.mxu0 %v8097_v15  ;;  %v8161_v14 = vld [vmem:[%s10952_s2 + $0x1210] ss:$8 sps:$4 sm:$0xff]  }
 0x219   :  { %4270 = vmatprep.subr.bf16.mxu1 %v8100_v16  ;;  %v8164_v15 = vld [vmem:[%s10952_s2 + $0x1510] ss:$8 sps:$4 sm:$0xff]   ;;  %v8169_v16 = vld [vmem:[%s10952_s2 + $0x1224] ss:$8 sps:$4 sm:$0xff]  }
 0x21b   :  { %3561 = vmatpush1.bf16.msra.mxu0 %v8095_v17  ;;  %v8172_v17 = vld [vmem:[%s10952_s2 + $0x1524] ss:$8 sps:$4 sm:$0xff]  }
 0x21c   :  { %4271 = vmatpush1.bf16.msra.mxu1 %v8098_v18  ;;  %3562 = vmatprep.subr.bf16.mxu0 %v8103_v19  ;;  %v8455_v18 = vld [vmem:[%s10953_s0 + $0x4] ss:$24 sps:$4 sm:$0xff]   ;;  %v8167_v19 = vld [vmem:[%s10952_s2 + $0x1220] ss:$8 sps:$4 sm:$0xff]  }
 0x21d   :  { %4272 = vmatprep.subr.bf16.mxu1 %v8106_v20  ;;  %v8170_v20 = vld [vmem:[%s10952_s2 + $0x1520] ss:$8 sps:$4 sm:$0xff]  }
 0x21f   :  { %3563 = vmatpush1.bf16.msra.mxu0 %v8101_v21  ;;  %v8175_v21 = vld [vmem:[%s10952_s2 + $0x1234] ss:$8 sps:$4 sm:$0xff]  }
 0x220   :  { %4273 = vmatpush1.bf16.msra.mxu1 %v8104_v22  ;;  %3564 = vmatprep.subr.bf16.mxu0 %v8109_v23  ;;  %v8178_v22 = vld [vmem:[%s10952_s2 + $0x1534] ss:$8 sps:$4 sm:$0xff]   ;;  %v8173_v23 = vld [vmem:[%s10952_s2 + $0x1230] ss:$8 sps:$4 sm:$0xff]  }
 0x221   :  { %4274 = vmatprep.subr.bf16.mxu1 %v8112_v24  ;;  %v8176_v24 = vld [vmem:[%s10952_s2 + $0x1530] ss:$8 sps:$4 sm:$0xff]  }
 0x223   :  { %3565 = vmatpush1.bf16.msra.mxu0 %v8107_v25  ;;  %v8181_v25 = vld [vmem:[%s10952_s2 + $0x1244] ss:$8 sps:$4 sm:$0xff]  }
 0x224   :  { %4275 = vmatpush1.bf16.msra.mxu1 %v8110_v26  ;;  %3566 = vmatprep.subr.bf16.mxu0 %v8115_v27  ;;  %v8184_v26 = vld [vmem:[%s10952_s2 + $0x1544] ss:$8 sps:$4 sm:$0xff]   ;;  %v8179_v27 = vld [vmem:[%s10952_s2 + $0x1240] ss:$8 sps:$4 sm:$0xff]  }
 0x225   :  { %4276 = vmatprep.subr.bf16.mxu1 %v8118_v28  ;;  %v8182_v28 = vld [vmem:[%s10952_s2 + $0x1540] ss:$8 sps:$4 sm:$0xff]  }
 0x227   :  { %3567 = vmatpush1.bf16.msra.mxu0 %v8113_v29  ;;  %v8187_v29 = vld [vmem:[%s10952_s2 + $0x1254] ss:$8 sps:$4 sm:$0xff]  }
 0x228   :  { %4277 = vmatpush1.bf16.msra.mxu1 %v8116_v30  ;;  %3568 = vmatprep.subr.bf16.mxu0 %v8121_v32  ;;  %v8190_v30 = vld [vmem:[%s10952_s2 + $0x1554] ss:$8 sps:$4 sm:$0xff]   ;;  %v8185_v32 = vld [vmem:[%s10952_s2 + $0x1250] ss:$8 sps:$4 sm:$0xff]  }
 0x229   :  { %4278 = vmatprep.subr.bf16.mxu1 %v8124_v33  ;;  %v8188_v33 = vld [vmem:[%s10952_s2 + $0x1550] ss:$8 sps:$4 sm:$0xff]  }
 0x22b   :  { %3569 = vmatpush1.bf16.msra.mxu0 %v8119_v34  ;;  %v8193_v34 = vld [vmem:[%s10952_s2 + $0x1264] ss:$8 sps:$4 sm:$0xff]  }
 0x22c   :  { %4279 = vmatpush1.bf16.msra.mxu1 %v8122_v35  ;;  %3570 = vmatprep.subr.bf16.mxu0 %v8127_v37  ;;  %v8196_v35 = vld [vmem:[%s10952_s2 + $0x1564] ss:$8 sps:$4 sm:$0xff]  }
 0x22d   :  { %4280 = vmatprep.subr.bf16.mxu1 %v8130_v38 }
 0x22f   :  { %3571 = vmatpush1.bf16.msra.mxu0 %v8125_v47 }
 0x230   :  { %4281 = vmatpush1.bf16.msra.mxu1 %v8128_v48  ;;  %3572 = vmatprep.subr.bf16.mxu0 %v8133_v52 }
 0x231   :  { %4282 = vmatprep.subr.bf16.mxu1 %v8136_v53 }
 0x233   :  { %3573 = vmatpush1.bf16.msra.mxu0 %v8131_v55 }
 0x234   :  { %4283 = vmatpush1.bf16.msra.mxu1 %v8134_v56  ;;  %3574 = vmatprep.subr.bf16.mxu0 %v8139_v57  ;;  %v8191_v57 = vld [vmem:[%s10952_s2 + $0x1260] ss:$8 sps:$4 sm:$0xff]  }
 0x235   :  { %4284 = vmatprep.subr.bf16.mxu1 %v8142_v58  ;;  %v8202_v58 = vld [vmem:[%s10952_s2 + $0x1574] ss:$8 sps:$4 sm:$0xff]  }
 0x237   :  { %3575 = vmatpush1.bf16.msra.mxu0 %v8137_v60 }
 0x238   :  { %4285 = vmatpush1.bf16.msra.mxu1 %v8140_v61  ;;  %3576 = vmatprep.subr.bf16.mxu0 %v8145_v62  ;;  %v8197_v61 = vld [vmem:[%s10952_s2 + $0x1270] ss:$8 sps:$4 sm:$0xff]  }
 0x239   :  { %4286 = vmatprep.subr.bf16.mxu1 %v8148_v63  ;;  %v8200_v62 = vld [vmem:[%s10952_s2 + $0x1570] ss:$8 sps:$4 sm:$0xff]   ;;  %v8206_v63 = vld [vmem:[%s10952_s2 + $0x1580] ss:$8 sps:$4 sm:$0xff]  }
 0x23b   :  { %3577 = vmatpush1.bf16.msra.mxu0 %v8143_v1  ;;  %v8211_v1 = vld [vmem:[%s10952_s2 + $0x1294] ss:$8 sps:$4 sm:$0xff]  }
 0x23c   :  { %4287 = vmatpush1.bf16.msra.mxu1 %v8146_v2  ;;  %3578 = vmatprep.subr.bf16.mxu0 %v8151_v3  ;;  %v8214_v2 = vld [vmem:[%s10952_s2 + $0x1594] ss:$8 sps:$4 sm:$0xff]   ;;  %v8209_v3 = vld [vmem:[%s10952_s2 + $0x1290] ss:$8 sps:$4 sm:$0xff]  }
 0x23d   :  { %4288 = vmatprep.subr.bf16.mxu1 %v8154_v4  ;;  %v8212_v4 = vld [vmem:[%s10952_s2 + $0x1590] ss:$8 sps:$4 sm:$0xff]  }
 0x23f   :  { %3579 = vmatpush1.bf16.msra.mxu0 %v8149_v5  ;;  %v8217_v5 = vld [vmem:[%s10952_s2 + $0x12a4] ss:$8 sps:$4 sm:$0xff]  }
 0x240   :  { %4289 = vmatpush1.bf16.msra.mxu1 %v8152_v6  ;;  %4882 = vmatprep.subr.bf16.mxu0 %v8157_v7  ;;  %v8220_v6 = vld [vmem:[%s10952_s2 + $0x15a4] ss:$8 sps:$4 sm:$0xff]   ;;  %v8215_v7 = vld [vmem:[%s10952_s2 + $0x12a0] ss:$8 sps:$4 sm:$0xff]  }
 0x241   :  { %5592 = vmatprep.subr.bf16.mxu1 %v8160_v8  ;;  %v8218_v8 = vld [vmem:[%s10952_s2 + $0x15a0] ss:$8 sps:$4 sm:$0xff]  }
 0x242   :  { %3581 = vmatmul.mubr.bf16.vlgmr.msra.gmra.mrb[8].mxu0 %v10317_v13 }
 0x243   :  { %4291 = vmatmul.mubr.bf16.vlgmr.msra.gmra.mrb[8].mxu1 %v10317_v13  ;;  %4883 = vmatpush1.bf16.msra.mxu0 %v8155_v9  ;;  %v8223_v9 = vld [vmem:[%s10952_s2 + $0x12b4] ss:$8 sps:$4 sm:$0xff]  }
 0x244   :  { %5593 = vmatpush1.bf16.msra.mxu1 %v8158_v10  ;;  %4884 = vmatprep.subr.bf16.mxu0 %v8163_v11  ;;  %v8226_v10 = vld [vmem:[%s10952_s2 + $0x15b4] ss:$8 sps:$4 sm:$0xff]   ;;  %v8221_v11 = vld [vmem:[%s10952_s2 + $0x12b0] ss:$8 sps:$4 sm:$0xff]  }
 0x245   :  { %5594 = vmatprep.subr.bf16.mxu1 %v8166_v12  ;;  %4914 = vmatprep.mubr.bf16.mxu0 %v8455_v18  ;;  %v8224_v12 = vld [vmem:[%s10952_s2 + $0x15b0] ss:$8 sps:$4 sm:$0xff]  }
 0x246   :  { %5624 = vmatprep.mubr.bf16.mxu1 %v8455_v18  ;;  %v8235_v18 = vld [vmem:[%s10952_s2 + $0x12d4] ss:$8 sps:$4 sm:$0xff]  }
 0x247   :  { %4885 = vmatpush1.bf16.msra.mxu0 %v8161_v14  ;;  %v8229_v14 = vld [vmem:[%s10952_s2 + $0x12c4] ss:$8 sps:$4 sm:$0xff]  }
 0x248   :  { %5595 = vmatpush1.bf16.msra.mxu1 %v8164_v15  ;;  %4886 = vmatprep.subr.bf16.mxu0 %v8169_v16  ;;  %v8232_v15 = vld [vmem:[%s10952_s2 + $0x15c4] ss:$8 sps:$4 sm:$0xff]   ;;  %v8227_v16 = vld [vmem:[%s10952_s2 + $0x12c0] ss:$8 sps:$4 sm:$0xff]  }
 0x249   :  { %5596 = vmatprep.subr.bf16.mxu1 %v8172_v17  ;;  %v8230_v17 = vld [vmem:[%s10952_s2 + $0x15c0] ss:$8 sps:$4 sm:$0xff]  }
 0x24b   :  { %4887 = vmatpush1.bf16.msra.mxu0 %v8167_v19  ;;  %v8238_v19 = vld [vmem:[%s10952_s2 + $0x15d4] ss:$8 sps:$4 sm:$0xff]  }
 0x24c   :  { %5597 = vmatpush1.bf16.msra.mxu1 %v8170_v20  ;;  %4888 = vmatprep.subr.bf16.mxu0 %v8175_v21  ;;  %v8233_v20 = vld [vmem:[%s10952_s2 + $0x12d0] ss:$8 sps:$4 sm:$0xff]  }
 0x24d   :  { %5598 = vmatprep.subr.bf16.mxu1 %v8178_v22  ;;  %v8236_v21 = vld [vmem:[%s10952_s2 + $0x15d0] ss:$8 sps:$4 sm:$0xff]   ;;  %v8241_v22 = vld [vmem:[%s10952_s2 + $0x12e4] ss:$8 sps:$4 sm:$0xff]  }
 0x24f   :  { %4889 = vmatpush1.bf16.msra.mxu0 %v8173_v23  ;;  %v8244_v23 = vld [vmem:[%s10952_s2 + $0x15e4] ss:$8 sps:$4 sm:$0xff]  }
 0x250   :  { %5599 = vmatpush1.bf16.msra.mxu1 %v8176_v24  ;;  %4890 = vmatprep.subr.bf16.mxu0 %v8181_v25  ;;  %v8239_v24 = vld [vmem:[%s10952_s2 + $0x12e0] ss:$8 sps:$4 sm:$0xff]  }
 0x251   :  { %5600 = vmatprep.subr.bf16.mxu1 %v8184_v26  ;;  %v8242_v25 = vld [vmem:[%s10952_s2 + $0x15e0] ss:$8 sps:$4 sm:$0xff]   ;;  %v8247_v26 = vld [vmem:[%s10952_s2 + $0x12f4] ss:$8 sps:$4 sm:$0xff]  }
 0x253   :  { %4891 = vmatpush1.bf16.msra.mxu0 %v8179_v27  ;;  %v8250_v27 = vld [vmem:[%s10952_s2 + $0x15f4] ss:$8 sps:$4 sm:$0xff]  }
 0x254   :  { %5601 = vmatpush1.bf16.msra.mxu1 %v8182_v28  ;;  %4892 = vmatprep.subr.bf16.mxu0 %v8187_v29  ;;  %v8245_v28 = vld [vmem:[%s10952_s2 + $0x12f0] ss:$8 sps:$4 sm:$0xff]  }
 0x255   :  { %5602 = vmatprep.subr.bf16.mxu1 %v8190_v30  ;;  %v2162_v37 = vpop.f32.mrb[4].mxu0  ;;  %v8248_v29 = vld [vmem:[%s10952_s2 + $0x15f0] ss:$8 sps:$4 sm:$0xff]   ;;  %v8253_v30 = vld [vmem:[%s10952_s2 + $0x1304] ss:$8 sps:$4 sm:$0xff]  }
 0x256   :  { %v10384_v38 = vpop.f32.mrb[4].mxu1  ;;  %v10389_v47 = vmax.f32 %v1461_v41, %v2162_v37  ;;  %v2164_v48 = vpop.f32.mrb[5].mxu0  ;;  %v8262_v37 = vld [vmem:[%s10952_s2 + $0x1614] ss:$8 sps:$4 sm:$0xff]  }
 0x257   :  { %v10391_v52 = vpop.f32.mrb[5].mxu1  ;;  %v10396_v53 = vmax.f32 %v1462_v44, %v2164_v48  ;;  %v2166_v55 = vpop.f32.mrb[6].mxu0  ;;  %4893 = vmatpush1.bf16.msra.mxu0 %v8185_v32  ;;  %v8199_v44 = vld [vmem:[%s10952_s2 + $0x1274] ss:$8 sps:$4 sm:$0xff]   ;;  %v8256_v32 = vld [vmem:[%s10952_s2 + $0x1604] ss:$8 sps:$4 sm:$0xff]  }
 0x258   :  { %v10398_v56 = vpop.f32.mrb[6].mxu1  ;;  %5603 = vmatpush1.bf16.msra.mxu1 %v8188_v33  ;;  %v2881_v40 = vmax.f32 %v10389_v47, %v10384_v38  ;;  %v10411_v41 = vmax.f32 %v1463_v49, %v2166_v55  ;;  %v2168_v42 = vpop.f32.mrb[7].mxu0  ;;  %4894 = vmatprep.subr.bf16.mxu0 %v8193_v34  ;;  %v8251_v33 = vld [vmem:[%s10952_s2 + $0x1300] ss:$8 sps:$4 sm:$0xff]   ;;  %v8257_v48 = vld [vmem:[%s10952_s2 + $0x1310] ss:$8 sps:$4 sm:$0xff]  }
 0x259   :  { %v10413_v43 = vpop.f32.mrb[7].mxu1  ;;  %5604 = vmatprep.subr.bf16.mxu1 %v8196_v35  ;;  %v2882_v60 = vmax.f32 %v10396_v53, %v10391_v52  ;;  %v10426_v45 = vmax.f32 %v1464_v54, %v2168_v42  ;;  %v8203_v54 = vld [vmem:[%s10952_s2 + $0x1280] ss:$8 sps:$4 sm:$0xff]   ;;  %v8259_v35 = vld [vmem:[%s10952_s2 + $0x1314] ss:$8 sps:$4 sm:$0xff]  }
 0x25a   :  { %v2883_v46 = vmax.f32 %v10411_v41, %v10398_v56  ;;  %v8254_v34 = vld [vmem:[%s10952_s2 + $0x1600] ss:$8 sps:$4 sm:$0xff]   ;;  %v8260_v55 = vld [vmem:[%s10952_s2 + $0x1610] ss:$8 sps:$4 sm:$0xff]  }
 0x25b   :  { %v2884_v49 = vmax.f32 %v10426_v45, %v10413_v43  ;;  %4895 = vmatpush1.bf16.msra.mxu0 %v8191_v57  ;;  %v8265_v57 = vld [vmem:[%s10952_s2 + $0x1324] ss:$8 sps:$4 sm:$0xff]   ;;  %v8266_v42 = vld [vmem:[%s10952_s2 + $0x1620] ss:$8 sps:$4 sm:$0xff]  }
 0x25c   :  { %5605 = vmatpush1.bf16.msra.mxu1 %v8194_v39  ;;  %4896 = vmatprep.subr.bf16.mxu0 %v8199_v44  ;;  %v8263_v39 = vld [vmem:[%s10952_s2 + $0x1320] ss:$8 sps:$4 sm:$0xff]   ;;  %v8271_v44 = vld [vmem:[%s10952_s2 + $0x1334] ss:$8 sps:$4 sm:$0xff]  }
 0x25d   :  { %5606 = vmatprep.subr.bf16.mxu1 %v8202_v58  ;;  %v8269_v58 = vld [vmem:[%s10952_s2 + $0x1330] ss:$8 sps:$4 sm:$0xff]  }
 0x25f   :  { %4897 = vmatpush1.bf16.msra.mxu0 %v8197_v61  ;;  %v8272_v61 = vld [vmem:[%s10952_s2 + $0x1630] ss:$8 sps:$4 sm:$0xff]  }
 0x260   :  { %5607 = vmatpush1.bf16.msra.mxu1 %v8200_v62  ;;  %4898 = vmatprep.subr.bf16.mxu0 %v8205_v50  ;;  %v8277_v62 = vld [vmem:[%s10952_s2 + $0x1344] ss:$8 sps:$4 sm:$0xff]  }
 0x261   :  { %5608 = vmatprep.subr.bf16.mxu1 %v8208_v51  ;;  %v8280_v50 = vld [vmem:[%s10952_s2 + $0x1644] ss:$8 sps:$4 sm:$0xff]   ;;  %v8275_v51 = vld [vmem:[%s10952_s2 + $0x1340] ss:$8 sps:$4 sm:$0xff]  }
 0x263   :  { %4899 = vmatpush1.bf16.msra.mxu0 %v8203_v54  ;;  %v8278_v54 = vld [vmem:[%s10952_s2 + $0x1640] ss:$8 sps:$4 sm:$0xff]  }
 0x264   :  { %5609 = vmatpush1.bf16.msra.mxu1 %v8206_v63  ;;  %4900 = vmatprep.subr.bf16.mxu0 %v8211_v1  ;;  %v8283_v63 = vld [vmem:[%s10952_s2 + $0x1354] ss:$8 sps:$4 sm:$0xff]  }
 0x265   :  { %5610 = vmatprep.subr.bf16.mxu1 %v8214_v2  ;;  %v8286_v1 = vld [vmem:[%s10952_s2 + $0x1654] ss:$8 sps:$4 sm:$0xff]   ;;  %v8281_v2 = vld [vmem:[%s10952_s2 + $0x1350] ss:$8 sps:$4 sm:$0xff]  }
 0x267   :  { %4901 = vmatpush1.bf16.msra.mxu0 %v8209_v3  ;;  %v8284_v3 = vld [vmem:[%s10952_s2 + $0x1650] ss:$8 sps:$4 sm:$0xff]  }
 0x268   :  { %5611 = vmatpush1.bf16.msra.mxu1 %v8212_v4  ;;  %4902 = vmatprep.subr.bf16.mxu0 %v8217_v5  ;;  %v8289_v4 = vld [vmem:[%s10952_s2 + $0x1364] ss:$8 sps:$4 sm:$0xff]  }
 0x269   :  { %5612 = vmatprep.subr.bf16.mxu1 %v8220_v6  ;;  %v8292_v5 = vld [vmem:[%s10952_s2 + $0x1664] ss:$8 sps:$4 sm:$0xff]   ;;  %v8287_v6 = vld [vmem:[%s10952_s2 + $0x1360] ss:$8 sps:$4 sm:$0xff]  }
 0x26b   :  { %4903 = vmatpush1.bf16.msra.mxu0 %v8215_v7  ;;  %v8290_v7 = vld [vmem:[%s10952_s2 + $0x1660] ss:$8 sps:$4 sm:$0xff]  }
 0x26c   :  { %5613 = vmatpush1.bf16.msra.mxu1 %v8218_v8  ;;  %4904 = vmatprep.subr.bf16.mxu0 %v8223_v9  ;;  %v8295_v8 = vld [vmem:[%s10952_s2 + $0x1374] ss:$8 sps:$4 sm:$0xff]  }
 0x26d   :  { %5614 = vmatprep.subr.bf16.mxu1 %v8226_v10  ;;  %v8298_v9 = vld [vmem:[%s10952_s2 + $0x1674] ss:$8 sps:$4 sm:$0xff]   ;;  %v8293_v10 = vld [vmem:[%s10952_s2 + $0x1370] ss:$8 sps:$4 sm:$0xff]  }
 0x26f   :  { %4905 = vmatpush1.bf16.msra.mxu0 %v8221_v11  ;;  %v8296_v11 = vld [vmem:[%s10952_s2 + $0x1670] ss:$8 sps:$4 sm:$0xff]  }
 0x270   :  { %5615 = vmatpush1.bf16.msra.mxu1 %v8224_v12  ;;  %4906 = vmatprep.subr.bf16.mxu0 %v8229_v14  ;;  %v8301_v12 = vld [vmem:[%s10952_s2 + $0x1384] ss:$8 sps:$4 sm:$0xff]  }
 0x271   :  { %5616 = vmatprep.subr.bf16.mxu1 %v8232_v15  ;;  %v8304_v14 = vld [vmem:[%s10952_s2 + $0x1684] ss:$8 sps:$4 sm:$0xff]  }
 0x272   :  { %v5725_v15 = vld [vmem:[%s10954_s1] sm:$0xff] }
 0x273   :  { %4907 = vmatpush1.bf16.msra.mxu0 %v8227_v16  ;;  %v8456_v16 = vmov 0  }
 0x274   :  { %5617 = vmatpush1.bf16.msra.mxu1 %v8230_v17  ;;  %4908 = vmatprep.subr.bf16.mxu0 %v8235_v18  ;;  %v8299_v17 = vld [vmem:[%s10952_s2 + $0x1380] ss:$8 sps:$4 sm:$0xff]  }
 0x275   :  { %5618 = vmatprep.subr.bf16.mxu1 %v8238_v19  ;;  %7281 = vset.pattern.permute.xlu0 %v8456_v16  ;;  %v8302_v18 = vld [vmem:[%s10952_s2 + $0x1680] ss:$8 sps:$4 sm:$0xff]  }
 0x276   :  { %5729 = vperm.xlu0 %7281, %v5725_v15   ;;  %v5726_v19 = vld [vmem:[%s10954_s1 + $0x8] sm:$0xff] }
 0x277   :  { %4909 = vmatpush1.bf16.msra.mxu0 %v8233_v20  ;;  %v8307_v20 = vld [vmem:[%s10952_s2 + $0x1394] ss:$8 sps:$4 sm:$0xff]   ;;  %v8371_v15 = vld [vmem:[%s10952_s2 + $0x1440] ss:$8 sps:$4 sm:$0xff]  }
 0x278   :  { %5619 = vmatpush1.bf16.msra.mxu1 %v8236_v21  ;;  %4910 = vmatprep.subr.bf16.mxu0 %v8241_v22  ;;  %v8310_v21 = vld [vmem:[%s10952_s2 + $0x1694] ss:$8 sps:$4 sm:$0xff]   ;;  %v8305_v22 = vld [vmem:[%s10952_s2 + $0x1390] ss:$8 sps:$4 sm:$0xff]   ;;  %v8374_v16 = vld [vmem:[%s10952_s2 + $0x1740] ss:$8 sps:$4 sm:$0xff]  }
 0x279   :  { %5620 = vmatprep.subr.bf16.mxu1 %v8244_v23  ;;  %v8308_v23 = vld [vmem:[%s10952_s2 + $0x1690] ss:$8 sps:$4 sm:$0xff]  }
 0x27a   :  { %5734 = vperm.xlu0 %7281, %v5726_v19   ;;  %v8377_v19 = vld [vmem:[%s10952_s2 + $0x1450] ss:$8 sps:$4 sm:$0xff]  }
 0x27b   :  { %4911 = vmatpush1.bf16.msra.mxu0 %v8239_v24  ;;  %v8313_v24 = vld [vmem:[%s10952_s2 + $0x13a4] ss:$8 sps:$4 sm:$0xff]  }
 0x27c   :  { %5621 = vmatpush1.bf16.msra.mxu1 %v8242_v25  ;;  %4912 = vmatprep.subr.bf16.mxu0 %v8247_v26  ;;  %v8316_v25 = vld [vmem:[%s10952_s2 + $0x16a4] ss:$8 sps:$4 sm:$0xff]   ;;  %v8311_v26 = vld [vmem:[%s10952_s2 + $0x13a0] ss:$8 sps:$4 sm:$0xff]  }
 0x27d   :  { %5622 = vmatprep.subr.bf16.mxu1 %v8250_v27  ;;  %v8314_v27 = vld [vmem:[%s10952_s2 + $0x16a0] ss:$8 sps:$4 sm:$0xff]  }
 0x27f   :  { %4913 = vmatpush1.bf16.msra.mxu0 %v8245_v28  ;;  %v8319_v28 = vld [vmem:[%s10952_s2 + $0x13b4] ss:$8 sps:$4 sm:$0xff]  }
 0x280   :  { %5623 = vmatpush1.bf16.msra.mxu1 %v8248_v29  ;;  %4925 = vmatprep.subr.bf16.mxu0 %v8253_v30  ;;  %v8322_v29 = vld [vmem:[%s10952_s2 + $0x16b4] ss:$8 sps:$4 sm:$0xff]   ;;  %v8317_v30 = vld [vmem:[%s10952_s2 + $0x13b0] ss:$8 sps:$4 sm:$0xff]  }
 0x281   :  { %5635 = vmatprep.subr.bf16.mxu1 %v8256_v32  ;;  %v8320_v32 = vld [vmem:[%s10952_s2 + $0x16b0] ss:$8 sps:$4 sm:$0xff]  }
 0x282   :  { %4915 = vmatmul.mubr.bf16.vlgmr.msra.gmra.mrb[12].mxu0 %v9905_v31 }
 0x283   :  { %5625 = vmatmul.mubr.bf16.vlgmr.msra.gmra.mrb[12].mxu1 %v9905_v31  ;;  %4926 = vmatpush1.bf16.msra.mxu0 %v8251_v33  ;;  %v8268_v31 = vld [vmem:[%s10952_s2 + $0x1624] ss:$8 sps:$4 sm:$0xff]  }
 0x284   :  { %5636 = vmatpush1.bf16.msra.mxu1 %v8254_v34  ;;  %4927 = vmatprep.subr.bf16.mxu0 %v8259_v35  ;;  %v8325_v33 = vld [vmem:[%s10952_s2 + $0x13c4] ss:$8 sps:$4 sm:$0xff]   ;;  %v8323_v35 = vld [vmem:[%s10952_s2 + $0x13c0] ss:$8 sps:$4 sm:$0xff]  }
 0x285   :  { %5637 = vmatprep.subr.bf16.mxu1 %v8262_v37  ;;  %4957 = vmatprep.mubr.bf16.mxu0 %v9924_v36  ;;  %v8328_v34 = vld [vmem:[%s10952_s2 + $0x16c4] ss:$8 sps:$4 sm:$0xff]   ;;  %v8326_v37 = vld [vmem:[%s10952_s2 + $0x16c0] ss:$8 sps:$4 sm:$0xff]  }
 0x286   :  { %5667 = vmatprep.mubr.bf16.mxu1 %v9924_v36  ;;  %v8274_v36 = vld [vmem:[%s10952_s2 + $0x1634] ss:$8 sps:$4 sm:$0xff]  }
 0x287   :  { %4928 = vmatpush1.bf16.msra.mxu0 %v8257_v48  ;;  %v8331_v48 = vld [vmem:[%s10952_s2 + $0x13d4] ss:$8 sps:$4 sm:$0xff]  }
 0x288   :  { %5638 = vmatpush1.bf16.msra.mxu1 %v8260_v55  ;;  %4929 = vmatprep.subr.bf16.mxu0 %v8265_v57  ;;  %v8334_v55 = vld [vmem:[%s10952_s2 + $0x16d4] ss:$8 sps:$4 sm:$0xff]   ;;  %v8329_v57 = vld [vmem:[%s10952_s2 + $0x13d0] ss:$8 sps:$4 sm:$0xff]  }
 0x289   :  { %5639 = vmatprep.subr.bf16.mxu1 %v8268_v31  ;;  %v8332_v31 = vld [vmem:[%s10952_s2 + $0x16d0] ss:$8 sps:$4 sm:$0xff]  }
 0x28b   :  { %4930 = vmatpush1.bf16.msra.mxu0 %v8263_v39  ;;  %v8337_v39 = vld [vmem:[%s10952_s2 + $0x13e4] ss:$8 sps:$4 sm:$0xff]  }
 0x28c   :  { %5640 = vmatpush1.bf16.msra.mxu1 %v8266_v42  ;;  %4931 = vmatprep.subr.bf16.mxu0 %v8271_v44  ;;  %v8340_v42 = vld [vmem:[%s10952_s2 + $0x16e4] ss:$8 sps:$4 sm:$0xff]   ;;  %v8335_v44 = vld [vmem:[%s10952_s2 + $0x13e0] ss:$8 sps:$4 sm:$0xff]  }
 0x28d   :  { %5641 = vmatprep.subr.bf16.mxu1 %v8274_v36  ;;  %v8338_v36 = vld [vmem:[%s10952_s2 + $0x16e0] ss:$8 sps:$4 sm:$0xff]  }
 0x28f   :  { %4932 = vmatpush1.bf16.msra.mxu0 %v8269_v58  ;;  %v8343_v58 = vld [vmem:[%s10952_s2 + $0x13f4] ss:$8 sps:$4 sm:$0xff]  }
 0x290   :  { %5642 = vmatpush1.bf16.msra.mxu1 %v8272_v61  ;;  %4933 = vmatprep.subr.bf16.mxu0 %v8277_v62  ;;  %v8346_v61 = vld [vmem:[%s10952_s2 + $0x16f4] ss:$8 sps:$4 sm:$0xff]   ;;  %v8341_v62 = vld [vmem:[%s10952_s2 + $0x13f0] ss:$8 sps:$4 sm:$0xff]  }
 0x291   :  { %5643 = vmatprep.subr.bf16.mxu1 %v8280_v50  ;;  %v8344_v50 = vld [vmem:[%s10952_s2 + $0x16f0] ss:$8 sps:$4 sm:$0xff]  }
 0x293   :  { %4934 = vmatpush1.bf16.msra.mxu0 %v8275_v51  ;;  %v8349_v51 = vld [vmem:[%s10952_s2 + $0x1404] ss:$8 sps:$4 sm:$0xff]  }
 0x294   :  { %5644 = vmatpush1.bf16.msra.mxu1 %v8278_v54  ;;  %4935 = vmatprep.subr.bf16.mxu0 %v8283_v63  ;;  %v8352_v54 = vld [vmem:[%s10952_s2 + $0x1704] ss:$8 sps:$4 sm:$0xff]   ;;  %v8347_v63 = vld [vmem:[%s10952_s2 + $0x1400] ss:$8 sps:$4 sm:$0xff]  }
 0x295   :  { %5645 = vmatprep.subr.bf16.mxu1 %v8286_v1  ;;  %v8350_v1 = vld [vmem:[%s10952_s2 + $0x1700] ss:$8 sps:$4 sm:$0xff]  }
 0x297   :  { %4936 = vmatpush1.bf16.msra.mxu0 %v8281_v2  ;;  %v8355_v2 = vld [vmem:[%s10952_s2 + $0x1414] ss:$8 sps:$4 sm:$0xff]  }
 0x298   :  { %5646 = vmatpush1.bf16.msra.mxu1 %v8284_v3  ;;  %4937 = vmatprep.subr.bf16.mxu0 %v8289_v4  ;;  %v8358_v3 = vld [vmem:[%s10952_s2 + $0x1714] ss:$8 sps:$4 sm:$0xff]   ;;  %v8353_v4 = vld [vmem:[%s10952_s2 + $0x1410] ss:$8 sps:$4 sm:$0xff]  }
 0x299   :  { %5647 = vmatprep.subr.bf16.mxu1 %v8292_v5  ;;  %v8356_v5 = vld [vmem:[%s10952_s2 + $0x1710] ss:$8 sps:$4 sm:$0xff]  }
 0x29b   :  { %4938 = vmatpush1.bf16.msra.mxu0 %v8287_v6  ;;  %v8361_v6 = vld [vmem:[%s10952_s2 + $0x1424] ss:$8 sps:$4 sm:$0xff]  }
 0x29c   :  { %5648 = vmatpush1.bf16.msra.mxu1 %v8290_v7  ;;  %4939 = vmatprep.subr.bf16.mxu0 %v8295_v8  ;;  %v8359_v7 = vld [vmem:[%s10952_s2 + $0x1420] ss:$8 sps:$4 sm:$0xff]  }
 0x29d   :  { %5649 = vmatprep.subr.bf16.mxu1 %v8298_v9  ;;  %v8362_v8 = vld [vmem:[%s10952_s2 + $0x1720] ss:$8 sps:$4 sm:$0xff]   ;;  %v8367_v9 = vld [vmem:[%s10952_s2 + $0x1434] ss:$8 sps:$4 sm:$0xff]  }
 0x29f   :  { %4940 = vmatpush1.bf16.msra.mxu0 %v8293_v10  ;;  %v8365_v10 = vld [vmem:[%s10952_s2 + $0x1430] ss:$8 sps:$4 sm:$0xff]  }
 0x2a0   :  { %5650 = vmatpush1.bf16.msra.mxu1 %v8296_v11  ;;  %4941 = vmatprep.subr.bf16.mxu0 %v8301_v12  ;;  %v8368_v11 = vld [vmem:[%s10952_s2 + $0x1730] ss:$8 sps:$4 sm:$0xff]   ;;  %v8373_v12 = vld [vmem:[%s10952_s2 + $0x1444] ss:$8 sps:$4 sm:$0xff]  }
 0x2a1   :  { %5651 = vmatprep.subr.bf16.mxu1 %v8304_v14  ;;  %v8376_v14 = vld [vmem:[%s10952_s2 + $0x1744] ss:$8 sps:$4 sm:$0xff]  }
 0x2a3   :  { %4942 = vmatpush1.bf16.msra.mxu0 %v8299_v17  ;;  %v8379_v17 = vld [vmem:[%s10952_s2 + $0x1454] ss:$8 sps:$4 sm:$0xff]  }
 0x2a4   :  { %5652 = vmatpush1.bf16.msra.mxu1 %v8302_v18  ;;  %4943 = vmatprep.subr.bf16.mxu0 %v8307_v20  ;;  %v8382_v18 = vld [vmem:[%s10952_s2 + $0x1754] ss:$8 sps:$4 sm:$0xff]   ;;  %v8380_v20 = vld [vmem:[%s10952_s2 + $0x1750] ss:$8 sps:$4 sm:$0xff]  }
 0x2a5   :  { %5653 = vmatprep.subr.bf16.mxu1 %v8310_v21  ;;  %v8385_v21 = vld [vmem:[%s10952_s2 + $0x1464] ss:$8 sps:$4 sm:$0xff]  }
 0x2a7   :  { %4944 = vmatpush1.bf16.msra.mxu0 %v8305_v22  ;;  %v8388_v22 = vld [vmem:[%s10952_s2 + $0x1764] ss:$8 sps:$4 sm:$0xff]  }
 0x2a8   :  { %5654 = vmatpush1.bf16.msra.mxu1 %v8308_v23  ;;  %4945 = vmatprep.subr.bf16.mxu0 %v8313_v24  ;;  %v8383_v23 = vld [vmem:[%s10952_s2 + $0x1460] ss:$8 sps:$4 sm:$0xff]  }
 0x2a9   :  { %5655 = vmatprep.subr.bf16.mxu1 %v8316_v25  ;;  %v8386_v24 = vld [vmem:[%s10952_s2 + $0x1760] ss:$8 sps:$4 sm:$0xff]   ;;  %v8391_v25 = vld [vmem:[%s10952_s2 + $0x1474] ss:$8 sps:$4 sm:$0xff]  }
 0x2ab   :  { %4946 = vmatpush1.bf16.msra.mxu0 %v8311_v26  ;;  %v8394_v26 = vld [vmem:[%s10952_s2 + $0x1774] ss:$8 sps:$4 sm:$0xff]  }
 0x2ac   :  { %5656 = vmatpush1.bf16.msra.mxu1 %v8314_v27  ;;  %4947 = vmatprep.subr.bf16.mxu0 %v8319_v28  ;;  %v8389_v27 = vld [vmem:[%s10952_s2 + $0x1470] ss:$8 sps:$4 sm:$0xff]  }
 0x2ad   :  { %5657 = vmatprep.subr.bf16.mxu1 %v8322_v29  ;;  %v8392_v28 = vld [vmem:[%s10952_s2 + $0x1770] ss:$8 sps:$4 sm:$0xff]   ;;  %v8397_v29 = vld [vmem:[%s10952_s2 + $0x1484] ss:$8 sps:$4 sm:$0xff]  }
 0x2af   :  { %4948 = vmatpush1.bf16.msra.mxu0 %v8317_v30  ;;  %v8400_v30 = vld [vmem:[%s10952_s2 + $0x1784] ss:$8 sps:$4 sm:$0xff]  }
 0x2b0   :  { %5658 = vmatpush1.bf16.msra.mxu1 %v8320_v32  ;;  %4949 = vmatprep.subr.bf16.mxu0 %v8325_v33  ;;  %v8395_v32 = vld [vmem:[%s10952_s2 + $0x1480] ss:$8 sps:$4 sm:$0xff]  }
 0x2b1   :  { %5659 = vmatprep.subr.bf16.mxu1 %v8328_v34  ;;  %v8398_v33 = vld [vmem:[%s10952_s2 + $0x1780] ss:$8 sps:$4 sm:$0xff]   ;;  %v8403_v34 = vld [vmem:[%s10952_s2 + $0x1494] ss:$8 sps:$4 sm:$0xff]  }
 0x2b3   :  { %4950 = vmatpush1.bf16.msra.mxu0 %v8323_v35  ;;  %v8406_v35 = vld [vmem:[%s10952_s2 + $0x1794] ss:$8 sps:$4 sm:$0xff]  }
 0x2b4   :  { %5660 = vmatpush1.bf16.msra.mxu1 %v8326_v37  ;;  %4951 = vmatprep.subr.bf16.mxu0 %v8331_v48  ;;  %v8401_v37 = vld [vmem:[%s10952_s2 + $0x1490] ss:$8 sps:$4 sm:$0xff]  }
 0x2b5   :  { %5661 = vmatprep.subr.bf16.mxu1 %v8334_v55  ;;  %v8404_v48 = vld [vmem:[%s10952_s2 + $0x1790] ss:$8 sps:$4 sm:$0xff]   ;;  %v8409_v55 = vld [vmem:[%s10952_s2 + $0x14a4] ss:$8 sps:$4 sm:$0xff]  }
 0x2b7   :  { %4952 = vmatpush1.bf16.msra.mxu0 %v8329_v57  ;;  %v8412_v57 = vld [vmem:[%s10952_s2 + $0x17a4] ss:$8 sps:$4 sm:$0xff]  }
 0x2b8   :  { %5662 = vmatpush1.bf16.msra.mxu1 %v8332_v31  ;;  %4953 = vmatprep.subr.bf16.mxu0 %v8337_v39  ;;  %v8407_v31 = vld [vmem:[%s10952_s2 + $0x14a0] ss:$8 sps:$4 sm:$0xff]  }
 0x2b9   :  { %5663 = vmatprep.subr.bf16.mxu1 %v8340_v42  ;;  %v8410_v39 = vld [vmem:[%s10952_s2 + $0x17a0] ss:$8 sps:$4 sm:$0xff]   ;;  %v8415_v42 = vld [vmem:[%s10952_s2 + $0x14b4] ss:$8 sps:$4 sm:$0xff]  }
 0x2bb   :  { %4954 = vmatpush1.bf16.msra.mxu0 %v8335_v44  ;;  %v8418_v44 = vld [vmem:[%s10952_s2 + $0x17b4] ss:$8 sps:$4 sm:$0xff]  }
 0x2bc   :  { %5664 = vmatpush1.bf16.msra.mxu1 %v8338_v36  ;;  %4955 = vmatprep.subr.bf16.mxu0 %v8343_v58  ;;  %v8413_v36 = vld [vmem:[%s10952_s2 + $0x14b0] ss:$8 sps:$4 sm:$0xff]  }
 0x2bd   :  { %5665 = vmatprep.subr.bf16.mxu1 %v8346_v61  ;;  %v8416_v58 = vld [vmem:[%s10952_s2 + $0x17b0] ss:$8 sps:$4 sm:$0xff]   ;;  %v8421_v61 = vld [vmem:[%s10952_s2 + $0x14c4] ss:$8 sps:$4 sm:$0xff]  }
 0x2bf   :  { %4956 = vmatpush1.bf16.msra.mxu0 %v8341_v62  ;;  %v8424_v62 = vld [vmem:[%s10952_s2 + $0x17c4] ss:$8 sps:$4 sm:$0xff]  }
 0x2c0   :  { %5666 = vmatpush1.bf16.msra.mxu1 %v8344_v50  ;;  %4968 = vmatprep.subr.bf16.mxu0 %v8349_v51  ;;  %v8419_v50 = vld [vmem:[%s10952_s2 + $0x14c0] ss:$8 sps:$4 sm:$0xff]  }
 0x2c1   :  { %5678 = vmatprep.subr.bf16.mxu1 %v8352_v54  ;;  %v8422_v51 = vld [vmem:[%s10952_s2 + $0x17c0] ss:$8 sps:$4 sm:$0xff]   ;;  %v8427_v54 = vld [vmem:[%s10952_s2 + $0x14d4] ss:$8 sps:$4 sm:$0xff]  }
 0x2c2   :  { %4958 = vmatmul.mubr.bf16.vlgmr.msra.gmra.mrb[12].mxu0 %v10111_v59 }
 0x2c3   :  { %5668 = vmatmul.mubr.bf16.vlgmr.msra.gmra.mrb[12].mxu1 %v10111_v59  ;;  %4969 = vmatpush1.bf16.msra.mxu0 %v8347_v63  ;;  %v8364_v59 = vld [vmem:[%s10952_s2 + $0x1724] ss:$8 sps:$4 sm:$0xff]   ;;  %v8430_v63 = vld [vmem:[%s10952_s2 + $0x17d4] ss:$8 sps:$4 sm:$0xff]  }
 0x2c4   :  { %5679 = vmatpush1.bf16.msra.mxu1 %v8350_v1  ;;  %4970 = vmatprep.subr.bf16.mxu0 %v8355_v2  ;;  %v8425_v1 = vld [vmem:[%s10952_s2 + $0x14d0] ss:$8 sps:$4 sm:$0xff]  }
 0x2c5   :  { %5680 = vmatprep.subr.bf16.mxu1 %v8358_v3  ;;  %5000 = vmatprep.mubr.bf16.mxu0 %v10130_v0  ;;  %v8428_v2 = vld [vmem:[%s10952_s2 + $0x17d0] ss:$8 sps:$4 sm:$0xff]   ;;  %v8433_v3 = vld [vmem:[%s10952_s2 + $0x14e4] ss:$8 sps:$4 sm:$0xff]  }
 0x2c6   :  { %5710 = vmatprep.mubr.bf16.mxu1 %v10130_v0  ;;  %v8370_v0 = vld [vmem:[%s10952_s2 + $0x1734] ss:$8 sps:$4 sm:$0xff]  }
 0x2c7   :  { %4971 = vmatpush1.bf16.msra.mxu0 %v8353_v4  ;;  %v8436_v4 = vld [vmem:[%s10952_s2 + $0x17e4] ss:$8 sps:$4 sm:$0xff]  }
 0x2c8   :  { %5681 = vmatpush1.bf16.msra.mxu1 %v8356_v5  ;;  %4972 = vmatprep.subr.bf16.mxu0 %v8361_v6  ;;  %v8431_v5 = vld [vmem:[%s10952_s2 + $0x14e0] ss:$8 sps:$4 sm:$0xff]  }
 0x2c9   :  { %5682 = vmatprep.subr.bf16.mxu1 %v8364_v59  ;;  %v8434_v6 = vld [vmem:[%s10952_s2 + $0x17e0] ss:$8 sps:$4 sm:$0xff]   ;;  %v8439_v59 = vld [vmem:[%s10952_s2 + $0x14f4] ss:$8 sps:$4 sm:$0xff]  }
 0x2cb   :  { %4973 = vmatpush1.bf16.msra.mxu0 %v8359_v7  ;;  %v8442_v7 = vld [vmem:[%s10952_s2 + $0x17f4] ss:$8 sps:$4 sm:$0xff]  }
 0x2cc   :  { %5683 = vmatpush1.bf16.msra.mxu1 %v8362_v8  ;;  %4974 = vmatprep.subr.bf16.mxu0 %v8367_v9  ;;  %v8437_v8 = vld [vmem:[%s10952_s2 + $0x14f0] ss:$8 sps:$4 sm:$0xff]  }
 0x2cd   :  { %5684 = vmatprep.subr.bf16.mxu1 %v8370_v0  ;;  %v8440_v9 = vld [vmem:[%s10952_s2 + $0x17f0] ss:$8 sps:$4 sm:$0xff]  }
 0x2cf   :  { %4975 = vmatpush1.bf16.msra.mxu0 %v8365_v10 }
 0x2d0   :  { %5685 = vmatpush1.bf16.msra.mxu1 %v8368_v11  ;;  %4976 = vmatprep.subr.bf16.mxu0 %v8373_v12 }
 0x2d1   :  { %5686 = vmatprep.subr.bf16.mxu1 %v8376_v14 }
 0x2d3   :  { %4977 = vmatpush1.bf16.msra.mxu0 %v8371_v15 }
 0x2d4   :  { %5687 = vmatpush1.bf16.msra.mxu1 %v8374_v16  ;;  %4978 = vmatprep.subr.bf16.mxu0 %v8379_v17 }
 0x2d5   :  { %5688 = vmatprep.subr.bf16.mxu1 %v8382_v18 }
 0x2d7   :  { %4979 = vmatpush1.bf16.msra.mxu0 %v8377_v19 }
 0x2d8   :  { %5689 = vmatpush1.bf16.msra.mxu1 %v8380_v20  ;;  %4980 = vmatprep.subr.bf16.mxu0 %v8385_v21 }
 0x2d9   :  { %5690 = vmatprep.subr.bf16.mxu1 %v8388_v22 }
 0x2db   :  { %4981 = vmatpush1.bf16.msra.mxu0 %v8383_v23 }
 0x2dc   :  { %5691 = vmatpush1.bf16.msra.mxu1 %v8386_v24  ;;  %4982 = vmatprep.subr.bf16.mxu0 %v8391_v25 }
 0x2dd   :  { %5692 = vmatprep.subr.bf16.mxu1 %v8394_v26 }
 0x2df   :  { %4983 = vmatpush1.bf16.msra.mxu0 %v8389_v27 }
 0x2e0   :  { %5693 = vmatpush1.bf16.msra.mxu1 %v8392_v28  ;;  %4984 = vmatprep.subr.bf16.mxu0 %v8397_v29 }
 0x2e1   :  { %5694 = vmatprep.subr.bf16.mxu1 %v8400_v30 }
 0x2e3   :  { %4985 = vmatpush1.bf16.msra.mxu0 %v8395_v32 }
 0x2e4   :  { %5695 = vmatpush1.bf16.msra.mxu1 %v8398_v33  ;;  %4986 = vmatprep.subr.bf16.mxu0 %v8403_v34 }
 0x2e5   :  { %5696 = vmatprep.subr.bf16.mxu1 %v8406_v35 }
 0x2e7   :  { %4987 = vmatpush1.bf16.msra.mxu0 %v8401_v37 }
 0x2e8   :  { %5697 = vmatpush1.bf16.msra.mxu1 %v8404_v48  ;;  %4988 = vmatprep.subr.bf16.mxu0 %v8409_v55 }
 0x2e9   :  { %5698 = vmatprep.subr.bf16.mxu1 %v8412_v57 }
 0x2eb   :  { %4989 = vmatpush1.bf16.msra.mxu0 %v8407_v31 }
 0x2ec   :  { %5699 = vmatpush1.bf16.msra.mxu1 %v8410_v39  ;;  %4990 = vmatprep.subr.bf16.mxu0 %v8415_v42 }
 0x2ed   :  { %5700 = vmatprep.subr.bf16.mxu1 %v8418_v44 }
 0x2ef   :  { %4991 = vmatpush1.bf16.msra.mxu0 %v8413_v36 }
 0x2f0   :  { %5701 = vmatpush1.bf16.msra.mxu1 %v8416_v58  ;;  %4992 = vmatprep.subr.bf16.mxu0 %v8421_v61 }
 0x2f1   :  { %5702 = vmatprep.subr.bf16.mxu1 %v8424_v62 }
 0x2f3   :  { %4993 = vmatpush1.bf16.msra.mxu0 %v8419_v50 }
 0x2f4   :  { %5703 = vmatpush1.bf16.msra.mxu1 %v8422_v51  ;;  %4994 = vmatprep.subr.bf16.mxu0 %v8427_v54 }
 0x2f5   :  { %5704 = vmatprep.subr.bf16.mxu1 %v8430_v63  ;;  %v5730_v22 = vpop.permute.xlu0 %5729 }
 0x2f7   :  { %4995 = vmatpush1.bf16.msra.mxu0 %v8425_v1 }
 0x2f8   :  { %5705 = vmatpush1.bf16.msra.mxu1 %v8428_v2  ;;  %4996 = vmatprep.subr.bf16.mxu0 %v8433_v3 }
 0x2f9   :  { %5706 = vmatprep.subr.bf16.mxu1 %v8436_v4 }
 0x2fb   :  { %4997 = vmatpush1.bf16.msra.mxu0 %v8431_v5 }
 0x2fc   :  { %5707 = vmatpush1.bf16.msra.mxu1 %v8434_v6  ;;  %4998 = vmatprep.subr.bf16.mxu0 %v8439_v59 }
 0x2fd   :  { %5708 = vmatprep.subr.bf16.mxu1 %v8442_v7 }
 0x2ff   :  { %4999 = vmatpush1.bf16.msra.mxu0 %v8437_v8 }
 0x300   :  { %5709 = vmatpush1.bf16.msra.mxu1 %v8440_v9 }
 0x302   :  { %5001 = vmatmul.mubr.bf16.vlgmr.msra.gmra.mrb[12].mxu0 %v10317_v13 }
 0x303   :  { %5711 = vmatmul.mubr.bf16.vlgmr.msra.gmra.mrb[12].mxu1 %v10317_v13 }
 0x315   :  { %v3582_v0 = vpop.f32.mrb[8].mxu0 }
 0x316   :  { %v4292_v10 = vpop.f32.mrb[8].mxu1  ;;  %v3591_v11 = vmax.f32 %v2881_v40, %v3582_v0  ;;  %v3584_v12 = vpop.f32.mrb[9].mxu0 }
 0x317   :  { %v4294_v14 = vpop.f32.mrb[9].mxu1  ;;  %v3592_v15 = vmax.f32 %v2882_v60, %v3584_v12  ;;  %v3586_v16 = vpop.f32.mrb[10].mxu0 }
 0x318   :  { %v4296_v17 = vpop.f32.mrb[10].mxu1  ;;  %v4301_v18 = vmax.f32 %v3591_v11, %v4292_v10  ;;  %v3593_v19 = vmax.f32 %v2883_v46, %v3586_v16  ;;  %v3588_v13 = vpop.f32.mrb[11].mxu0 }
 0x319   :  { %v4298_v20 = vpop.f32.mrb[11].mxu1  ;;  %v4302_v21 = vmax.f32 %v3592_v15, %v4294_v14  ;;  %v3594_v38 = vmax.f32 %v2884_v49, %v3588_v13  ;;  %v5735_v49 = vpop.permute.xlu0 %5734 }
 0x31a   :  { %v4303_v47 = vmax.f32 %v3593_v19, %v4296_v17 }
 0x31b   :  { %v4304_v40 = vmax.f32 %v3594_v38, %v4298_v20 }
 0x3d5   :  { %v5002_v23 = vpop.f32.mrb[12].mxu0 }
 0x3d6   :  { %v5712_v52 = vpop.f32.mrb[12].mxu1  ;;  %v5011_v53 = vmax.f32 %v4301_v18, %v5002_v23  ;;  %v5004_v60 = vpop.f32.mrb[13].mxu0 }
 0x3d7   :  { %v5714_v24 = vpop.f32.mrb[13].mxu1  ;;  %v5012_v25 = vmax.f32 %v4302_v21, %v5004_v60  ;;  %v5006_v26 = vpop.f32.mrb[14].mxu0 }
 0x3d8   :  { %v5716_v27 = vpop.f32.mrb[14].mxu1  ;;  %v5721_v56 = vmax.f32 %v5011_v53, %v5712_v52  ;;  %v5013_v41 = vmax.f32 %v4303_v47, %v5006_v26  ;;  %v5008_v46 = vpop.f32.mrb[15].mxu0 }
 0x3d9   :  { %v5718_v28 = vpop.f32.mrb[15].mxu1  ;;  %v5722_v29 = vmax.f32 %v5012_v25, %v5714_v24  ;;  %v5014_v30 = vmax.f32 %v4304_v40, %v5008_v46 }
 0x3da   :  { %v5737_v32 = vadd.f32 %v5730_v22, %v5721_v56  ;;  %v5723_v43 = vmax.f32 %v5013_v41, %v5716_v27 }
 0x3db   :  { %v5738_v45 = vadd.f32 %v5730_v22, %v5722_v29  ;;  %v5724_v33 = vmax.f32 %v5014_v30, %v5718_v28 }
 0x3dc   :  { %v5741_v34 = vmax.f32 %v5737_v32, 0.0  ;;  %v5739_v35 = vadd.f32 %v5735_v49, %v5723_v43 }
 0x3dd   :  { %v5742_v37 = vmax.f32 %v5738_v45, 0.0  ;;  %v5740_v48 = vadd.f32 %v5735_v49, %v5724_v33 }
 0x3de   :  { %v5743_v55 = vmax.f32 %v5739_v35, 0.0 }
 0x3df   :  { %v7214_v57 = vpack.c.bf16 %v5742_v37, %v5741_v34  ;;  %v5744_v31 = vmax.f32 %v5740_v48, 0.0 }
 0x3e1   :  { %5760 = vst.msk [vmem:[%s10955_s3] sm:$0xff] %vm5759_vm2, %v7214_v57  ;;  %v7215_v39 = vpack.c.bf16 %v5744_v31, %v5743_v55 }
 0x3e3   :  { %5761 = vst.msk [vmem:[%s10955_s3 + $0x8] sm:$0xff] %vm5759_vm2, %v7215_v39 }

// kernel: lenet_forward.5
= control target key start
LH: loop header
LB: loop body
LE: loop exit
PB: predicated region body
PF: predicated region fallthrough
CT: control target
= control target key end

     0   :  { %vm1303_vm0 = vcmask 523264   ;;  %vm1709_vm1 = vcmask 1043456   ;;  %vm1705_vm2 = vcmask 588800   ;;  %vm2806_vm3 = vmmov 0   ;;  %s3688_s1 = inlined_call_operand.vmem [shape: bf16[1600,200], index: 1, kind: input, shape index: {}]   ;;  %s3689_s0 = inlined_call_operand.vmem [shape: bf16[8,1600], index: 0, kind: input, shape index: {}]   ;;  %s3690_s3 = inlined_call_operand.vmem [shape: bf16[200,120], index: 3, kind: input, shape index: {}]   ;;  %s3691_s5 = inlined_call_operand.vmem [shape: bf16[120,120], index: 5, kind: input, shape index: {}]   ;;  %s3692_s2 = inlined_call_operand.vmem [shape: f32[1,200], index: 2, kind: input, shape index: {}]   ;;  %s3693_s7 = inlined_call_operand.vmem [shape: bf16[120,84], index: 7, kind: input, shape index: {}]   ;;  %s3694_s4 = inlined_call_operand.vmem [shape: f32[1,120], index: 4, kind: input, shape index: {}]   ;;  %s3695_s9 = inlined_call_operand.vmem [shape: bf16[84,4], index: 9, kind: input, shape index: {}]   ;;  %s3696_s6 = inlined_call_operand.vmem [shape: f32[1,120], index: 6, kind: input, shape index: {}]   ;;  %s3697_s8 = inlined_call_operand.vmem [shape: f32[1,84], index: 8, kind: input, shape index: {}]   ;;  %s3698_s10 = inlined_call_operand.vmem [shape: f32[1,4], index: 10, kind: input, shape index: {}]   ;;  %s3699_s11 = inlined_call_operand.vmem [shape: f32[8,4], index: 11, kind: output, shape index: {}]  }
   0x1   :  { %v2456_v0 = vld [vmem:[%s3688_s1 + $0x204] ss:$8 sps:$4 sm:$0xff]   ;;  %v2458_v1 = vld [vmem:[%s3688_s1 + $0x200] ss:$8 sps:$4 sm:$0xff]   ;;  %v2459_v2 = vld [vmem:[%s3688_s1 + $0x214] ss:$8 sps:$4 sm:$0xff]  }
   0x2   :  { %1389 = vmatprep.subr.bf16.mxu0 %v2456_v0  ;;  %v2461_v3 = vld [vmem:[%s3688_s1 + $0x210] ss:$8 sps:$4 sm:$0xff]   ;;  %v2462_v4 = vld [vmem:[%s3688_s1 + $0x224] ss:$8 sps:$4 sm:$0xff]   ;;  %v2464_v5 = vld [vmem:[%s3688_s1 + $0x220] ss:$8 sps:$4 sm:$0xff]  }
   0x3   :  { %1390 = vmatpush1.bf16.msra.mxu0 %v2458_v1  ;;  %v2465_v6 = vld [vmem:[%s3688_s1 + $0x234] ss:$8 sps:$4 sm:$0xff]   ;;  %v2467_v7 = vld [vmem:[%s3688_s1 + $0x230] ss:$8 sps:$4 sm:$0xff]   ;;  %v2468_v8 = vld [vmem:[%s3688_s1 + $0x244] ss:$8 sps:$4 sm:$0xff]  }
   0x4   :  { %1391 = vmatprep.subr.bf16.mxu0 %v2459_v2  ;;  %v2470_v9 = vld [vmem:[%s3688_s1 + $0x240] ss:$8 sps:$4 sm:$0xff]   ;;  %v2471_v10 = vld [vmem:[%s3688_s1 + $0x254] ss:$8 sps:$4 sm:$0xff]   ;;  %v2473_v11 = vld [vmem:[%s3688_s1 + $0x250] ss:$8 sps:$4 sm:$0xff]  }
   0x5   :  { %v2474_v12 = vld [vmem:[%s3688_s1 + $0x264] ss:$8 sps:$4 sm:$0xff]   ;;  %v2909_v13 = vld [vmem:[%s3689_s0 + $0x10] sm:$0xff]  ;;  %v2476_v15 = vld [vmem:[%s3688_s1 + $0x260] ss:$8 sps:$4 sm:$0xff]   ;;  %vm1822_vm4 = vcmask 982016  }
   0x6   :  { %v2096_v14 = vcombine.high %v2909_v13, %v2909_v13  ;;  %v2477_v16 = vld [vmem:[%s3688_s1 + $0x274] ss:$8 sps:$4 sm:$0xff]   ;;  %v2515_v17 = vld [vmem:[%s3688_s1 + $0x4] ss:$8 sps:$4 sm:$0xff]   ;;  %v2479_v18 = vld [vmem:[%s3688_s1 + $0x270] ss:$8 sps:$4 sm:$0xff]   ;;  %v2095_v55 = vcombine.low %v2909_v13, %v2909_v13 }
   0x7   :  { %1392 = vmatpush1.bf16.msra.mxu0 %v2461_v3  ;;  %v2480_v19 = vld [vmem:[%s3688_s1 + $0x284] ss:$8 sps:$4 sm:$0xff]   ;;  %1307 = vmatprep.subr.bf16.mxu1 %v2515_v17  ;;  %v2520_v20 = vld [vmem:[%s3688_s1] ss:$8 sps:$4 sm:$0xff]   ;;  %v2521_v21 = vld [vmem:[%s3688_s1 + $0x14] ss:$8 sps:$4 sm:$0xff]  }
   0x8   :  { %1393 = vmatprep.subr.bf16.mxu0 %v2462_v4  ;;  %1421 = vmatprep.mubr.bf16.mxu0 %v2096_v14  ;;  %v2482_v22 = vld [vmem:[%s3688_s1 + $0x280] ss:$8 sps:$4 sm:$0xff]   ;;  %v2526_v23 = vld [vmem:[%s3688_s1 + $0x10] ss:$8 sps:$4 sm:$0xff]   ;;  %v2527_v24 = vld [vmem:[%s3688_s1 + $0x24] ss:$8 sps:$4 sm:$0xff]  }
   0x9   :  { %1308 = vmatpush1.bf16.msra.mxu1 %v2520_v20  ;;  %v2483_v25 = vld [vmem:[%s3688_s1 + $0x294] ss:$8 sps:$4 sm:$0xff]   ;;  %v2532_v26 = vld [vmem:[%s3688_s1 + $0x20] ss:$8 sps:$4 sm:$0xff]   ;;  %v2485_v27 = vld [vmem:[%s3688_s1 + $0x290] ss:$8 sps:$4 sm:$0xff]  }
   0xa   :  { %1309 = vmatprep.subr.bf16.mxu1 %v2521_v21  ;;  %v2533_v28 = vld [vmem:[%s3688_s1 + $0x34] ss:$8 sps:$4 sm:$0xff]   ;;  %v2486_v29 = vld [vmem:[%s3688_s1 + $0x2a4] ss:$8 sps:$4 sm:$0xff]   ;;  %v2488_v30 = vld [vmem:[%s3688_s1 + $0x2a0] ss:$8 sps:$4 sm:$0xff]  }
   0xb   :  { %1394 = vmatpush1.bf16.msra.mxu0 %v2464_v5  ;;  %v2538_v31 = vld [vmem:[%s3688_s1 + $0x30] ss:$8 sps:$4 sm:$0xff]   ;;  %v2539_v32 = vld [vmem:[%s3688_s1 + $0x44] ss:$8 sps:$4 sm:$0xff]   ;;  %v2489_v33 = vld [vmem:[%s3688_s1 + $0x2b4] ss:$8 sps:$4 sm:$0xff]  }
   0xc   :  { %1395 = vmatprep.subr.bf16.mxu0 %v2465_v6  ;;  %v2544_v34 = vld [vmem:[%s3688_s1 + $0x40] ss:$8 sps:$4 sm:$0xff]   ;;  %v2491_v35 = vld [vmem:[%s3688_s1 + $0x2b0] ss:$8 sps:$4 sm:$0xff]   ;;  %v2545_v36 = vld [vmem:[%s3688_s1 + $0x54] ss:$8 sps:$4 sm:$0xff]  }
   0xd   :  { %1310 = vmatpush1.bf16.msra.mxu1 %v2526_v23  ;;  %v2492_v37 = vld [vmem:[%s3688_s1 + $0x2c4] ss:$8 sps:$4 sm:$0xff]   ;;  %v2494_v38 = vld [vmem:[%s3688_s1 + $0x2c0] ss:$8 sps:$4 sm:$0xff]   ;;  %v2550_v39 = vld [vmem:[%s3688_s1 + $0x50] ss:$8 sps:$4 sm:$0xff]  }
   0xe   :  { %1311 = vmatprep.subr.bf16.mxu1 %v2527_v24  ;;  %v2551_v40 = vld [vmem:[%s3688_s1 + $0x64] ss:$8 sps:$4 sm:$0xff]   ;;  %v2495_v41 = vld [vmem:[%s3688_s1 + $0x2d4] ss:$8 sps:$4 sm:$0xff]   ;;  %v2556_v42 = vld [vmem:[%s3688_s1 + $0x60] ss:$8 sps:$4 sm:$0xff]  }
   0xf   :  { %1396 = vmatpush1.bf16.msra.mxu0 %v2467_v7  ;;  %v2497_v43 = vld [vmem:[%s3688_s1 + $0x2d0] ss:$8 sps:$4 sm:$0xff]   ;;  %v2557_v44 = vld [vmem:[%s3688_s1 + $0x74] ss:$8 sps:$4 sm:$0xff]   ;;  %v2498_v45 = vld [vmem:[%s3688_s1 + $0x2e4] ss:$8 sps:$4 sm:$0xff]  }
  0x10   :  { %1397 = vmatprep.subr.bf16.mxu0 %v2468_v8  ;;  %v2500_v46 = vld [vmem:[%s3688_s1 + $0x2e0] ss:$8 sps:$4 sm:$0xff]   ;;  %v2562_v47 = vld [vmem:[%s3688_s1 + $0x70] ss:$8 sps:$4 sm:$0xff]   ;;  %v2563_v48 = vld [vmem:[%s3688_s1 + $0x84] ss:$8 sps:$4 sm:$0xff]  }
  0x11   :  { %1312 = vmatpush1.bf16.msra.mxu1 %v2532_v26  ;;  %v2501_v49 = vld [vmem:[%s3688_s1 + $0x2f4] ss:$8 sps:$4 sm:$0xff]   ;;  %v2568_v50 = vld [vmem:[%s3688_s1 + $0x80] ss:$8 sps:$4 sm:$0xff]   ;;  %v2503_v51 = vld [vmem:[%s3688_s1 + $0x2f0] ss:$8 sps:$4 sm:$0xff]  }
  0x12   :  { %1313 = vmatprep.subr.bf16.mxu1 %v2533_v28  ;;  %v2569_v52 = vld [vmem:[%s3688_s1 + $0x94] ss:$8 sps:$4 sm:$0xff]   ;;  %v2508_v53 = vld [vmem:[%s3688_s1 + $0x304] ss:$8 sps:$4 sm:$0xff]   ;;  %v2506_v56 = vld [vmem:[%s3688_s1 + $0x300] ss:$8 sps:$4 sm:$0xff]  }
  0x13   :  { %1398 = vmatpush1.bf16.msra.mxu0 %v2470_v9  ;;  %v3033_v54 = vld [vmem:[%s3689_s0 + $0x18] sm:$0xff]  ;;  %v2575_v58 = vld [vmem:[%s3688_s1 + $0xa4] ss:$8 sps:$4 sm:$0xff]   ;;  %v2580_v62 = vld [vmem:[%s3688_s1 + $0xa0] ss:$8 sps:$4 sm:$0xff]   ;;  %vm2041_vm5 = vcmask 1041408  }
  0x14   :  { %1399 = vmatprep.subr.bf16.mxu0 %v2471_v10  ;;  %v2574_v57 = vld [vmem:[%s3688_s1 + $0x90] ss:$8 sps:$4 sm:$0xff]   ;;  %v2511_v59 = vld [vmem:[%s3688_s1 + $0x314] ss:$8 sps:$4 sm:$0xff]   ;;  %v2098_v60 = vcombine.high %v3033_v54, %v3033_v54  ;;  %v2514_v0 = vld [vmem:[%s3688_s1 + $0x324] ss:$8 sps:$4 sm:$0xff]  }
  0x15   :  { %1314 = vmatpush1.bf16.msra.mxu1 %v2538_v31  ;;  %v2509_v61 = vld [vmem:[%s3688_s1 + $0x310] ss:$8 sps:$4 sm:$0xff]   ;;  %v2581_v63 = vld [vmem:[%s3688_s1 + $0xb4] ss:$8 sps:$4 sm:$0xff]   ;;  %v39_v1 = vld [vmem:[%s3689_s0] sm:$0xff]  ;;  %vm2037_vm6 = vcmask 687104  }
  0x16   :  { %1315 = vmatprep.subr.bf16.mxu1 %v2539_v32  ;;  %v2092_v2 = vcombine.high %v39_v1, %v39_v1  ;;  %v2586_v3 = vld [vmem:[%s3688_s1 + $0xb0] ss:$8 sps:$4 sm:$0xff]   ;;  %v2512_v4 = vld [vmem:[%s3688_s1 + $0x320] ss:$8 sps:$4 sm:$0xff]   ;;  %v2587_v5 = vld [vmem:[%s3688_s1 + $0xc4] ss:$8 sps:$4 sm:$0xff]   ;;  %v2091_v23 = vcombine.low %v39_v1, %v39_v1 }
  0x17   :  { %1400 = vmatpush1.bf16.msra.mxu0 %v2473_v11  ;;  %v2519_v6 = vld [vmem:[%s3688_s1 + $0x334] ss:$8 sps:$4 sm:$0xff]   ;;  %v2592_v7 = vld [vmem:[%s3688_s1 + $0xc0] ss:$8 sps:$4 sm:$0xff]   ;;  %v2517_v8 = vld [vmem:[%s3688_s1 + $0x330] ss:$8 sps:$4 sm:$0xff]  }
  0x18   :  { %1401 = vmatprep.subr.bf16.mxu0 %v2474_v12  ;;  %1339 = vmatprep.mubr.bf16.mxu1 %v2092_v2  ;;  %v2593_v9 = vld [vmem:[%s3688_s1 + $0xd4] ss:$8 sps:$4 sm:$0xff]   ;;  %v2525_v10 = vld [vmem:[%s3688_s1 + $0x344] ss:$8 sps:$4 sm:$0xff]   ;;  %v2600_v11 = vld [vmem:[%s3688_s1 + $0xd0] ss:$8 sps:$4 sm:$0xff]  }
  0x19   :  { %1316 = vmatpush1.bf16.msra.mxu1 %v2544_v34  ;;  %v2523_v12 = vld [vmem:[%s3688_s1 + $0x340] ss:$8 sps:$4 sm:$0xff]   ;;  %v2601_v13 = vld [vmem:[%s3688_s1 + $0xe4] ss:$8 sps:$4 sm:$0xff]   ;;  %v2531_v14 = vld [vmem:[%s3688_s1 + $0x354] ss:$8 sps:$4 sm:$0xff]  }
  0x1a   :  { %1317 = vmatprep.subr.bf16.mxu1 %v2545_v36  ;;  %v2607_v17 = vld [vmem:[%s3688_s1 + $0xf4] ss:$8 sps:$4 sm:$0xff]   ;;  %v2535_v20 = vld [vmem:[%s3688_s1 + $0x360] ss:$8 sps:$4 sm:$0xff]   ;;  %v2617_v21 = vld [vmem:[%s3688_s1 + $0x104] ss:$8 sps:$4 sm:$0xff]  }
  0x1b   :  { %1402 = vmatpush1.bf16.msra.mxu0 %v2476_v15  ;;  %v2606_v15 = vld [vmem:[%s3688_s1 + $0xe0] ss:$8 sps:$4 sm:$0xff]   ;;  %v2623_v26 = vld [vmem:[%s3688_s1 + $0x114] ss:$8 sps:$4 sm:$0xff]   ;;  %v2621_v28 = vld [vmem:[%s3688_s1 + $0x110] ss:$8 sps:$4 sm:$0xff]  }
  0x1c   :  { %1403 = vmatprep.subr.bf16.mxu0 %v2477_v16  ;;  %v2529_v16 = vld [vmem:[%s3688_s1 + $0x350] ss:$8 sps:$4 sm:$0xff]   ;;  %v2615_v24 = vld [vmem:[%s3688_s1 + $0x100] ss:$8 sps:$4 sm:$0xff]   ;;  %v2555_v31 = vld [vmem:[%s3688_s1 + $0x394] ss:$8 sps:$4 sm:$0xff]  }
  0x1d   :  { %1318 = vmatpush1.bf16.msra.mxu1 %v2550_v39  ;;  %v2627_v32 = vld [vmem:[%s3688_s1 + $0x120] ss:$8 sps:$4 sm:$0xff]   ;;  %v2635_v34 = vld [vmem:[%s3688_s1 + $0x134] ss:$8 sps:$4 sm:$0xff]   ;;  %v2633_v36 = vld [vmem:[%s3688_s1 + $0x130] ss:$8 sps:$4 sm:$0xff]  }
  0x1e   :  { %1319 = vmatprep.subr.bf16.mxu1 %v2551_v40  ;;  %v2567_v39 = vld [vmem:[%s3688_s1 + $0x3b4] ss:$8 sps:$4 sm:$0xff]   ;;  %v2639_v40 = vld [vmem:[%s3688_s1 + $0x140] ss:$8 sps:$4 sm:$0xff]   ;;  %v2669_v2 = vld [vmem:[%s3688_s1 + $0x190] ss:$8 sps:$4 sm:$0xff]  }
  0x1f   :  { %1404 = vmatpush1.bf16.msra.mxu0 %v2479_v18  ;;  %v2537_v18 = vld [vmem:[%s3688_s1 + $0x364] ss:$8 sps:$4 sm:$0xff]   ;;  %v2597_v1 = vld [vmem:[%s3688_s1 + $0x400] ss:$8 sps:$4 sm:$0xff]   ;;  %vm2085_vm7 = vcmask 31744  }
  0x20   :  { %1405 = vmatprep.subr.bf16.mxu0 %v2480_v19  ;;  %v2612_v19 = vld [vmem:[%s3688_s1 + $0xf0] ss:$8 sps:$4 sm:$0xff]  }
  0x21   :  { %1320 = vmatpush1.bf16.msra.mxu1 %v2556_v42  ;;  %v2647_v42 = vld [vmem:[%s3688_s1 + $0x154] ss:$8 sps:$4 sm:$0xff]  }
  0x22   :  { %1321 = vmatprep.subr.bf16.mxu1 %v2557_v44  ;;  %v2571_v44 = vld [vmem:[%s3688_s1 + $0x3c0] ss:$8 sps:$4 sm:$0xff]  }
  0x23   :  { %1406 = vmatpush1.bf16.msra.mxu0 %v2482_v22  ;;  %v2543_v22 = vld [vmem:[%s3688_s1 + $0x374] ss:$8 sps:$4 sm:$0xff]  }
  0x24   :  { %1407 = vmatprep.subr.bf16.mxu0 %v2483_v25  ;;  %v2541_v25 = vld [vmem:[%s3688_s1 + $0x370] ss:$8 sps:$4 sm:$0xff]  }
  0x25   :  { %1322 = vmatpush1.bf16.msra.mxu1 %v2562_v47  ;;  %v2653_v47 = vld [vmem:[%s3688_s1 + $0x164] ss:$8 sps:$4 sm:$0xff]  }
  0x26   :  { %1323 = vmatprep.subr.bf16.mxu1 %v2563_v48  ;;  %v3201_v48 = vld [vmem:[%s3689_s0 + $0x8] sm:$0xff] }
  0x27   :  { %1408 = vmatpush1.bf16.msra.mxu0 %v2485_v27  ;;  %v2549_v27 = vld [vmem:[%s3688_s1 + $0x384] ss:$8 sps:$4 sm:$0xff]  }
  0x28   :  { %1409 = vmatprep.subr.bf16.mxu0 %v2486_v29  ;;  %v2547_v29 = vld [vmem:[%s3688_s1 + $0x380] ss:$8 sps:$4 sm:$0xff]  }
  0x29   :  { %1324 = vmatpush1.bf16.msra.mxu1 %v2568_v50  ;;  %v2577_v50 = vld [vmem:[%s3688_s1 + $0x3d0] ss:$8 sps:$4 sm:$0xff]  }
  0x2a   :  { %1325 = vmatprep.subr.bf16.mxu1 %v2569_v52  ;;  %v2659_v52 = vld [vmem:[%s3688_s1 + $0x174] ss:$8 sps:$4 sm:$0xff]  }
  0x2b   :  { %1410 = vmatpush1.bf16.msra.mxu0 %v2488_v30  ;;  %v2629_v30 = vld [vmem:[%s3688_s1 + $0x124] ss:$8 sps:$4 sm:$0xff]  }
  0x2c   :  { %1411 = vmatprep.subr.bf16.mxu0 %v2489_v33  ;;  %v2553_v33 = vld [vmem:[%s3688_s1 + $0x390] ss:$8 sps:$4 sm:$0xff]  }
  0x2d   :  { %1326 = vmatpush1.bf16.msra.mxu1 %v2574_v57  ;;  %v2665_v57 = vld [vmem:[%s3688_s1 + $0x184] ss:$8 sps:$4 sm:$0xff]  }
  0x2e   :  { %1327 = vmatprep.subr.bf16.mxu1 %v2575_v58  ;;  %v2591_v58 = vld [vmem:[%s3688_s1 + $0x3f4] ss:$8 sps:$4 sm:$0xff]  }
  0x2f   :  { %1412 = vmatpush1.bf16.msra.mxu0 %v2491_v35  ;;  %v2561_v35 = vld [vmem:[%s3688_s1 + $0x3a4] ss:$8 sps:$4 sm:$0xff]  }
  0x30   :  { %1413 = vmatprep.subr.bf16.mxu0 %v2492_v37  ;;  %v2559_v37 = vld [vmem:[%s3688_s1 + $0x3a0] ss:$8 sps:$4 sm:$0xff]  }
  0x31   :  { %1328 = vmatpush1.bf16.msra.mxu1 %v2580_v62  ;;  %v2599_v62 = vld [vmem:[%s3688_s1 + $0x404] ss:$8 sps:$4 sm:$0xff]  }
  0x32   :  { %1329 = vmatprep.subr.bf16.mxu1 %v2581_v63  ;;  %v3244_v63 = vld [vmem:[%s3689_s0 + $0x20] sm:$0xff] }
  0x33   :  { %1414 = vmatpush1.bf16.msra.mxu0 %v2494_v38  ;;  %v2641_v38 = vld [vmem:[%s3688_s1 + $0x144] ss:$8 sps:$4 sm:$0xff]  }
  0x34   :  { %1415 = vmatprep.subr.bf16.mxu0 %v2495_v41  ;;  %v2565_v41 = vld [vmem:[%s3688_s1 + $0x3b0] ss:$8 sps:$4 sm:$0xff]  }
  0x35   :  { %1330 = vmatpush1.bf16.msra.mxu1 %v2586_v3  ;;  %v2677_v3 = vld [vmem:[%s3688_s1 + $0x1a4] ss:$8 sps:$4 sm:$0xff]  }
  0x36   :  { %1331 = vmatprep.subr.bf16.mxu1 %v2587_v5  ;;  %v2603_v5 = vld [vmem:[%s3688_s1 + $0x410] ss:$8 sps:$4 sm:$0xff]  }
  0x37   :  { %1416 = vmatpush1.bf16.msra.mxu0 %v2497_v43  ;;  %v2573_v43 = vld [vmem:[%s3688_s1 + $0x3c4] ss:$8 sps:$4 sm:$0xff]  }
  0x38   :  { %1417 = vmatprep.subr.bf16.mxu0 %v2498_v45  ;;  %v2645_v45 = vld [vmem:[%s3688_s1 + $0x150] ss:$8 sps:$4 sm:$0xff]  }
  0x39   :  { %1332 = vmatpush1.bf16.msra.mxu1 %v2592_v7  ;;  %v2683_v7 = vld [vmem:[%s3688_s1 + $0x1b4] ss:$8 sps:$4 sm:$0xff]  }
  0x3a   :  { %1333 = vmatprep.subr.bf16.mxu1 %v2593_v9  ;;  %v2681_v9 = vld [vmem:[%s3688_s1 + $0x1b0] ss:$8 sps:$4 sm:$0xff]  }
  0x3b   :  { %1418 = vmatpush1.bf16.msra.mxu0 %v2500_v46  ;;  %v2579_v46 = vld [vmem:[%s3688_s1 + $0x3d4] ss:$8 sps:$4 sm:$0xff]  }
  0x3c   :  { %1419 = vmatprep.subr.bf16.mxu0 %v2501_v49  ;;  %v2094_v49 = vcombine.high %v3201_v48, %v3201_v48 }
  0x3d   :  { %1334 = vmatpush1.bf16.msra.mxu1 %v2600_v11  ;;  %v2689_v11 = vld [vmem:[%s3688_s1 + $0x1c4] ss:$8 sps:$4 sm:$0xff]  }
  0x3e   :  { %1335 = vmatprep.subr.bf16.mxu1 %v2601_v13  ;;  %v2687_v13 = vld [vmem:[%s3688_s1 + $0x1c0] ss:$8 sps:$4 sm:$0xff]  }
  0x3f   :  { %1420 = vmatpush1.bf16.msra.mxu0 %v2503_v51  ;;  %v2651_v51 = vld [vmem:[%s3688_s1 + $0x160] ss:$8 sps:$4 sm:$0xff]  }
  0x40   :  { %1430 = vmatprep.subr.bf16.mxu0 %v2508_v53  ;;  %v2585_v53 = vld [vmem:[%s3688_s1 + $0x3e4] ss:$8 sps:$4 sm:$0xff]  }
  0x41   :  { %1336 = vmatpush1.bf16.msra.mxu1 %v2606_v15  ;;  %v2695_v15 = vld [vmem:[%s3688_s1 + $0x1d4] ss:$8 sps:$4 sm:$0xff]  }
  0x42   :  { %1422 = vmatmul.mubr.bf16.vlgmr.msra.gmra.mrb[0].mxu0 %v2095_v55  ;;  %1337 = vmatprep.subr.bf16.mxu1 %v2607_v17  ;;  %v2583_v55 = vld [vmem:[%s3688_s1 + $0x3e0] ss:$8 sps:$4 sm:$0xff]   ;;  %v2693_v17 = vld [vmem:[%s3688_s1 + $0x1d0] ss:$8 sps:$4 sm:$0xff]  }
  0x43   :  { %1431 = vmatpush1.bf16.msra.mxu0 %v2506_v56  ;;  %1462 = vmatprep.mubr.bf16.mxu0 %v2098_v60  ;;  %v2657_v56 = vld [vmem:[%s3688_s1 + $0x170] ss:$8 sps:$4 sm:$0xff]   ;;  %v2663_v60 = vld [vmem:[%s3688_s1 + $0x180] ss:$8 sps:$4 sm:$0xff]  }
  0x44   :  { %1432 = vmatprep.subr.bf16.mxu0 %v2511_v59  ;;  %v2589_v59 = vld [vmem:[%s3688_s1 + $0x3f0] ss:$8 sps:$4 sm:$0xff]  }
  0x45   :  { %1338 = vmatpush1.bf16.msra.mxu1 %v2612_v19  ;;  %v2703_v19 = vld [vmem:[%s3688_s1 + $0x1e4] ss:$8 sps:$4 sm:$0xff]  }
  0x46   :  { %1348 = vmatprep.subr.bf16.mxu1 %v2617_v21  ;;  %v2701_v21 = vld [vmem:[%s3688_s1 + $0x1e0] ss:$8 sps:$4 sm:$0xff]  }
  0x47   :  { %1433 = vmatpush1.bf16.msra.mxu0 %v2509_v61  ;;  %v2671_v61 = vld [vmem:[%s3688_s1 + $0x194] ss:$8 sps:$4 sm:$0xff]  }
  0x48   :  { %1434 = vmatprep.subr.bf16.mxu0 %v2514_v0  ;;  %1340 = vmatmul.mubr.bf16.vlgmr.msra.gmra.mrb[0].mxu1 %v2091_v23  ;;  %v2097_v0 = vcombine.low %v3033_v54, %v3033_v54  ;;  %v2605_v54 = vld [vmem:[%s3688_s1 + $0x414] ss:$8 sps:$4 sm:$0xff]  }
  0x49   :  { %1349 = vmatpush1.bf16.msra.mxu1 %v2615_v24  ;;  %1380 = vmatprep.mubr.bf16.mxu1 %v2094_v49  ;;  %v2709_v23 = vld [vmem:[%s3688_s1 + $0x1f4] ss:$8 sps:$4 sm:$0xff]   ;;  %v2638_v24 = vld [vmem:[%s3688_s1 + $0x464] ss:$8 sps:$4 sm:$0xff]   ;;  %v2099_v49 = vcombine.low %v3244_v63, %v3244_v63 }
  0x4a   :  { %1350 = vmatprep.subr.bf16.mxu1 %v2623_v26  ;;  %v2636_v26 = vld [vmem:[%s3688_s1 + $0x460] ss:$8 sps:$4 sm:$0xff]  }
  0x4b   :  { %1435 = vmatpush1.bf16.msra.mxu0 %v2512_v4  ;;  %v2100_v4 = vcombine.high %v3244_v63, %v3244_v63  ;;  %v2726_v63 = vld [vmem:[%s3688_s1 + $0x564] ss:$8 sps:$4 sm:$0xff]  }
  0x4c   :  { %1436 = vmatprep.subr.bf16.mxu0 %v2519_v6  ;;  %v2675_v6 = vld [vmem:[%s3688_s1 + $0x1a0] ss:$8 sps:$4 sm:$0xff]  }
  0x4d   :  { %1351 = vmatpush1.bf16.msra.mxu1 %v2621_v28  ;;  %v2093_v28 = vcombine.low %v3201_v48, %v3201_v48  ;;  %v3391_v48 = vld [vmem:[%s3689_s0 + $0x28] sm:$0xff] }
  0x4e   :  { %1352 = vmatprep.subr.bf16.mxu1 %v2629_v30  ;;  %v2804_v30 = vmov 0  }
  0x4f   :  { %1437 = vmatpush1.bf16.msra.mxu0 %v2517_v8  ;;  %v2611_v8 = vld [vmem:[%s3688_s1 + $0x424] ss:$8 sps:$4 sm:$0xff]  }
  0x50   :  { %1438 = vmatprep.subr.bf16.mxu0 %v2525_v10  ;;  %v2609_v10 = vld [vmem:[%s3688_s1 + $0x420] ss:$8 sps:$4 sm:$0xff]  }
  0x51   :  { %1353 = vmatpush1.bf16.msra.mxu1 %v2627_v32  ;;  %v2648_v32 = vld [vmem:[%s3688_s1 + $0x480] ss:$8 sps:$4 sm:$0xff]  }
  0x52   :  { %1354 = vmatprep.subr.bf16.mxu1 %v2635_v34  ;;  %v2654_v34 = vld [vmem:[%s3688_s1 + $0x490] ss:$8 sps:$4 sm:$0xff]  }
  0x53   :  { %1439 = vmatpush1.bf16.msra.mxu0 %v2523_v12  ;;  %v2620_v12 = vld [vmem:[%s3688_s1 + $0x434] ss:$8 sps:$4 sm:$0xff]  }
  0x54   :  { %1440 = vmatprep.subr.bf16.mxu0 %v2531_v14  ;;  %v2618_v14 = vld [vmem:[%s3688_s1 + $0x430] ss:$8 sps:$4 sm:$0xff]  }
  0x55   :  { %1355 = vmatpush1.bf16.msra.mxu1 %v2633_v36  ;;  %v2660_v36 = vld [vmem:[%s3688_s1 + $0x4a0] ss:$8 sps:$4 sm:$0xff]  }
  0x56   :  { %1356 = vmatprep.subr.bf16.mxu1 %v2641_v38  ;;  %v2666_v38 = vld [vmem:[%s3688_s1 + $0x4b0] ss:$8 sps:$4 sm:$0xff]  }
  0x57   :  { %1441 = vmatpush1.bf16.msra.mxu0 %v2529_v16  ;;  %v2626_v16 = vld [vmem:[%s3688_s1 + $0x444] ss:$8 sps:$4 sm:$0xff]  }
  0x58   :  { %1442 = vmatprep.subr.bf16.mxu0 %v2537_v18  ;;  %v2624_v18 = vld [vmem:[%s3688_s1 + $0x440] ss:$8 sps:$4 sm:$0xff]  }
  0x59   :  { %1357 = vmatpush1.bf16.msra.mxu1 %v2639_v40  ;;  %v2672_v40 = vld [vmem:[%s3688_s1 + $0x4c0] ss:$8 sps:$4 sm:$0xff]  }
  0x5a   :  { %1358 = vmatprep.subr.bf16.mxu1 %v2647_v42  ;;  %v2678_v42 = vld [vmem:[%s3688_s1 + $0x4d0] ss:$8 sps:$4 sm:$0xff]  }
  0x5b   :  { %1443 = vmatpush1.bf16.msra.mxu0 %v2535_v20  ;;  %v2632_v20 = vld [vmem:[%s3688_s1 + $0x454] ss:$8 sps:$4 sm:$0xff]  }
  0x5c   :  { %1444 = vmatprep.subr.bf16.mxu0 %v2543_v22  ;;  %v2630_v22 = vld [vmem:[%s3688_s1 + $0x450] ss:$8 sps:$4 sm:$0xff]  }
  0x5d   :  { %1359 = vmatpush1.bf16.msra.mxu1 %v2645_v45  ;;  %v2692_v45 = vld [vmem:[%s3688_s1 + $0x4f4] ss:$8 sps:$4 sm:$0xff]  }
  0x5e   :  { %1360 = vmatprep.subr.bf16.mxu1 %v2653_v47  ;;  %v2700_v47 = vld [vmem:[%s3688_s1 + $0x504] ss:$8 sps:$4 sm:$0xff]  }
  0x5f   :  { %1445 = vmatpush1.bf16.msra.mxu0 %v2541_v25  ;;  %v2707_v25 = vld [vmem:[%s3688_s1 + $0x1f0] ss:$8 sps:$4 sm:$0xff]  }
  0x60   :  { %1446 = vmatprep.subr.bf16.mxu0 %v2549_v27  ;;  %v2644_v27 = vld [vmem:[%s3688_s1 + $0x474] ss:$8 sps:$4 sm:$0xff]  }
  0x61   :  { %1361 = vmatpush1.bf16.msra.mxu1 %v2651_v51  ;;  %v2102_v51 = vcombine.high %v3391_v48, %v3391_v48 }
  0x62   :  { %1362 = vmatprep.subr.bf16.mxu1 %v2659_v52  ;;  %v2706_v52 = vld [vmem:[%s3688_s1 + $0x514] ss:$8 sps:$4 sm:$0xff]  }
  0x63   :  { %1447 = vmatpush1.bf16.msra.mxu0 %v2547_v29  ;;  %v2642_v29 = vld [vmem:[%s3688_s1 + $0x470] ss:$8 sps:$4 sm:$0xff]  }
  0x64   :  { %1448 = vmatprep.subr.bf16.mxu0 %v2555_v31  ;;  %v2650_v31 = vld [vmem:[%s3688_s1 + $0x484] ss:$8 sps:$4 sm:$0xff]  }
  0x65   :  { %1363 = vmatpush1.bf16.msra.mxu1 %v2657_v56  ;;  %v2710_v56 = vld [vmem:[%s3688_s1 + $0x520] ss:$8 sps:$4 sm:$0xff]  }
  0x66   :  { %1364 = vmatprep.subr.bf16.mxu1 %v2665_v57  ;;  %v2717_v57 = vld [vmem:[%s3688_s1 + $0x534] ss:$8 sps:$4 sm:$0xff]  }
  0x67   :  { %1449 = vmatpush1.bf16.msra.mxu0 %v2553_v33  ;;  %v2656_v33 = vld [vmem:[%s3688_s1 + $0x494] ss:$8 sps:$4 sm:$0xff]  }
  0x68   :  { %1450 = vmatprep.subr.bf16.mxu0 %v2561_v35  ;;  %v2662_v35 = vld [vmem:[%s3688_s1 + $0x4a4] ss:$8 sps:$4 sm:$0xff]  }
  0x69   :  { %1365 = vmatpush1.bf16.msra.mxu1 %v2663_v60  ;;  %v2718_v60 = vld [vmem:[%s3688_s1 + $0x540] ss:$8 sps:$4 sm:$0xff]  }
  0x6a   :  { %1366 = vmatprep.subr.bf16.mxu1 %v2671_v61  ;;  %v2723_v61 = vld [vmem:[%s3688_s1 + $0x554] ss:$8 sps:$4 sm:$0xff]  }
  0x6b   :  { %1451 = vmatpush1.bf16.msra.mxu0 %v2559_v37  ;;  %v2668_v37 = vld [vmem:[%s3688_s1 + $0x4b4] ss:$8 sps:$4 sm:$0xff]  }
  0x6c   :  { %1452 = vmatprep.subr.bf16.mxu0 %v2567_v39  ;;  %v2674_v39 = vld [vmem:[%s3688_s1 + $0x4c4] ss:$8 sps:$4 sm:$0xff]  }
  0x6d   :  { %1367 = vmatpush1.bf16.msra.mxu1 %v2669_v2  ;;  %v2727_v2 = vld [vmem:[%s3688_s1 + $0x570] ss:$8 sps:$4 sm:$0xff]  }
  0x6e   :  { %1368 = vmatprep.subr.bf16.mxu1 %v2677_v3  ;;  %v2732_v3 = vld [vmem:[%s3688_s1 + $0x584] ss:$8 sps:$4 sm:$0xff]  }
  0x6f   :  { %1453 = vmatpush1.bf16.msra.mxu0 %v2565_v41  ;;  %v2680_v41 = vld [vmem:[%s3688_s1 + $0x4d4] ss:$8 sps:$4 sm:$0xff]  }
  0x70   :  { %1454 = vmatprep.subr.bf16.mxu0 %v2573_v43  ;;  %v2686_v43 = vld [vmem:[%s3688_s1 + $0x4e4] ss:$8 sps:$4 sm:$0xff]  }
  0x71   :  { %1369 = vmatpush1.bf16.msra.mxu1 %v2675_v6  ;;  %v2738_v6 = vld [vmem:[%s3688_s1 + $0x5a4] ss:$8 sps:$4 sm:$0xff]  }
  0x72   :  { %1370 = vmatprep.subr.bf16.mxu1 %v2683_v7  ;;  %v2736_v7 = vld [vmem:[%s3688_s1 + $0x5a0] ss:$8 sps:$4 sm:$0xff]  }
  0x73   :  { %1455 = vmatpush1.bf16.msra.mxu0 %v2571_v44  ;;  %v2684_v44 = vld [vmem:[%s3688_s1 + $0x4e0] ss:$8 sps:$4 sm:$0xff]  }
  0x74   :  { %1456 = vmatprep.subr.bf16.mxu0 %v2579_v46  ;;  %v2690_v46 = vld [vmem:[%s3688_s1 + $0x4f0] ss:$8 sps:$4 sm:$0xff]  }
  0x75   :  { %1371 = vmatpush1.bf16.msra.mxu1 %v2681_v9  ;;  %v2739_v9 = vld [vmem:[%s3688_s1 + $0x5b0] ss:$8 sps:$4 sm:$0xff]  }
  0x76   :  { %1372 = vmatprep.subr.bf16.mxu1 %v2689_v11  ;;  %v2742_v11 = vld [vmem:[%s3688_s1 + $0x5c0] ss:$8 sps:$4 sm:$0xff]  }
  0x77   :  { %1457 = vmatpush1.bf16.msra.mxu0 %v2577_v50  ;;  %v2698_v50 = vld [vmem:[%s3688_s1 + $0x500] ss:$8 sps:$4 sm:$0xff]  }
  0x78   :  { %1458 = vmatprep.subr.bf16.mxu0 %v2585_v53  ;;  %v2704_v53 = vld [vmem:[%s3688_s1 + $0x510] ss:$8 sps:$4 sm:$0xff]  }
  0x79   :  { %1373 = vmatpush1.bf16.msra.mxu1 %v2687_v13  ;;  %v2745_v13 = vld [vmem:[%s3688_s1 + $0x5d0] ss:$8 sps:$4 sm:$0xff]  }
  0x7a   :  { %1374 = vmatprep.subr.bf16.mxu1 %v2695_v15  ;;  %v2769_v15 = vld [vmem:[%s3690_s3] sm:$0xff]  }
  0x7b   :  { %1459 = vmatpush1.bf16.msra.mxu0 %v2583_v55  ;;  %v2712_v55 = vld [vmem:[%s3688_s1 + $0x524] ss:$8 sps:$4 sm:$0xff]  }
  0x7c   :  { %1460 = vmatprep.subr.bf16.mxu0 %v2591_v58  ;;  %v2715_v58 = vld [vmem:[%s3688_s1 + $0x530] ss:$8 sps:$4 sm:$0xff]  }
  0x7d   :  { %1375 = vmatpush1.bf16.msra.mxu1 %v2693_v17  ;;  %v2748_v17 = vld [vmem:[%s3688_s1 + $0x5e0] ss:$8 sps:$4 sm:$0xff]  }
  0x7e   :  { %1376 = vmatprep.subr.bf16.mxu1 %v2703_v19  ;;  %v2771_v19 = vld [vmem:[%s3690_s3 + $0x10] sm:$0xff]  }
  0x7f   :  { %1461 = vmatpush1.bf16.msra.mxu0 %v2589_v59  ;;  %v2720_v59 = vld [vmem:[%s3688_s1 + $0x544] ss:$8 sps:$4 sm:$0xff]  }
  0x80   :  { %1471 = vmatprep.subr.bf16.mxu0 %v2599_v62  ;;  %v2721_v62 = vld [vmem:[%s3688_s1 + $0x550] ss:$8 sps:$4 sm:$0xff]  }
  0x81   :  { %1377 = vmatpush1.bf16.msra.mxu1 %v2701_v21  ;;  %v2758_v21 = vld [vmem:[%s3688_s1 + $0x604] ss:$8 sps:$4 sm:$0xff]  }
  0x82   :  { %1463 = vmatmul.mubr.bf16.vlgmr.msra.gmra.mrb[0].mxu0 %v2097_v0  ;;  %1378 = vmatprep.subr.bf16.mxu1 %v2709_v23  ;;  %v2724_v0 = vld [vmem:[%s3688_s1 + $0x560] ss:$8 sps:$4 sm:$0xff]   ;;  %v2101_v23 = vcombine.low %v3391_v48, %v3391_v48  ;;  %v248_v48 = vlaneseq }
  0x83   :  { %1472 = vmatpush1.bf16.msra.mxu0 %v2597_v1  ;;  %1503 = vmatprep.mubr.bf16.mxu0 %v2100_v4  ;;  %v2729_v1 = vld [vmem:[%s3688_s1 + $0x574] ss:$8 sps:$4 sm:$0xff]  }
  0x84   :  { %1473 = vmatprep.subr.bf16.mxu0 %v2605_v54  ;;  %v2730_v54 = vld [vmem:[%s3688_s1 + $0x580] ss:$8 sps:$4 sm:$0xff]   ;;  %v2735_v4 = vld [vmem:[%s3688_s1 + $0x594] ss:$8 sps:$4 sm:$0xff]  }
  0x85   :  { %1379 = vmatpush1.bf16.msra.mxu1 %v2707_v25  ;;  %v2761_v25 = vld [vmem:[%s3688_s1 + $0x614] ss:$8 sps:$4 sm:$0xff]  }
  0x86   :  { %1713 = vmatprep.subr.bf16.mxu1 %v2804_v30 }
  0x87   :  { %1474 = vmatpush1.bf16.msra.mxu0 %v2603_v5  ;;  %v2733_v5 = vld [vmem:[%s3688_s1 + $0x590] ss:$8 sps:$4 sm:$0xff]  }
  0x88   :  { %1475 = vmatprep.subr.bf16.mxu0 %v2611_v8  ;;  %1381 = vmatmul.mubr.bf16.vlgmr.msra.gmra.mrb[0].mxu1 %v2093_v28  ;;  %v2741_v8 = vld [vmem:[%s3688_s1 + $0x5b4] ss:$8 sps:$4 sm:$0xff]   ;;  %v2764_v28 = vld [vmem:[%s3688_s1 + $0x624] ss:$8 sps:$4 sm:$0xff]  }
  0x89   :  { %1714 = vmatpush1.bf16.msra.mxu1 %v2769_v15 }
  0x8a   :  { %1715 = vmatprep.subr.bf16.mxu1 %v2804_v30 }
  0x8b   :  { %1476 = vmatpush1.bf16.msra.mxu0 %v2609_v10  ;;  %v2744_v10 = vld [vmem:[%s3688_s1 + $0x5c4] ss:$8 sps:$4 sm:$0xff]  }
  0x8c   :  { %1477 = vmatprep.subr.bf16.mxu0 %v2620_v12  ;;  %v2747_v12 = vld [vmem:[%s3688_s1 + $0x5d4] ss:$8 sps:$4 sm:$0xff]  }
  0x8f   :  { %1478 = vmatpush1.bf16.msra.mxu0 %v2618_v14  ;;  %v2750_v14 = vld [vmem:[%s3688_s1 + $0x5e4] ss:$8 sps:$4 sm:$0xff]  }
  0x90   :  { %1479 = vmatprep.subr.bf16.mxu0 %v2626_v16  ;;  %v2770_v16 = vld [vmem:[%s3690_s3 + $0x8] sm:$0xff]  }
  0x91   :  { %1716 = vmatpush1.bf16.msra.mxu1 %v2770_v16 }
  0x92   :  { %1717 = vmatprep.subr.bf16.mxu1 %v2804_v30 }
  0x93   :  { %1480 = vmatpush1.bf16.msra.mxu0 %v2624_v18  ;;  %v2753_v18 = vld [vmem:[%s3688_s1 + $0x5f4] ss:$8 sps:$4 sm:$0xff]  }
  0x94   :  { %1481 = vmatprep.subr.bf16.mxu0 %v2632_v20  ;;  %v2751_v20 = vld [vmem:[%s3688_s1 + $0x5f0] ss:$8 sps:$4 sm:$0xff]  }
  0x95   :  { %1718 = vmatpush1.bf16.msra.mxu1 %v2771_v19 }
  0x96   :  { %1719 = vmatprep.subr.bf16.mxu1 %v2804_v30 }
  0x97   :  { %1482 = vmatpush1.bf16.msra.mxu0 %v2630_v22  ;;  %v2756_v22 = vld [vmem:[%s3688_s1 + $0x600] ss:$8 sps:$4 sm:$0xff]  }
  0x98   :  { %1483 = vmatprep.subr.bf16.mxu0 %v2638_v24  ;;  %v2772_v24 = vld [vmem:[%s3690_s3 + $0x18] sm:$0xff]  }
  0x99   :  { %1720 = vmatpush1.bf16.msra.mxu1 %v2772_v24  ;;  %v2795_v24 = vld [vmem:[%s3693_s7 + $0x28] sm:$0xff]  }
  0x9a   :  { %1721 = vmatprep.subr.bf16.mxu1 %v2804_v30 }
  0x9b   :  { %1484 = vmatpush1.bf16.msra.mxu0 %v2636_v26  ;;  %v2773_v26 = vld [vmem:[%s3690_s3 + $0x20] sm:$0xff]  }
  0x9c   :  { %1485 = vmatprep.subr.bf16.mxu0 %v2644_v27  ;;  %v2759_v27 = vld [vmem:[%s3688_s1 + $0x610] ss:$8 sps:$4 sm:$0xff]  }
  0x9d   :  { %1722 = vmatpush1.bf16.msra.mxu1 %v2773_v26  ;;  %v2797_v26 = vld [vmem:[%s3693_s7 + $0x38] ss:$0 sps:$4 sm:$0xff]  }
  0x9e   :  { %1723 = vmatprep.subr.bf16.mxu1 %v2804_v30 }
  0x9f   :  { %1486 = vmatpush1.bf16.msra.mxu0 %v2642_v29  ;;  %v2774_v29 = vld [vmem:[%s3690_s3 + $0x28] sm:$0xff]  }
  0xa0   :  { %1487 = vmatprep.subr.bf16.mxu0 %v2650_v31  ;;  %v2762_v31 = vld [vmem:[%s3688_s1 + $0x620] ss:$8 sps:$4 sm:$0xff]  }
  0xa1   :  { %1724 = vmatpush1.bf16.msra.mxu1 %v2774_v29 }
  0xa2   :  { %1725 = vmatprep.subr.bf16.mxu1 %v2804_v30 }
  0xa3   :  { %1488 = vmatpush1.bf16.msra.mxu0 %v2648_v32  ;;  %v2767_v32 = vld [vmem:[%s3688_s1 + $0x634] ss:$8 sps:$4 sm:$0xff]  }
  0xa4   :  { %1489 = vmatprep.subr.bf16.mxu0 %v2656_v33  ;;  %v2775_v33 = vld [vmem:[%s3690_s3 + $0x30] sm:$0xff]  }
  0xa5   :  { %1726 = vmatpush1.bf16.msra.mxu1 %v2775_v33 }
  0xa6   :  { %1727 = vmatprep.subr.bf16.mxu1 %v2804_v30 }
  0xa7   :  { %1490 = vmatpush1.bf16.msra.mxu0 %v2654_v34  ;;  %v2765_v34 = vld [vmem:[%s3688_s1 + $0x630] ss:$8 sps:$4 sm:$0xff]  }
  0xa8   :  { %1491 = vmatprep.subr.bf16.mxu0 %v2662_v35  ;;  %v2768_v35 = vld [vmem:[%s3689_s0 + $0x30] ss:$0 sps:$4 sm:$0xff]  }
  0xab   :  { %1492 = vmatpush1.bf16.msra.mxu0 %v2660_v36  ;;  %v2776_v36 = vld [vmem:[%s3690_s3 + $0x38] sm:$0xff]  }
  0xac   :  { %1493 = vmatprep.subr.bf16.mxu0 %v2668_v37  ;;  %1728 = vmatpush1.bf16.msra.mxu1 %v2776_v36  ;;  %v2777_v37 = vld [vmem:[%s3690_s3 + $0x40] sm:$0xff]  }
  0xad   :  { %1729 = vmatprep.subr.bf16.mxu1 %v2804_v30  ;;  %v2798_v36 = vld [vmem:[%s3695_s9] sm:$0xff]  }
  0xaf   :  { %1494 = vmatpush1.bf16.msra.mxu0 %v2666_v38  ;;  %v2778_v38 = vld [vmem:[%s3690_s3 + $0x48] sm:$0xff]  }
  0xb0   :  { %1495 = vmatprep.subr.bf16.mxu0 %v2674_v39  ;;  %1730 = vmatpush1.bf16.msra.mxu1 %v2777_v37  ;;  %v2779_v39 = vld [vmem:[%s3690_s3 + $0x50] sm:$0xff]  }
  0xb1   :  { %1731 = vmatprep.subr.bf16.mxu1 %v2804_v30 }
  0xb3   :  { %1496 = vmatpush1.bf16.msra.mxu0 %v2672_v40  ;;  %v2780_v40 = vld [vmem:[%s3690_s3 + $0x58] sm:$0xff]  }
  0xb4   :  { %1497 = vmatprep.subr.bf16.mxu0 %v2680_v41  ;;  %1732 = vmatpush1.bf16.msra.mxu1 %v2778_v38  ;;  %v2781_v41 = vld [vmem:[%s3690_s3 + $0x60] ss:$0 sps:$4 sm:$0xff]   ;;  %v2799_v38 = vld [vmem:[%s3695_s9 + $0x8] sm:$0xff]  }
  0xb5   :  { %1733 = vmatprep.subr.bf16.mxu1 %v2804_v30 }
  0xb7   :  { %1498 = vmatpush1.bf16.msra.mxu0 %v2678_v42  ;;  %v1711_v42 = vsel %vm1709_vm1, %v2781_v41, 0  ;;  %v2802_v41 = vld [vmem:[%s3695_s9 + $0x20] sm:$0xff]  }
  0xb8   :  { %1499 = vmatprep.subr.bf16.mxu0 %v2686_v43  ;;  %1734 = vmatpush1.bf16.msra.mxu1 %v2779_v39  ;;  %v2805_v43 = vmov 0.0   ;;  %v2800_v39 = vld [vmem:[%s3695_s9 + $0x10] sm:$0xff]  }
  0xb9   :  { %1735 = vmatprep.subr.bf16.mxu1 %v2804_v30 }
  0xbb   :  { %1500 = vmatpush1.bf16.msra.mxu0 %v2684_v44 }
  0xbc   :  { %1501 = vmatprep.subr.bf16.mxu0 %v2692_v45  ;;  %1736 = vmatpush1.bf16.msra.mxu1 %v2780_v40  ;;  %v2801_v40 = vld [vmem:[%s3695_s9 + $0x18] sm:$0xff]  }
  0xbd   :  { %1737 = vmatprep.subr.bf16.mxu1 %v2804_v30 }
  0xbf   :  { %1502 = vmatpush1.bf16.msra.mxu0 %v2690_v46 }
  0xc0   :  { %1512 = vmatprep.subr.bf16.mxu0 %v2700_v47  ;;  %1738 = vmatpush1.bf16.msra.mxu1 %v1711_v42  ;;  %v2803_v42 = vld [vmem:[%s3695_s9 + $0x28] ss:$0 sps:$4 sm:$0x33]  }
  0xc1   :  { %2373 = vmatprep.subr.bf16.mxu1 %v2805_v43 }
  0xc2   :  { %1504 = vmatmul.mubr.bf16.vlgmr.msra.gmra.mrb[0].mxu0 %v2099_v49  ;;  %v249_v49 = vshrl.u32 %v248_v48, 7 }
  0xc3   :  { %1513 = vmatpush1.bf16.msra.mxu0 %v2698_v50  ;;  %1544 = vmatprep.mubr.bf16.mxu0 %v2102_v51 }
  0xc4   :  { %1514 = vmatprep.subr.bf16.mxu0 %v2706_v52  ;;  %v250_v50 = vsub.s32 0, %v249_v49  ;;  %v254_v51 = vsub.s32 1, %v249_v49 }
  0xc7   :  { %1515 = vmatpush1.bf16.msra.mxu0 %v2704_v53 }
  0xc8   :  { %1516 = vmatprep.subr.bf16.mxu0 %v2712_v55 }
  0xcb   :  { %1517 = vmatpush1.bf16.msra.mxu0 %v2710_v56 }
  0xcc   :  { %1518 = vmatprep.subr.bf16.mxu0 %v2717_v57 }
  0xcf   :  { %1519 = vmatpush1.bf16.msra.mxu0 %v2715_v58 }
  0xd0   :  { %1520 = vmatprep.subr.bf16.mxu0 %v2720_v59 }
  0xd3   :  { %1521 = vmatpush1.bf16.msra.mxu0 %v2718_v60 }
  0xd4   :  { %1522 = vmatprep.subr.bf16.mxu0 %v2723_v61 }
  0xd7   :  { %1523 = vmatpush1.bf16.msra.mxu0 %v2721_v62 }
  0xd8   :  { %1524 = vmatprep.subr.bf16.mxu0 %v2726_v63 }
  0xdb   :  { %1525 = vmatpush1.bf16.msra.mxu0 %v2724_v0 }
  0xdc   :  { %1526 = vmatprep.subr.bf16.mxu0 %v2729_v1 }
  0xdf   :  { %1527 = vmatpush1.bf16.msra.mxu0 %v2727_v2  ;;  %v2782_v2 = vld [vmem:[%s3691_s5] sm:$0xff]  }
  0xe0   :  { %1528 = vmatprep.subr.bf16.mxu0 %v2732_v3 }
  0xe3   :  { %1529 = vmatpush1.bf16.msra.mxu0 %v2730_v54  ;;  %v2783_v54 = vld [vmem:[%s3691_s5 + $0x8] sm:$0xff]  }
  0xe4   :  { %1530 = vmatprep.subr.bf16.mxu0 %v2735_v4  ;;  %v2784_v4 = vld [vmem:[%s3691_s5 + $0x10] sm:$0xff]  }
  0xe7   :  { %1531 = vmatpush1.bf16.msra.mxu0 %v2733_v5  ;;  %v2785_v5 = vld [vmem:[%s3691_s5 + $0x18] sm:$0xff]  }
  0xe8   :  { %1532 = vmatprep.subr.bf16.mxu0 %v2738_v6  ;;  %v2786_v6 = vld [vmem:[%s3691_s5 + $0x20] sm:$0xff]  }
  0xeb   :  { %1533 = vmatpush1.bf16.msra.mxu0 %v2736_v7  ;;  %v2787_v7 = vld [vmem:[%s3691_s5 + $0x28] sm:$0xff]  }
  0xec   :  { %1534 = vmatprep.subr.bf16.mxu0 %v2741_v8  ;;  %v2788_v8 = vld [vmem:[%s3691_s5 + $0x30] sm:$0xff]  }
  0xef   :  { %1535 = vmatpush1.bf16.msra.mxu0 %v2739_v9  ;;  %v2789_v9 = vld [vmem:[%s3691_s5 + $0x38] ss:$0 sps:$4 sm:$0xff]  }
  0xf0   :  { %1536 = vmatprep.subr.bf16.mxu0 %v2744_v10  ;;  %v1827_v10 = vsel %vm1709_vm1, %v2789_v9, 0 }
  0xf3   :  { %1537 = vmatpush1.bf16.msra.mxu0 %v2742_v11  ;;  %v2305_v11 = vld [vmem:[%s3694_s4] ss:$0 sm:$0xff] }
  0xf4   :  { %1538 = vmatprep.subr.bf16.mxu0 %v2747_v12 }
  0xf7   :  { %1539 = vmatpush1.bf16.msra.mxu0 %v2745_v13 }
  0xf8   :  { %1540 = vmatprep.subr.bf16.mxu0 %v2750_v14 }
  0xfb   :  { %1541 = vmatpush1.bf16.msra.mxu0 %v2748_v17 }
  0xfc   :  { %1542 = vmatprep.subr.bf16.mxu0 %v2753_v18  ;;  %v2790_v18 = vld [vmem:[%s3693_s7] sm:$0xff]  }
  0xff   :  { %1543 = vmatpush1.bf16.msra.mxu0 %v2751_v20  ;;  %v2791_v20 = vld [vmem:[%s3693_s7 + $0x8] sm:$0xff]  }
 0x100   :  { %1553 = vmatprep.subr.bf16.mxu0 %v2758_v21  ;;  %v2792_v21 = vld [vmem:[%s3693_s7 + $0x10] sm:$0xff]  }
 0x102   :  { %1545 = vmatmul.mubr.bf16.vlgmr.msra.gmra.mrb[0].mxu0 %v2101_v23  ;;  %v2794_v23 = vld [vmem:[%s3693_s7 + $0x20] sm:$0xff]  }
 0x103   :  { %1554 = vmatpush1.bf16.msra.mxu0 %v2756_v22  ;;  %1585 = vmatprep.mubr.bf16.mxu0 %v2804_v30  ;;  %v246_v30 = vld [vmem:[%s3692_s2] sm:$0x3]  ;;  %v2793_v22 = vld [vmem:[%s3693_s7 + $0x18] sm:$0xff]  }
 0x104   :  { %1555 = vmatprep.subr.bf16.mxu0 %v2761_v25  ;;  %v251_v52 = vrot.slane %v246_v30, %v250_v50  ;;  %v255_v53 = vrot.slane %v246_v30, %v254_v51  ;;  %v2796_v25 = vld [vmem:[%s3693_s7 + $0x30] sm:$0xff]  }
 0x107   :  { %1556 = vmatpush1.bf16.msra.mxu0 %v2759_v27  ;;  %v1942_v27 = vsel %vm1709_vm1, %v2797_v26, 0 }
 0x108   :  { %1557 = vmatprep.subr.bf16.mxu0 %v2764_v28  ;;  %v2320_v28 = vld [vmem:[%s3696_s6] ss:$0 sm:$0xff] }
 0x10b   :  { %1558 = vmatpush1.bf16.msra.mxu0 %v2762_v31 }
 0x10c   :  { %1559 = vmatprep.subr.bf16.mxu0 %v2767_v32 }
 0x10f   :  { %1560 = vmatpush1.bf16.msra.mxu0 %v2765_v34 }
 0x112   :  { %2304 = vmatmul.mubr.msk.bf16.vlgmr.msra.gmra.mrb[0].mxu0 %vm1303_vm0, %v2768_v35 }
 0x15b   :  { %v1382_v44 = vpop.f32.mrb[0].mxu1 }
 0x15c   :  { %v1384_v45 = vpop.f32.mrb[1].mxu1  ;;  %v2429_v55 = vadd.f32 %v1382_v44, %v251_v52  ;;  %v2043_v44 = vsel %vm2041_vm5, %v2803_v42, 0 }
 0x15d   :  { %v1386_v46 = vpop.f32.mrb[2].mxu1  ;;  %v2431_v56 = vadd.f32 %v1384_v45, %v255_v53  ;;  %v2330_v45 = vld [vmem:[%s3697_s8] ss:$0 sm:$0xff] }
 0x15e   :  { %v1387_v47 = vpop.f32.mrb[3].mxu1 }
 0x1e5   :  { %v1587_v57 = vpop.f32.mrb[0].mxu0 }
 0x1e6   :  { %v2430_v58 = vadd.f32 %v2429_v55, %v1587_v57  ;;  %v1589_v59 = vpop.f32.mrb[1].mxu0 }
 0x1e7   :  { %v2432_v60 = vadd.f32 %v2431_v56, %v1589_v59  ;;  %v1591_v61 = vpop.f32.mrb[2].mxu0 }
 0x1e8   :  { %v1594_v62 = vmax.f32 %v2430_v58, 0.0  ;;  %v1592_v63 = vpop.f32.mrb[3].mxu0 }
 0x1e9   :  { %v1595_v0 = vmax.f32 %v2432_v60, 0.0 }
 0x1ea   :  { %v1596_v3 = vpack.c.bf16 %v1594_v62, %v1594_v62 }
 0x1eb   :  { %v1597_v1 = vpack.c.bf16 %v1595_v0, %v1595_v0 }
 0x1ed   :  { %2319 = vmatprep.mubr.msk.bf16.mxu1 %vm1705_vm2, %v1597_v1 }
 0x1ee   :  { %1746 = vmatmul.mubr.bf16.vlgmr.msra.gmra.mrb[4].mxu1 %v1596_v3 }
 0x1ef   :  { %2374 = vmatpush3.bf16.msra.mxu1 %v2782_v2  ;;  %2389 = vmatprep.mubr.msk.bf16.mxu1 %vm2806_vm3, %v2805_v43 }
 0x1f0   :  { %2375 = vmatprep.subr.bf16.mxu1 %v2805_v43 }
 0x1f3   :  { %2376 = vmatpush3.bf16.msra.mxu1 %v2783_v54 }
 0x1f4   :  { %2377 = vmatprep.subr.bf16.mxu1 %v2805_v43 }
 0x1f7   :  { %2378 = vmatpush3.bf16.msra.mxu1 %v2784_v4 }
 0x1f8   :  { %2379 = vmatprep.subr.bf16.mxu1 %v2805_v43 }
 0x1fb   :  { %2380 = vmatpush3.bf16.msra.mxu1 %v2785_v5 }
 0x1fc   :  { %2381 = vmatprep.subr.bf16.mxu1 %v2805_v43 }
 0x1ff   :  { %2382 = vmatpush3.bf16.msra.mxu1 %v2786_v6 }
 0x200   :  { %2383 = vmatprep.subr.bf16.mxu1 %v2805_v43 }
 0x203   :  { %2384 = vmatpush3.bf16.msra.mxu1 %v2787_v7 }
 0x204   :  { %2385 = vmatprep.subr.bf16.mxu1 %v2805_v43 }
 0x207   :  { %2386 = vmatpush3.bf16.msra.mxu1 %v2788_v8 }
 0x208   :  { %2387 = vmatprep.subr.bf16.mxu1 %v2805_v43 }
 0x20b   :  { %2388 = vmatpush3.bf16.msra.mxu1 %v1827_v10 }
 0x20c   :  { %2393 = vmatprep.subr.bf16.mxu1 %v2805_v43 }
 0x2c1   :  { %v1747_v12 = vpop.f32.mrb[4].mxu1 }
 0x2c2   :  { %v1748_v13 = vadd.f32 %v2305_v11, %v1747_v12  ;;  %v1749_v14 = vpop.f32.mrb[5].mxu1 }
 0x2c3   :  { %v1750_v15 = vpop.f32.mrb[6].mxu1 }
 0x2c4   :  { %v1753_v16 = vmax.f32 %v1748_v13, 0.0  ;;  %v1751_v17 = vpop.f32.mrb[7].mxu1 }
 0x2c6   :  { %v1754_v19 = vpack.c.bf16 %v1753_v16, %v1753_v16 }
 0x2c8   :  { %2390 = vmatmul.mubr.msk.bf16.vlgmr.msra.gmra.mrb[8].mxu1 %vm1822_vm4, %v1754_v19 }
 0x2c9   :  { %2394 = vmatpush3.bf16.msra.mxu1 %v2790_v18  ;;  %2409 = vmatprep.mubr.msk.bf16.mxu1 %vm2806_vm3, %v2805_v43 }
 0x2ca   :  { %2395 = vmatprep.subr.bf16.mxu1 %v2805_v43 }
 0x2cd   :  { %2396 = vmatpush3.bf16.msra.mxu1 %v2791_v20 }
 0x2ce   :  { %2397 = vmatprep.subr.bf16.mxu1 %v2805_v43 }
 0x2d1   :  { %2398 = vmatpush3.bf16.msra.mxu1 %v2792_v21 }
 0x2d2   :  { %2399 = vmatprep.subr.bf16.mxu1 %v2805_v43 }
 0x2d5   :  { %2400 = vmatpush3.bf16.msra.mxu1 %v2793_v22 }
 0x2d6   :  { %2401 = vmatprep.subr.bf16.mxu1 %v2805_v43 }
 0x2d9   :  { %2402 = vmatpush3.bf16.msra.mxu1 %v2794_v23 }
 0x2da   :  { %2403 = vmatprep.subr.bf16.mxu1 %v2805_v43 }
 0x2dd   :  { %2404 = vmatpush3.bf16.msra.mxu1 %v2795_v24 }
 0x2de   :  { %2405 = vmatprep.subr.bf16.mxu1 %v2805_v43 }
 0x2e1   :  { %2406 = vmatpush3.bf16.msra.mxu1 %v2796_v25 }
 0x2e2   :  { %2407 = vmatprep.subr.bf16.mxu1 %v2805_v43 }
 0x2e5   :  { %2408 = vmatpush3.bf16.msra.mxu1 %v1942_v27 }
 0x2e6   :  { %2413 = vmatprep.subr.bf16.mxu1 %v2805_v43 }
 0x39b   :  { %v1863_v29 = vpop.f32.mrb[8].mxu1 }
 0x39c   :  { %v1864_v31 = vadd.f32 %v2320_v28, %v1863_v29  ;;  %v2391_v32 = vpop.f32.mrb[9].mxu1 }
 0x39d   :  { %v1866_v33 = vpop.f32.mrb[10].mxu1 }
 0x39e   :  { %v1869_v34 = vmax.f32 %v1864_v31, 0.0  ;;  %v2392_v35 = vpop.f32.mrb[11].mxu1 }
 0x3a0   :  { %v1870_v37 = vpack.c.bf16 %v1869_v34, %v1869_v34 }
 0x3a2   :  { %2410 = vmatmul.mubr.msk.bf16.vlgmr.msra.gmra.mrb[12].mxu1 %vm1822_vm4, %v1870_v37 }
 0x3a3   :  { %2414 = vmatpush3.bf16.msra.mxu1 %v2798_v36  ;;  %2425 = vmatprep.mubr.msk.bf16.mxu1 %vm2806_vm3, %v2805_v43 }
 0x3a4   :  { %2415 = vmatprep.subr.bf16.mxu1 %v2805_v43 }
 0x3a7   :  { %2416 = vmatpush3.bf16.msra.mxu1 %v2799_v38 }
 0x3a8   :  { %2417 = vmatprep.subr.bf16.mxu1 %v2805_v43 }
 0x3ab   :  { %2418 = vmatpush3.bf16.msra.mxu1 %v2800_v39 }
 0x3ac   :  { %2419 = vmatprep.subr.bf16.mxu1 %v2805_v43 }
 0x3af   :  { %2420 = vmatpush3.bf16.msra.mxu1 %v2801_v40 }
 0x3b0   :  { %2421 = vmatprep.subr.bf16.mxu1 %v2805_v43 }
 0x3b3   :  { %2422 = vmatpush3.bf16.msra.mxu1 %v2802_v41 }
 0x3b4   :  { %2423 = vmatprep.subr.bf16.mxu1 %v2805_v43  ;;  %v2340_v43 = vld [vmem:[%s3698_s10] ss:$0 sm:$0xff] }
 0x3b7   :  { %2424 = vmatpush3.bf16.msra.mxu1 %v2043_v44 }
 0x475   :  { %v1978_v46 = vpop.f32.mrb[12].mxu1 }
 0x476   :  { %v1979_v47 = vadd.f32 %v2330_v45, %v1978_v46  ;;  %v2411_v48 = vpop.f32.mrb[13].mxu1 }
 0x477   :  { %v1981_v49 = vpop.f32.mrb[14].mxu1 }
 0x478   :  { %v1984_v50 = vmax.f32 %v1979_v47, 0.0  ;;  %v2412_v30 = vpop.f32.mrb[15].mxu1 }
 0x47a   :  { %v1985_v51 = vpack.c.bf16 %v1984_v50, %v1984_v50 }
 0x47c   :  { %2426 = vmatmul.mubr.msk.bf16.vlgmr.msra.gmra.mrb[16].mxu1 %vm2037_vm6, %v1985_v51 }
 0x54f   :  { %v2079_v52 = vpop.f32.mrb[16].mxu1 }
 0x550   :  { %v2080_v53 = vadd.f32 %v2340_v43, %v2079_v52  ;;  %v2427_v55 = vpop.f32.mrb[17].mxu1 }
 0x551   :  { %v2082_v56 = vpop.f32.mrb[18].mxu1 }
 0x552   :  { %2086 = vst.msk [vmem:[%s3699_s11] sm:$0xff] %vm2085_vm7, %v2080_v53  ;;  %v2428_v57 = vpop.f32.mrb[19].mxu1 }

</bundles_post_ra>
